<compile_context>
chip_gen: v5e
topology: v5e:2x2
jax: 0.10.0
libtpu: 0.0.40
codegen_flags: <defaults>
</compile_context>

<pallas_src>
import functools
import math

import numpy as np

import jax
import jax.numpy as jnp
from jax import lax
from jax.experimental import pallas as pl
from jax.experimental.pallas import tpu as pltpu


# ------------------------- chip-dependent budgeting -------------------------

def _tpu_vmem_capacity():
    try:
        info = pltpu.get_tpu_info()
        cap = getattr(info, "vmem_capacity_bytes", None)
        if cap:
            return int(cap)
    except Exception:
        pass
    return 64 << 20          # conservative (v7x-sized) fallback


_VMEM_CAP = _tpu_vmem_capacity()
# v5e/v6e: 128 MiB physical -> 64 MiB scoped limit is cheap headroom.
# v7x: 64 MiB physical -> stay at 48 MiB to leave DMA/compiler headroom.
_VMEM_LIMIT = (64 << 20) if _VMEM_CAP >= (96 << 20) else (48 << 20)


def _round_up(n, m):
    return ((n + m - 1) // m) * m


def _pick_unroll(s):
    if s <= 8:
        return max(1, s)
    for u in (8, 4, 2):
        if s % u == 0:
            return u
    return 1


# ----------------------------- Pallas kernels ------------------------------

def tokenizer_kernel(x_ref, *refs):
    # x: (TN, P) raw signal rows.  refs = 6 x (band, bias, lnw, lnb) + pool_w,
    # pool_b, out.  Activations live as (TN, L*C) lane-dense 2-D slabs.
    o_ref = refs[-1]
    pool_w_ref = refs[-3]
    pool_b_ref = refs[-2]
    h = x_ref[...]                                        # f32
    for i in range(6):
        band = refs[4 * i][...]                           # bf16 (Lin*Cin, Lout*Co)
        bias = refs[4 * i + 1][...]                       # f32  (1, Lout*Co)
        lnw = refs[4 * i + 2][...]                        # f32  (1, Lout*Co)
        lnb = refs[4 * i + 3][...]
        y = jnp.dot(h.astype(jnp.bfloat16), band,
                    preferred_element_type=jnp.float32) + bias   # conv + folded BN
        y = jnp.where(y > 0, y, jnp.exp(jnp.minimum(y, 0.0)) - 1.0)   # ELU(alpha=1)
        # LayerNorm([C, L]): normalize over all L*C elements per row
        mu = jnp.mean(y, axis=1, keepdims=True)
        var = jnp.mean((y - mu) ** 2, axis=1, keepdims=True)
        h = (y - mu) * lax.rsqrt(var + 1e-5) * lnw + lnb
    # AdaptiveAvgPool1d(1) + Flatten + Linear(128, E) folded into one matmul
    o_ref[...] = (jnp.dot(h.astype(jnp.bfloat16), pool_w_ref[...],
                          preferred_element_type=jnp.float32) + pool_b_ref[...])


def attn_pool_kernel(x_ref, m_ref, wqkv_ref, bqkv_ref, wo_ref, bo_ref,
                     ln1w_ref, ln1b_ref, w1_ref, b1_ref, w2_ref, b2_ref,
                     ln2w_ref, ln2b_ref, o_ref, *, num_heads):
    # x: (R, C, E)   m: (R, C) float, 1.0 == padded channel (key_padding_mask)
    x = x_ref[...]
    R, C, E = x.shape
    nh = num_heads
    dh = E // nh
    scale = 1.0 / math.sqrt(dh)
    x2 = x.reshape(R * C, E)

    # Fused QKV projection (single (E, 3E) matmul)
    qkv = (jnp.dot(x2.astype(jnp.bfloat16), wqkv_ref[...],
                   preferred_element_type=jnp.float32) + bqkv_ref[...])
    maskf = m_ref[...]                                    # (R, C), 1.0 == padded
    neg = (maskf * (-1e30))[:, None, :]                   # (R, 1, C)

    # Per-head attention via lane slices only (no axis-0 head stacking/concat).
    ctx_heads = []
    for h in range(nh):
        qh = qkv[:, h * dh:(h + 1) * dh].reshape(R, C, dh).astype(jnp.bfloat16)
        kh = qkv[:, E + h * dh:E + (h + 1) * dh].reshape(R, C, dh).astype(jnp.bfloat16)
        vh = qkv[:, 2 * E + h * dh:2 * E + (h + 1) * dh].reshape(R, C, dh).astype(jnp.bfloat16)
        s = jnp.einsum('rqd,rkd->rqk', qh, kh,
                       preferred_element_type=jnp.float32) * scale + neg
        s_max = jnp.max(s, axis=-1, keepdims=True)
        p = jnp.exp(s - s_max)
        att = p / jnp.sum(p, axis=-1, keepdims=True)
        ctx_heads.append(jnp.einsum('rqk,rkd->rqd', att.astype(jnp.bfloat16), vh,
                                    preferred_element_type=jnp.float32))
    ctx = jnp.concatenate(ctx_heads, axis=-1).reshape(R * C, E)   # lane concat
    attn_out = jnp.dot(ctx.astype(jnp.bfloat16), wo_ref[...],
                       preferred_element_type=jnp.float32) + bo_ref[...]

    def layer_norm(t, w, b):
        mu = jnp.mean(t, axis=-1, keepdims=True)
        var = jnp.mean((t - mu) ** 2, axis=-1, keepdims=True)
        return (t - mu) * lax.rsqrt(var + 1e-5) * w + b

    src = layer_norm(x2 + attn_out, ln1w_ref[...], ln1b_ref[...])   # post-norm
    ff = jnp.maximum(jnp.dot(src.astype(jnp.bfloat16), w1_ref[...],
                             preferred_element_type=jnp.float32) + b1_ref[...], 0.0)
    ff = jnp.dot(ff.astype(jnp.bfloat16), w2_ref[...],
                 preferred_element_type=jnp.float32) + b2_ref[...]
    out = layer_norm(src + ff, ln2w_ref[...], ln2b_ref[...]).reshape(R, C, E)

    valid = 1.0 - maskf                                   # 1.0 == keep
    pooled = jnp.sum(out * valid[:, :, None], axis=1)
    denom = jnp.maximum(jnp.sum(valid, axis=1, keepdims=True), 1.0)
    o_ref[...] = pooled / denom


def bilstm_dir_kernel(x_ref, wia_ref, wib_ref, whh_ref, b_ref, o_ref, ig_scr,
                      *, seq_out):
    # Grid axis 0 = direction (0 fwd, 1 bwd), marked "parallel" (v7x: one TC each).
    # x_ref:   (2, S, Bp, H) -- the two input slabs (layer input split in halves)
    # wia/wib: (H, 4H) input weights of this direction for slab A / slab B
    # whh:     (H, 4H) recurrent weights of this direction (no zero blocks)
    # b:       (1, 4H)
    # o_ref:   (S, Bp, H) if seq_out else (Bp, H) (this direction's slab / mean)
    d = pl.program_id(0)
    _, S, Bp, H = x_ref.shape

    # Hoisted input projection for all timesteps of this direction.
    xa = x_ref[0].reshape(S * Bp, H)
    xb = x_ref[1].reshape(S * Bp, H)
    ig = (jnp.dot(xa.astype(jnp.bfloat16), wia_ref[...],
                  preferred_element_type=jnp.float32)
          + jnp.dot(xb.astype(jnp.bfloat16), wib_ref[...],
                    preferred_element_type=jnp.float32)
          + b_ref[...])
    ig_scr[...] = ig.reshape(S, Bp, 4 * H)
    whh = whh_ref[...]

    def cell(tt, h, c):
        g = ig_scr[tt] + jnp.dot(h.astype(jnp.bfloat16), whh,
                                 preferred_element_type=jnp.float32)
        i = jax.nn.sigmoid(g[:, 0:H])
        f = jax.nn.sigmoid(g[:, H:2 * H])
        gg = jnp.tanh(g[:, 2 * H:3 * H])
        o = jax.nn.sigmoid(g[:, 3 * H:4 * H])
        c_new = f * c + i * gg
        h_new = o * jnp.tanh(c_new)
        return h_new, c_new

    z = jnp.zeros((Bp, H), jnp.float32)
    unroll = _pick_unroll(S)

    if seq_out:
        def step(t, carry):
            h, c = carry
            tt = jnp.where(d == 0, t, S - 1 - t)
            h, c = cell(tt, h, c)
            o_ref[tt] = h
            return (h, c)
        lax.fori_loop(0, S, step, (z, z), unroll=unroll)
    else:
        # Last layer: never materialize the sequence; emit the mean over S.
        def step(t, carry):
            h, c, acc = carry
            tt = jnp.where(d == 0, t, S - 1 - t)
            h, c = cell(tt, h, c)
            return (h, c, acc + h)
        _, _, acc = lax.fori_loop(0, S, step, (z, z, z), unroll=unroll)
        o_ref[...] = acc * (1.0 / S)


def head_kernel(mean_ref, demo_ref, wd_ref, bd_ref, w1f_ref, w1b_ref,
                w2_ref, bh_ref, o_ref):
    # mean_ref: (2, Bp, H) per-direction LSTM means;  demo: (Bp, 2)
    xf = mean_ref[0]
    xb = mean_ref[1]
    de = jnp.maximum(
        jnp.dot(demo_ref[...].astype(jnp.bfloat16), wd_ref[...],
                preferred_element_type=jnp.float32) + bd_ref[...], 0.0)
    o_ref[...] = (jnp.dot(xf.astype(jnp.bfloat16), w1f_ref[...],
                          preferred_element_type=jnp.float32)
                  + jnp.dot(xb.astype(jnp.bfloat16), w1b_ref[...],
                            preferred_element_type=jnp.float32)
                  + jnp.dot(de.astype(jnp.bfloat16), w2_ref[...],
                            preferred_element_type=jnp.float32)
                  + bh_ref[...])


# ------------------------------ JAX wrappers --------------------------------

def tokenizer_fused(xr, tok, embed_dim):
    N, P = xr.shape
    tn_cap = 1024 if _VMEM_CAP >= (96 << 20) else 512
    TN = min(tn_cap, _round_up(N, 8))
    Npad = _round_up(N, TN)
    if Npad != N:
        xr = jnp.pad(xr, ((0, Npad - N), (0, 0)))
    weight_args = []
    in_specs = [pl.BlockSpec((TN, P), lambda i: (i, 0))]
    for layer in tok['layers']:
        for nm in ('band', 'bias', 'lnw', 'lnb'):
            a = layer[nm]
            weight_args.append(a)
            in_specs.append(pl.BlockSpec(a.shape, lambda i: (0, 0)))
    for nm in ('pool_w', 'pool_b'):
        a = tok[nm]
        weight_args.append(a)
        in_specs.append(pl.BlockSpec(a.shape, lambda i: (0, 0)))
    out = pl.pallas_call(
        tokenizer_kernel,
        out_shape=jax.ShapeDtypeStruct((Npad, embed_dim), jnp.float32),
        grid=(Npad // TN,),
        in_specs=in_specs,
        out_specs=pl.BlockSpec((TN, embed_dim), lambda i: (i, 0)),
        compiler_params=pltpu.CompilerParams(
            dimension_semantics=("parallel",),
            vmem_limit_bytes=_VMEM_LIMIT),
    )(xr, *weight_args)
    return out[:N]


def attention_pool(xs, mask_rows, a, num_heads):
    R, C, E = xs.shape
    # Cap TR so the (TR*C, ffn) f32 FFN intermediate stays within VMEM budget
    # (tighter budget on small-VMEM chips like v7x).
    row_budget = 2048 if _VMEM_CAP >= (96 << 20) else 1024
    TR = max(8, min(256, ((row_budget // max(C, 1)) // 8) * 8))
    TR = min(TR, _round_up(R, 8))
    Rp = _round_up(R, TR)
    if Rp != R:
        xs = jnp.pad(xs, ((0, Rp - R), (0, 0), (0, 0)))
        mask_rows = jnp.pad(mask_rows, ((0, Rp - R), (0, 0)))
    names = ('wqkv', 'bqkv', 'wo', 'bo', 'ln1w', 'ln1b',
             'w1', 'b1', 'w2', 'b2', 'ln2w', 'ln2b')
    wargs = [a[n] for n in names]
    in_specs = [pl.BlockSpec((TR, C, E), lambda i: (i, 0, 0)),
                pl.BlockSpec((TR, C), lambda i: (i, 0))]
    in_specs += [pl.BlockSpec(w.shape, lambda i: (0, 0)) for w in wargs]
    out = pl.pallas_call(
        functools.partial(attn_pool_kernel, num_heads=num_heads),
        out_shape=jax.ShapeDtypeStruct((Rp, E), jnp.float32),
        grid=(Rp // TR,),
        in_specs=in_specs,
        out_specs=pl.BlockSpec((TR, E), lambda i: (i, 0)),
        compiler_params=pltpu.CompilerParams(
            dimension_semantics=("parallel",),
            vmem_limit_bytes=_VMEM_LIMIT),
    )(xs, mask_rows, *wargs)
    return out[:R]


def bilstm(x_slabs, layer, *, seq_out):
    # x_slabs: (2, S, Bp, H) -- two halves of the layer input (fwd/bwd slabs
    # from the previous layer, or the two halves of the pooled embedding).
    _, S, Bp, H = x_slabs.shape
    if seq_out:
        out_shape = jax.ShapeDtypeStruct((2, S, Bp, H), jnp.float32)
        out_spec = pl.BlockSpec((None, S, Bp, H), lambda d: (d, 0, 0, 0))
    else:
        out_shape = jax.ShapeDtypeStruct((2, Bp, H), jnp.float32)
        out_spec = pl.BlockSpec((None, Bp, H), lambda d: (d, 0, 0))
    return pl.pallas_call(
        functools.partial(bilstm_dir_kernel, seq_out=seq_out),
        out_shape=out_shape,
        grid=(2,),
        in_specs=[pl.BlockSpec((2, S, Bp, H), lambda d: (0, 0, 0, 0)),
                  pl.BlockSpec((None, H, 4 * H), lambda d: (d, 0, 0)),
                  pl.BlockSpec((None, H, 4 * H), lambda d: (d, 0, 0)),
                  pl.BlockSpec((None, H, 4 * H), lambda d: (d, 0, 0)),
                  pl.BlockSpec((None, 1, 4 * H), lambda d: (d, 0, 0))],
        out_specs=out_spec,
        scratch_shapes=[pltpu.VMEM((S, Bp, 4 * H), jnp.float32)],
        compiler_params=pltpu.CompilerParams(
            dimension_semantics=("parallel",),
            vmem_limit_bytes=_VMEM_LIMIT),
    )(x_slabs, layer['wih_a'], layer['wih_b'], layer['whh'], layer['b'])


def head(mean_fb, demo, hp):
    Bp = demo.shape[0]
    nc = hp['b'].shape[1]
    return pl.pallas_call(
        head_kernel,
        out_shape=jax.ShapeDtypeStruct((Bp, nc), jnp.float32),
    )(mean_fb, demo, hp['demo_w'], hp['demo_b'], hp['w1f'], hp['w1b'],
      hp['w2'], hp['b'])


# ------------------------------ params / forward ----------------------------

def init_params(seed, in_channels, patch_size, embed_dim, num_layers,
                num_classes, pooling_head, dim_feedforward=2048):
    assert patch_size % 64 == 0
    rng = np.random.RandomState(seed)

    def nrm(*shape, scale=0.1):
        return (scale * rng.standard_normal(shape)).astype(np.float32)

    params = {}

    # --- Tokenizer: Conv1d(k=5,s=2,p=2)+BN(eval, folded)+ELU+LayerNorm x6 ---
    chans = [1, 4, 8, 16, 32, 64, 128]
    tok_layers = []
    Lin = patch_size
    for i in range(6):
        ci, co = chans[i], chans[i + 1]
        Lout = Lin // 2
        W = nrm(co, ci, 5)
        b = nrm(co)
        gamma = 1.0 + nrm(co)
        beta = nrm(co)
        rmean = nrm(co)
        rvar = 1.0 + np.abs(nrm(co))
        lnw = 1.0 + nrm(co, Lout)
        lnb = nrm(co, Lout)
        scale = gamma / np.sqrt(rvar + 1e-5)            # fold eval BatchNorm
        Wf = W * scale[:, None, None]
        bf = (b - rmean) * scale + beta
        # banded matrix: out[l*co+c_out] = sum W[c_out,c_in,k]*in[(2l+k-2)*ci+c_in]
        band = np.zeros((Lin * ci, Lout * co), np.float32)
        for lo in range(Lout):
            for k in range(5):
                li = 2 * lo + k - 2
                if 0 <= li < Lin:
                    band[li * ci:(li + 1) * ci, lo * co:(lo + 1) * co] = Wf[:, :, k].T
        tok_layers.append(dict(
            band=jnp.asarray(band, jnp.bfloat16),
            bias=jnp.asarray(np.tile(bf, Lout).reshape(1, -1)),
            lnw=jnp.asarray(lnw.T.reshape(1, -1)),
            lnb=jnp.asarray(lnb.T.reshape(1, -1)),
        ))
        Lin = Lout
    Lf = Lin                                             # patch_size // 64
    Wlin = nrm(embed_dim, 128)
    blin = nrm(embed_dim)
    params['tok'] = dict(
        layers=tok_layers,
        pool_w=jnp.asarray(np.tile(Wlin.T / Lf, (Lf, 1)), jnp.bfloat16),  # pool+linear fold
        pool_b=jnp.asarray(blin.reshape(1, -1)),
    )

    # --- TransformerEncoderLayer (d_model=E, nhead=pooling_head, ffn=2048) ---
    E = embed_dim
    in_proj_w = nrm(3 * E, E)
    in_proj_b = nrm(3 * E)
    params['attn'] = dict(
        wqkv=jnp.asarray(in_proj_w.T, jnp.bfloat16),      # (E, 3E) cols [q|k|v]
        bqkv=jnp.asarray(in_proj_b.reshape(1, 3 * E)),
        wo=jnp.asarray(nrm(E, E).T, jnp.bfloat16),
        bo=jnp.asarray(nrm(E).reshape(1, E)),
        ln1w=jnp.asarray((1.0 + nrm(E)).reshape(1, E)),
        ln1b=jnp.asarray(nrm(E).reshape(1, E)),
        w1=jnp.asarray(nrm(dim_feedforward, E).T, jnp.bfloat16),
        b1=jnp.asarray(nrm(dim_feedforward).reshape(1, dim_feedforward)),
        w2=jnp.asarray(nrm(E, dim_feedforward).T, jnp.bfloat16),
        b2=jnp.asarray(nrm(E).reshape(1, E)),
        ln2w=jnp.asarray((1.0 + nrm(E)).reshape(1, E)),
        ln2b=jnp.asarray(nrm(E).reshape(1, E)),
    )

    # --- Bidirectional LSTM: per-direction weights (no zero block-diagonal) ---
    H = E // 2
    lstm_layers = []
    for _l in range(num_layers):
        wih_a = np.zeros((2, H, 4 * H), np.float32)
        wih_b = np.zeros((2, H, 4 * H), np.float32)
        whh = np.zeros((2, H, 4 * H), np.float32)
        bias = np.zeros((2, 1, 4 * H), np.float32)
        for d in range(2):
            w_ih = nrm(4 * H, 2 * H)        # input size is E = 2H for all layers
            w_hh = nrm(4 * H, H)
            b_ih = nrm(4 * H)
            b_hh = nrm(4 * H)
            wih_a[d] = w_ih[:, :H].T        # acts on slab A (fwd / first half)
            wih_b[d] = w_ih[:, H:].T        # acts on slab B (bwd / second half)
            whh[d] = w_hh.T
            bias[d, 0] = b_ih + b_hh
        lstm_layers.append(dict(wih_a=jnp.asarray(wih_a, jnp.bfloat16),
                                wih_b=jnp.asarray(wih_b, jnp.bfloat16),
                                whh=jnp.asarray(whh, jnp.bfloat16),
                                b=jnp.asarray(bias)))
    params['lstm'] = lstm_layers

    # --- demo embedding + disease head (split over the two LSTM directions) ---
    Wh = nrm(num_classes, E + E // 4)
    params['head'] = dict(
        demo_w=jnp.asarray(nrm(E // 4, 2).T, jnp.bfloat16),       # (2, E//4)
        demo_b=jnp.asarray(nrm(E // 4).reshape(1, E // 4)),
        w1f=jnp.asarray(Wh[:, :H].T, jnp.bfloat16),               # (H, nc) fwd slab
        w1b=jnp.asarray(Wh[:, H:E].T, jnp.bfloat16),              # (H, nc) bwd slab
        w2=jnp.asarray(Wh[:, E:].T, jnp.bfloat16),                # (E//4, nc)
        b=jnp.asarray(nrm(num_classes).reshape(1, num_classes)),
    )
    return params


def forward(params, x, mask, demo_features, *, patch_size, embed_dim, pooling_head):
    B, C, T = x.shape
    S = T // patch_size
    E = embed_dim
    H = E // 2
    N = B * C * S

    # ---- Tokenizer: one fused kernel over all B*C*S rows ----
    xr = x.reshape(N, patch_size)
    tokens = tokenizer_fused(xr, params['tok'], E).reshape(B, C, S, E)

    # ---- rearrange 'b c s e -> (b s) c e' + spatial key_padding_mask ----
    xs = tokens.transpose(0, 2, 1, 3).reshape(B * S, C, E)
    mask_spatial = (mask[:, :, 0] != 0).astype(jnp.float32)       # (B, C), 1.0 == padded
    mask_rows = jnp.broadcast_to(mask_spatial[:, None, :], (B, S, C)).reshape(B * S, C)

    if C == 1:
        pooled = jnp.mean(xs, axis=1)                             # AttentionPooling C==1 branch
    else:
        pooled = attention_pool(xs, mask_rows, params['attn'], pooling_head)

    # ---- pad batch to a sublane multiple of 8, go time-major, split slabs ----
    seq = pooled.reshape(B, S, E)
    Bp = max(8, _round_up(B, 8))
    if Bp != B:
        seq = jnp.pad(seq, ((0, Bp - B), (0, 0), (0, 0)))
        demo_p = jnp.pad(demo_features, ((0, Bp - B), (0, 0)))
    else:
        demo_p = demo_features
    x_tm = seq.transpose(1, 0, 2)                                 # (S, Bp, E)
    x_slabs = jnp.stack([x_tm[:, :, :H], x_tm[:, :, H:]], axis=0)  # (2, S, Bp, H)

    # ---- bidirectional multi-layer LSTM (one fused kernel per layer,
    #      direction on a "parallel" grid axis; last layer emits the mean) ----
    n_layers = len(params['lstm'])
    for li, layer in enumerate(params['lstm']):
        x_slabs = bilstm(x_slabs, layer, seq_out=(li != n_layers - 1))

    # ---- per-direction means + demo embed + concat + disease head ----
    hazards = head(x_slabs, demo_p, params['head'])
    return hazards[:B]


# ----------------------------------- main -----------------------------------

if __name__ == "__main__":
    B, C = 2, 4
    patch_size = 128            # must be a multiple of 64 (Tokenizer conv stack)
    S = 4
    T = S * patch_size
    embed_dim = 32
    num_heads = 4               # module arg (unused in forward; pooling_head drives attention)
    num_layers = 2
    num_classes = 5
    pooling_head = 4

    params = init_params(0, C, patch_size, embed_dim, num_layers,
                         num_classes, pooling_head)

    key = jax.random.PRNGKey(0)
    kx, kd = jax.random.split(key)
    x = jax.random.normal(kx, (B, C, T), dtype=jnp.float32)
    # mask[:, :, 0] used as key_padding_mask (nonzero == padded channel)
    mask = jnp.zeros((B, C, S), dtype=jnp.float32).at[0, 3, :].set(1.0)
    demo_features = jax.random.normal(kd, (B, 2), dtype=jnp.float32)

    fwd = jax.jit(functools.partial(forward, patch_size=patch_size,
                                    embed_dim=embed_dim, pooling_head=pooling_head))
    hazards = jax.block_until_ready(fwd(params, x, mask, demo_features))
    assert hazards.shape == (B, num_classes)
    assert bool(jnp.all(jnp.isfinite(hazards)))
    print("KERNEL_OK")
</pallas_src>

<mosaic_0001>
module attributes {stable_mosaic.version = 11 : i64} {
  func.func @tokenizer_kernel(%arg0: i32, %arg1: memref<32x128xf32, #tpu.memory_space<vmem>>, %arg2: memref<128x256xbf16, #tpu.memory_space<vmem>>, %arg3: memref<1x256xf32, #tpu.memory_space<vmem>>, %arg4: memref<1x256xf32, #tpu.memory_space<vmem>>, %arg5: memref<1x256xf32, #tpu.memory_space<vmem>>, %arg6: memref<256x256xbf16, #tpu.memory_space<vmem>>, %arg7: memref<1x256xf32, #tpu.memory_space<vmem>>, %arg8: memref<1x256xf32, #tpu.memory_space<vmem>>, %arg9: memref<1x256xf32, #tpu.memory_space<vmem>>, %arg10: memref<256x256xbf16, #tpu.memory_space<vmem>>, %arg11: memref<1x256xf32, #tpu.memory_space<vmem>>, %arg12: memref<1x256xf32, #tpu.memory_space<vmem>>, %arg13: memref<1x256xf32, #tpu.memory_space<vmem>>, %arg14: memref<256x256xbf16, #tpu.memory_space<vmem>>, %arg15: memref<1x256xf32, #tpu.memory_space<vmem>>, %arg16: memref<1x256xf32, #tpu.memory_space<vmem>>, %arg17: memref<1x256xf32, #tpu.memory_space<vmem>>, %arg18: memref<256x256xbf16, #tpu.memory_space<vmem>>, %arg19: memref<1x256xf32, #tpu.memory_space<vmem>>, %arg20: memref<1x256xf32, #tpu.memory_space<vmem>>, %arg21: memref<1x256xf32, #tpu.memory_space<vmem>>, %arg22: memref<256x256xbf16, #tpu.memory_space<vmem>>, %arg23: memref<1x256xf32, #tpu.memory_space<vmem>>, %arg24: memref<1x256xf32, #tpu.memory_space<vmem>>, %arg25: memref<1x256xf32, #tpu.memory_space<vmem>>, %arg26: memref<256x32xbf16, #tpu.memory_space<vmem>>, %arg27: memref<1x32xf32, #tpu.memory_space<vmem>>, %arg28: memref<32x32xf32, #tpu.memory_space<vmem>>) attributes {dimension_semantics = [#tpu.dimension_semantics<parallel>], iteration_bounds = array<i64: 1>, scalar_prefetch = 0 : i64, scratch_operands = 0 : i64, tpu.core_type = #tpu.core_type<tc>, window_params = [{transform_indices = @transform_0, window_bounds = array<i64: 32, 128>}, {pipeline_mode = #tpu.pipeline_mode<synchronous>, transform_indices = @transform_1, window_bounds = array<i64: 128, 256>}, {pipeline_mode = #tpu.pipeline_mode<synchronous>, transform_indices = @transform_2, window_bounds = array<i64: 1, 256>}, {pipeline_mode = #tpu.pipeline_mode<synchronous>, transform_indices = @transform_3, window_bounds = array<i64: 1, 256>}, {pipeline_mode = #tpu.pipeline_mode<synchronous>, transform_indices = @transform_4, window_bounds = array<i64: 1, 256>}, {pipeline_mode = #tpu.pipeline_mode<synchronous>, transform_indices = @transform_5, window_bounds = array<i64: 256, 256>}, {pipeline_mode = #tpu.pipeline_mode<synchronous>, transform_indices = @transform_6, window_bounds = array<i64: 1, 256>}, {pipeline_mode = #tpu.pipeline_mode<synchronous>, transform_indices = @transform_7, window_bounds = array<i64: 1, 256>}, {pipeline_mode = #tpu.pipeline_mode<synchronous>, transform_indices = @transform_8, window_bounds = array<i64: 1, 256>}, {pipeline_mode = #tpu.pipeline_mode<synchronous>, transform_indices = @transform_9, window_bounds = array<i64: 256, 256>}, {pipeline_mode = #tpu.pipeline_mode<synchronous>, transform_indices = @transform_10, window_bounds = array<i64: 1, 256>}, {pipeline_mode = #tpu.pipeline_mode<synchronous>, transform_indices = @transform_11, window_bounds = array<i64: 1, 256>}, {pipeline_mode = #tpu.pipeline_mode<synchronous>, transform_indices = @transform_12, window_bounds = array<i64: 1, 256>}, {pipeline_mode = #tpu.pipeline_mode<synchronous>, transform_indices = @transform_13, window_bounds = array<i64: 256, 256>}, {pipeline_mode = #tpu.pipeline_mode<synchronous>, transform_indices = @transform_14, window_bounds = array<i64: 1, 256>}, {pipeline_mode = #tpu.pipeline_mode<synchronous>, transform_indices = @transform_15, window_bounds = array<i64: 1, 256>}, {pipeline_mode = #tpu.pipeline_mode<synchronous>, transform_indices = @transform_16, window_bounds = array<i64: 1, 256>}, {pipeline_mode = #tpu.pipeline_mode<synchronous>, transform_indices = @transform_17, window_bounds = array<i64: 256, 256>}, {pipeline_mode = #tpu.pipeline_mode<synchronous>, transform_indices = @transform_18, window_bounds = array<i64: 1, 256>}, {pipeline_mode = #tpu.pipeline_mode<synchronous>, transform_indices = @transform_19, window_bounds = array<i64: 1, 256>}, {pipeline_mode = #tpu.pipeline_mode<synchronous>, transform_indices = @transform_20, window_bounds = array<i64: 1, 256>}, {pipeline_mode = #tpu.pipeline_mode<synchronous>, transform_indices = @transform_21, window_bounds = array<i64: 256, 256>}, {pipeline_mode = #tpu.pipeline_mode<synchronous>, transform_indices = @transform_22, window_bounds = array<i64: 1, 256>}, {pipeline_mode = #tpu.pipeline_mode<synchronous>, transform_indices = @transform_23, window_bounds = array<i64: 1, 256>}, {pipeline_mode = #tpu.pipeline_mode<synchronous>, transform_indices = @transform_24, window_bounds = array<i64: 1, 256>}, {pipeline_mode = #tpu.pipeline_mode<synchronous>, transform_indices = @transform_25, window_bounds = array<i64: 256, 32>}, {pipeline_mode = #tpu.pipeline_mode<synchronous>, transform_indices = @transform_26, window_bounds = array<i64: 1, 32>}, {transform_indices = @transform_27, window_bounds = array<i64: 32, 32>}]} {
    %c0 = arith.constant 0 : index
    %c0_0 = arith.constant 0 : index
    %0 = vector.load %arg1[%c0, %c0_0] : memref<32x128xf32, #tpu.memory_space<vmem>>, vector<32x128xf32>
    %c0_1 = arith.constant 0 : index
    %c0_2 = arith.constant 0 : index
    %1 = vector.load %arg2[%c0_1, %c0_2] : memref<128x256xbf16, #tpu.memory_space<vmem>>, vector<128x256xbf16>
    %c0_3 = arith.constant 0 : index
    %c0_4 = arith.constant 0 : index
    %2 = vector.load %arg3[%c0_3, %c0_4] : memref<1x256xf32, #tpu.memory_space<vmem>>, vector<1x256xf32>
    %c0_5 = arith.constant 0 : index
    %c0_6 = arith.constant 0 : index
    %3 = vector.load %arg4[%c0_5, %c0_6] : memref<1x256xf32, #tpu.memory_space<vmem>>, vector<1x256xf32>
    %c0_7 = arith.constant 0 : index
    %c0_8 = arith.constant 0 : index
    %4 = vector.load %arg5[%c0_7, %c0_8] : memref<1x256xf32, #tpu.memory_space<vmem>>, vector<1x256xf32>
    %5 = arith.truncf %0 : vector<32x128xf32> to vector<32x128xbf16>
    %cst = arith.constant dense<0.000000e+00> : vector<32x256xf32>
    %6 = tpu.matmul %5, %1, %cst {dimension_numbers = #tpu.dot_dimension_numbers<[1], [0], [0], [1], [0, 0, 1, 1], [], []>} : vector<32x128xbf16>, vector<128x256xbf16>, vector<32x256xf32> -> vector<32x256xf32>
    %7 = vector.broadcast %2 : vector<1x256xf32> to vector<32x256xf32>
    %8 = arith.addf %6, %7 : vector<32x256xf32>
    %cst_9 = arith.constant 0.000000e+00 : f32
    %9 = vector.broadcast %cst_9 : f32 to vector<32x256xf32>
    %10 = arith.cmpf ogt, %8, %9 : vector<32x256xf32>
    %cst_10 = arith.constant 0.000000e+00 : f32
    %11 = vector.broadcast %cst_10 : f32 to vector<32x256xf32>
    %12 = arith.minimumf %8, %11 : vector<32x256xf32>
    %13 = math.exp %12 : vector<32x256xf32>
    %cst_11 = arith.constant 1.000000e+00 : f32
    %14 = vector.broadcast %cst_11 : f32 to vector<32x256xf32>
    %15 = arith.subf %13, %14 : vector<32x256xf32>
    %16 = arith.select %10, %8, %15 : vector<32x256xi1>, vector<32x256xf32>
    %cst_12 = arith.constant dense<0.000000e+00> : vector<32xf32>
    %17 = vector.multi_reduction <add>, %16, %cst_12 [1] : vector<32x256xf32> to vector<32xf32>
    %18 = vector.shape_cast %17 : vector<32xf32> to vector<32x1xf32>
    %cst_13 = arith.constant 2.560000e+02 : f32
    %19 = vector.broadcast %cst_13 : f32 to vector<32x1xf32>
    %20 = arith.divf %18, %19 : vector<32x1xf32>
    %21 = vector.broadcast %20 : vector<32x1xf32> to vector<32x256xf32>
    %22 = arith.subf %16, %21 : vector<32x256xf32>
    %23 = arith.mulf %22, %22 : vector<32x256xf32>
    %cst_14 = arith.constant dense<0.000000e+00> : vector<32xf32>
    %24 = vector.multi_reduction <add>, %23, %cst_14 [1] : vector<32x256xf32> to vector<32xf32>
    %25 = vector.shape_cast %24 : vector<32xf32> to vector<32x1xf32>
    %cst_15 = arith.constant 2.560000e+02 : f32
    %26 = vector.broadcast %cst_15 : f32 to vector<32x1xf32>
    %27 = arith.divf %25, %26 : vector<32x1xf32>
    %28 = vector.broadcast %20 : vector<32x1xf32> to vector<32x256xf32>
    %29 = arith.subf %16, %28 : vector<32x256xf32>
    %cst_16 = arith.constant 9.99999974E-6 : f32
    %30 = vector.broadcast %cst_16 : f32 to vector<32x1xf32>
    %31 = arith.addf %27, %30 : vector<32x1xf32>
    %32 = math.rsqrt %31 : vector<32x1xf32>
    %33 = vector.broadcast %32 : vector<32x1xf32> to vector<32x256xf32>
    %34 = arith.mulf %29, %33 : vector<32x256xf32>
    %35 = vector.broadcast %3 : vector<1x256xf32> to vector<32x256xf32>
    %36 = arith.mulf %34, %35 : vector<32x256xf32>
    %37 = vector.broadcast %4 : vector<1x256xf32> to vector<32x256xf32>
    %38 = arith.addf %36, %37 : vector<32x256xf32>
    %c0_17 = arith.constant 0 : index
    %c0_18 = arith.constant 0 : index
    %39 = vector.load %arg6[%c0_17, %c0_18] : memref<256x256xbf16, #tpu.memory_space<vmem>>, vector<256x256xbf16>
    %c0_19 = arith.constant 0 : index
    %c0_20 = arith.constant 0 : index
    %40 = vector.load %arg7[%c0_19, %c0_20] : memref<1x256xf32, #tpu.memory_space<vmem>>, vector<1x256xf32>
    %c0_21 = arith.constant 0 : index
    %c0_22 = arith.constant 0 : index
    %41 = vector.load %arg8[%c0_21, %c0_22] : memref<1x256xf32, #tpu.memory_space<vmem>>, vector<1x256xf32>
    %c0_23 = arith.constant 0 : index
    %c0_24 = arith.constant 0 : index
    %42 = vector.load %arg9[%c0_23, %c0_24] : memref<1x256xf32, #tpu.memory_space<vmem>>, vector<1x256xf32>
    %43 = arith.truncf %38 : vector<32x256xf32> to vector<32x256xbf16>
    %cst_25 = arith.constant dense<0.000000e+00> : vector<32x256xf32>
    %44 = tpu.matmul %43, %39, %cst_25 {dimension_numbers = #tpu.dot_dimension_numbers<[1], [0], [0], [1], [0, 0, 1, 1], [], []>} : vector<32x256xbf16>, vector<256x256xbf16>, vector<32x256xf32> -> vector<32x256xf32>
    %45 = vector.broadcast %40 : vector<1x256xf32> to vector<32x256xf32>
    %46 = arith.addf %44, %45 : vector<32x256xf32>
    %cst_26 = arith.constant 0.000000e+00 : f32
    %47 = vector.broadcast %cst_26 : f32 to vector<32x256xf32>
    %48 = arith.cmpf ogt, %46, %47 : vector<32x256xf32>
    %cst_27 = arith.constant 0.000000e+00 : f32
    %49 = vector.broadcast %cst_27 : f32 to vector<32x256xf32>
    %50 = arith.minimumf %46, %49 : vector<32x256xf32>
    %51 = math.exp %50 : vector<32x256xf32>
    %cst_28 = arith.constant 1.000000e+00 : f32
    %52 = vector.broadcast %cst_28 : f32 to vector<32x256xf32>
    %53 = arith.subf %51, %52 : vector<32x256xf32>
    %54 = arith.select %48, %46, %53 : vector<32x256xi1>, vector<32x256xf32>
    %cst_29 = arith.constant dense<0.000000e+00> : vector<32xf32>
    %55 = vector.multi_reduction <add>, %54, %cst_29 [1] : vector<32x256xf32> to vector<32xf32>
    %56 = vector.shape_cast %55 : vector<32xf32> to vector<32x1xf32>
    %cst_30 = arith.constant 2.560000e+02 : f32
    %57 = vector.broadcast %cst_30 : f32 to vector<32x1xf32>
    %58 = arith.divf %56, %57 : vector<32x1xf32>
    %59 = vector.broadcast %58 : vector<32x1xf32> to vector<32x256xf32>
    %60 = arith.subf %54, %59 : vector<32x256xf32>
    %61 = arith.mulf %60, %60 : vector<32x256xf32>
    %cst_31 = arith.constant dense<0.000000e+00> : vector<32xf32>
    %62 = vector.multi_reduction <add>, %61, %cst_31 [1] : vector<32x256xf32> to vector<32xf32>
    %63 = vector.shape_cast %62 : vector<32xf32> to vector<32x1xf32>
    %cst_32 = arith.constant 2.560000e+02 : f32
    %64 = vector.broadcast %cst_32 : f32 to vector<32x1xf32>
    %65 = arith.divf %63, %64 : vector<32x1xf32>
    %66 = vector.broadcast %58 : vector<32x1xf32> to vector<32x256xf32>
    %67 = arith.subf %54, %66 : vector<32x256xf32>
    %cst_33 = arith.constant 9.99999974E-6 : f32
    %68 = vector.broadcast %cst_33 : f32 to vector<32x1xf32>
    %69 = arith.addf %65, %68 : vector<32x1xf32>
    %70 = math.rsqrt %69 : vector<32x1xf32>
    %71 = vector.broadcast %70 : vector<32x1xf32> to vector<32x256xf32>
    %72 = arith.mulf %67, %71 : vector<32x256xf32>
    %73 = vector.broadcast %41 : vector<1x256xf32> to vector<32x256xf32>
    %74 = arith.mulf %72, %73 : vector<32x256xf32>
    %75 = vector.broadcast %42 : vector<1x256xf32> to vector<32x256xf32>
    %76 = arith.addf %74, %75 : vector<32x256xf32>
    %c0_34 = arith.constant 0 : index
    %c0_35 = arith.constant 0 : index
    %77 = vector.load %arg10[%c0_34, %c0_35] : memref<256x256xbf16, #tpu.memory_space<vmem>>, vector<256x256xbf16>
    %c0_36 = arith.constant 0 : index
    %c0_37 = arith.constant 0 : index
    %78 = vector.load %arg11[%c0_36, %c0_37] : memref<1x256xf32, #tpu.memory_space<vmem>>, vector<1x256xf32>
    %c0_38 = arith.constant 0 : index
    %c0_39 = arith.constant 0 : index
    %79 = vector.load %arg12[%c0_38, %c0_39] : memref<1x256xf32, #tpu.memory_space<vmem>>, vector<1x256xf32>
    %c0_40 = arith.constant 0 : index
    %c0_41 = arith.constant 0 : index
    %80 = vector.load %arg13[%c0_40, %c0_41] : memref<1x256xf32, #tpu.memory_space<vmem>>, vector<1x256xf32>
    %81 = arith.truncf %76 : vector<32x256xf32> to vector<32x256xbf16>
    %cst_42 = arith.constant dense<0.000000e+00> : vector<32x256xf32>
    %82 = tpu.matmul %81, %77, %cst_42 {dimension_numbers = #tpu.dot_dimension_numbers<[1], [0], [0], [1], [0, 0, 1, 1], [], []>} : vector<32x256xbf16>, vector<256x256xbf16>, vector<32x256xf32> -> vector<32x256xf32>
    %83 = vector.broadcast %78 : vector<1x256xf32> to vector<32x256xf32>
    %84 = arith.addf %82, %83 : vector<32x256xf32>
    %cst_43 = arith.constant 0.000000e+00 : f32
    %85 = vector.broadcast %cst_43 : f32 to vector<32x256xf32>
    %86 = arith.cmpf ogt, %84, %85 : vector<32x256xf32>
    %cst_44 = arith.constant 0.000000e+00 : f32
    %87 = vector.broadcast %cst_44 : f32 to vector<32x256xf32>
    %88 = arith.minimumf %84, %87 : vector<32x256xf32>
    %89 = math.exp %88 : vector<32x256xf32>
    %cst_45 = arith.constant 1.000000e+00 : f32
    %90 = vector.broadcast %cst_45 : f32 to vector<32x256xf32>
    %91 = arith.subf %89, %90 : vector<32x256xf32>
    %92 = arith.select %86, %84, %91 : vector<32x256xi1>, vector<32x256xf32>
    %cst_46 = arith.constant dense<0.000000e+00> : vector<32xf32>
    %93 = vector.multi_reduction <add>, %92, %cst_46 [1] : vector<32x256xf32> to vector<32xf32>
    %94 = vector.shape_cast %93 : vector<32xf32> to vector<32x1xf32>
    %cst_47 = arith.constant 2.560000e+02 : f32
    %95 = vector.broadcast %cst_47 : f32 to vector<32x1xf32>
    %96 = arith.divf %94, %95 : vector<32x1xf32>
    %97 = vector.broadcast %96 : vector<32x1xf32> to vector<32x256xf32>
    %98 = arith.subf %92, %97 : vector<32x256xf32>
    %99 = arith.mulf %98, %98 : vector<32x256xf32>
    %cst_48 = arith.constant dense<0.000000e+00> : vector<32xf32>
    %100 = vector.multi_reduction <add>, %99, %cst_48 [1] : vector<32x256xf32> to vector<32xf32>
    %101 = vector.shape_cast %100 : vector<32xf32> to vector<32x1xf32>
    %cst_49 = arith.constant 2.560000e+02 : f32
    %102 = vector.broadcast %cst_49 : f32 to vector<32x1xf32>
    %103 = arith.divf %101, %102 : vector<32x1xf32>
    %104 = vector.broadcast %96 : vector<32x1xf32> to vector<32x256xf32>
    %105 = arith.subf %92, %104 : vector<32x256xf32>
    %cst_50 = arith.constant 9.99999974E-6 : f32
    %106 = vector.broadcast %cst_50 : f32 to vector<32x1xf32>
    %107 = arith.addf %103, %106 : vector<32x1xf32>
    %108 = math.rsqrt %107 : vector<32x1xf32>
    %109 = vector.broadcast %108 : vector<32x1xf32> to vector<32x256xf32>
    %110 = arith.mulf %105, %109 : vector<32x256xf32>
    %111 = vector.broadcast %79 : vector<1x256xf32> to vector<32x256xf32>
    %112 = arith.mulf %110, %111 : vector<32x256xf32>
    %113 = vector.broadcast %80 : vector<1x256xf32> to vector<32x256xf32>
    %114 = arith.addf %112, %113 : vector<32x256xf32>
    %c0_51 = arith.constant 0 : index
    %c0_52 = arith.constant 0 : index
    %115 = vector.load %arg14[%c0_51, %c0_52] : memref<256x256xbf16, #tpu.memory_space<vmem>>, vector<256x256xbf16>
    %c0_53 = arith.constant 0 : index
    %c0_54 = arith.constant 0 : index
    %116 = vector.load %arg15[%c0_53, %c0_54] : memref<1x256xf32, #tpu.memory_space<vmem>>, vector<1x256xf32>
    %c0_55 = arith.constant 0 : index
    %c0_56 = arith.constant 0 : index
    %117 = vector.load %arg16[%c0_55, %c0_56] : memref<1x256xf32, #tpu.memory_space<vmem>>, vector<1x256xf32>
    %c0_57 = arith.constant 0 : index
    %c0_58 = arith.constant 0 : index
    %118 = vector.load %arg17[%c0_57, %c0_58] : memref<1x256xf32, #tpu.memory_space<vmem>>, vector<1x256xf32>
    %119 = arith.truncf %114 : vector<32x256xf32> to vector<32x256xbf16>
    %cst_59 = arith.constant dense<0.000000e+00> : vector<32x256xf32>
    %120 = tpu.matmul %119, %115, %cst_59 {dimension_numbers = #tpu.dot_dimension_numbers<[1], [0], [0], [1], [0, 0, 1, 1], [], []>} : vector<32x256xbf16>, vector<256x256xbf16>, vector<32x256xf32> -> vector<32x256xf32>
    %121 = vector.broadcast %116 : vector<1x256xf32> to vector<32x256xf32>
    %122 = arith.addf %120, %121 : vector<32x256xf32>
    %cst_60 = arith.constant 0.000000e+00 : f32
    %123 = vector.broadcast %cst_60 : f32 to vector<32x256xf32>
    %124 = arith.cmpf ogt, %122, %123 : vector<32x256xf32>
    %cst_61 = arith.constant 0.000000e+00 : f32
    %125 = vector.broadcast %cst_61 : f32 to vector<32x256xf32>
    %126 = arith.minimumf %122, %125 : vector<32x256xf32>
    %127 = math.exp %126 : vector<32x256xf32>
    %cst_62 = arith.constant 1.000000e+00 : f32
    %128 = vector.broadcast %cst_62 : f32 to vector<32x256xf32>
    %129 = arith.subf %127, %128 : vector<32x256xf32>
    %130 = arith.select %124, %122, %129 : vector<32x256xi1>, vector<32x256xf32>
    %cst_63 = arith.constant dense<0.000000e+00> : vector<32xf32>
    %131 = vector.multi_reduction <add>, %130, %cst_63 [1] : vector<32x256xf32> to vector<32xf32>
    %132 = vector.shape_cast %131 : vector<32xf32> to vector<32x1xf32>
    %cst_64 = arith.constant 2.560000e+02 : f32
    %133 = vector.broadcast %cst_64 : f32 to vector<32x1xf32>
    %134 = arith.divf %132, %133 : vector<32x1xf32>
    %135 = vector.broadcast %134 : vector<32x1xf32> to vector<32x256xf32>
    %136 = arith.subf %130, %135 : vector<32x256xf32>
    %137 = arith.mulf %136, %136 : vector<32x256xf32>
    %cst_65 = arith.constant dense<0.000000e+00> : vector<32xf32>
    %138 = vector.multi_reduction <add>, %137, %cst_65 [1] : vector<32x256xf32> to vector<32xf32>
    %139 = vector.shape_cast %138 : vector<32xf32> to vector<32x1xf32>
    %cst_66 = arith.constant 2.560000e+02 : f32
    %140 = vector.broadcast %cst_66 : f32 to vector<32x1xf32>
    %141 = arith.divf %139, %140 : vector<32x1xf32>
    %142 = vector.broadcast %134 : vector<32x1xf32> to vector<32x256xf32>
    %143 = arith.subf %130, %142 : vector<32x256xf32>
    %cst_67 = arith.constant 9.99999974E-6 : f32
    %144 = vector.broadcast %cst_67 : f32 to vector<32x1xf32>
    %145 = arith.addf %141, %144 : vector<32x1xf32>
    %146 = math.rsqrt %145 : vector<32x1xf32>
    %147 = vector.broadcast %146 : vector<32x1xf32> to vector<32x256xf32>
    %148 = arith.mulf %143, %147 : vector<32x256xf32>
    %149 = vector.broadcast %117 : vector<1x256xf32> to vector<32x256xf32>
    %150 = arith.mulf %148, %149 : vector<32x256xf32>
    %151 = vector.broadcast %118 : vector<1x256xf32> to vector<32x256xf32>
    %152 = arith.addf %150, %151 : vector<32x256xf32>
    %c0_68 = arith.constant 0 : index
    %c0_69 = arith.constant 0 : index
    %153 = vector.load %arg18[%c0_68, %c0_69] : memref<256x256xbf16, #tpu.memory_space<vmem>>, vector<256x256xbf16>
    %c0_70 = arith.constant 0 : index
    %c0_71 = arith.constant 0 : index
    %154 = vector.load %arg19[%c0_70, %c0_71] : memref<1x256xf32, #tpu.memory_space<vmem>>, vector<1x256xf32>
    %c0_72 = arith.constant 0 : index
    %c0_73 = arith.constant 0 : index
    %155 = vector.load %arg20[%c0_72, %c0_73] : memref<1x256xf32, #tpu.memory_space<vmem>>, vector<1x256xf32>
    %c0_74 = arith.constant 0 : index
    %c0_75 = arith.constant 0 : index
    %156 = vector.load %arg21[%c0_74, %c0_75] : memref<1x256xf32, #tpu.memory_space<vmem>>, vector<1x256xf32>
    %157 = arith.truncf %152 : vector<32x256xf32> to vector<32x256xbf16>
    %cst_76 = arith.constant dense<0.000000e+00> : vector<32x256xf32>
    %158 = tpu.matmul %157, %153, %cst_76 {dimension_numbers = #tpu.dot_dimension_numbers<[1], [0], [0], [1], [0, 0, 1, 1], [], []>} : vector<32x256xbf16>, vector<256x256xbf16>, vector<32x256xf32> -> vector<32x256xf32>
    %159 = vector.broadcast %154 : vector<1x256xf32> to vector<32x256xf32>
    %160 = arith.addf %158, %159 : vector<32x256xf32>
    %cst_77 = arith.constant 0.000000e+00 : f32
    %161 = vector.broadcast %cst_77 : f32 to vector<32x256xf32>
    %162 = arith.cmpf ogt, %160, %161 : vector<32x256xf32>
    %cst_78 = arith.constant 0.000000e+00 : f32
    %163 = vector.broadcast %cst_78 : f32 to vector<32x256xf32>
    %164 = arith.minimumf %160, %163 : vector<32x256xf32>
    %165 = math.exp %164 : vector<32x256xf32>
    %cst_79 = arith.constant 1.000000e+00 : f32
    %166 = vector.broadcast %cst_79 : f32 to vector<32x256xf32>
    %167 = arith.subf %165, %166 : vector<32x256xf32>
    %168 = arith.select %162, %160, %167 : vector<32x256xi1>, vector<32x256xf32>
    %cst_80 = arith.constant dense<0.000000e+00> : vector<32xf32>
    %169 = vector.multi_reduction <add>, %168, %cst_80 [1] : vector<32x256xf32> to vector<32xf32>
    %170 = vector.shape_cast %169 : vector<32xf32> to vector<32x1xf32>
    %cst_81 = arith.constant 2.560000e+02 : f32
    %171 = vector.broadcast %cst_81 : f32 to vector<32x1xf32>
    %172 = arith.divf %170, %171 : vector<32x1xf32>
    %173 = vector.broadcast %172 : vector<32x1xf32> to vector<32x256xf32>
    %174 = arith.subf %168, %173 : vector<32x256xf32>
    %175 = arith.mulf %174, %174 : vector<32x256xf32>
    %cst_82 = arith.constant dense<0.000000e+00> : vector<32xf32>
    %176 = vector.multi_reduction <add>, %175, %cst_82 [1] : vector<32x256xf32> to vector<32xf32>
    %177 = vector.shape_cast %176 : vector<32xf32> to vector<32x1xf32>
    %cst_83 = arith.constant 2.560000e+02 : f32
    %178 = vector.broadcast %cst_83 : f32 to vector<32x1xf32>
    %179 = arith.divf %177, %178 : vector<32x1xf32>
    %180 = vector.broadcast %172 : vector<32x1xf32> to vector<32x256xf32>
    %181 = arith.subf %168, %180 : vector<32x256xf32>
    %cst_84 = arith.constant 9.99999974E-6 : f32
    %182 = vector.broadcast %cst_84 : f32 to vector<32x1xf32>
    %183 = arith.addf %179, %182 : vector<32x1xf32>
    %184 = math.rsqrt %183 : vector<32x1xf32>
    %185 = vector.broadcast %184 : vector<32x1xf32> to vector<32x256xf32>
    %186 = arith.mulf %181, %185 : vector<32x256xf32>
    %187 = vector.broadcast %155 : vector<1x256xf32> to vector<32x256xf32>
    %188 = arith.mulf %186, %187 : vector<32x256xf32>
    %189 = vector.broadcast %156 : vector<1x256xf32> to vector<32x256xf32>
    %190 = arith.addf %188, %189 : vector<32x256xf32>
    %c0_85 = arith.constant 0 : index
    %c0_86 = arith.constant 0 : index
    %191 = vector.load %arg22[%c0_85, %c0_86] : memref<256x256xbf16, #tpu.memory_space<vmem>>, vector<256x256xbf16>
    %c0_87 = arith.constant 0 : index
    %c0_88 = arith.constant 0 : index
    %192 = vector.load %arg23[%c0_87, %c0_88] : memref<1x256xf32, #tpu.memory_space<vmem>>, vector<1x256xf32>
    %c0_89 = arith.constant 0 : index
    %c0_90 = arith.constant 0 : index
    %193 = vector.load %arg24[%c0_89, %c0_90] : memref<1x256xf32, #tpu.memory_space<vmem>>, vector<1x256xf32>
    %c0_91 = arith.constant 0 : index
    %c0_92 = arith.constant 0 : index
    %194 = vector.load %arg25[%c0_91, %c0_92] : memref<1x256xf32, #tpu.memory_space<vmem>>, vector<1x256xf32>
    %195 = arith.truncf %190 : vector<32x256xf32> to vector<32x256xbf16>
    %cst_93 = arith.constant dense<0.000000e+00> : vector<32x256xf32>
    %196 = tpu.matmul %195, %191, %cst_93 {dimension_numbers = #tpu.dot_dimension_numbers<[1], [0], [0], [1], [0, 0, 1, 1], [], []>} : vector<32x256xbf16>, vector<256x256xbf16>, vector<32x256xf32> -> vector<32x256xf32>
    %197 = vector.broadcast %192 : vector<1x256xf32> to vector<32x256xf32>
    %198 = arith.addf %196, %197 : vector<32x256xf32>
    %cst_94 = arith.constant 0.000000e+00 : f32
    %199 = vector.broadcast %cst_94 : f32 to vector<32x256xf32>
    %200 = arith.cmpf ogt, %198, %199 : vector<32x256xf32>
    %cst_95 = arith.constant 0.000000e+00 : f32
    %201 = vector.broadcast %cst_95 : f32 to vector<32x256xf32>
    %202 = arith.minimumf %198, %201 : vector<32x256xf32>
    %203 = math.exp %202 : vector<32x256xf32>
    %cst_96 = arith.constant 1.000000e+00 : f32
    %204 = vector.broadcast %cst_96 : f32 to vector<32x256xf32>
    %205 = arith.subf %203, %204 : vector<32x256xf32>
    %206 = arith.select %200, %198, %205 : vector<32x256xi1>, vector<32x256xf32>
    %cst_97 = arith.constant dense<0.000000e+00> : vector<32xf32>
    %207 = vector.multi_reduction <add>, %206, %cst_97 [1] : vector<32x256xf32> to vector<32xf32>
    %208 = vector.shape_cast %207 : vector<32xf32> to vector<32x1xf32>
    %cst_98 = arith.constant 2.560000e+02 : f32
    %209 = vector.broadcast %cst_98 : f32 to vector<32x1xf32>
    %210 = arith.divf %208, %209 : vector<32x1xf32>
    %211 = vector.broadcast %210 : vector<32x1xf32> to vector<32x256xf32>
    %212 = arith.subf %206, %211 : vector<32x256xf32>
    %213 = arith.mulf %212, %212 : vector<32x256xf32>
    %cst_99 = arith.constant dense<0.000000e+00> : vector<32xf32>
    %214 = vector.multi_reduction <add>, %213, %cst_99 [1] : vector<32x256xf32> to vector<32xf32>
    %215 = vector.shape_cast %214 : vector<32xf32> to vector<32x1xf32>
    %cst_100 = arith.constant 2.560000e+02 : f32
    %216 = vector.broadcast %cst_100 : f32 to vector<32x1xf32>
    %217 = arith.divf %215, %216 : vector<32x1xf32>
    %218 = vector.broadcast %210 : vector<32x1xf32> to vector<32x256xf32>
    %219 = arith.subf %206, %218 : vector<32x256xf32>
    %cst_101 = arith.constant 9.99999974E-6 : f32
    %220 = vector.broadcast %cst_101 : f32 to vector<32x1xf32>
    %221 = arith.addf %217, %220 : vector<32x1xf32>
    %222 = math.rsqrt %221 : vector<32x1xf32>
    %223 = vector.broadcast %222 : vector<32x1xf32> to vector<32x256xf32>
    %224 = arith.mulf %219, %223 : vector<32x256xf32>
    %225 = vector.broadcast %193 : vector<1x256xf32> to vector<32x256xf32>
    %226 = arith.mulf %224, %225 : vector<32x256xf32>
    %227 = vector.broadcast %194 : vector<1x256xf32> to vector<32x256xf32>
    %228 = arith.addf %226, %227 : vector<32x256xf32>
    %229 = arith.truncf %228 : vector<32x256xf32> to vector<32x256xbf16>
    %c0_102 = arith.constant 0 : index
    %c0_103 = arith.constant 0 : index
    %230 = vector.load %arg26[%c0_102, %c0_103] : memref<256x32xbf16, #tpu.memory_space<vmem>>, vector<256x32xbf16>
    %cst_104 = arith.constant dense<0.000000e+00> : vector<32x32xf32>
    %231 = tpu.matmul %229, %230, %cst_104 {dimension_numbers = #tpu.dot_dimension_numbers<[1], [0], [0], [1], [0, 0, 1, 1], [], []>} : vector<32x256xbf16>, vector<256x32xbf16>, vector<32x32xf32> -> vector<32x32xf32>
    %c0_105 = arith.constant 0 : index
    %c0_106 = arith.constant 0 : index
    %232 = vector.load %arg27[%c0_105, %c0_106] : memref<1x32xf32, #tpu.memory_space<vmem>>, vector<1x32xf32>
    %233 = vector.broadcast %232 : vector<1x32xf32> to vector<32x32xf32>
    %234 = arith.addf %231, %233 : vector<32x32xf32>
    %c0_107 = arith.constant 0 : index
    %c0_108 = arith.constant 0 : index
    %235 = vector.load %arg28[%c0_107, %c0_108] : memref<32x32xf32, #tpu.memory_space<vmem>>, vector<32x32xf32>
    tpu.vector_store %arg28[%c0_107, %c0_108], %234 {strides = array<i32>} : memref<32x32xf32, #tpu.memory_space<vmem>>, vector<32x32xf32>,
    return
  }
  func.func @transform_0(%arg0: i32) -> (i32, i32) {
    %c0_i32 = arith.constant 0 : i32
    %c0_i32_0 = arith.constant 0 : i32
    return %arg0, %c0_i32 : i32, i32
  }
  func.func @transform_1(%arg0: i32) -> (i32, i32) {
    %c0_i32 = arith.constant 0 : i32
    %c0_i32_0 = arith.constant 0 : i32
    %c0_i32_1 = arith.constant 0 : i32
    return %c0_i32, %c0_i32_0 : i32, i32
  }
  func.func @transform_2(%arg0: i32) -> (i32, i32) {
    %c0_i32 = arith.constant 0 : i32
    %c0_i32_0 = arith.constant 0 : i32
    %c0_i32_1 = arith.constant 0 : i32
    return %c0_i32, %c0_i32_0 : i32, i32
  }
  func.func @transform_3(%arg0: i32) -> (i32, i32) {
    %c0_i32 = arith.constant 0 : i32
    %c0_i32_0 = arith.constant 0 : i32
    %c0_i32_1 = arith.constant 0 : i32
    return %c0_i32, %c0_i32_0 : i32, i32
  }
  func.func @transform_4(%arg0: i32) -> (i32, i32) {
    %c0_i32 = arith.constant 0 : i32
    %c0_i32_0 = arith.constant 0 : i32
    %c0_i32_1 = arith.constant 0 : i32
    return %c0_i32, %c0_i32_0 : i32, i32
  }
  func.func @transform_5(%arg0: i32) -> (i32, i32) {
    %c0_i32 = arith.constant 0 : i32
    %c0_i32_0 = arith.constant 0 : i32
    %c0_i32_1 = arith.constant 0 : i32
    return %c0_i32, %c0_i32_0 : i32, i32
  }
  func.func @transform_6(%arg0: i32) -> (i32, i32) {
    %c0_i32 = arith.constant 0 : i32
    %c0_i32_0 = arith.constant 0 : i32
    %c0_i32_1 = arith.constant 0 : i32
    return %c0_i32, %c0_i32_0 : i32, i32
  }
  func.func @transform_7(%arg0: i32) -> (i32, i32) {
    %c0_i32 = arith.constant 0 : i32
    %c0_i32_0 = arith.constant 0 : i32
    %c0_i32_1 = arith.constant 0 : i32
    return %c0_i32, %c0_i32_0 : i32, i32
  }
  func.func @transform_8(%arg0: i32) -> (i32, i32) {
    %c0_i32 = arith.constant 0 : i32
    %c0_i32_0 = arith.constant 0 : i32
    %c0_i32_1 = arith.constant 0 : i32
    return %c0_i32, %c0_i32_0 : i32, i32
  }
  func.func @transform_9(%arg0: i32) -> (i32, i32) {
    %c0_i32 = arith.constant 0 : i32
    %c0_i32_0 = arith.constant 0 : i32
    %c0_i32_1 = arith.constant 0 : i32
    return %c0_i32, %c0_i32_0 : i32, i32
  }
  func.func @transform_10(%arg0: i32) -> (i32, i32) {
    %c0_i32 = arith.constant 0 : i32
    %c0_i32_0 = arith.constant 0 : i32
    %c0_i32_1 = arith.constant 0 : i32
    return %c0_i32, %c0_i32_0 : i32, i32
  }
  func.func @transform_11(%arg0: i32) -> (i32, i32) {
    %c0_i32 = arith.constant 0 : i32
    %c0_i32_0 = arith.constant 0 : i32
    %c0_i32_1 = arith.constant 0 : i32
    return %c0_i32, %c0_i32_0 : i32, i32
  }
  func.func @transform_12(%arg0: i32) -> (i32, i32) {
    %c0_i32 = arith.constant 0 : i32
    %c0_i32_0 = arith.constant 0 : i32
    %c0_i32_1 = arith.constant 0 : i32
    return %c0_i32, %c0_i32_0 : i32, i32
  }
  func.func @transform_13(%arg0: i32) -> (i32, i32) {
    %c0_i32 = arith.constant 0 : i32
    %c0_i32_0 = arith.constant 0 : i32
    %c0_i32_1 = arith.constant 0 : i32
    return %c0_i32, %c0_i32_0 : i32, i32
  }
  func.func @transform_14(%arg0: i32) -> (i32, i32) {
    %c0_i32 = arith.constant 0 : i32
    %c0_i32_0 = arith.constant 0 : i32
    %c0_i32_1 = arith.constant 0 : i32
    return %c0_i32, %c0_i32_0 : i32, i32
  }
  func.func @transform_15(%arg0: i32) -> (i32, i32) {
    %c0_i32 = arith.constant 0 : i32
    %c0_i32_0 = arith.constant 0 : i32
    %c0_i32_1 = arith.constant 0 : i32
    return %c0_i32, %c0_i32_0 : i32, i32
  }
  func.func @transform_16(%arg0: i32) -> (i32, i32) {
    %c0_i32 = arith.constant 0 : i32
    %c0_i32_0 = arith.constant 0 : i32
    %c0_i32_1 = arith.constant 0 : i32
    return %c0_i32, %c0_i32_0 : i32, i32
  }
  func.func @transform_17(%arg0: i32) -> (i32, i32) {
    %c0_i32 = arith.constant 0 : i32
    %c0_i32_0 = arith.constant 0 : i32
    %c0_i32_1 = arith.constant 0 : i32
    return %c0_i32, %c0_i32_0 : i32, i32
  }
  func.func @transform_18(%arg0: i32) -> (i32, i32) {
    %c0_i32 = arith.constant 0 : i32
    %c0_i32_0 = arith.constant 0 : i32
    %c0_i32_1 = arith.constant 0 : i32
    return %c0_i32, %c0_i32_0 : i32, i32
  }
  func.func @transform_19(%arg0: i32) -> (i32, i32) {
    %c0_i32 = arith.constant 0 : i32
    %c0_i32_0 = arith.constant 0 : i32
    %c0_i32_1 = arith.constant 0 : i32
    return %c0_i32, %c0_i32_0 : i32, i32
  }
  func.func @transform_20(%arg0: i32) -> (i32, i32) {
    %c0_i32 = arith.constant 0 : i32
    %c0_i32_0 = arith.constant 0 : i32
    %c0_i32_1 = arith.constant 0 : i32
    return %c0_i32, %c0_i32_0 : i32, i32
  }
  func.func @transform_21(%arg0: i32) -> (i32, i32) {
    %c0_i32 = arith.constant 0 : i32
    %c0_i32_0 = arith.constant 0 : i32
    %c0_i32_1 = arith.constant 0 : i32
    return %c0_i32, %c0_i32_0 : i32, i32
  }
  func.func @transform_22(%arg0: i32) -> (i32, i32) {
    %c0_i32 = arith.constant 0 : i32
    %c0_i32_0 = arith.constant 0 : i32
    %c0_i32_1 = arith.constant 0 : i32
    return %c0_i32, %c0_i32_0 : i32, i32
  }
  func.func @transform_23(%arg0: i32) -> (i32, i32) {
    %c0_i32 = arith.constant 0 : i32
    %c0_i32_0 = arith.constant 0 : i32
    %c0_i32_1 = arith.constant 0 : i32
    return %c0_i32, %c0_i32_0 : i32, i32
  }
  func.func @transform_24(%arg0: i32) -> (i32, i32) {
    %c0_i32 = arith.constant 0 : i32
    %c0_i32_0 = arith.constant 0 : i32
    %c0_i32_1 = arith.constant 0 : i32
    return %c0_i32, %c0_i32_0 : i32, i32
  }
  func.func @transform_25(%arg0: i32) -> (i32, i32) {
    %c0_i32 = arith.constant 0 : i32
    %c0_i32_0 = arith.constant 0 : i32
    %c0_i32_1 = arith.constant 0 : i32
    return %c0_i32, %c0_i32_0 : i32, i32
  }
  func.func @transform_26(%arg0: i32) -> (i32, i32) {
    %c0_i32 = arith.constant 0 : i32
    %c0_i32_0 = arith.constant 0 : i32
    %c0_i32_1 = arith.constant 0 : i32
    return %c0_i32, %c0_i32_0 : i32, i32
  }
  func.func @transform_27(%arg0: i32) -> (i32, i32) {
    %c0_i32 = arith.constant 0 : i32
    %c0_i32_0 = arith.constant 0 : i32
    return %arg0, %c0_i32 : i32, i32
  }
}

module attributes {stable_mosaic.version = 11 : i64} {
  func.func @attn_pool_kernel(%arg0: i32, %arg1: memref<8x4x32xf32, #tpu.memory_space<vmem>>, %arg2: memref<8x4xf32, #tpu.memory_space<vmem>>, %arg3: memref<32x96xbf16, #tpu.memory_space<vmem>>, %arg4: memref<1x96xf32, #tpu.memory_space<vmem>>, %arg5: memref<32x32xbf16, #tpu.memory_space<vmem>>, %arg6: memref<1x32xf32, #tpu.memory_space<vmem>>, %arg7: memref<1x32xf32, #tpu.memory_space<vmem>>, %arg8: memref<1x32xf32, #tpu.memory_space<vmem>>, %arg9: memref<32x2048xbf16, #tpu.memory_space<vmem>>, %arg10: memref<1x2048xf32, #tpu.memory_space<vmem>>, %arg11: memref<2048x32xbf16, #tpu.memory_space<vmem>>, %arg12: memref<1x32xf32, #tpu.memory_space<vmem>>, %arg13: memref<1x32xf32, #tpu.memory_space<vmem>>, %arg14: memref<1x32xf32, #tpu.memory_space<vmem>>, %arg15: memref<8x32xf32, #tpu.memory_space<vmem>>) attributes {dimension_semantics = [#tpu.dimension_semantics<parallel>], iteration_bounds = array<i64: 1>, scalar_prefetch = 0 : i64, scratch_operands = 0 : i64, tpu.core_type = #tpu.core_type<tc>, window_params = [{transform_indices = @transform_0, window_bounds = array<i64: 8, 4, 32>}, {transform_indices = @transform_1, window_bounds = array<i64: 8, 4>}, {pipeline_mode = #tpu.pipeline_mode<synchronous>, transform_indices = @transform_2, window_bounds = array<i64: 32, 96>}, {pipeline_mode = #tpu.pipeline_mode<synchronous>, transform_indices = @transform_3, window_bounds = array<i64: 1, 96>}, {pipeline_mode = #tpu.pipeline_mode<synchronous>, transform_indices = @transform_4, window_bounds = array<i64: 32, 32>}, {pipeline_mode = #tpu.pipeline_mode<synchronous>, transform_indices = @transform_5, window_bounds = array<i64: 1, 32>}, {pipeline_mode = #tpu.pipeline_mode<synchronous>, transform_indices = @transform_6, window_bounds = array<i64: 1, 32>}, {pipeline_mode = #tpu.pipeline_mode<synchronous>, transform_indices = @transform_7, window_bounds = array<i64: 1, 32>}, {pipeline_mode = #tpu.pipeline_mode<synchronous>, transform_indices = @transform_8, window_bounds = array<i64: 32, 2048>}, {pipeline_mode = #tpu.pipeline_mode<synchronous>, transform_indices = @transform_9, window_bounds = array<i64: 1, 2048>}, {pipeline_mode = #tpu.pipeline_mode<synchronous>, transform_indices = @transform_10, window_bounds = array<i64: 2048, 32>}, {pipeline_mode = #tpu.pipeline_mode<synchronous>, transform_indices = @transform_11, window_bounds = array<i64: 1, 32>}, {pipeline_mode = #tpu.pipeline_mode<synchronous>, transform_indices = @transform_12, window_bounds = array<i64: 1, 32>}, {pipeline_mode = #tpu.pipeline_mode<synchronous>, transform_indices = @transform_13, window_bounds = array<i64: 1, 32>}, {transform_indices = @transform_14, window_bounds = array<i64: 8, 32>}]} {
    %c0 = arith.constant 0 : index
    %c0_0 = arith.constant 0 : index
    %c0_1 = arith.constant 0 : index
    %0 = vector.load %arg1[%c0, %c0_0, %c0_1] : memref<8x4x32xf32, #tpu.memory_space<vmem>>, vector<8x4x32xf32>
    %1 = vector.shape_cast %0 : vector<8x4x32xf32> to vector<32x32xf32>
    %2 = arith.truncf %1 : vector<32x32xf32> to vector<32x32xbf16>
    %c0_2 = arith.constant 0 : index
    %c0_3 = arith.constant 0 : index
    %3 = vector.load %arg3[%c0_2, %c0_3] : memref<32x96xbf16, #tpu.memory_space<vmem>>, vector<32x96xbf16>
    %cst = arith.constant dense<0.000000e+00> : vector<32x96xf32>
    %4 = tpu.matmul %2, %3, %cst {dimension_numbers = #tpu.dot_dimension_numbers<[1], [0], [0], [1], [0, 0, 1, 1], [], []>} : vector<32x32xbf16>, vector<32x96xbf16>, vector<32x96xf32> -> vector<32x96xf32>
    %c0_4 = arith.constant 0 : index
    %c0_5 = arith.constant 0 : index
    %5 = vector.load %arg4[%c0_4, %c0_5] : memref<1x96xf32, #tpu.memory_space<vmem>>, vector<1x96xf32>
    %6 = vector.broadcast %5 : vector<1x96xf32> to vector<32x96xf32>
    %7 = arith.addf %4, %6 : vector<32x96xf32>
    %c0_6 = arith.constant 0 : index
    %c0_7 = arith.constant 0 : index
    %8 = vector.load %arg2[%c0_6, %c0_7] : memref<8x4xf32, #tpu.memory_space<vmem>>, vector<8x4xf32>
    %cst_8 = arith.constant -1.000000e+30 : f32
    %9 = vector.broadcast %cst_8 : f32 to vector<8x4xf32>
    %10 = arith.mulf %8, %9 : vector<8x4xf32>
    %11 = vector.shape_cast %10 : vector<8x4xf32> to vector<8x1x4xf32>
    %12 = vector.extract_strided_slice %7 {offsets = [0, 0], sizes = [32, 8], strides = [1, 1]} : vector<32x96xf32> to vector<32x8xf32>
    %13 = vector.shape_cast %12 : vector<32x8xf32> to vector<8x4x8xf32>
    %14 = arith.truncf %13 : vector<8x4x8xf32> to vector<8x4x8xbf16>
    %15 = vector.extract_strided_slice %7 {offsets = [0, 32], sizes = [32, 8], strides = [1, 1]} : vector<32x96xf32> to vector<32x8xf32>
    %16 = vector.shape_cast %15 : vector<32x8xf32> to vector<8x4x8xf32>
    %17 = arith.truncf %16 : vector<8x4x8xf32> to vector<8x4x8xbf16>
    %18 = vector.extract_strided_slice %7 {offsets = [0, 64], sizes = [32, 8], strides = [1, 1]} : vector<32x96xf32> to vector<32x8xf32>
    %19 = vector.shape_cast %18 : vector<32x8xf32> to vector<8x4x8xf32>
    %20 = arith.truncf %19 : vector<8x4x8xf32> to vector<8x4x8xbf16>
    "tpu.trace_start"() <{level = 10 : i32, message = "rqd,rkd->rqk"}> : () -> ()
    %cst_9 = arith.constant dense<0.000000e+00> : vector<8x4x4xf32>
    %21 = tpu.matmul %14, %17, %cst_9 {dimension_numbers = #tpu.dot_dimension_numbers<[2], [2], [1], [1], [0, 0, 0, 1, 1, 1], [0], [0]>} : vector<8x4x8xbf16>, vector<8x4x8xbf16>, vector<8x4x4xf32> -> vector<8x4x4xf32>
    "tpu.trace_stop"() : () -> ()
    %cst_10 = arith.constant 0.353553385 : f32
    %22 = vector.broadcast %cst_10 : f32 to vector<8x4x4xf32>
    %23 = arith.mulf %21, %22 : vector<8x4x4xf32>
    %24 = vector.broadcast %11 : vector<8x1x4xf32> to vector<8x4x4xf32>
    %25 = arith.addf %23, %24 : vector<8x4x4xf32>
    %cst_11 = arith.constant dense<0xFF800000> : vector<8x4xf32>
    %26 = vector.multi_reduction <maximumf>, %25, %cst_11 [2] : vector<8x4x4xf32> to vector<8x4xf32>
    %27 = vector.shape_cast %26 : vector<8x4xf32> to vector<8x4x1xf32>
    %28 = vector.broadcast %27 : vector<8x4x1xf32> to vector<8x4x4xf32>
    %29 = arith.subf %25, %28 : vector<8x4x4xf32>
    %30 = math.exp %29 : vector<8x4x4xf32>
    %cst_12 = arith.constant dense<0.000000e+00> : vector<8x4xf32>
    %31 = vector.multi_reduction <add>, %30, %cst_12 [2] : vector<8x4x4xf32> to vector<8x4xf32>
    %32 = vector.shape_cast %31 : vector<8x4xf32> to vector<8x4x1xf32>
    %33 = vector.broadcast %32 : vector<8x4x1xf32> to vector<8x4x4xf32>
    %34 = arith.divf %30, %33 : vector<8x4x4xf32>
    %35 = arith.truncf %34 : vector<8x4x4xf32> to vector<8x4x4xbf16>
    "tpu.trace_start"() <{level = 10 : i32, message = "rqk,rkd->rqd"}> : () -> ()
    %cst_13 = arith.constant dense<0.000000e+00> : vector<8x4x8xf32>
    %36 = tpu.matmul %35, %20, %cst_13 {dimension_numbers = #tpu.dot_dimension_numbers<[2], [1], [1], [2], [0, 0, 0, 1, 1, 2], [0], [0]>} : vector<8x4x4xbf16>, vector<8x4x8xbf16>, vector<8x4x8xf32> -> vector<8x4x8xf32>
    "tpu.trace_stop"() : () -> ()
    %37 = vector.extract_strided_slice %7 {offsets = [0, 8], sizes = [32, 8], strides = [1, 1]} : vector<32x96xf32> to vector<32x8xf32>
    %38 = vector.shape_cast %37 : vector<32x8xf32> to vector<8x4x8xf32>
    %39 = arith.truncf %38 : vector<8x4x8xf32> to vector<8x4x8xbf16>
    %40 = vector.extract_strided_slice %7 {offsets = [0, 40], sizes = [32, 8], strides = [1, 1]} : vector<32x96xf32> to vector<32x8xf32>
    %41 = vector.shape_cast %40 : vector<32x8xf32> to vector<8x4x8xf32>
    %42 = arith.truncf %41 : vector<8x4x8xf32> to vector<8x4x8xbf16>
    %43 = vector.extract_strided_slice %7 {offsets = [0, 72], sizes = [32, 8], strides = [1, 1]} : vector<32x96xf32> to vector<32x8xf32>
    %44 = vector.shape_cast %43 : vector<32x8xf32> to vector<8x4x8xf32>
    %45 = arith.truncf %44 : vector<8x4x8xf32> to vector<8x4x8xbf16>
    "tpu.trace_start"() <{level = 10 : i32, message = "rqd,rkd->rqk"}> : () -> ()
    %cst_14 = arith.constant dense<0.000000e+00> : vector<8x4x4xf32>
    %46 = tpu.matmul %39, %42, %cst_14 {dimension_numbers = #tpu.dot_dimension_numbers<[2], [2], [1], [1], [0, 0, 0, 1, 1, 1], [0], [0]>} : vector<8x4x8xbf16>, vector<8x4x8xbf16>, vector<8x4x4xf32> -> vector<8x4x4xf32>
    "tpu.trace_stop"() : () -> ()
    %cst_15 = arith.constant 0.353553385 : f32
    %47 = vector.broadcast %cst_15 : f32 to vector<8x4x4xf32>
    %48 = arith.mulf %46, %47 : vector<8x4x4xf32>
    %49 = vector.broadcast %11 : vector<8x1x4xf32> to vector<8x4x4xf32>
    %50 = arith.addf %48, %49 : vector<8x4x4xf32>
    %cst_16 = arith.constant dense<0xFF800000> : vector<8x4xf32>
    %51 = vector.multi_reduction <maximumf>, %50, %cst_16 [2] : vector<8x4x4xf32> to vector<8x4xf32>
    %52 = vector.shape_cast %51 : vector<8x4xf32> to vector<8x4x1xf32>
    %53 = vector.broadcast %52 : vector<8x4x1xf32> to vector<8x4x4xf32>
    %54 = arith.subf %50, %53 : vector<8x4x4xf32>
    %55 = math.exp %54 : vector<8x4x4xf32>
    %cst_17 = arith.constant dense<0.000000e+00> : vector<8x4xf32>
    %56 = vector.multi_reduction <add>, %55, %cst_17 [2] : vector<8x4x4xf32> to vector<8x4xf32>
    %57 = vector.shape_cast %56 : vector<8x4xf32> to vector<8x4x1xf32>
    %58 = vector.broadcast %57 : vector<8x4x1xf32> to vector<8x4x4xf32>
    %59 = arith.divf %55, %58 : vector<8x4x4xf32>
    %60 = arith.truncf %59 : vector<8x4x4xf32> to vector<8x4x4xbf16>
    "tpu.trace_start"() <{level = 10 : i32, message = "rqk,rkd->rqd"}> : () -> ()
    %cst_18 = arith.constant dense<0.000000e+00> : vector<8x4x8xf32>
    %61 = tpu.matmul %60, %45, %cst_18 {dimension_numbers = #tpu.dot_dimension_numbers<[2], [1], [1], [2], [0, 0, 0, 1, 1, 2], [0], [0]>} : vector<8x4x4xbf16>, vector<8x4x8xbf16>, vector<8x4x8xf32> -> vector<8x4x8xf32>
    "tpu.trace_stop"() : () -> ()
    %62 = vector.extract_strided_slice %7 {offsets = [0, 16], sizes = [32, 8], strides = [1, 1]} : vector<32x96xf32> to vector<32x8xf32>
    %63 = vector.shape_cast %62 : vector<32x8xf32> to vector<8x4x8xf32>
    %64 = arith.truncf %63 : vector<8x4x8xf32> to vector<8x4x8xbf16>
    %65 = vector.extract_strided_slice %7 {offsets = [0, 48], sizes = [32, 8], strides = [1, 1]} : vector<32x96xf32> to vector<32x8xf32>
    %66 = vector.shape_cast %65 : vector<32x8xf32> to vector<8x4x8xf32>
    %67 = arith.truncf %66 : vector<8x4x8xf32> to vector<8x4x8xbf16>
    %68 = vector.extract_strided_slice %7 {offsets = [0, 80], sizes = [32, 8], strides = [1, 1]} : vector<32x96xf32> to vector<32x8xf32>
    %69 = vector.shape_cast %68 : vector<32x8xf32> to vector<8x4x8xf32>
    %70 = arith.truncf %69 : vector<8x4x8xf32> to vector<8x4x8xbf16>
    "tpu.trace_start"() <{level = 10 : i32, message = "rqd,rkd->rqk"}> : () -> ()
    %cst_19 = arith.constant dense<0.000000e+00> : vector<8x4x4xf32>
    %71 = tpu.matmul %64, %67, %cst_19 {dimension_numbers = #tpu.dot_dimension_numbers<[2], [2], [1], [1], [0, 0, 0, 1, 1, 1], [0], [0]>} : vector<8x4x8xbf16>, vector<8x4x8xbf16>, vector<8x4x4xf32> -> vector<8x4x4xf32>
    "tpu.trace_stop"() : () -> ()
    %cst_20 = arith.constant 0.353553385 : f32
    %72 = vector.broadcast %cst_20 : f32 to vector<8x4x4xf32>
    %73 = arith.mulf %71, %72 : vector<8x4x4xf32>
    %74 = vector.broadcast %11 : vector<8x1x4xf32> to vector<8x4x4xf32>
    %75 = arith.addf %73, %74 : vector<8x4x4xf32>
    %cst_21 = arith.constant dense<0xFF800000> : vector<8x4xf32>
    %76 = vector.multi_reduction <maximumf>, %75, %cst_21 [2] : vector<8x4x4xf32> to vector<8x4xf32>
    %77 = vector.shape_cast %76 : vector<8x4xf32> to vector<8x4x1xf32>
    %78 = vector.broadcast %77 : vector<8x4x1xf32> to vector<8x4x4xf32>
    %79 = arith.subf %75, %78 : vector<8x4x4xf32>
    %80 = math.exp %79 : vector<8x4x4xf32>
    %cst_22 = arith.constant dense<0.000000e+00> : vector<8x4xf32>
    %81 = vector.multi_reduction <add>, %80, %cst_22 [2] : vector<8x4x4xf32> to vector<8x4xf32>
    %82 = vector.shape_cast %81 : vector<8x4xf32> to vector<8x4x1xf32>
    %83 = vector.broadcast %82 : vector<8x4x1xf32> to vector<8x4x4xf32>
    %84 = arith.divf %80, %83 : vector<8x4x4xf32>
    %85 = arith.truncf %84 : vector<8x4x4xf32> to vector<8x4x4xbf16>
    "tpu.trace_start"() <{level = 10 : i32, message = "rqk,rkd->rqd"}> : () -> ()
    %cst_23 = arith.constant dense<0.000000e+00> : vector<8x4x8xf32>
    %86 = tpu.matmul %85, %70, %cst_23 {dimension_numbers = #tpu.dot_dimension_numbers<[2], [1], [1], [2], [0, 0, 0, 1, 1, 2], [0], [0]>} : vector<8x4x4xbf16>, vector<8x4x8xbf16>, vector<8x4x8xf32> -> vector<8x4x8xf32>
    "tpu.trace_stop"() : () -> ()
    %87 = vector.extract_strided_slice %7 {offsets = [0, 24], sizes = [32, 8], strides = [1, 1]} : vector<32x96xf32> to vector<32x8xf32>
    %88 = vector.shape_cast %87 : vector<32x8xf32> to vector<8x4x8xf32>
    %89 = arith.truncf %88 : vector<8x4x8xf32> to vector<8x4x8xbf16>
    %90 = vector.extract_strided_slice %7 {offsets = [0, 56], sizes = [32, 8], strides = [1, 1]} : vector<32x96xf32> to vector<32x8xf32>
    %91 = vector.shape_cast %90 : vector<32x8xf32> to vector<8x4x8xf32>
    %92 = arith.truncf %91 : vector<8x4x8xf32> to vector<8x4x8xbf16>
    %93 = vector.extract_strided_slice %7 {offsets = [0, 88], sizes = [32, 8], strides = [1, 1]} : vector<32x96xf32> to vector<32x8xf32>
    %94 = vector.shape_cast %93 : vector<32x8xf32> to vector<8x4x8xf32>
    %95 = arith.truncf %94 : vector<8x4x8xf32> to vector<8x4x8xbf16>
    "tpu.trace_start"() <{level = 10 : i32, message = "rqd,rkd->rqk"}> : () -> ()
    %cst_24 = arith.constant dense<0.000000e+00> : vector<8x4x4xf32>
    %96 = tpu.matmul %89, %92, %cst_24 {dimension_numbers = #tpu.dot_dimension_numbers<[2], [2], [1], [1], [0, 0, 0, 1, 1, 1], [0], [0]>} : vector<8x4x8xbf16>, vector<8x4x8xbf16>, vector<8x4x4xf32> -> vector<8x4x4xf32>
    "tpu.trace_stop"() : () -> ()
    %cst_25 = arith.constant 0.353553385 : f32
    %97 = vector.broadcast %cst_25 : f32 to vector<8x4x4xf32>
    %98 = arith.mulf %96, %97 : vector<8x4x4xf32>
    %99 = vector.broadcast %11 : vector<8x1x4xf32> to vector<8x4x4xf32>
    %100 = arith.addf %98, %99 : vector<8x4x4xf32>
    %cst_26 = arith.constant dense<0xFF800000> : vector<8x4xf32>
    %101 = vector.multi_reduction <maximumf>, %100, %cst_26 [2] : vector<8x4x4xf32> to vector<8x4xf32>
    %102 = vector.shape_cast %101 : vector<8x4xf32> to vector<8x4x1xf32>
    %103 = vector.broadcast %102 : vector<8x4x1xf32> to vector<8x4x4xf32>
    %104 = arith.subf %100, %103 : vector<8x4x4xf32>
    %105 = math.exp %104 : vector<8x4x4xf32>
    %cst_27 = arith.constant dense<0.000000e+00> : vector<8x4xf32>
    %106 = vector.multi_reduction <add>, %105, %cst_27 [2] : vector<8x4x4xf32> to vector<8x4xf32>
    %107 = vector.shape_cast %106 : vector<8x4xf32> to vector<8x4x1xf32>
    %108 = vector.broadcast %107 : vector<8x4x1xf32> to vector<8x4x4xf32>
    %109 = arith.divf %105, %108 : vector<8x4x4xf32>
    %110 = arith.truncf %109 : vector<8x4x4xf32> to vector<8x4x4xbf16>
    "tpu.trace_start"() <{level = 10 : i32, message = "rqk,rkd->rqd"}> : () -> ()
    %cst_28 = arith.constant dense<0.000000e+00> : vector<8x4x8xf32>
    %111 = tpu.matmul %110, %95, %cst_28 {dimension_numbers = #tpu.dot_dimension_numbers<[2], [1], [1], [2], [0, 0, 0, 1, 1, 2], [0], [0]>} : vector<8x4x4xbf16>, vector<8x4x8xbf16>, vector<8x4x8xf32> -> vector<8x4x8xf32>
    "tpu.trace_stop"() : () -> ()
    %112 = tpu.concatenate %36, %61, %86, %111 in 2 : vector<8x4x8xf32>, vector<8x4x8xf32>, vector<8x4x8xf32>, vector<8x4x8xf32> -> vector<8x4x32xf32>
    %113 = vector.shape_cast %112 : vector<8x4x32xf32> to vector<32x32xf32>
    %114 = arith.truncf %113 : vector<32x32xf32> to vector<32x32xbf16>
    %c0_29 = arith.constant 0 : index
    %c0_30 = arith.constant 0 : index
    %115 = vector.load %arg5[%c0_29, %c0_30] : memref<32x32xbf16, #tpu.memory_space<vmem>>, vector<32x32xbf16>
    %cst_31 = arith.constant dense<0.000000e+00> : vector<32x32xf32>
    %116 = tpu.matmul %114, %115, %cst_31 {dimension_numbers = #tpu.dot_dimension_numbers<[1], [0], [0], [1], [0, 0, 1, 1], [], []>} : vector<32x32xbf16>, vector<32x32xbf16>, vector<32x32xf32> -> vector<32x32xf32>
    %c0_32 = arith.constant 0 : index
    %c0_33 = arith.constant 0 : index
    %117 = vector.load %arg6[%c0_32, %c0_33] : memref<1x32xf32, #tpu.memory_space<vmem>>, vector<1x32xf32>
    %118 = vector.broadcast %117 : vector<1x32xf32> to vector<32x32xf32>
    %119 = arith.addf %116, %118 : vector<32x32xf32>
    %120 = arith.addf %1, %119 : vector<32x32xf32>
    %c0_34 = arith.constant 0 : index
    %c0_35 = arith.constant 0 : index
    %121 = vector.load %arg7[%c0_34, %c0_35] : memref<1x32xf32, #tpu.memory_space<vmem>>, vector<1x32xf32>
    %c0_36 = arith.constant 0 : index
    %c0_37 = arith.constant 0 : index
    %122 = vector.load %arg8[%c0_36, %c0_37] : memref<1x32xf32, #tpu.memory_space<vmem>>, vector<1x32xf32>
    %cst_38 = arith.constant dense<0.000000e+00> : vector<32xf32>
    %123 = vector.multi_reduction <add>, %120, %cst_38 [1] : vector<32x32xf32> to vector<32xf32>
    %124 = vector.shape_cast %123 : vector<32xf32> to vector<32x1xf32>
    %cst_39 = arith.constant 3.200000e+01 : f32
    %125 = vector.broadcast %cst_39 : f32 to vector<32x1xf32>
    %126 = arith.divf %124, %125 : vector<32x1xf32>
    %127 = vector.broadcast %126 : vector<32x1xf32> to vector<32x32xf32>
    %128 = arith.subf %120, %127 : vector<32x32xf32>
    %129 = arith.mulf %128, %128 : vector<32x32xf32>
    %cst_40 = arith.constant dense<0.000000e+00> : vector<32xf32>
    %130 = vector.multi_reduction <add>, %129, %cst_40 [1] : vector<32x32xf32> to vector<32xf32>
    %131 = vector.shape_cast %130 : vector<32xf32> to vector<32x1xf32>
    %cst_41 = arith.constant 3.200000e+01 : f32
    %132 = vector.broadcast %cst_41 : f32 to vector<32x1xf32>
    %133 = arith.divf %131, %132 : vector<32x1xf32>
    %134 = vector.broadcast %126 : vector<32x1xf32> to vector<32x32xf32>
    %135 = arith.subf %120, %134 : vector<32x32xf32>
    %cst_42 = arith.constant 9.99999974E-6 : f32
    %136 = vector.broadcast %cst_42 : f32 to vector<32x1xf32>
    %137 = arith.addf %133, %136 : vector<32x1xf32>
    %138 = math.rsqrt %137 : vector<32x1xf32>
    %139 = vector.broadcast %138 : vector<32x1xf32> to vector<32x32xf32>
    %140 = arith.mulf %135, %139 : vector<32x32xf32>
    %141 = vector.broadcast %121 : vector<1x32xf32> to vector<32x32xf32>
    %142 = arith.mulf %140, %141 : vector<32x32xf32>
    %143 = vector.broadcast %122 : vector<1x32xf32> to vector<32x32xf32>
    %144 = arith.addf %142, %143 : vector<32x32xf32>
    %145 = arith.truncf %144 : vector<32x32xf32> to vector<32x32xbf16>
    %c0_43 = arith.constant 0 : index
    %c0_44 = arith.constant 0 : index
    %146 = vector.load %arg9[%c0_43, %c0_44] : memref<32x2048xbf16, #tpu.memory_space<vmem>>, vector<32x2048xbf16>
    %cst_45 = arith.constant dense<0.000000e+00> : vector<32x2048xf32>
    %147 = tpu.matmul %145, %146, %cst_45 {dimension_numbers = #tpu.dot_dimension_numbers<[1], [0], [0], [1], [0, 0, 1, 1], [], []>} : vector<32x32xbf16>, vector<32x2048xbf16>, vector<32x2048xf32> -> vector<32x2048xf32>
    %c0_46 = arith.constant 0 : index
    %c0_47 = arith.constant 0 : index
    %148 = vector.load %arg10[%c0_46, %c0_47] : memref<1x2048xf32, #tpu.memory_space<vmem>>, vector<1x2048xf32>
    %149 = vector.broadcast %148 : vector<1x2048xf32> to vector<32x2048xf32>
    %150 = arith.addf %147, %149 : vector<32x2048xf32>
    %cst_48 = arith.constant 0.000000e+00 : f32
    %151 = vector.broadcast %cst_48 : f32 to vector<32x2048xf32>
    %152 = arith.maximumf %150, %151 : vector<32x2048xf32>
    %153 = arith.truncf %152 : vector<32x2048xf32> to vector<32x2048xbf16>
    %c0_49 = arith.constant 0 : index
    %c0_50 = arith.constant 0 : index
    %154 = vector.load %arg11[%c0_49, %c0_50] : memref<2048x32xbf16, #tpu.memory_space<vmem>>, vector<2048x32xbf16>
    %cst_51 = arith.constant dense<0.000000e+00> : vector<32x32xf32>
    %155 = tpu.matmul %153, %154, %cst_51 {dimension_numbers = #tpu.dot_dimension_numbers<[1], [0], [0], [1], [0, 0, 1, 1], [], []>} : vector<32x2048xbf16>, vector<2048x32xbf16>, vector<32x32xf32> -> vector<32x32xf32>
    %c0_52 = arith.constant 0 : index
    %c0_53 = arith.constant 0 : index
    %156 = vector.load %arg12[%c0_52, %c0_53] : memref<1x32xf32, #tpu.memory_space<vmem>>, vector<1x32xf32>
    %157 = vector.broadcast %156 : vector<1x32xf32> to vector<32x32xf32>
    %158 = arith.addf %155, %157 : vector<32x32xf32>
    %159 = arith.addf %144, %158 : vector<32x32xf32>
    %c0_54 = arith.constant 0 : index
    %c0_55 = arith.constant 0 : index
    %160 = vector.load %arg13[%c0_54, %c0_55] : memref<1x32xf32, #tpu.memory_space<vmem>>, vector<1x32xf32>
    %c0_56 = arith.constant 0 : index
    %c0_57 = arith.constant 0 : index
    %161 = vector.load %arg14[%c0_56, %c0_57] : memref<1x32xf32, #tpu.memory_space<vmem>>, vector<1x32xf32>
    %cst_58 = arith.constant dense<0.000000e+00> : vector<32xf32>
    %162 = vector.multi_reduction <add>, %159, %cst_58 [1] : vector<32x32xf32> to vector<32xf32>
    %163 = vector.shape_cast %162 : vector<32xf32> to vector<32x1xf32>
    %cst_59 = arith.constant 3.200000e+01 : f32
    %164 = vector.broadcast %cst_59 : f32 to vector<32x1xf32>
    %165 = arith.divf %163, %164 : vector<32x1xf32>
    %166 = vector.broadcast %165 : vector<32x1xf32> to vector<32x32xf32>
    %167 = arith.subf %159, %166 : vector<32x32xf32>
    %168 = arith.mulf %167, %167 : vector<32x32xf32>
    %cst_60 = arith.constant dense<0.000000e+00> : vector<32xf32>
    %169 = vector.multi_reduction <add>, %168, %cst_60 [1] : vector<32x32xf32> to vector<32xf32>
    %170 = vector.shape_cast %169 : vector<32xf32> to vector<32x1xf32>
    %cst_61 = arith.constant 3.200000e+01 : f32
    %171 = vector.broadcast %cst_61 : f32 to vector<32x1xf32>
    %172 = arith.divf %170, %171 : vector<32x1xf32>
    %173 = vector.broadcast %165 : vector<32x1xf32> to vector<32x32xf32>
    %174 = arith.subf %159, %173 : vector<32x32xf32>
    %cst_62 = arith.constant 9.99999974E-6 : f32
    %175 = vector.broadcast %cst_62 : f32 to vector<32x1xf32>
    %176 = arith.addf %172, %175 : vector<32x1xf32>
    %177 = math.rsqrt %176 : vector<32x1xf32>
    %178 = vector.broadcast %177 : vector<32x1xf32> to vector<32x32xf32>
    %179 = arith.mulf %174, %178 : vector<32x32xf32>
    %180 = vector.broadcast %160 : vector<1x32xf32> to vector<32x32xf32>
    %181 = arith.mulf %179, %180 : vector<32x32xf32>
    %182 = vector.broadcast %161 : vector<1x32xf32> to vector<32x32xf32>
    %183 = arith.addf %181, %182 : vector<32x32xf32>
    %184 = vector.shape_cast %183 : vector<32x32xf32> to vector<8x4x32xf32>
    %cst_63 = arith.constant 1.000000e+00 : f32
    %185 = vector.broadcast %cst_63 : f32 to vector<8x4xf32>
    %186 = arith.subf %185, %8 : vector<8x4xf32>
    %187 = vector.shape_cast %186 : vector<8x4xf32> to vector<8x4x1xf32>
    %188 = vector.broadcast %187 : vector<8x4x1xf32> to vector<8x4x32xf32>
    %189 = arith.mulf %184, %188 : vector<8x4x32xf32>
    %cst_64 = arith.constant dense<0.000000e+00> : vector<8x32xf32>
    %190 = vector.multi_reduction <add>, %189, %cst_64 [1] : vector<8x4x32xf32> to vector<8x32xf32>
    %cst_65 = arith.constant dense<0.000000e+00> : vector<8xf32>
    %191 = vector.multi_reduction <add>, %186, %cst_65 [1] : vector<8x4xf32> to vector<8xf32>
    %192 = vector.shape_cast %191 : vector<8xf32> to vector<8x1xf32>
    %cst_66 = arith.constant 1.000000e+00 : f32
    %193 = vector.broadcast %cst_66 : f32 to vector<8x1xf32>
    %194 = arith.maximumf %192, %193 : vector<8x1xf32>
    %195 = vector.broadcast %194 : vector<8x1xf32> to vector<8x32xf32>
    %196 = arith.divf %190, %195 : vector<8x32xf32>
    %c0_67 = arith.constant 0 : index
    %c0_68 = arith.constant 0 : index
    %197 = vector.load %arg15[%c0_67, %c0_68] : memref<8x32xf32, #tpu.memory_space<vmem>>, vector<8x32xf32>
    tpu.vector_store %arg15[%c0_67, %c0_68], %196 {strides = array<i32>} : memref<8x32xf32, #tpu.memory_space<vmem>>, vector<8x32xf32>,
    return
  }
  func.func @transform_0(%arg0: i32) -> (i32, i32, i32) {
    %c0_i32 = arith.constant 0 : i32
    %c0_i32_0 = arith.constant 0 : i32
    %c0_i32_1 = arith.constant 0 : i32
    return %arg0, %c0_i32, %c0_i32_0 : i32, i32, i32
  }
  func.func @transform_1(%arg0: i32) -> (i32, i32) {
    %c0_i32 = arith.constant 0 : i32
    %c0_i32_0 = arith.constant 0 : i32
    return %arg0, %c0_i32 : i32, i32
  }
  func.func @transform_2(%arg0: i32) -> (i32, i32) {
    %c0_i32 = arith.constant 0 : i32
    %c0_i32_0 = arith.constant 0 : i32
    %c0_i32_1 = arith.constant 0 : i32
    return %c0_i32, %c0_i32_0 : i32, i32
  }
  func.func @transform_3(%arg0: i32) -> (i32, i32) {
    %c0_i32 = arith.constant 0 : i32
    %c0_i32_0 = arith.constant 0 : i32
    %c0_i32_1 = arith.constant 0 : i32
    return %c0_i32, %c0_i32_0 : i32, i32
  }
  func.func @transform_4(%arg0: i32) -> (i32, i32) {
    %c0_i32 = arith.constant 0 : i32
    %c0_i32_0 = arith.constant 0 : i32
    %c0_i32_1 = arith.constant 0 : i32
    return %c0_i32, %c0_i32_0 : i32, i32
  }
  func.func @transform_5(%arg0: i32) -> (i32, i32) {
    %c0_i32 = arith.constant 0 : i32
    %c0_i32_0 = arith.constant 0 : i32
    %c0_i32_1 = arith.constant 0 : i32
    return %c0_i32, %c0_i32_0 : i32, i32
  }
  func.func @transform_6(%arg0: i32) -> (i32, i32) {
    %c0_i32 = arith.constant 0 : i32
    %c0_i32_0 = arith.constant 0 : i32
    %c0_i32_1 = arith.constant 0 : i32
    return %c0_i32, %c0_i32_0 : i32, i32
  }
  func.func @transform_7(%arg0: i32) -> (i32, i32) {
    %c0_i32 = arith.constant 0 : i32
    %c0_i32_0 = arith.constant 0 : i32
    %c0_i32_1 = arith.constant 0 : i32
    return %c0_i32, %c0_i32_0 : i32, i32
  }
  func.func @transform_8(%arg0: i32) -> (i32, i32) {
    %c0_i32 = arith.constant 0 : i32
    %c0_i32_0 = arith.constant 0 : i32
    %c0_i32_1 = arith.constant 0 : i32
    return %c0_i32, %c0_i32_0 : i32, i32
  }
  func.func @transform_9(%arg0: i32) -> (i32, i32) {
    %c0_i32 = arith.constant 0 : i32
    %c0_i32_0 = arith.constant 0 : i32
    %c0_i32_1 = arith.constant 0 : i32
    return %c0_i32, %c0_i32_0 : i32, i32
  }
  func.func @transform_10(%arg0: i32) -> (i32, i32) {
    %c0_i32 = arith.constant 0 : i32
    %c0_i32_0 = arith.constant 0 : i32
    %c0_i32_1 = arith.constant 0 : i32
    return %c0_i32, %c0_i32_0 : i32, i32
  }
  func.func @transform_11(%arg0: i32) -> (i32, i32) {
    %c0_i32 = arith.constant 0 : i32
    %c0_i32_0 = arith.constant 0 : i32
    %c0_i32_1 = arith.constant 0 : i32
    return %c0_i32, %c0_i32_0 : i32, i32
  }
  func.func @transform_12(%arg0: i32) -> (i32, i32) {
    %c0_i32 = arith.constant 0 : i32
    %c0_i32_0 = arith.constant 0 : i32
    %c0_i32_1 = arith.constant 0 : i32
    return %c0_i32, %c0_i32_0 : i32, i32
  }
  func.func @transform_13(%arg0: i32) -> (i32, i32) {
    %c0_i32 = arith.constant 0 : i32
    %c0_i32_0 = arith.constant 0 : i32
    %c0_i32_1 = arith.constant 0 : i32
    return %c0_i32, %c0_i32_0 : i32, i32
  }
  func.func @transform_14(%arg0: i32) -> (i32, i32) {
    %c0_i32 = arith.constant 0 : i32
    %c0_i32_0 = arith.constant 0 : i32
    return %arg0, %c0_i32 : i32, i32
  }
}

module attributes {stable_mosaic.version = 11 : i64} {
  func.func @bilstm_dir_kernel(%arg0: i32, %arg1: memref<2x4x8x16xf32, #tpu.memory_space<vmem>>, %arg2: memref<1x16x64xbf16, #tpu.memory_space<vmem>>, %arg3: memref<1x16x64xbf16, #tpu.memory_space<vmem>>, %arg4: memref<1x16x64xbf16, #tpu.memory_space<vmem>>, %arg5: memref<1x1x64xf32, #tpu.memory_space<vmem>>, %arg6: memref<1x4x8x16xf32, #tpu.memory_space<vmem>>, %arg7: memref<4x8x64xf32, #tpu.memory_space<vmem>>) attributes {dimension_semantics = [#tpu.dimension_semantics<parallel>], iteration_bounds = array<i64: 2>, scalar_prefetch = 0 : i64, scratch_operands = 1 : i64, tpu.core_type = #tpu.core_type<tc>, window_params = [{pipeline_mode = #tpu.pipeline_mode<synchronous>, transform_indices = @transform_0, window_bounds = array<i64: 2, 4, 8, 16>}, {transform_indices = @transform_1, window_bounds = array<i64: 1, 16, 64>}, {transform_indices = @transform_2, window_bounds = array<i64: 1, 16, 64>}, {transform_indices = @transform_3, window_bounds = array<i64: 1, 16, 64>}, {transform_indices = @transform_4, window_bounds = array<i64: 1, 1, 64>}, {transform_indices = @transform_5, window_bounds = array<i64: 1, 4, 8, 16>}]} {
    %c0 = arith.constant 0 : index
    %c0_0 = arith.constant 0 : index
    %c0_1 = arith.constant 0 : index
    %c0_2 = arith.constant 0 : index
    %0 = vector.load %arg1[%c0, %c0_0, %c0_1, %c0_2] : memref<2x4x8x16xf32, #tpu.memory_space<vmem>>, vector<1x4x8x16xf32>
    %1 = vector.shape_cast %0 : vector<1x4x8x16xf32> to vector<4x8x16xf32>
    %2 = vector.shape_cast %1 : vector<4x8x16xf32> to vector<32x16xf32>
    %c1 = arith.constant 1 : index
    %c0_3 = arith.constant 0 : index
    %c0_4 = arith.constant 0 : index
    %c0_5 = arith.constant 0 : index
    %3 = vector.load %arg1[%c1, %c0_3, %c0_4, %c0_5] : memref<2x4x8x16xf32, #tpu.memory_space<vmem>>, vector<1x4x8x16xf32>
    %4 = vector.shape_cast %3 : vector<1x4x8x16xf32> to vector<4x8x16xf32>
    %5 = vector.shape_cast %4 : vector<4x8x16xf32> to vector<32x16xf32>
    %6 = arith.truncf %2 : vector<32x16xf32> to vector<32x16xbf16>
    %c0_6 = arith.constant 0 : index
    %c0_7 = arith.constant 0 : index
    %c0_8 = arith.constant 0 : index
    %7 = vector.load %arg2[%c0_6, %c0_7, %c0_8] : memref<1x16x64xbf16, #tpu.memory_space<vmem>>, vector<1x16x64xbf16>
    %8 = vector.shape_cast %7 : vector<1x16x64xbf16> to vector<16x64xbf16>
    %cst = arith.constant dense<0.000000e+00> : vector<32x64xf32>
    %9 = tpu.matmul %6, %8, %cst {dimension_numbers = #tpu.dot_dimension_numbers<[1], [0], [0], [1], [0, 0, 1, 1], [], []>} : vector<32x16xbf16>, vector<16x64xbf16>, vector<32x64xf32> -> vector<32x64xf32>
    %10 = arith.truncf %5 : vector<32x16xf32> to vector<32x16xbf16>
    %c0_9 = arith.constant 0 : index
    %c0_10 = arith.constant 0 : index
    %c0_11 = arith.constant 0 : index
    %11 = vector.load %arg3[%c0_9, %c0_10, %c0_11] : memref<1x16x64xbf16, #tpu.memory_space<vmem>>, vector<1x16x64xbf16>
    %12 = vector.shape_cast %11 : vector<1x16x64xbf16> to vector<16x64xbf16>
    %cst_12 = arith.constant dense<0.000000e+00> : vector<32x64xf32>
    %13 = tpu.matmul %10, %12, %cst_12 {dimension_numbers = #tpu.dot_dimension_numbers<[1], [0], [0], [1], [0, 0, 1, 1], [], []>} : vector<32x16xbf16>, vector<16x64xbf16>, vector<32x64xf32> -> vector<32x64xf32>
    %14 = arith.addf %9, %13 : vector<32x64xf32>
    %c0_13 = arith.constant 0 : index
    %c0_14 = arith.constant 0 : index
    %c0_15 = arith.constant 0 : index
    %15 = vector.load %arg5[%c0_13, %c0_14, %c0_15] : memref<1x1x64xf32, #tpu.memory_space<vmem>>, vector<1x1x64xf32>
    %16 = vector.shape_cast %15 : vector<1x1x64xf32> to vector<1x64xf32>
    %17 = vector.broadcast %16 : vector<1x64xf32> to vector<32x64xf32>
    %18 = arith.addf %14, %17 : vector<32x64xf32>
    %19 = vector.shape_cast %18 : vector<32x64xf32> to vector<4x8x64xf32>
    %c0_16 = arith.constant 0 : index
    %c0_17 = arith.constant 0 : index
    %c0_18 = arith.constant 0 : index
    %20 = vector.load %arg7[%c0_16, %c0_17, %c0_18] : memref<4x8x64xf32, #tpu.memory_space<vmem>>, vector<4x8x64xf32>
    tpu.vector_store %arg7[%c0_16, %c0_17, %c0_18], %19 {strides = array<i32>} : memref<4x8x64xf32, #tpu.memory_space<vmem>>, vector<4x8x64xf32>,
    %c0_19 = arith.constant 0 : index
    %c0_20 = arith.constant 0 : index
    %c0_21 = arith.constant 0 : index
    %21 = vector.load %arg4[%c0_19, %c0_20, %c0_21] : memref<1x16x64xbf16, #tpu.memory_space<vmem>>, vector<1x16x64xbf16>
    %22 = vector.shape_cast %21 : vector<1x16x64xbf16> to vector<16x64xbf16>
    %cst_22 = arith.constant 0.000000e+00 : f32
    %23 = vector.broadcast %cst_22 : f32 to vector<8x16xf32>
    %c0_i32 = arith.constant 0 : i32
    %c0_i32_23 = arith.constant 0 : i32
    %24 = arith.cmpi eq, %arg0, %c0_i32_23 : i32
    %c3_i32 = arith.constant 3 : i32
    %25 = arith.subi %c3_i32, %c0_i32 : i32
    %26 = arith.select %24, %c0_i32, %25 : i32
    %27 = arith.index_cast %26 : i32 to index
    %c0_24 = arith.constant 0 : index
    %c0_25 = arith.constant 0 : index
    %28 = vector.load %arg7[%27, %c0_24, %c0_25] : memref<4x8x64xf32, #tpu.memory_space<vmem>>, vector<1x8x64xf32>
    %29 = vector.shape_cast %28 : vector<1x8x64xf32> to vector<8x64xf32>
    %30 = arith.truncf %23 : vector<8x16xf32> to vector<8x16xbf16>
    %cst_26 = arith.constant dense<0.000000e+00> : vector<8x64xf32>
    %31 = tpu.matmul %30, %22, %cst_26 {dimension_numbers = #tpu.dot_dimension_numbers<[1], [0], [0], [1], [0, 0, 1, 1], [], []>} : vector<8x16xbf16>, vector<16x64xbf16>, vector<8x64xf32> -> vector<8x64xf32>
    %32 = arith.addf %29, %31 : vector<8x64xf32>
    %33 = vector.extract_strided_slice %32 {offsets = [0, 0], sizes = [8, 16], strides = [1, 1]} : vector<8x64xf32> to vector<8x16xf32>
    %34 = arith.negf %33 : vector<8x16xf32>
    %35 = math.exp %34 : vector<8x16xf32>
    %cst_27 = arith.constant 1.000000e+00 : f32
    %36 = vector.broadcast %cst_27 : f32 to vector<8x16xf32>
    %37 = arith.addf %36, %35 : vector<8x16xf32>
    %38 = arith.divf %36, %37 : vector<8x16xf32>
    %39 = vector.extract_strided_slice %32 {offsets = [0, 16], sizes = [8, 16], strides = [1, 1]} : vector<8x64xf32> to vector<8x16xf32>
    %40 = arith.negf %39 : vector<8x16xf32>
    %41 = math.exp %40 : vector<8x16xf32>
    %cst_28 = arith.constant 1.000000e+00 : f32
    %42 = vector.broadcast %cst_28 : f32 to vector<8x16xf32>
    %43 = arith.addf %42, %41 : vector<8x16xf32>
    %44 = arith.divf %42, %43 : vector<8x16xf32>
    %45 = vector.extract_strided_slice %32 {offsets = [0, 32], sizes = [8, 16], strides = [1, 1]} : vector<8x64xf32> to vector<8x16xf32>
    %46 = math.tanh %45 : vector<8x16xf32>
    %47 = vector.extract_strided_slice %32 {offsets = [0, 48], sizes = [8, 16], strides = [1, 1]} : vector<8x64xf32> to vector<8x16xf32>
    %48 = arith.negf %47 : vector<8x16xf32>
    %49 = math.exp %48 : vector<8x16xf32>
    %cst_29 = arith.constant 1.000000e+00 : f32
    %50 = vector.broadcast %cst_29 : f32 to vector<8x16xf32>
    %51 = arith.addf %50, %49 : vector<8x16xf32>
    %52 = arith.divf %50, %51 : vector<8x16xf32>
    %53 = arith.mulf %44, %23 : vector<8x16xf32>
    %54 = arith.mulf %38, %46 : vector<8x16xf32>
    %55 = arith.addf %53, %54 : vector<8x16xf32>
    %56 = math.tanh %55 : vector<8x16xf32>
    %57 = arith.mulf %52, %56 : vector<8x16xf32>
    %c0_30 = arith.constant 0 : index
    %58 = arith.index_cast %26 : i32 to index
    %c0_31 = arith.constant 0 : index
    %c0_32 = arith.constant 0 : index
    %59 = vector.load %arg6[%c0_30, %58, %c0_31, %c0_32] : memref<1x4x8x16xf32, #tpu.memory_space<vmem>>, vector<1x1x8x16xf32>
    %60 = vector.shape_cast %59 : vector<1x1x8x16xf32> to vector<8x16xf32>
    %61 = vector.shape_cast %57 : vector<8x16xf32> to vector<1x1x8x16xf32>
    tpu.vector_store %arg6[%c0_30, %58, %c0_31, %c0_32], %61 {strides = array<i32>} : memref<1x4x8x16xf32, #tpu.memory_space<vmem>>, vector<1x1x8x16xf32>,
    %c1_i32 = arith.constant 1 : i32
    %c0_i32_33 = arith.constant 0 : i32
    %62 = arith.cmpi eq, %arg0, %c0_i32_33 : i32
    %c3_i32_34 = arith.constant 3 : i32
    %63 = arith.subi %c3_i32_34, %c1_i32 : i32
    %64 = arith.select %62, %c1_i32, %63 : i32
    %65 = arith.index_cast %64 : i32 to index
    %c0_35 = arith.constant 0 : index
    %c0_36 = arith.constant 0 : index
    %66 = vector.load %arg7[%65, %c0_35, %c0_36] : memref<4x8x64xf32, #tpu.memory_space<vmem>>, vector<1x8x64xf32>
    %67 = vector.shape_cast %66 : vector<1x8x64xf32> to vector<8x64xf32>
    %68 = arith.truncf %57 : vector<8x16xf32> to vector<8x16xbf16>
    %cst_37 = arith.constant dense<0.000000e+00> : vector<8x64xf32>
    %69 = tpu.matmul %68, %22, %cst_37 {dimension_numbers = #tpu.dot_dimension_numbers<[1], [0], [0], [1], [0, 0, 1, 1], [], []>} : vector<8x16xbf16>, vector<16x64xbf16>, vector<8x64xf32> -> vector<8x64xf32>
    %70 = arith.addf %67, %69 : vector<8x64xf32>
    %71 = vector.extract_strided_slice %70 {offsets = [0, 0], sizes = [8, 16], strides = [1, 1]} : vector<8x64xf32> to vector<8x16xf32>
    %72 = arith.negf %71 : vector<8x16xf32>
    %73 = math.exp %72 : vector<8x16xf32>
    %cst_38 = arith.constant 1.000000e+00 : f32
    %74 = vector.broadcast %cst_38 : f32 to vector<8x16xf32>
    %75 = arith.addf %74, %73 : vector<8x16xf32>
    %76 = arith.divf %74, %75 : vector<8x16xf32>
    %77 = vector.extract_strided_slice %70 {offsets = [0, 16], sizes = [8, 16], strides = [1, 1]} : vector<8x64xf32> to vector<8x16xf32>
    %78 = arith.negf %77 : vector<8x16xf32>
    %79 = math.exp %78 : vector<8x16xf32>
    %cst_39 = arith.constant 1.000000e+00 : f32
    %80 = vector.broadcast %cst_39 : f32 to vector<8x16xf32>
    %81 = arith.addf %80, %79 : vector<8x16xf32>
    %82 = arith.divf %80, %81 : vector<8x16xf32>
    %83 = vector.extract_strided_slice %70 {offsets = [0, 32], sizes = [8, 16], strides = [1, 1]} : vector<8x64xf32> to vector<8x16xf32>
    %84 = math.tanh %83 : vector<8x16xf32>
    %85 = vector.extract_strided_slice %70 {offsets = [0, 48], sizes = [8, 16], strides = [1, 1]} : vector<8x64xf32> to vector<8x16xf32>
    %86 = arith.negf %85 : vector<8x16xf32>
    %87 = math.exp %86 : vector<8x16xf32>
    %cst_40 = arith.constant 1.000000e+00 : f32
    %88 = vector.broadcast %cst_40 : f32 to vector<8x16xf32>
    %89 = arith.addf %88, %87 : vector<8x16xf32>
    %90 = arith.divf %88, %89 : vector<8x16xf32>
    %91 = arith.mulf %82, %55 : vector<8x16xf32>
    %92 = arith.mulf %76, %84 : vector<8x16xf32>
    %93 = arith.addf %91, %92 : vector<8x16xf32>
    %94 = math.tanh %93 : vector<8x16xf32>
    %95 = arith.mulf %90, %94 : vector<8x16xf32>
    %c0_41 = arith.constant 0 : index
    %96 = arith.index_cast %64 : i32 to index
    %c0_42 = arith.constant 0 : index
    %c0_43 = arith.constant 0 : index
    %97 = vector.load %arg6[%c0_41, %96, %c0_42, %c0_43] : memref<1x4x8x16xf32, #tpu.memory_space<vmem>>, vector<1x1x8x16xf32>
    %98 = vector.shape_cast %97 : vector<1x1x8x16xf32> to vector<8x16xf32>
    %99 = vector.shape_cast %95 : vector<8x16xf32> to vector<1x1x8x16xf32>
    tpu.vector_store %arg6[%c0_41, %96, %c0_42, %c0_43], %99 {strides = array<i32>} : memref<1x4x8x16xf32, #tpu.memory_space<vmem>>, vector<1x1x8x16xf32>,
    %c2_i32 = arith.constant 2 : i32
    %c0_i32_44 = arith.constant 0 : i32
    %100 = arith.cmpi eq, %arg0, %c0_i32_44 : i32
    %c3_i32_45 = arith.constant 3 : i32
    %101 = arith.subi %c3_i32_45, %c2_i32 : i32
    %102 = arith.select %100, %c2_i32, %101 : i32
    %103 = arith.index_cast %102 : i32 to index
    %c0_46 = arith.constant 0 : index
    %c0_47 = arith.constant 0 : index
    %104 = vector.load %arg7[%103, %c0_46, %c0_47] : memref<4x8x64xf32, #tpu.memory_space<vmem>>, vector<1x8x64xf32>
    %105 = vector.shape_cast %104 : vector<1x8x64xf32> to vector<8x64xf32>
    %106 = arith.truncf %95 : vector<8x16xf32> to vector<8x16xbf16>
    %cst_48 = arith.constant dense<0.000000e+00> : vector<8x64xf32>
    %107 = tpu.matmul %106, %22, %cst_48 {dimension_numbers = #tpu.dot_dimension_numbers<[1], [0], [0], [1], [0, 0, 1, 1], [], []>} : vector<8x16xbf16>, vector<16x64xbf16>, vector<8x64xf32> -> vector<8x64xf32>
    %108 = arith.addf %105, %107 : vector<8x64xf32>
    %109 = vector.extract_strided_slice %108 {offsets = [0, 0], sizes = [8, 16], strides = [1, 1]} : vector<8x64xf32> to vector<8x16xf32>
    %110 = arith.negf %109 : vector<8x16xf32>
    %111 = math.exp %110 : vector<8x16xf32>
    %cst_49 = arith.constant 1.000000e+00 : f32
    %112 = vector.broadcast %cst_49 : f32 to vector<8x16xf32>
    %113 = arith.addf %112, %111 : vector<8x16xf32>
    %114 = arith.divf %112, %113 : vector<8x16xf32>
    %115 = vector.extract_strided_slice %108 {offsets = [0, 16], sizes = [8, 16], strides = [1, 1]} : vector<8x64xf32> to vector<8x16xf32>
    %116 = arith.negf %115 : vector<8x16xf32>
    %117 = math.exp %116 : vector<8x16xf32>
    %cst_50 = arith.constant 1.000000e+00 : f32
    %118 = vector.broadcast %cst_50 : f32 to vector<8x16xf32>
    %119 = arith.addf %118, %117 : vector<8x16xf32>
    %120 = arith.divf %118, %119 : vector<8x16xf32>
    %121 = vector.extract_strided_slice %108 {offsets = [0, 32], sizes = [8, 16], strides = [1, 1]} : vector<8x64xf32> to vector<8x16xf32>
    %122 = math.tanh %121 : vector<8x16xf32>
    %123 = vector.extract_strided_slice %108 {offsets = [0, 48], sizes = [8, 16], strides = [1, 1]} : vector<8x64xf32> to vector<8x16xf32>
    %124 = arith.negf %123 : vector<8x16xf32>
    %125 = math.exp %124 : vector<8x16xf32>
    %cst_51 = arith.constant 1.000000e+00 : f32
    %126 = vector.broadcast %cst_51 : f32 to vector<8x16xf32>
    %127 = arith.addf %126, %125 : vector<8x16xf32>
    %128 = arith.divf %126, %127 : vector<8x16xf32>
    %129 = arith.mulf %120, %93 : vector<8x16xf32>
    %130 = arith.mulf %114, %122 : vector<8x16xf32>
    %131 = arith.addf %129, %130 : vector<8x16xf32>
    %132 = math.tanh %131 : vector<8x16xf32>
    %133 = arith.mulf %128, %132 : vector<8x16xf32>
    %c0_52 = arith.constant 0 : index
    %134 = arith.index_cast %102 : i32 to index
    %c0_53 = arith.constant 0 : index
    %c0_54 = arith.constant 0 : index
    %135 = vector.load %arg6[%c0_52, %134, %c0_53, %c0_54] : memref<1x4x8x16xf32, #tpu.memory_space<vmem>>, vector<1x1x8x16xf32>
    %136 = vector.shape_cast %135 : vector<1x1x8x16xf32> to vector<8x16xf32>
    %137 = vector.shape_cast %133 : vector<8x16xf32> to vector<1x1x8x16xf32>
    tpu.vector_store %arg6[%c0_52, %134, %c0_53, %c0_54], %137 {strides = array<i32>} : memref<1x4x8x16xf32, #tpu.memory_space<vmem>>, vector<1x1x8x16xf32>,
    %c3_i32_55 = arith.constant 3 : i32
    %c0_i32_56 = arith.constant 0 : i32
    %138 = arith.cmpi eq, %arg0, %c0_i32_56 : i32
    %c3_i32_57 = arith.constant 3 : i32
    %139 = arith.subi %c3_i32_57, %c3_i32_55 : i32
    %140 = arith.select %138, %c3_i32_55, %139 : i32
    %141 = arith.index_cast %140 : i32 to index
    %c0_58 = arith.constant 0 : index
    %c0_59 = arith.constant 0 : index
    %142 = vector.load %arg7[%141, %c0_58, %c0_59] : memref<4x8x64xf32, #tpu.memory_space<vmem>>, vector<1x8x64xf32>
    %143 = vector.shape_cast %142 : vector<1x8x64xf32> to vector<8x64xf32>
    %144 = arith.truncf %133 : vector<8x16xf32> to vector<8x16xbf16>
    %cst_60 = arith.constant dense<0.000000e+00> : vector<8x64xf32>
    %145 = tpu.matmul %144, %22, %cst_60 {dimension_numbers = #tpu.dot_dimension_numbers<[1], [0], [0], [1], [0, 0, 1, 1], [], []>} : vector<8x16xbf16>, vector<16x64xbf16>, vector<8x64xf32> -> vector<8x64xf32>
    %146 = arith.addf %143, %145 : vector<8x64xf32>
    %147 = vector.extract_strided_slice %146 {offsets = [0, 0], sizes = [8, 16], strides = [1, 1]} : vector<8x64xf32> to vector<8x16xf32>
    %148 = arith.negf %147 : vector<8x16xf32>
    %149 = math.exp %148 : vector<8x16xf32>
    %cst_61 = arith.constant 1.000000e+00 : f32
    %150 = vector.broadcast %cst_61 : f32 to vector<8x16xf32>
    %151 = arith.addf %150, %149 : vector<8x16xf32>
    %152 = arith.divf %150, %151 : vector<8x16xf32>
    %153 = vector.extract_strided_slice %146 {offsets = [0, 16], sizes = [8, 16], strides = [1, 1]} : vector<8x64xf32> to vector<8x16xf32>
    %154 = arith.negf %153 : vector<8x16xf32>
    %155 = math.exp %154 : vector<8x16xf32>
    %cst_62 = arith.constant 1.000000e+00 : f32
    %156 = vector.broadcast %cst_62 : f32 to vector<8x16xf32>
    %157 = arith.addf %156, %155 : vector<8x16xf32>
    %158 = arith.divf %156, %157 : vector<8x16xf32>
    %159 = vector.extract_strided_slice %146 {offsets = [0, 32], sizes = [8, 16], strides = [1, 1]} : vector<8x64xf32> to vector<8x16xf32>
    %160 = math.tanh %159 : vector<8x16xf32>
    %161 = vector.extract_strided_slice %146 {offsets = [0, 48], sizes = [8, 16], strides = [1, 1]} : vector<8x64xf32> to vector<8x16xf32>
    %162 = arith.negf %161 : vector<8x16xf32>
    %163 = math.exp %162 : vector<8x16xf32>
    %cst_63 = arith.constant 1.000000e+00 : f32
    %164 = vector.broadcast %cst_63 : f32 to vector<8x16xf32>
    %165 = arith.addf %164, %163 : vector<8x16xf32>
    %166 = arith.divf %164, %165 : vector<8x16xf32>
    %167 = arith.mulf %158, %131 : vector<8x16xf32>
    %168 = arith.mulf %152, %160 : vector<8x16xf32>
    %169 = arith.addf %167, %168 : vector<8x16xf32>
    %170 = math.tanh %169 : vector<8x16xf32>
    %171 = arith.mulf %166, %170 : vector<8x16xf32>
    %c0_64 = arith.constant 0 : index
    %172 = arith.index_cast %140 : i32 to index
    %c0_65 = arith.constant 0 : index
    %c0_66 = arith.constant 0 : index
    %173 = vector.load %arg6[%c0_64, %172, %c0_65, %c0_66] : memref<1x4x8x16xf32, #tpu.memory_space<vmem>>, vector<1x1x8x16xf32>
    %174 = vector.shape_cast %173 : vector<1x1x8x16xf32> to vector<8x16xf32>
    %175 = vector.shape_cast %171 : vector<8x16xf32> to vector<1x1x8x16xf32>
    tpu.vector_store %arg6[%c0_64, %172, %c0_65, %c0_66], %175 {strides = array<i32>} : memref<1x4x8x16xf32, #tpu.memory_space<vmem>>, vector<1x1x8x16xf32>,
    %c4_i32 = arith.constant 4 : i32
    return
  }
  func.func @transform_0(%arg0: i32) -> (i32, i32, i32, i32) {
    %c0_i32 = arith.constant 0 : i32
    %c0_i32_0 = arith.constant 0 : i32
    %c0_i32_1 = arith.constant 0 : i32
    %c0_i32_2 = arith.constant 0 : i32
    %c0_i32_3 = arith.constant 0 : i32
    return %c0_i32, %c0_i32_0, %c0_i32_1, %c0_i32_2 : i32, i32, i32, i32
  }
  func.func @transform_1(%arg0: i32) -> (i32, i32, i32) {
    %c0_i32 = arith.constant 0 : i32
    %c0_i32_0 = arith.constant 0 : i32
    %c0_i32_1 = arith.constant 0 : i32
    return %arg0, %c0_i32, %c0_i32_0 : i32, i32, i32
  }
  func.func @transform_2(%arg0: i32) -> (i32, i32, i32) {
    %c0_i32 = arith.constant 0 : i32
    %c0_i32_0 = arith.constant 0 : i32
    %c0_i32_1 = arith.constant 0 : i32
    return %arg0, %c0_i32, %c0_i32_0 : i32, i32, i32
  }
  func.func @transform_3(%arg0: i32) -> (i32, i32, i32) {
    %c0_i32 = arith.constant 0 : i32
    %c0_i32_0 = arith.constant 0 : i32
    %c0_i32_1 = arith.constant 0 : i32
    return %arg0, %c0_i32, %c0_i32_0 : i32, i32, i32
  }
  func.func @transform_4(%arg0: i32) -> (i32, i32, i32) {
    %c0_i32 = arith.constant 0 : i32
    %c0_i32_0 = arith.constant 0 : i32
    %c0_i32_1 = arith.constant 0 : i32
    return %arg0, %c0_i32, %c0_i32_0 : i32, i32, i32
  }
  func.func @transform_5(%arg0: i32) -> (i32, i32, i32, i32) {
    %c0_i32 = arith.constant 0 : i32
    %c0_i32_0 = arith.constant 0 : i32
    %c0_i32_1 = arith.constant 0 : i32
    %c0_i32_2 = arith.constant 0 : i32
    return %arg0, %c0_i32, %c0_i32_0, %c0_i32_1 : i32, i32, i32, i32
  }
}

module attributes {stable_mosaic.version = 11 : i64} {
  func.func @bilstm_dir_kernel(%arg0: i32, %arg1: memref<2x4x8x16xf32, #tpu.memory_space<vmem>>, %arg2: memref<1x16x64xbf16, #tpu.memory_space<vmem>>, %arg3: memref<1x16x64xbf16, #tpu.memory_space<vmem>>, %arg4: memref<1x16x64xbf16, #tpu.memory_space<vmem>>, %arg5: memref<1x1x64xf32, #tpu.memory_space<vmem>>, %arg6: memref<1x8x16xf32, #tpu.memory_space<vmem>>, %arg7: memref<4x8x64xf32, #tpu.memory_space<vmem>>) attributes {dimension_semantics = [#tpu.dimension_semantics<parallel>], iteration_bounds = array<i64: 2>, scalar_prefetch = 0 : i64, scratch_operands = 1 : i64, tpu.core_type = #tpu.core_type<tc>, window_params = [{pipeline_mode = #tpu.pipeline_mode<synchronous>, transform_indices = @transform_0, window_bounds = array<i64: 2, 4, 8, 16>}, {transform_indices = @transform_1, window_bounds = array<i64: 1, 16, 64>}, {transform_indices = @transform_2, window_bounds = array<i64: 1, 16, 64>}, {transform_indices = @transform_3, window_bounds = array<i64: 1, 16, 64>}, {transform_indices = @transform_4, window_bounds = array<i64: 1, 1, 64>}, {transform_indices = @transform_5, window_bounds = array<i64: 1, 8, 16>}]} {
    %c0 = arith.constant 0 : index
    %c0_0 = arith.constant 0 : index
    %c0_1 = arith.constant 0 : index
    %c0_2 = arith.constant 0 : index
    %0 = vector.load %arg1[%c0, %c0_0, %c0_1, %c0_2] : memref<2x4x8x16xf32, #tpu.memory_space<vmem>>, vector<1x4x8x16xf32>
    %1 = vector.shape_cast %0 : vector<1x4x8x16xf32> to vector<4x8x16xf32>
    %2 = vector.shape_cast %1 : vector<4x8x16xf32> to vector<32x16xf32>
    %c1 = arith.constant 1 : index
    %c0_3 = arith.constant 0 : index
    %c0_4 = arith.constant 0 : index
    %c0_5 = arith.constant 0 : index
    %3 = vector.load %arg1[%c1, %c0_3, %c0_4, %c0_5] : memref<2x4x8x16xf32, #tpu.memory_space<vmem>>, vector<1x4x8x16xf32>
    %4 = vector.shape_cast %3 : vector<1x4x8x16xf32> to vector<4x8x16xf32>
    %5 = vector.shape_cast %4 : vector<4x8x16xf32> to vector<32x16xf32>
    %6 = arith.truncf %2 : vector<32x16xf32> to vector<32x16xbf16>
    %c0_6 = arith.constant 0 : index
    %c0_7 = arith.constant 0 : index
    %c0_8 = arith.constant 0 : index
    %7 = vector.load %arg2[%c0_6, %c0_7, %c0_8] : memref<1x16x64xbf16, #tpu.memory_space<vmem>>, vector<1x16x64xbf16>
    %8 = vector.shape_cast %7 : vector<1x16x64xbf16> to vector<16x64xbf16>
    %cst = arith.constant dense<0.000000e+00> : vector<32x64xf32>
    %9 = tpu.matmul %6, %8, %cst {dimension_numbers = #tpu.dot_dimension_numbers<[1], [0], [0], [1], [0, 0, 1, 1], [], []>} : vector<32x16xbf16>, vector<16x64xbf16>, vector<32x64xf32> -> vector<32x64xf32>
    %10 = arith.truncf %5 : vector<32x16xf32> to vector<32x16xbf16>
    %c0_9 = arith.constant 0 : index
    %c0_10 = arith.constant 0 : index
    %c0_11 = arith.constant 0 : index
    %11 = vector.load %arg3[%c0_9, %c0_10, %c0_11] : memref<1x16x64xbf16, #tpu.memory_space<vmem>>, vector<1x16x64xbf16>
    %12 = vector.shape_cast %11 : vector<1x16x64xbf16> to vector<16x64xbf16>
    %cst_12 = arith.constant dense<0.000000e+00> : vector<32x64xf32>
    %13 = tpu.matmul %10, %12, %cst_12 {dimension_numbers = #tpu.dot_dimension_numbers<[1], [0], [0], [1], [0, 0, 1, 1], [], []>} : vector<32x16xbf16>, vector<16x64xbf16>, vector<32x64xf32> -> vector<32x64xf32>
    %14 = arith.addf %9, %13 : vector<32x64xf32>
    %c0_13 = arith.constant 0 : index
    %c0_14 = arith.constant 0 : index
    %c0_15 = arith.constant 0 : index
    %15 = vector.load %arg5[%c0_13, %c0_14, %c0_15] : memref<1x1x64xf32, #tpu.memory_space<vmem>>, vector<1x1x64xf32>
    %16 = vector.shape_cast %15 : vector<1x1x64xf32> to vector<1x64xf32>
    %17 = vector.broadcast %16 : vector<1x64xf32> to vector<32x64xf32>
    %18 = arith.addf %14, %17 : vector<32x64xf32>
    %19 = vector.shape_cast %18 : vector<32x64xf32> to vector<4x8x64xf32>
    %c0_16 = arith.constant 0 : index
    %c0_17 = arith.constant 0 : index
    %c0_18 = arith.constant 0 : index
    %20 = vector.load %arg7[%c0_16, %c0_17, %c0_18] : memref<4x8x64xf32, #tpu.memory_space<vmem>>, vector<4x8x64xf32>
    tpu.vector_store %arg7[%c0_16, %c0_17, %c0_18], %19 {strides = array<i32>} : memref<4x8x64xf32, #tpu.memory_space<vmem>>, vector<4x8x64xf32>,
    %c0_19 = arith.constant 0 : index
    %c0_20 = arith.constant 0 : index
    %c0_21 = arith.constant 0 : index
    %21 = vector.load %arg4[%c0_19, %c0_20, %c0_21] : memref<1x16x64xbf16, #tpu.memory_space<vmem>>, vector<1x16x64xbf16>
    %22 = vector.shape_cast %21 : vector<1x16x64xbf16> to vector<16x64xbf16>
    %cst_22 = arith.constant 0.000000e+00 : f32
    %23 = vector.broadcast %cst_22 : f32 to vector<8x16xf32>
    %c0_i32 = arith.constant 0 : i32
    %c0_i32_23 = arith.constant 0 : i32
    %24 = arith.cmpi eq, %arg0, %c0_i32_23 : i32
    %c3_i32 = arith.constant 3 : i32
    %25 = arith.subi %c3_i32, %c0_i32 : i32
    %26 = arith.select %24, %c0_i32, %25 : i32
    %27 = arith.index_cast %26 : i32 to index
    %c0_24 = arith.constant 0 : index
    %c0_25 = arith.constant 0 : index
    %28 = vector.load %arg7[%27, %c0_24, %c0_25] : memref<4x8x64xf32, #tpu.memory_space<vmem>>, vector<1x8x64xf32>
    %29 = vector.shape_cast %28 : vector<1x8x64xf32> to vector<8x64xf32>
    %30 = arith.truncf %23 : vector<8x16xf32> to vector<8x16xbf16>
    %cst_26 = arith.constant dense<0.000000e+00> : vector<8x64xf32>
    %31 = tpu.matmul %30, %22, %cst_26 {dimension_numbers = #tpu.dot_dimension_numbers<[1], [0], [0], [1], [0, 0, 1, 1], [], []>} : vector<8x16xbf16>, vector<16x64xbf16>, vector<8x64xf32> -> vector<8x64xf32>
    %32 = arith.addf %29, %31 : vector<8x64xf32>
    %33 = vector.extract_strided_slice %32 {offsets = [0, 0], sizes = [8, 16], strides = [1, 1]} : vector<8x64xf32> to vector<8x16xf32>
    %34 = arith.negf %33 : vector<8x16xf32>
    %35 = math.exp %34 : vector<8x16xf32>
    %cst_27 = arith.constant 1.000000e+00 : f32
    %36 = vector.broadcast %cst_27 : f32 to vector<8x16xf32>
    %37 = arith.addf %36, %35 : vector<8x16xf32>
    %38 = arith.divf %36, %37 : vector<8x16xf32>
    %39 = vector.extract_strided_slice %32 {offsets = [0, 16], sizes = [8, 16], strides = [1, 1]} : vector<8x64xf32> to vector<8x16xf32>
    %40 = arith.negf %39 : vector<8x16xf32>
    %41 = math.exp %40 : vector<8x16xf32>
    %cst_28 = arith.constant 1.000000e+00 : f32
    %42 = vector.broadcast %cst_28 : f32 to vector<8x16xf32>
    %43 = arith.addf %42, %41 : vector<8x16xf32>
    %44 = arith.divf %42, %43 : vector<8x16xf32>
    %45 = vector.extract_strided_slice %32 {offsets = [0, 32], sizes = [8, 16], strides = [1, 1]} : vector<8x64xf32> to vector<8x16xf32>
    %46 = math.tanh %45 : vector<8x16xf32>
    %47 = vector.extract_strided_slice %32 {offsets = [0, 48], sizes = [8, 16], strides = [1, 1]} : vector<8x64xf32> to vector<8x16xf32>
    %48 = arith.negf %47 : vector<8x16xf32>
    %49 = math.exp %48 : vector<8x16xf32>
    %cst_29 = arith.constant 1.000000e+00 : f32
    %50 = vector.broadcast %cst_29 : f32 to vector<8x16xf32>
    %51 = arith.addf %50, %49 : vector<8x16xf32>
    %52 = arith.divf %50, %51 : vector<8x16xf32>
    %53 = arith.mulf %44, %23 : vector<8x16xf32>
    %54 = arith.mulf %38, %46 : vector<8x16xf32>
    %55 = arith.addf %53, %54 : vector<8x16xf32>
    %56 = math.tanh %55 : vector<8x16xf32>
    %57 = arith.mulf %52, %56 : vector<8x16xf32>
    %58 = arith.addf %23, %57 : vector<8x16xf32>
    %c1_i32 = arith.constant 1 : i32
    %c0_i32_30 = arith.constant 0 : i32
    %59 = arith.cmpi eq, %arg0, %c0_i32_30 : i32
    %c3_i32_31 = arith.constant 3 : i32
    %60 = arith.subi %c3_i32_31, %c1_i32 : i32
    %61 = arith.select %59, %c1_i32, %60 : i32
    %62 = arith.index_cast %61 : i32 to index
    %c0_32 = arith.constant 0 : index
    %c0_33 = arith.constant 0 : index
    %63 = vector.load %arg7[%62, %c0_32, %c0_33] : memref<4x8x64xf32, #tpu.memory_space<vmem>>, vector<1x8x64xf32>
    %64 = vector.shape_cast %63 : vector<1x8x64xf32> to vector<8x64xf32>
    %65 = arith.truncf %57 : vector<8x16xf32> to vector<8x16xbf16>
    %cst_34 = arith.constant dense<0.000000e+00> : vector<8x64xf32>
    %66 = tpu.matmul %65, %22, %cst_34 {dimension_numbers = #tpu.dot_dimension_numbers<[1], [0], [0], [1], [0, 0, 1, 1], [], []>} : vector<8x16xbf16>, vector<16x64xbf16>, vector<8x64xf32> -> vector<8x64xf32>
    %67 = arith.addf %64, %66 : vector<8x64xf32>
    %68 = vector.extract_strided_slice %67 {offsets = [0, 0], sizes = [8, 16], strides = [1, 1]} : vector<8x64xf32> to vector<8x16xf32>
    %69 = arith.negf %68 : vector<8x16xf32>
    %70 = math.exp %69 : vector<8x16xf32>
    %cst_35 = arith.constant 1.000000e+00 : f32
    %71 = vector.broadcast %cst_35 : f32 to vector<8x16xf32>
    %72 = arith.addf %71, %70 : vector<8x16xf32>
    %73 = arith.divf %71, %72 : vector<8x16xf32>
    %74 = vector.extract_strided_slice %67 {offsets = [0, 16], sizes = [8, 16], strides = [1, 1]} : vector<8x64xf32> to vector<8x16xf32>
    %75 = arith.negf %74 : vector<8x16xf32>
    %76 = math.exp %75 : vector<8x16xf32>
    %cst_36 = arith.constant 1.000000e+00 : f32
    %77 = vector.broadcast %cst_36 : f32 to vector<8x16xf32>
    %78 = arith.addf %77, %76 : vector<8x16xf32>
    %79 = arith.divf %77, %78 : vector<8x16xf32>
    %80 = vector.extract_strided_slice %67 {offsets = [0, 32], sizes = [8, 16], strides = [1, 1]} : vector<8x64xf32> to vector<8x16xf32>
    %81 = math.tanh %80 : vector<8x16xf32>
    %82 = vector.extract_strided_slice %67 {offsets = [0, 48], sizes = [8, 16], strides = [1, 1]} : vector<8x64xf32> to vector<8x16xf32>
    %83 = arith.negf %82 : vector<8x16xf32>
    %84 = math.exp %83 : vector<8x16xf32>
    %cst_37 = arith.constant 1.000000e+00 : f32
    %85 = vector.broadcast %cst_37 : f32 to vector<8x16xf32>
    %86 = arith.addf %85, %84 : vector<8x16xf32>
    %87 = arith.divf %85, %86 : vector<8x16xf32>
    %88 = arith.mulf %79, %55 : vector<8x16xf32>
    %89 = arith.mulf %73, %81 : vector<8x16xf32>
    %90 = arith.addf %88, %89 : vector<8x16xf32>
    %91 = math.tanh %90 : vector<8x16xf32>
    %92 = arith.mulf %87, %91 : vector<8x16xf32>
    %93 = arith.addf %58, %92 : vector<8x16xf32>
    %c2_i32 = arith.constant 2 : i32
    %c0_i32_38 = arith.constant 0 : i32
    %94 = arith.cmpi eq, %arg0, %c0_i32_38 : i32
    %c3_i32_39 = arith.constant 3 : i32
    %95 = arith.subi %c3_i32_39, %c2_i32 : i32
    %96 = arith.select %94, %c2_i32, %95 : i32
    %97 = arith.index_cast %96 : i32 to index
    %c0_40 = arith.constant 0 : index
    %c0_41 = arith.constant 0 : index
    %98 = vector.load %arg7[%97, %c0_40, %c0_41] : memref<4x8x64xf32, #tpu.memory_space<vmem>>, vector<1x8x64xf32>
    %99 = vector.shape_cast %98 : vector<1x8x64xf32> to vector<8x64xf32>
    %100 = arith.truncf %92 : vector<8x16xf32> to vector<8x16xbf16>
    %cst_42 = arith.constant dense<0.000000e+00> : vector<8x64xf32>
    %101 = tpu.matmul %100, %22, %cst_42 {dimension_numbers = #tpu.dot_dimension_numbers<[1], [0], [0], [1], [0, 0, 1, 1], [], []>} : vector<8x16xbf16>, vector<16x64xbf16>, vector<8x64xf32> -> vector<8x64xf32>
    %102 = arith.addf %99, %101 : vector<8x64xf32>
    %103 = vector.extract_strided_slice %102 {offsets = [0, 0], sizes = [8, 16], strides = [1, 1]} : vector<8x64xf32> to vector<8x16xf32>
    %104 = arith.negf %103 : vector<8x16xf32>
    %105 = math.exp %104 : vector<8x16xf32>
    %cst_43 = arith.constant 1.000000e+00 : f32
    %106 = vector.broadcast %cst_43 : f32 to vector<8x16xf32>
    %107 = arith.addf %106, %105 : vector<8x16xf32>
    %108 = arith.divf %106, %107 : vector<8x16xf32>
    %109 = vector.extract_strided_slice %102 {offsets = [0, 16], sizes = [8, 16], strides = [1, 1]} : vector<8x64xf32> to vector<8x16xf32>
    %110 = arith.negf %109 : vector<8x16xf32>
    %111 = math.exp %110 : vector<8x16xf32>
    %cst_44 = arith.constant 1.000000e+00 : f32
    %112 = vector.broadcast %cst_44 : f32 to vector<8x16xf32>
    %113 = arith.addf %112, %111 : vector<8x16xf32>
    %114 = arith.divf %112, %113 : vector<8x16xf32>
    %115 = vector.extract_strided_slice %102 {offsets = [0, 32], sizes = [8, 16], strides = [1, 1]} : vector<8x64xf32> to vector<8x16xf32>
    %116 = math.tanh %115 : vector<8x16xf32>
    %117 = vector.extract_strided_slice %102 {offsets = [0, 48], sizes = [8, 16], strides = [1, 1]} : vector<8x64xf32> to vector<8x16xf32>
    %118 = arith.negf %117 : vector<8x16xf32>
    %119 = math.exp %118 : vector<8x16xf32>
    %cst_45 = arith.constant 1.000000e+00 : f32
    %120 = vector.broadcast %cst_45 : f32 to vector<8x16xf32>
    %121 = arith.addf %120, %119 : vector<8x16xf32>
    %122 = arith.divf %120, %121 : vector<8x16xf32>
    %123 = arith.mulf %114, %90 : vector<8x16xf32>
    %124 = arith.mulf %108, %116 : vector<8x16xf32>
    %125 = arith.addf %123, %124 : vector<8x16xf32>
    %126 = math.tanh %125 : vector<8x16xf32>
    %127 = arith.mulf %122, %126 : vector<8x16xf32>
    %128 = arith.addf %93, %127 : vector<8x16xf32>
    %c3_i32_46 = arith.constant 3 : i32
    %c0_i32_47 = arith.constant 0 : i32
    %129 = arith.cmpi eq, %arg0, %c0_i32_47 : i32
    %c3_i32_48 = arith.constant 3 : i32
    %130 = arith.subi %c3_i32_48, %c3_i32_46 : i32
    %131 = arith.select %129, %c3_i32_46, %130 : i32
    %132 = arith.index_cast %131 : i32 to index
    %c0_49 = arith.constant 0 : index
    %c0_50 = arith.constant 0 : index
    %133 = vector.load %arg7[%132, %c0_49, %c0_50] : memref<4x8x64xf32, #tpu.memory_space<vmem>>, vector<1x8x64xf32>
    %134 = vector.shape_cast %133 : vector<1x8x64xf32> to vector<8x64xf32>
    %135 = arith.truncf %127 : vector<8x16xf32> to vector<8x16xbf16>
    %cst_51 = arith.constant dense<0.000000e+00> : vector<8x64xf32>
    %136 = tpu.matmul %135, %22, %cst_51 {dimension_numbers = #tpu.dot_dimension_numbers<[1], [0], [0], [1], [0, 0, 1, 1], [], []>} : vector<8x16xbf16>, vector<16x64xbf16>, vector<8x64xf32> -> vector<8x64xf32>
    %137 = arith.addf %134, %136 : vector<8x64xf32>
    %138 = vector.extract_strided_slice %137 {offsets = [0, 0], sizes = [8, 16], strides = [1, 1]} : vector<8x64xf32> to vector<8x16xf32>
    %139 = arith.negf %138 : vector<8x16xf32>
    %140 = math.exp %139 : vector<8x16xf32>
    %cst_52 = arith.constant 1.000000e+00 : f32
    %141 = vector.broadcast %cst_52 : f32 to vector<8x16xf32>
    %142 = arith.addf %141, %140 : vector<8x16xf32>
    %143 = arith.divf %141, %142 : vector<8x16xf32>
    %144 = vector.extract_strided_slice %137 {offsets = [0, 16], sizes = [8, 16], strides = [1, 1]} : vector<8x64xf32> to vector<8x16xf32>
    %145 = arith.negf %144 : vector<8x16xf32>
    %146 = math.exp %145 : vector<8x16xf32>
    %cst_53 = arith.constant 1.000000e+00 : f32
    %147 = vector.broadcast %cst_53 : f32 to vector<8x16xf32>
    %148 = arith.addf %147, %146 : vector<8x16xf32>
    %149 = arith.divf %147, %148 : vector<8x16xf32>
    %150 = vector.extract_strided_slice %137 {offsets = [0, 32], sizes = [8, 16], strides = [1, 1]} : vector<8x64xf32> to vector<8x16xf32>
    %151 = math.tanh %150 : vector<8x16xf32>
    %152 = vector.extract_strided_slice %137 {offsets = [0, 48], sizes = [8, 16], strides = [1, 1]} : vector<8x64xf32> to vector<8x16xf32>
    %153 = arith.negf %152 : vector<8x16xf32>
    %154 = math.exp %153 : vector<8x16xf32>
    %cst_54 = arith.constant 1.000000e+00 : f32
    %155 = vector.broadcast %cst_54 : f32 to vector<8x16xf32>
    %156 = arith.addf %155, %154 : vector<8x16xf32>
    %157 = arith.divf %155, %156 : vector<8x16xf32>
    %158 = arith.mulf %149, %125 : vector<8x16xf32>
    %159 = arith.mulf %143, %151 : vector<8x16xf32>
    %160 = arith.addf %158, %159 : vector<8x16xf32>
    %161 = math.tanh %160 : vector<8x16xf32>
    %162 = arith.mulf %157, %161 : vector<8x16xf32>
    %163 = arith.addf %128, %162 : vector<8x16xf32>
    %c4_i32 = arith.constant 4 : i32
    %cst_55 = arith.constant 2.500000e-01 : f32
    %164 = vector.broadcast %cst_55 : f32 to vector<8x16xf32>
    %165 = arith.mulf %163, %164 : vector<8x16xf32>
    %c0_56 = arith.constant 0 : index
    %c0_57 = arith.constant 0 : index
    %c0_58 = arith.constant 0 : index
    %166 = vector.load %arg6[%c0_56, %c0_57, %c0_58] : memref<1x8x16xf32, #tpu.memory_space<vmem>>, vector<1x8x16xf32>
    %167 = vector.shape_cast %166 : vector<1x8x16xf32> to vector<8x16xf32>
    %168 = vector.shape_cast %165 : vector<8x16xf32> to vector<1x8x16xf32>
    tpu.vector_store %arg6[%c0_56, %c0_57, %c0_58], %168 {strides = array<i32>} : memref<1x8x16xf32, #tpu.memory_space<vmem>>, vector<1x8x16xf32>,
    return
  }
  func.func @transform_0(%arg0: i32) -> (i32, i32, i32, i32) {
    %c0_i32 = arith.constant 0 : i32
    %c0_i32_0 = arith.constant 0 : i32
    %c0_i32_1 = arith.constant 0 : i32
    %c0_i32_2 = arith.constant 0 : i32
    %c0_i32_3 = arith.constant 0 : i32
    return %c0_i32, %c0_i32_0, %c0_i32_1, %c0_i32_2 : i32, i32, i32, i32
  }
  func.func @transform_1(%arg0: i32) -> (i32, i32, i32) {
    %c0_i32 = arith.constant 0 : i32
    %c0_i32_0 = arith.constant 0 : i32
    %c0_i32_1 = arith.constant 0 : i32
    return %arg0, %c0_i32, %c0_i32_0 : i32, i32, i32
  }
  func.func @transform_2(%arg0: i32) -> (i32, i32, i32) {
    %c0_i32 = arith.constant 0 : i32
    %c0_i32_0 = arith.constant 0 : i32
    %c0_i32_1 = arith.constant 0 : i32
    return %arg0, %c0_i32, %c0_i32_0 : i32, i32, i32
  }
  func.func @transform_3(%arg0: i32) -> (i32, i32, i32) {
    %c0_i32 = arith.constant 0 : i32
    %c0_i32_0 = arith.constant 0 : i32
    %c0_i32_1 = arith.constant 0 : i32
    return %arg0, %c0_i32, %c0_i32_0 : i32, i32, i32
  }
  func.func @transform_4(%arg0: i32) -> (i32, i32, i32) {
    %c0_i32 = arith.constant 0 : i32
    %c0_i32_0 = arith.constant 0 : i32
    %c0_i32_1 = arith.constant 0 : i32
    return %arg0, %c0_i32, %c0_i32_0 : i32, i32, i32
  }
  func.func @transform_5(%arg0: i32) -> (i32, i32, i32) {
    %c0_i32 = arith.constant 0 : i32
    %c0_i32_0 = arith.constant 0 : i32
    %c0_i32_1 = arith.constant 0 : i32
    return %arg0, %c0_i32, %c0_i32_0 : i32, i32, i32
  }
}

module attributes {stable_mosaic.version = 11 : i64} {
  func.func @head_kernel(%arg0: memref<2x8x16xf32, #tpu.memory_space<vmem>>, %arg1: memref<8x2xf32, #tpu.memory_space<vmem>>, %arg2: memref<2x8xbf16, #tpu.memory_space<vmem>>, %arg3: memref<1x8xf32, #tpu.memory_space<vmem>>, %arg4: memref<16x5xbf16, #tpu.memory_space<vmem>>, %arg5: memref<16x5xbf16, #tpu.memory_space<vmem>>, %arg6: memref<8x5xbf16, #tpu.memory_space<vmem>>, %arg7: memref<1x5xf32, #tpu.memory_space<vmem>>, %arg8: memref<8x5xf32, #tpu.memory_space<vmem>>) attributes {dimension_semantics = [], scalar_prefetch = 0 : i64, scratch_operands = 0 : i64, tpu.core_type = #tpu.core_type<tc>} {
    %c0 = arith.constant 0 : index
    %c0_0 = arith.constant 0 : index
    %c0_1 = arith.constant 0 : index
    %0 = vector.load %arg0[%c0, %c0_0, %c0_1] : memref<2x8x16xf32, #tpu.memory_space<vmem>>, vector<1x8x16xf32>
    %1 = vector.shape_cast %0 : vector<1x8x16xf32> to vector<8x16xf32>
    %c1 = arith.constant 1 : index
    %c0_2 = arith.constant 0 : index
    %c0_3 = arith.constant 0 : index
    %2 = vector.load %arg0[%c1, %c0_2, %c0_3] : memref<2x8x16xf32, #tpu.memory_space<vmem>>, vector<1x8x16xf32>
    %3 = vector.shape_cast %2 : vector<1x8x16xf32> to vector<8x16xf32>
    %c0_4 = arith.constant 0 : index
    %c0_5 = arith.constant 0 : index
    %4 = vector.load %arg1[%c0_4, %c0_5] : memref<8x2xf32, #tpu.memory_space<vmem>>, vector<8x2xf32>
    %5 = arith.truncf %4 : vector<8x2xf32> to vector<8x2xbf16>
    %c0_6 = arith.constant 0 : index
    %c0_7 = arith.constant 0 : index
    %6 = vector.load %arg2[%c0_6, %c0_7] : memref<2x8xbf16, #tpu.memory_space<vmem>>, vector<2x8xbf16>
    %cst = arith.constant dense<0.000000e+00> : vector<8x8xf32>
    %7 = tpu.matmul %5, %6, %cst {dimension_numbers = #tpu.dot_dimension_numbers<[1], [0], [0], [1], [0, 0, 1, 1], [], []>} : vector<8x2xbf16>, vector<2x8xbf16>, vector<8x8xf32> -> vector<8x8xf32>
    %c0_8 = arith.constant 0 : index
    %c0_9 = arith.constant 0 : index
    %8 = vector.load %arg3[%c0_8, %c0_9] : memref<1x8xf32, #tpu.memory_space<vmem>>, vector<1x8xf32>
    %9 = vector.broadcast %8 : vector<1x8xf32> to vector<8x8xf32>
    %10 = arith.addf %7, %9 : vector<8x8xf32>
    %cst_10 = arith.constant 0.000000e+00 : f32
    %11 = vector.broadcast %cst_10 : f32 to vector<8x8xf32>
    %12 = arith.maximumf %10, %11 : vector<8x8xf32>
    %13 = arith.truncf %1 : vector<8x16xf32> to vector<8x16xbf16>
    %c0_11 = arith.constant 0 : index
    %c0_12 = arith.constant 0 : index
    %14 = vector.load %arg4[%c0_11, %c0_12] : memref<16x5xbf16, #tpu.memory_space<vmem>>, vector<16x5xbf16>
    %cst_13 = arith.constant dense<0.000000e+00> : vector<8x5xf32>
    %15 = tpu.matmul %13, %14, %cst_13 {dimension_numbers = #tpu.dot_dimension_numbers<[1], [0], [0], [1], [0, 0, 1, 1], [], []>} : vector<8x16xbf16>, vector<16x5xbf16>, vector<8x5xf32> -> vector<8x5xf32>
    %16 = arith.truncf %3 : vector<8x16xf32> to vector<8x16xbf16>
    %c0_14 = arith.constant 0 : index
    %c0_15 = arith.constant 0 : index
    %17 = vector.load %arg5[%c0_14, %c0_15] : memref<16x5xbf16, #tpu.memory_space<vmem>>, vector<16x5xbf16>
    %cst_16 = arith.constant dense<0.000000e+00> : vector<8x5xf32>
    %18 = tpu.matmul %16, %17, %cst_16 {dimension_numbers = #tpu.dot_dimension_numbers<[1], [0], [0], [1], [0, 0, 1, 1], [], []>} : vector<8x16xbf16>, vector<16x5xbf16>, vector<8x5xf32> -> vector<8x5xf32>
    %19 = arith.addf %15, %18 : vector<8x5xf32>
    %20 = arith.truncf %12 : vector<8x8xf32> to vector<8x8xbf16>
    %c0_17 = arith.constant 0 : index
    %c0_18 = arith.constant 0 : index
    %21 = vector.load %arg6[%c0_17, %c0_18] : memref<8x5xbf16, #tpu.memory_space<vmem>>, vector<8x5xbf16>
    %cst_19 = arith.constant dense<0.000000e+00> : vector<8x5xf32>
    %22 = tpu.matmul %20, %21, %cst_19 {dimension_numbers = #tpu.dot_dimension_numbers<[1], [0], [0], [1], [0, 0, 1, 1], [], []>} : vector<8x8xbf16>, vector<8x5xbf16>, vector<8x5xf32> -> vector<8x5xf32>
    %23 = arith.addf %19, %22 : vector<8x5xf32>
    %c0_20 = arith.constant 0 : index
    %c0_21 = arith.constant 0 : index
    %24 = vector.load %arg7[%c0_20, %c0_21] : memref<1x5xf32, #tpu.memory_space<vmem>>, vector<1x5xf32>
    %25 = vector.broadcast %24 : vector<1x5xf32> to vector<8x5xf32>
    %26 = arith.addf %23, %25 : vector<8x5xf32>
    %c0_22 = arith.constant 0 : index
    %c0_23 = arith.constant 0 : index
    %27 = vector.load %arg8[%c0_22, %c0_23] : memref<8x5xf32, #tpu.memory_space<vmem>>, vector<8x5xf32>
    tpu.vector_store %arg8[%c0_22, %c0_23], %26 {strides = array<i32>} : memref<8x5xf32, #tpu.memory_space<vmem>>, vector<8x5xf32>,
    return
  }
}

</mosaic_0001>

<bundles_post_ra>
// kernel: forward.7
= control target key start
LH: loop header
LB: loop body
LE: loop exit
PB: predicated region body
PF: predicated region fallthrough
CT: control target
= control target key end

     0   :  { %s896_s18 = smov 0   ;;  %s1036_s0 = inlined_call_operand.vmem [shape: f32[2,4,8,16], index: 0, kind: input, shape index: {}]   ;;  %s1037_s1 = inlined_call_operand.vmem [shape: bf16[2,16,64], index: 1, kind: input, shape index: {}]   ;;  %s1038_s2 = inlined_call_operand.vmem [shape: bf16[2,16,64], index: 2, kind: input, shape index: {}]   ;;  %s1039_s3 = inlined_call_operand.vmem [shape: bf16[2,16,64], index: 3, kind: input, shape index: {}]   ;;  %s1040_s4 = inlined_call_operand.vmem [shape: f32[2,1,64], index: 4, kind: input, shape index: {}]   ;;  %s1041_s5 = inlined_call_operand.vmem [shape: f32[2,4,8,16], index: 5, kind: output, shape index: {}]  }
   0x1 LB: > { %s902_s19 = sadd.s32 4294967295, %s859_s18   ;;  %p758_p0 = scmp.ge.s32.totalorder %s859_s18, 1  ;;  %s859_s18 = sphi %s896_s18, %s15_s18  }
   0x2   : > { %p215_p1 = scmp.lt.s32.totalorder %s859_s18, 3 }
   0x4   : > { %p216_p2 = pnand %p758_p0, %p215_p1 }
   0x5   : > { %p256_p3 = scmp.lt.s32.totalorder (!%p216_p2), %s902_s19, 1  ;;  %p375_p4 = scmp.eq.s32.totalorder (!%p216_p2), %s902_s19, 0 }
   0x6   : > { %219 = sbr.rel (%p216_p2) target bundleno = 2395 (0x95b), region = 40  ;;  %s863_s7 = smov (!%p216_p2), 16  }
   0x7   : > { %s864_s8 = smov (!%p216_p2), 32   ;;  %s865_s9 = smov (!%p216_p2), 80  }
   0xb   : > { %s908_s20 = scalar_select %p256_p3, %s902_s19, 1  ;;  %v767_v0 = vld [vmem:[%s1036_s0 + $0x20] sm:$0xff]  ;;  %v768_v1 = vld [vmem:[%s1036_s0 + $0x28] sm:$0xff]  ;;  %vm303_vm0 = vcmask 130048   ;;  %v861_v9 = vmov 0   ;;  %v769_v10 = vld [vmem:[%s1036_s0 + $0x30] sm:$0xff] }
   0xc   : > { %v280_v2 = vld [vmem:[%s1036_s0] sm:$0xff]  ;;  %v281_v3 = vld [vmem:[%s1036_s0 + $0x8] sm:$0xff]  ;;  %v293_v7 = vpack.c.bf16 %v768_v1, %v767_v0  ;;  %v770_v11 = vld [vmem:[%s1036_s0 + $0x38] sm:$0xff]  ;;  %vm368_vm1 = vcmask 523264   ;;  %s975_s10 = scalar_select %p375_p4, 1, 2 }
   0xd   : > { %s800_s21 = sshll.u32 %s908_s20, 3  ;;  %v289_v8 = vpack.c.bf16 %v281_v3, %v280_v2  ;;  %s273_s16 = scalar_lea.vmem %s1040_s4, %s908_s20  ;;  %v282_v12 = vld [vmem:[%s1036_s0 + $0x10] sm:$0xff]  ;;  %v283_v13 = vld [vmem:[%s1036_s0 + $0x18] sm:$0xff]  ;;  %v294_v14 = vpack.c.bf16 %v770_v11, %v769_v10 }
   0xe   : > { %s265_s28 = scalar_lea.vmem %s1038_s2, %s800_s21  ;;  %s270_s6 = scalar_lea.vmem %s1039_s3, %s800_s21  ;;  %v290_v15 = vpack.c.bf16 %v283_v13, %v282_v12  ;;  %v820_v17 = vld [vmem:[%s273_s16] ss:$0 sm:$0xff] }
   0xf   : > { %v805_v4 = vld [vmem:[%s265_s28] sm:$0xff]  ;;  %s260_s13 = scalar_lea.vmem %s1037_s1, %s800_s21  ;;  %s789_s11 = sshll.u32 %s975_s10, 3 }
  0x10   : > { %v806_v5 = vld [vmem:[%s270_s6] sm:$0xff]  ;;  %317 = vmatpush.bf16.msra.mxu0 %v805_v4  ;;  %s958_s28 = scalar_select %p375_p4, 0, 3 }
  0x11   : > { %v804_v6 = vld [vmem:[%s260_s13] sm:$0xff]  ;;  %396 = vmatpush.bf16.msra.mxu2 %v806_v5  ;;  %464 = vmatpush.bf16.msra.mxu3 %v806_v5  ;;  %s862_s6 = smov 96   ;;  %s448_s12 = scalar_lea.vmem [#allocation2], %s789_s11 }
  0x12   : > { %348 = vmatpush.bf16.msra.mxu1 %v804_v6  ;;  %s783_s29 = sshll.u32 %s958_s28, 3  ;;  %s803_s19 = sshll.u32 %s908_s20, 5 }
  0x13   : > { %775 = vmatmul.msk.bf16.vlgmr.msra.gmra.mxu0 %vm303_vm0, %v293_v7  ;;  %s378_s30 = scalar_lea.vmem [#allocation2], %s783_s29  ;;  %s278_s24 = scalar_lea.vmem %s1041_s5, %s803_s19 }
  0x14   : > { %397 = vmatmul.bf16.vlgmr.msra.gmra.mxu2 %v861_v9  ;;  %s991_s13 = scalar_select %p375_p4, 2, 1 }
  0x15   : > { %532 = vmatpush.bf16.msrb.mxu2 %v806_v5  ;;  %600 = vmatpush.bf16.msrb.mxu3 %v806_v5  ;;  %s1003_s16 = scalar_select %p375_p4, 3, 0 }
  0x16   : > { %781 = vmatmul.msk.bf16.vlgmr.msra.gmra.mxu1 %vm303_vm0, %v289_v8  ;;  %s792_s14 = sshll.u32 %s991_s13, 3  ;;  %s444_s25 = scalar_lea.vmem %s278_s24, %s783_s29 }
  0x17   : > { %s516_s15 = scalar_lea.vmem [#allocation2], %s792_s14  ;;  %s795_s17 = sshll.u32 %s1003_s16, 3 }
  0x18   : > { %s584_s21 = scalar_lea.vmem [#allocation2], %s795_s17  ;;  %s512_s20 = scalar_lea.vmem %s278_s24, %s789_s11 }
  0x19   : > { %s580_s26 = scalar_lea.vmem %s278_s24, %s792_s14  ;;  %s648_s27 = scalar_lea.vmem %s278_s24, %s795_s17 }
  0x23   : > { %776 = vmatmul.msk.bf16.gmra.mxu0 %vm303_vm0, %v294_v14 }
  0x26   : > { %782 = vmatmul.msk.bf16.gmra.mxu1 %vm303_vm0, %v290_v15 }
  0x90   : > { %v319_v16 = vpop.f32.mrf.mxu0 }
  0x93   : > { %v350_v18 = vpop.f32.mrf.mxu1 }
  0x94   : > { %v351_v19 = vadd.f32 %v350_v18, %v319_v16 }
  0x96   : > { %v364_v20 = vadd.f32 %v820_v17, %v351_v19 }
  0x97   : > { %v398_v21 = vpop.f32.mrf.mxu2 }
  0x98   : > { %369 = vst.msk [vmem:[#allocation2] sm:$0xff] %vm368_vm1, %v364_v20  ;;  %v321_v22 = vpop.f32.mrf.mxu0 }
  0x9b   : > { %v352_v23 = vpop.f32.mrf.mxu1 }
  0x9c   : > { %v353_v24 = vadd.f32 %v352_v23, %v321_v22 }
  0x9e   : > { %v365_v25 = vadd.f32 %v820_v17, %v353_v24 }
  0x9f   : > { %v400_v26 = vpop.f32.mrf.mxu2 }
  0xa0   : > { %370 = vst.msk [vmem:[#allocation2 + $0x8] sm:$0xff] %vm368_vm1, %v365_v25  ;;  %v324_v27 = vpop.f32.mrf.mxu0 }
  0xa3   : > { %v355_v28 = vpop.f32.mrf.mxu1 }
  0xa4   : > { %v356_v29 = vadd.f32 %v355_v28, %v324_v27 }
  0xa6   : > { %v366_v30 = vadd.f32 %v820_v17, %v356_v29 }
  0xa8   : > { %371 = vst.msk [vmem:[#allocation2 + $0x10] sm:$0xff] %vm368_vm1, %v366_v30  ;;  %v326_v31 = vpop.f32.mrf.mxu0 }
  0xab   : > { %v357_v32 = vpop.f32.mrf.mxu1 }
  0xac   : > { %v358_v33 = vadd.f32 %v357_v32, %v326_v31 }
  0xae   : > { %v367_v34 = vadd.f32 %v820_v17, %v358_v33 }
  0xb0   : > { %372 = vst.msk [vmem:[#allocation2 + $0x18] sm:$0xff] %vm368_vm1, %v367_v34 }
  0xb7   : > { %v379_v35 = vld [vmem:[%s378_s30] sm:$0xff] }
  0xb8   : > { %v402_v36 = vadd.f32 %v398_v21, %v379_v35  ;;  %v449_v61 = vld [vmem:[%s448_s12] sm:$0xff] }
  0xb9   : > { %v517_v25 = vld [vmem:[%s516_s15] sm:$0xff] }
  0xba   : > { %821 = vtanh.f32 %v402_v36  ;;  %v788_v38 = vmul.f32 -1.442695, %v402_v36 }
  0xbc   : > { %823 = vpow2.f32 %v788_v38 }
  0xc0   : > { %v822_v37 = vpop.eup %821 }
  0xc1   : > { %425 = vrot.lane.b32.xlu0 %v822_v37, %s862_s6 }
  0xc2   : > { %v824_v39 = vpop.eup %823 }
  0xc3   : > { %v406_v40 = vadd.f32 1.0, %v824_v39 }
  0xc5   : > { %825 = vrcp.f32 %v406_v40  ;;  %v418_v46 = vand.u32 2147483648, %v406_v40  ;;  %vm412_vm3 = vweird.f32 %v406_v40  ;;  %v416_v47 = vand.u32 2147483647, %v406_v40 }
  0xc7   : > { %v419_v49 = vor.u32 1.1754944e-38, %v418_v46  ;;  %vm417_vm5 = vcmp.eq.f32.partialorder %v416_v47, 8.507059e+37 }
  0xcb   : > { %v826_v41 = vpop.eup %825 }
  0xcc   : > { %v408_v42 = vmul.f32 %v826_v41, %v406_v40  ;;  %vm413_vm2 = vweird.f32 %v826_v41 }
  0xcd   : > { %vm414_vm4 = vmor %vm412_vm3, %vm413_vm2 }
  0xce   : > { %v409_v43 = vsub.f32 1.0, %v408_v42 }
  0xd0   : > { %v410_v44 = vmul.f32 %v826_v41, %v409_v43 }
  0xd2   : > { %v411_v45 = vadd.f32 %v826_v41, %v410_v44 }
  0xd4   : > { %v415_v48 = vsel %vm414_vm4, %v826_v41, %v411_v45 }
  0xd5   : > { %v420_v51 = vsel %vm417_vm5, %v419_v49, %v415_v48 }
  0xd6   : > { %v423_v53 = vmul.f32 0.0, %v420_v51 }
 0x133   : > { %v426_v50 = vpop.permute.xlu0 %425 }
 0x134   : > { %v428_v52 = vmul.f32 %v426_v50, %v420_v51 }
 0x136   : > { %430 = vrot.lane.b32.xlu0 %v428_v52, %s863_s7 }
 0x1a8   : > { %v431_v54 = vpop.permute.xlu0 %430 }
 0x1a9   : > { %v433_v55 = vadd.f32 %v431_v54, %v423_v53  ;;  %v585_v53 = vld [vmem:[%s584_s21] sm:$0xff] }
 0x1ab   : > { %827 = vtanh.f32 %v433_v55 }
 0x1b1   : > { %v828_v56 = vpop.eup %827 }
 0x1b2   : > { %436 = vrot.lane.b32.xlu1 %v828_v56, %s864_s8 }
 0x224   : > { %v437_v57 = vpop.permute.xlu1 %436 }
 0x225   : > { %v967_v58 = vmul.f32 %v437_v57, %v420_v51 }
 0x227   : > { %v450_v59 = vpack.c.bf16 %v967_v58, %v967_v58 }
 0x229   : > { %452 = vrot.lane.b32.xlu1 %v450_v59, %s865_s9 }
 0x29b   : > { %v453_v60 = vpop.permute.xlu1 %452 }
 0x29c   : > { %790 = vmatmul.msk.bf16.vlgmr.msra.gmra.mxu3 %vm303_vm0, %v453_v60 }
 0x31f   : > { %v466_v62 = vpop.f32.mrf.mxu3 }
 0x320   : > { %v470_v63 = vadd.f32 %v466_v62, %v449_v61 }
 0x322   : > { %829 = vtanh.f32 %v470_v63  ;;  %v791_v2 = vmul.f32 -1.442695, %v470_v63 }
 0x324   : > { %831 = vpow2.f32 %v791_v2 }
 0x327   : > { %v468_v0 = vpop.f32.mrf.mxu3 }
 0x328   : > { %v830_v1 = vpop.eup %829 }
 0x329   : > { %493 = vrot.lane.b32.xlu2 %v830_v1, %s862_s6 }
 0x32a   : > { %v832_v3 = vpop.eup %831 }
 0x32b   : > { %v474_v4 = vadd.f32 1.0, %v832_v3 }
 0x32d   : > { %833 = vrcp.f32 %v474_v4  ;;  %v486_v10 = vand.u32 2147483648, %v474_v4  ;;  %vm480_vm7 = vweird.f32 %v474_v4  ;;  %v484_v11 = vand.u32 2147483647, %v474_v4 }
 0x32f   : > { %v487_v13 = vor.u32 1.1754944e-38, %v486_v10  ;;  %vm485_vm9 = vcmp.eq.f32.partialorder %v484_v11, 8.507059e+37 }
 0x333   : > { %v834_v5 = vpop.eup %833 }
 0x334   : > { %v476_v6 = vmul.f32 %v834_v5, %v474_v4  ;;  %vm481_vm6 = vweird.f32 %v834_v5 }
 0x335   : > { %vm482_vm8 = vmor %vm480_vm7, %vm481_vm6 }
 0x336   : > { %v477_v7 = vsub.f32 1.0, %v476_v6 }
 0x338   : > { %v478_v8 = vmul.f32 %v834_v5, %v477_v7 }
 0x33a   : > { %v479_v9 = vadd.f32 %v834_v5, %v478_v8 }
 0x33c   : > { %v483_v12 = vsel %vm482_vm8, %v834_v5, %v479_v9 }
 0x33d   : > { %v488_v15 = vsel %vm485_vm9, %v487_v13, %v483_v12 }
 0x33e   : > { %v491_v17 = vmul.f32 %v488_v15, %v433_v55 }
 0x383   : > { %v494_v14 = vpop.permute.xlu2 %493 }
 0x384   : > { %v496_v16 = vmul.f32 %v494_v14, %v488_v15 }
 0x386   : > { %498 = vrot.lane.b32.xlu2 %v496_v16, %s863_s7 }
 0x3e0   : > { %v499_v18 = vpop.permute.xlu2 %498 }
 0x3e1   : > { %v501_v19 = vadd.f32 %v499_v18, %v491_v17 }
 0x3e3   : > { %835 = vtanh.f32 %v501_v19 }
 0x3e9   : > { %v836_v20 = vpop.eup %835 }
 0x3ea   : > { %504 = vrot.lane.b32.xlu0 %v836_v20, %s864_s8 }
 0x45c   : > { %v505_v21 = vpop.permute.xlu0 %504 }
 0x45d   : > { %v983_v22 = vmul.f32 %v505_v21, %v488_v15 }
 0x45f   : > { %v518_v23 = vpack.c.bf16 %v983_v22, %v983_v22 }
 0x461   : > { %520 = vrot.lane.b32.xlu1 %v518_v23, %s865_s9 }
 0x4d3   : > { %v521_v24 = vpop.permute.xlu1 %520 }
 0x4d4   : > { %793 = vmatmul.msk.bf16.vlgmr.msrb.gmra.mxu2 %vm303_vm0, %v521_v24 }
 0x557   : > { %v534_v26 = vpop.f32.mrf.mxu2 }
 0x558   : > { %v538_v27 = vadd.f32 %v534_v26, %v517_v25 }
 0x55a   : > { %837 = vtanh.f32 %v538_v27  ;;  %v794_v30 = vmul.f32 -1.442695, %v538_v27 }
 0x55c   : > { %839 = vpow2.f32 %v794_v30 }
 0x55f   : > { %v536_v28 = vpop.f32.mrf.mxu2 }
 0x560   : > { %v838_v29 = vpop.eup %837 }
 0x561   : > { %561 = vrot.lane.b32.xlu2 %v838_v29, %s862_s6 }
 0x562   : > { %v840_v31 = vpop.eup %839 }
 0x563   : > { %v542_v32 = vadd.f32 1.0, %v840_v31 }
 0x565   : > { %841 = vrcp.f32 %v542_v32  ;;  %v554_v38 = vand.u32 2147483648, %v542_v32  ;;  %vm548_vm11 = vweird.f32 %v542_v32  ;;  %v552_v39 = vand.u32 2147483647, %v542_v32 }
 0x567   : > { %v555_v41 = vor.u32 1.1754944e-38, %v554_v38  ;;  %vm553_vm13 = vcmp.eq.f32.partialorder %v552_v39, 8.507059e+37 }
 0x56b   : > { %v842_v33 = vpop.eup %841 }
 0x56c   : > { %v544_v34 = vmul.f32 %v842_v33, %v542_v32  ;;  %vm549_vm10 = vweird.f32 %v842_v33 }
 0x56d   : > { %vm550_vm12 = vmor %vm548_vm11, %vm549_vm10 }
 0x56e   : > { %v545_v35 = vsub.f32 1.0, %v544_v34 }
 0x570   : > { %v546_v36 = vmul.f32 %v842_v33, %v545_v35 }
 0x572   : > { %v547_v37 = vadd.f32 %v842_v33, %v546_v36 }
 0x574   : > { %v551_v40 = vsel %vm550_vm12, %v842_v33, %v547_v37 }
 0x575   : > { %v556_v43 = vsel %vm553_vm13, %v555_v41, %v551_v40 }
 0x576   : > { %v559_v45 = vmul.f32 %v556_v43, %v501_v19 }
 0x5bb   : > { %v562_v42 = vpop.permute.xlu2 %561 }
 0x5bc   : > { %v564_v44 = vmul.f32 %v562_v42, %v556_v43 }
 0x5be   : > { %566 = vrot.lane.b32.xlu0 %v564_v44, %s863_s7 }
 0x630   : > { %v567_v46 = vpop.permute.xlu0 %566 }
 0x631   : > { %v569_v47 = vadd.f32 %v567_v46, %v559_v45 }
 0x633   : > { %843 = vtanh.f32 %v569_v47 }
 0x639   : > { %v844_v48 = vpop.eup %843 }
 0x63a   : > { %572 = vrot.lane.b32.xlu1 %v844_v48, %s864_s8 }
 0x6ac   : > { %v573_v49 = vpop.permute.xlu1 %572 }
 0x6ad   : > { %v575_v50 = vmul.f32 %v573_v49, %v556_v43 }
 0x6af   : > { %v586_v51 = vpack.c.bf16 %v575_v50, %v575_v50 }
 0x6b1   : > { %588 = vrot.lane.b32.xlu2 %v586_v51, %s865_s9 }
 0x70b   : > { %v589_v52 = vpop.permute.xlu2 %588 }
 0x70c   : > { %796 = vmatmul.msk.bf16.vlgmr.msrb.gmra.mxu3 %vm303_vm0, %v589_v52 }
 0x78f   : > { %v602_v54 = vpop.f32.mrf.mxu3 }
 0x790   : > { %v606_v55 = vadd.f32 %v602_v54, %v585_v53 }
 0x792   : > { %845 = vtanh.f32 %v606_v55  ;;  %v797_v59 = vmul.f32 -1.442695, %v606_v55 }
 0x794   : > { %847 = vpow2.f32 %v797_v59 }
 0x797   : > { %v604_v56 = vpop.f32.mrf.mxu3 }
 0x798   : > { %v846_v57 = vpop.eup %845 }
 0x799   : > { %629 = vrot.lane.b32.xlu0 %v846_v57, %s862_s6 }
 0x79a   : > { %v848_v60 = vpop.eup %847 }
 0x79b   : > { %v610_v61 = vadd.f32 1.0, %v848_v60 }
 0x79d   : > { %849 = vrcp.f32 %v610_v61  ;;  %v622_v3 = vand.u32 2147483648, %v610_v61  ;;  %vm616_vm15 = vweird.f32 %v610_v61  ;;  %v620_v4 = vand.u32 2147483647, %v610_v61 }
 0x79f   : > { %v623_v6 = vor.u32 1.1754944e-38, %v622_v3  ;;  %vm621_vm2 = vcmp.eq.f32.partialorder %v620_v4, 8.507059e+37 }
 0x7a1   : > { %441 = vrot.lane.b32.xlu0 %v967_v58, %s865_s9 }
 0x7a3   : > { %v850_v62 = vpop.eup %849 }
 0x7a4   : > { %v612_v63 = vmul.f32 %v850_v62, %v610_v61  ;;  %vm617_vm14 = vweird.f32 %v850_v62 }
 0x7a5   : > { %vm618_vm1 = vmor %vm616_vm15, %vm617_vm14 }
 0x7a6   : > { %v613_v0 = vsub.f32 1.0, %v612_v63 }
 0x7a8   : > { %v614_v1 = vmul.f32 %v850_v62, %v613_v0 }
 0x7aa   : > { %v615_v2 = vadd.f32 %v850_v62, %v614_v1 }
 0x7ac   : > { %v619_v5 = vsel %vm618_vm1, %v850_v62, %v615_v2 }
 0x7ad   : > { %v624_v7 = vsel %vm621_vm2, %v623_v6, %v619_v5 }
 0x7ae   : > { %v627_v10 = vmul.f32 %v624_v7, %v569_v47 }
 0x80b   : > { %v630_v58 = vpop.permute.xlu0 %629 }
 0x80c   : > { %v632_v8 = vmul.f32 %v630_v58, %v624_v7 }
 0x80e   : > { %634 = vrot.lane.b32.xlu1 %v632_v8, %s863_s7 }
 0x813   : > { %v442_v9 = vpop.permute.xlu0 %441 }
 0x814   : > { %445 = vst.msk [vmem:[%s444_s25] sm:$0xff] %vm303_vm0, %v442_v9 }
 0x816   : > { %509 = vrot.lane.b32.xlu1 %v983_v22, %s865_s9 }
 0x880   : > { %v635_v11 = vpop.permute.xlu1 %634 }
 0x881   : > { %v637_v12 = vadd.f32 %v635_v11, %v627_v10 }
 0x883   : > { %851 = vtanh.f32 %v637_v12 }
 0x888   : > { %v510_v13 = vpop.permute.xlu1 %509 }
 0x889   : > { %v852_v14 = vpop.eup %851  ;;  %513 = vst.msk [vmem:[%s512_s20] sm:$0xff] %vm303_vm0, %v510_v13 }
 0x88a   : > { %640 = vrot.lane.b32.xlu2 %v852_v14, %s864_s8 }
 0x892   : > { %577 = vrot.lane.b32.xlu2 %v575_v50, %s865_s9 }
 0x8e4   : > { %v641_v15 = vpop.permute.xlu2 %640 }
 0x8e5   : > { %v643_v16 = vmul.f32 %v641_v15, %v624_v7 }
 0x8e7   : > { %645 = vrot.lane.b32.xlu0 %v643_v16, %s865_s9 }
 0x8ec   : > { %v578_v17 = vpop.permute.xlu2 %577 }
 0x8ed   : > { %581 = vst.msk [vmem:[%s580_s26] sm:$0xff] %vm303_vm0, %v578_v17 }
 0x959   : > { %v646_v18 = vpop.permute.xlu0 %645 }
 0x95a   : > { %649 = vst.msk [vmem:[%s648_s27] sm:$0xff] %vm303_vm0, %v646_v18 }
 0x95b PF: > { %s15_s18 = sadd.s32 1, %s859_s18  }
 0x95c   : > { %p12_p5 = scmp.ge.s32.totalorder %s15_s18, 4  }
 0x95e   :  { %14 = sbr.rel (!%p12_p5) target bundleno = 1 (0x1), region = 88 }

// kernel: forward.5
= control target key start
LH: loop header
LB: loop body
LE: loop exit
PB: predicated region body
PF: predicated region fallthrough
CT: control target
= control target key end

     0   :  { %s5386_s0 = inlined_call_operand.vmem [shape: f32[32,128], index: 0, kind: input, shape index: {}]   ;;  %s5387_s1 = inlined_call_operand.hbm [shape: bf16[128,256], index: 1, kind: input, shape index: {}]   ;;  %s5388_s2 = inlined_call_operand.vmem [shape: f32[1,256], index: 2, kind: input, shape index: {}]   ;;  %s5389_s3 = inlined_call_operand.vmem [shape: f32[1,256], index: 3, kind: input, shape index: {}]   ;;  %s5390_s4 = inlined_call_operand.vmem [shape: f32[1,256], index: 4, kind: input, shape index: {}]   ;;  %s5391_s5 = inlined_call_operand.hbm [shape: bf16[256,256], index: 5, kind: input, shape index: {}]   ;;  %s5392_s6 = inlined_call_operand.vmem [shape: f32[1,256], index: 6, kind: input, shape index: {}]   ;;  %s5393_s7 = inlined_call_operand.vmem [shape: f32[1,256], index: 7, kind: input, shape index: {}]   ;;  %s5394_s8 = inlined_call_operand.vmem [shape: f32[1,256], index: 8, kind: input, shape index: {}]   ;;  %s5395_s9 = inlined_call_operand.hbm [shape: bf16[256,256], index: 9, kind: input, shape index: {}]   ;;  %s5396_s10 = inlined_call_operand.vmem [shape: f32[1,256], index: 10, kind: input, shape index: {}]   ;;  %s5397_s11 = inlined_call_operand.hbm [shape: f32[1,256], index: 11, kind: input, shape index: {}]   ;;  %s5398_s12 = inlined_call_operand.hbm [shape: f32[1,256], index: 12, kind: input, shape index: {}]   ;;  %s5399_s13 = inlined_call_operand.hbm [shape: bf16[256,256], index: 13, kind: input, shape index: {}]   ;;  %s5400_s14 = inlined_call_operand.hbm [shape: f32[1,256], index: 14, kind: input, shape index: {}]   ;;  %s5401_s15 = inlined_call_operand.hbm [shape: f32[1,256], index: 15, kind: input, shape index: {}]   ;;  %s5402_s16 = inlined_call_operand.hbm [shape: f32[1,256], index: 16, kind: input, shape index: {}]   ;;  %s5403_s17 = inlined_call_operand.hbm [shape: bf16[256,256], index: 17, kind: input, shape index: {}]   ;;  %s5404_s18 = inlined_call_operand.hbm [shape: f32[1,256], index: 18, kind: input, shape index: {}]   ;;  %s5405_s19 = inlined_call_operand.hbm [shape: f32[1,256], index: 19, kind: input, shape index: {}]   ;;  %s5406_s20 = inlined_call_operand.hbm [shape: f32[1,256], index: 20, kind: input, shape index: {}]   ;;  %s5407_s21 = inlined_call_operand.hbm [shape: bf16[256,256], index: 21, kind: input, shape index: {}]   ;;  %s5408_s22 = inlined_call_operand.hbm [shape: f32[1,256], index: 22, kind: input, shape index: {}]   ;;  %s5409_s23 = inlined_call_operand.hbm [shape: f32[1,256], index: 23, kind: input, shape index: {}]   ;;  %s5410_s24 = inlined_call_operand.hbm [shape: f32[1,256], index: 24, kind: input, shape index: {}]   ;;  %s5411_s25 = inlined_call_operand.vmem [shape: bf16[256,32], index: 25, kind: input, shape index: {}]   ;;  %s5412_s26 = inlined_call_operand.hbm [shape: f32[1,32], index: 26, kind: input, shape index: {}]   ;;  %s5413_s27 = inlined_call_operand.vmem [shape: f32[32,32], index: 27, kind: output, shape index: {}]  }
   0x1   :  { %5415 = sst [smem:[#allocation40_spill]] %s5386_s0 }
   0x2   :  { %5416 = sst [smem:[#allocation41_spill]] %s5387_s1 }
   0x3   :  { %5417 = sst [smem:[#allocation42_spill]] %s5388_s2 }
   0x4   :  { %5418 = sst [smem:[#allocation43_spill]] %s5389_s3 }
   0x5   :  { %5419 = sst [smem:[#allocation44_spill]] %s5390_s4 }
   0x6   :  { %5420 = sst [smem:[#allocation45_spill]] %s5391_s5 }
   0x7   :  { %5421 = sst [smem:[#allocation46_spill]] %s5392_s6 }
   0x8   :  { %5422 = sst [smem:[#allocation47_spill]] %s5393_s7 }
   0x9   :  { %5423 = sst [smem:[#allocation48_spill]] %s5394_s8 }
   0xa   :  { %5424 = sst [smem:[#allocation49_spill]] %s5395_s9 }
   0xb   :  { %5425 = sst [smem:[#allocation50_spill]] %s5396_s10 }
   0xc   :  { %5426 = sst [smem:[#allocation51_spill]] %s5397_s11 }
   0xd   :  { %32 = vsyncpa [#allocation3], 0 }
   0xe   :  { %33 = vsyncpa [#allocation5], 0 }
   0xf   :  { %34 = vsyncpa [#allocation8], 0 }
  0x10   :  { %35 = vsyncpa [#allocation11], 0 }
  0x11   :  { %36 = vsyncpa [#allocation14], 0 }
  0x12   :  { %37 = vsyncpa [#allocation17], 0 }
  0x13   :  { %38 = vsyncpa [#allocation20], 0 }
  0x14   :  { %39 = vsyncpa [#allocation23], 0 }
  0x15   :  { %40 = vsyncpa [#allocation26], 0 }
  0x16   :  { %41 = vsyncpa [#allocation29], 0  ;;  %s5427_s8 = sld [smem:[#allocation45_spill]]  ;;  %s4762_s9 = smov [#allocation4]  }
  0x17   :  { %s69_s5 = sshll.u32 %s4762_s9, 4  ;;  %s5428_s10 = sld [smem:[#allocation51_spill]]  ;;  %s70_s5 = int_to_ptr.vmem [resolvable:$true] %s69_s5 }
  0x18   :  { %s4763_s1 = smov 128   ;;  %s4764_s6 = smov 8  }
  0x19   :  { %s4765_s11 = smov [#allocation7]   ;;  %s123_s4 = sshll.u32 %s5399_s13, 4  ;;  %s124_s4 = int_to_ptr.hbm [resolvable:$true] %s123_s4 }
  0x1a   :  { %s104_s2 = sshll.u32 %s4765_s11, 4  ;;  %s148_s28 = sshll.u32 %s5401_s15, 4  ;;  %s105_s2 = int_to_ptr.vmem [resolvable:$true] %s104_s2  ;;  %s149_s28 = int_to_ptr.hbm [resolvable:$true] %s148_s28 }
  0x1b   :  { %s4766_s0 = smov [#allocation10]   ;;  %s169_s13 = sshll.u32 %s5403_s17, 4  ;;  %s170_s13 = int_to_ptr.hbm [resolvable:$true] %s169_s13 }
  0x1c   :  { %s67_s30 = sshll.u32 %s5427_s8, 4  ;;  %s194_s15 = sshll.u32 %s5405_s19, 4  ;;  %s68_s30 = int_to_ptr.hbm [resolvable:$true] %s67_s30  ;;  %s195_s15 = int_to_ptr.hbm [resolvable:$true] %s194_s15 }
  0x1d   :  { %s102_s29 = sshll.u32 %s5428_s10, 4  ;;  %s125_s10 = sshll.u32 %s4766_s0, 4  ;;  %s103_s29 = int_to_ptr.hbm [resolvable:$true] %s102_s29  ;;  %s126_s10 = int_to_ptr.vmem [resolvable:$true] %s125_s10 }
  0x1e   :  { %75 = dma.hbm_to_vmem [thread:$0]  %s68_s30, 4096, %s70_s5, [#allocation5], %s4763_s1, %s4763_s1, %s4764_s6  }
  0x1f   :  { %107 = dma.hbm_to_vmem [thread:$0]  %s103_s29, 32, %s105_s2, [#allocation8]  }
  0x20   :  { %131 = dma.hbm_to_vmem [thread:$0]  %s124_s4, 4096, %s126_s10, [#allocation11], %s4763_s1, %s4763_s1, %s4764_s6  }
  0x21   :  { %s4767_s30 = smov [#allocation13]   ;;  %s4768_s7 = smov [#allocation16]  }
  0x22   :  { %s150_s5 = sshll.u32 %s4767_s30, 4  ;;  %s171_s8 = sshll.u32 %s4768_s7, 4  ;;  %s151_s5 = int_to_ptr.vmem [resolvable:$true] %s150_s5  ;;  %s172_s8 = int_to_ptr.vmem [resolvable:$true] %s171_s8 }
  0x23   :  { %153 = dma.hbm_to_vmem [thread:$0]  %s149_s28, 32, %s151_s5, [#allocation14]  }
  0x24   :  { %177 = dma.hbm_to_vmem [thread:$0]  %s170_s13, 4096, %s172_s8, [#allocation17], %s4763_s1, %s4763_s1, %s4764_s6  }
  0x25   :  { %s4769_s4 = smov [#allocation19]   ;;  %s215_s17 = sshll.u32 %s5407_s21, 4  ;;  %s216_s17 = int_to_ptr.hbm [resolvable:$true] %s215_s17 }
  0x26   :  { %s196_s9 = sshll.u32 %s4769_s4, 4  ;;  %s240_s19 = sshll.u32 %s5409_s23, 4  ;;  %s197_s9 = int_to_ptr.vmem [resolvable:$true] %s196_s9  ;;  %s241_s19 = int_to_ptr.hbm [resolvable:$true] %s240_s19 }
  0x27   :  { %199 = dma.hbm_to_vmem [thread:$0]  %s195_s15, 32, %s197_s9, [#allocation20]  }
  0x28   :  { %s4770_s5 = smov [#allocation22]   ;;  %s4771_s3 = smov [#allocation25]  }
  0x29   :  { %s217_s11 = sshll.u32 %s4770_s5, 4  ;;  %s242_s13 = sshll.u32 %s4771_s3, 4  ;;  %s218_s11 = int_to_ptr.vmem [resolvable:$true] %s217_s11  ;;  %s243_s13 = int_to_ptr.vmem [resolvable:$true] %s242_s13 }
  0x2a   :  { %223 = dma.hbm_to_vmem [thread:$0]  %s216_s17, 4096, %s218_s11, [#allocation23], %s4763_s1, %s4763_s1, %s4764_s6  }
  0x2b   :  { %s5429_s21 = sld [smem:[#allocation41_spill]]  ;;  %s4772_s9 = smov [#allocation2]  }
  0x2c   :  { %245 = dma.hbm_to_vmem [thread:$0]  %s241_s19, 32, %s243_s13, [#allocation26]  }
  0x2d   :  { %s5430_s23 = sld [smem:[#allocation49_spill]]  ;;  %s50_s0 = sshll.u32 %s4772_s9, 4  ;;  %s51_s0 = int_to_ptr.vmem [resolvable:$true] %s50_s0 }
  0x2e   :  { %s4773_s10 = smov [#allocation6]   ;;  %s113_s5 = sshll.u32 %s5398_s12, 4  ;;  %s114_s5 = int_to_ptr.hbm [resolvable:$true] %s113_s5 }
  0x2f   :  { %s88_s17 = sshll.u32 %s4773_s10, 4  ;;  %s137_s3 = sshll.u32 %s5400_s14, 4  ;;  %s89_s17 = int_to_ptr.vmem [resolvable:$true] %s88_s17  ;;  %s138_s3 = int_to_ptr.hbm [resolvable:$true] %s137_s3 }
  0x30   :  { %s4774_s13 = smov [#allocation9]   ;;  %s4775_s2 = smov [#allocation12]  }
  0x31   :  { %s48_s7 = sshll.u32 %s5429_s21, 4  ;;  %s115_s29 = sshll.u32 %s4774_s13, 4  ;;  %s49_s7 = int_to_ptr.hbm [resolvable:$true] %s48_s7  ;;  %s116_s29 = int_to_ptr.vmem [resolvable:$true] %s115_s29 }
  0x32   :  { %56 = dma.hbm_to_vmem [thread:$0]  %s49_s7, 2048, %s51_s0, [#allocation3], %s4763_s1, %s4763_s1, %s4764_s6  }
  0x33   :  { %s86_s4 = sshll.u32 %s5430_s23, 4  ;;  %s139_s21 = sshll.u32 %s4775_s2, 4  ;;  %s87_s4 = int_to_ptr.hbm [resolvable:$true] %s86_s4  ;;  %s140_s21 = int_to_ptr.vmem [resolvable:$true] %s139_s21 }
  0x34   :  { %94 = dma.hbm_to_vmem [thread:$0]  %s87_s4, 4096, %s89_s17, [#allocation5], %s4763_s1, %s4763_s1, %s4764_s6  }
  0x35   :  { %118 = dma.hbm_to_vmem [thread:$0]  %s114_s5, 32, %s116_s29, [#allocation8]  }
  0x36   :  { %s159_s12 = sshll.u32 %s5402_s16, 4  ;;  %s183_s6 = sshll.u32 %s5404_s18, 4  ;;  %s160_s12 = int_to_ptr.hbm [resolvable:$true] %s159_s12  ;;  %s184_s6 = int_to_ptr.hbm [resolvable:$true] %s183_s6 }
  0x37   :  { %142 = dma.hbm_to_vmem [thread:$0]  %s138_s3, 32, %s140_s21, [#allocation11]  }
  0x38   :  { %s4776_s23 = smov [#allocation15]   ;;  %s4777_s4 = smov [#allocation18]  }
  0x39   :  { %s161_s14 = sshll.u32 %s4776_s23, 4  ;;  %s185_s9 = sshll.u32 %s4777_s4, 4  ;;  %s162_s14 = int_to_ptr.vmem [resolvable:$true] %s161_s14  ;;  %s186_s9 = int_to_ptr.vmem [resolvable:$true] %s185_s9 }
  0x3a   :  { %164 = dma.hbm_to_vmem [thread:$0]  %s160_s12, 32, %s162_s14, [#allocation14]  }
  0x3b   :  { %s205_s17 = sshll.u32 %s5406_s20, 4  ;;  %s229_s30 = sshll.u32 %s5408_s22, 4  ;;  %s206_s17 = int_to_ptr.hbm [resolvable:$true] %s205_s17  ;;  %s230_s30 = int_to_ptr.hbm [resolvable:$true] %s229_s30 }
  0x3c   :  { %188 = dma.hbm_to_vmem [thread:$0]  %s184_s6, 32, %s186_s9, [#allocation17]  }
  0x3d   :  { %s4778_s5 = smov [#allocation21]   ;;  %s4779_s19 = smov [#allocation24]  }
  0x3e   :  { %s207_s18 = sshll.u32 %s4778_s5, 4  ;;  %s231_s11 = sshll.u32 %s4779_s19, 4  ;;  %s208_s18 = int_to_ptr.vmem [resolvable:$true] %s207_s18  ;;  %s232_s11 = int_to_ptr.vmem [resolvable:$true] %s231_s11 }
  0x3f   :  { %210 = dma.hbm_to_vmem [thread:$0]  %s206_s17, 32, %s208_s18, [#allocation20]  }
  0x40   :  { %s251_s29 = sshll.u32 %s5410_s24, 4  ;;  %s264_s21 = sshll.u32 %s5412_s26, 4  ;;  %s252_s29 = int_to_ptr.hbm [resolvable:$true] %s251_s29  ;;  %s265_s21 = int_to_ptr.hbm [resolvable:$true] %s264_s21 }
  0x41   :  { %234 = dma.hbm_to_vmem [thread:$0]  %s230_s30, 32, %s232_s11, [#allocation23]  }
  0x42   :  { %s4780_s7 = smov [#allocation27]   ;;  %s4781_s15 = smov [#allocation28]  }
  0x43   :  { %s253_s22 = sshll.u32 %s4780_s7, 4  ;;  %s266_s12 = sshll.u32 %s4781_s15, 4  ;;  %s254_s22 = int_to_ptr.vmem [resolvable:$true] %s253_s22  ;;  %s267_s12 = int_to_ptr.vmem [resolvable:$true] %s266_s12 }
  0x44   :  { %256 = dma.hbm_to_vmem [thread:$0]  %s252_s29, 32, %s254_s22, [#allocation26]  }
  0x45   :  { %269 = dma.hbm_to_vmem [thread:$0]  %s265_s21, 16, %s267_s12, [#allocation29]  }
  0x46   :  { %4742 = dma.done.wait [#allocation3], 2048  }
  0x47   :  { %4743 = vsyncadd [#allocation3], 4294965248 }
  0x48   :  { %4744 = dma.done.wait [#allocation5], 8192  }
  0x49   :  { %4745 = vsyncadd [#allocation5], 4294959104 }
  0x4a   :  { %4746 = dma.done.wait [#allocation8], 64  }
  0x4b   :  { %4747 = vsyncadd [#allocation8], 4294967232 }
  0x4c   :  { %4748 = dma.done.wait [#allocation11], 4128  }
  0x4d   :  { %4749 = vsyncadd [#allocation11], 4294963168 }
  0x4e   :  { %4750 = dma.done.wait [#allocation14], 64  }
  0x4f   :  { %4751 = vsyncadd [#allocation14], 4294967232 }
  0x50   :  { %4752 = dma.done.wait [#allocation17], 4128  }
  0x51   :  { %4753 = vsyncadd [#allocation17], 4294963168 }
  0x52   :  { %4754 = dma.done.wait [#allocation20], 64  }
  0x53   :  { %4755 = vsyncadd [#allocation20], 4294967232 }
  0x54   :  { %4756 = dma.done.wait [#allocation23], 4128  }
  0x55   :  { %4757 = vsyncadd [#allocation23], 4294963168 }
  0x56   :  { %4758 = dma.done.wait [#allocation26], 64  }
  0x57   :  { %4759 = vsyncadd [#allocation26], 4294967232 }
  0x58   :  { %4760 = dma.done.wait [#allocation29], 16  }
  0x59   :  { %4761 = vsyncadd [#allocation29], 4294967280  ;;  %v3192_v0 = vld [vmem:[#allocation2 + $0x70] sm:$0xf]  ;;  %v3965_v1 = vld [vmem:[#allocation2 + $0x74] sm:$0xf0] }
  0x5a   :  { %v3964_v2 = vld [vmem:[#allocation2 + $0x74] sm:$0xf]  ;;  %v3193_v3 = vor.u32 %v3965_v1, %v3192_v0  ;;  %v3194_v4 = vld [vmem:[#allocation2 + $0x78] sm:$0xf0]  ;;  %v3184_v5 = vld [vmem:[#allocation2 + $0x60] sm:$0xf] }
  0x5b   :  { %v3963_v6 = vld [vmem:[#allocation2 + $0x64] sm:$0xf0]  ;;  %v3197_v7 = vor.u32 %v3964_v2, %v3194_v4  ;;  %v3962_v8 = vld [vmem:[#allocation2 + $0x64] sm:$0xf]  ;;  %v3186_v9 = vld [vmem:[#allocation2 + $0x68] sm:$0xf0] }
  0x5c   :  { %452 = vmatpush.bf16.msra.mxu0 %v3193_v3  ;;  %v3185_v10 = vor.u32 %v3963_v6, %v3184_v5  ;;  %v3189_v11 = vor.u32 %v3962_v8, %v3186_v9  ;;  %v3176_v12 = vld [vmem:[#allocation2 + $0x50] sm:$0xf]  ;;  %v3961_v13 = vld [vmem:[#allocation2 + $0x54] sm:$0xf0]  ;;  %v3960_v14 = vld [vmem:[#allocation2 + $0x54] sm:$0xf] }
  0x5d   :  { %471 = vmatpush.bf16.msra.mxu1 %v3197_v7  ;;  %v3178_v15 = vld [vmem:[#allocation2 + $0x58] sm:$0xf0]  ;;  %v3177_v16 = vor.u32 %v3961_v13, %v3176_v12  ;;  %v3168_v18 = vld [vmem:[#allocation2 + $0x40] sm:$0xf]  ;;  %v3959_v19 = vld [vmem:[#allocation2 + $0x44] sm:$0xf0] }
  0x5e   :  { %v3181_v17 = vor.u32 %v3960_v14, %v3178_v15  ;;  %v3958_v20 = vld [vmem:[#allocation2 + $0x44] sm:$0xf]  ;;  %v3170_v21 = vld [vmem:[#allocation2 + $0x48] sm:$0xf0]  ;;  %v3169_v22 = vor.u32 %v3959_v19, %v3168_v18  ;;  %v3160_v24 = vld [vmem:[#allocation2 + $0x30] sm:$0xf] }
  0x5f   :  { %v3173_v23 = vor.u32 %v3958_v20, %v3170_v21  ;;  %v3957_v25 = vld [vmem:[#allocation2 + $0x34] sm:$0xf0]  ;;  %v3956_v26 = vld [vmem:[#allocation2 + $0x34] sm:$0xf]  ;;  %v3162_v27 = vld [vmem:[#allocation2 + $0x38] sm:$0xf0] }
  0x60   :  { %453 = vmatpush.bf16.msra.mxu0 %v3185_v10  ;;  %v3161_v28 = vor.u32 %v3957_v25, %v3160_v24  ;;  %v3165_v29 = vor.u32 %v3956_v26, %v3162_v27  ;;  %v3152_v30 = vld [vmem:[#allocation2 + $0x20] sm:$0xf]  ;;  %v3955_v31 = vld [vmem:[#allocation2 + $0x24] sm:$0xf0]  ;;  %v3954_v32 = vld [vmem:[#allocation2 + $0x24] sm:$0xf] }
  0x61   :  { %472 = vmatpush.bf16.msra.mxu1 %v3189_v11  ;;  %v3154_v33 = vld [vmem:[#allocation2 + $0x28] sm:$0xf0]  ;;  %v3153_v34 = vor.u32 %v3955_v31, %v3152_v30  ;;  %v3144_v36 = vld [vmem:[#allocation2 + $0x10] sm:$0xf]  ;;  %v3953_v37 = vld [vmem:[#allocation2 + $0x14] sm:$0xf0] }
  0x62   :  { %v3157_v35 = vor.u32 %v3954_v32, %v3154_v33  ;;  %v3952_v38 = vld [vmem:[#allocation2 + $0x14] sm:$0xf]  ;;  %v3146_v39 = vld [vmem:[#allocation2 + $0x18] sm:$0xf0]  ;;  %v3145_v40 = vor.u32 %v3953_v37, %v3144_v36  ;;  %v3136_v42 = vld [vmem:[#allocation2] sm:$0xf] }
  0x63   :  { %v3149_v41 = vor.u32 %v3952_v38, %v3146_v39  ;;  %v3951_v43 = vld [vmem:[#allocation2 + $0x4] sm:$0xf0]  ;;  %v3950_v44 = vld [vmem:[#allocation2 + $0x4] sm:$0xf]  ;;  %v3138_v45 = vld [vmem:[#allocation2 + $0x8] sm:$0xf0] }
  0x64   :  { %454 = vmatpush.bf16.msra.mxu0 %v3177_v16  ;;  %v3137_v46 = vor.u32 %v3951_v43, %v3136_v42  ;;  %s5431_s8 = sld [smem:[#allocation40_spill]]  ;;  %v3141_v49 = vor.u32 %v3950_v44, %v3138_v45 }
  0x65   :  { %473 = vmatpush.bf16.msra.mxu1 %v3181_v17  ;;  %s5432_s17 = sld [smem:[#allocation42_spill]] }
  0x66   :  { %s5433_s30 = sld [smem:[#allocation43_spill]] }
  0x67   :  { %s5434_s19 = sld [smem:[#allocation44_spill]] }
  0x68   :  { %455 = vmatpush.bf16.msra.mxu0 %v3169_v22  ;;  %s5435_s13 = sld [smem:[#allocation46_spill]] }
  0x69   :  { %474 = vmatpush.bf16.msra.mxu1 %v3173_v23  ;;  %s5436_s2 = sld [smem:[#allocation47_spill]] }
  0x6a   :  { %v342_v47 = vld [vmem:[%s5431_s8] sm:$0xff]  ;;  %v343_v48 = vld [vmem:[%s5431_s8 + $0x8] sm:$0xff]  ;;  %v344_v51 = vld [vmem:[%s5431_s8 + $0x10] sm:$0xff]  ;;  %s5437_s22 = sld [smem:[#allocation48_spill]] }
  0x6b   :  { %v365_v50 = vpack.c.bf16 %v343_v48, %v342_v47  ;;  %v345_v52 = vld [vmem:[%s5431_s8 + $0x18] sm:$0xff]  ;;  %v362_v54 = vld [vmem:[%s5432_s17] sm:$0x3]  ;;  %s5438_s24 = sld [smem:[#allocation50_spill]] }
  0x6c   :  { %456 = vmatpush.bf16.msra.mxu0 %v3161_v28  ;;  %v366_v53 = vpack.c.bf16 %v345_v52, %v344_v51  ;;  %v368_v55 = vperm.slane %v362_v54, 0  ;;  %v369_v56 = vperm.slane %v362_v54, 1 }
  0x6d   :  { %475 = vmatpush.bf16.msra.mxu1 %v3165_v29 }
  0x70   :  { %457 = vmatpush.bf16.msra.mxu0 %v3153_v34 }
  0x71   :  { %476 = vmatpush.bf16.msra.mxu1 %v3157_v35 }
  0x74   :  { %458 = vmatpush.bf16.msra.mxu0 %v3145_v40 }
  0x75   :  { %477 = vmatpush.bf16.msra.mxu1 %v3149_v41 }
  0x78   :  { %459 = vmatpush.bf16.msra.mxu0 %v3137_v46 }
  0x79   :  { %478 = vmatpush.bf16.msra.mxu1 %v3141_v49 }
  0x7b   :  { %460 = vmatmul.bf16.vlgmr.msra.gmra.mxu0 %v365_v50 }
  0x7c   :  { %479 = vmatmul.bf16.vlgmr.msra.gmra.mxu1 %v365_v50 }
  0x8b   :  { %465 = vmatmul.bf16.gmra.mxu0 %v366_v53 }
  0x8c   :  { %484 = vmatmul.bf16.gmra.mxu1 %v366_v53  ;;  %v4782_v53 = vmov 256.0  }
  0xf8   :  { %v461_v57 = vpop.f32.mrf.mxu0 }
  0xf9   :  { %v462_v58 = vadd.f32 %v461_v57, %v368_v55  ;;  %v480_v59 = vpop.f32.mrf.mxu1 }
  0xfa   :  { %v481_v60 = vadd.f32 %v480_v59, %v369_v56 }
  0xfb   :  { %v498_v61 = vmin.f32 %v462_v58, 0.0  ;;  %vm490_vm0 = vcmp.gt.f32.partialorder %v462_v58, 0.0 }
  0xfc   :  { %v499_v62 = vmin.f32 %v481_v60, 0.0  ;;  %vm491_vm1 = vcmp.gt.f32.partialorder %v481_v60, 0.0 }
  0xfd   :  { %v506_v63 = vmul.f32 1.442695, %v498_v61 }
  0xfe   :  { %v508_v0 = vmul.f32 1.442695, %v499_v62 }
  0xff   :  { %4164 = vpow2.f32 %v506_v63 }
 0x100   :  { %4166 = vpow2.f32 %v508_v0  ;;  %v463_v1 = vpop.f32.mrf.mxu0 }
 0x101   :  { %v464_v2 = vadd.f32 %v463_v1, %v368_v55  ;;  %v482_v3 = vpop.f32.mrf.mxu1 }
 0x102   :  { %v483_v4 = vadd.f32 %v482_v3, %v369_v56 }
 0x103   :  { %v500_v5 = vmin.f32 %v464_v2, 0.0  ;;  %vm492_vm2 = vcmp.gt.f32.partialorder %v464_v2, 0.0 }
 0x104   :  { %v501_v6 = vmin.f32 %v483_v4, 0.0  ;;  %vm493_vm3 = vcmp.gt.f32.partialorder %v483_v4, 0.0 }
 0x105   :  { %v4165_v7 = vpop.eup %4164  ;;  %v510_v8 = vmul.f32 1.442695, %v500_v5 }
 0x106   :  { %v4167_v9 = vpop.eup %4166  ;;  %v512_v10 = vmul.f32 1.442695, %v501_v6  ;;  %v3198_v11 = vadd.f32 -1.0, %v4165_v7 }
 0x107   :  { %4168 = vpow2.f32 %v510_v8  ;;  %v3199_v12 = vadd.f32 -1.0, %v4167_v9 }
 0x108   :  { %4170 = vpow2.f32 %v512_v10  ;;  %v466_v13 = vpop.f32.mrf.mxu0  ;;  %v5010_v14 = vsel %vm490_vm0, %v462_v58, %v3198_v11 }
 0x109   :  { %v467_v15 = vadd.f32 %v466_v13, %v368_v55  ;;  %v485_v16 = vpop.f32.mrf.mxu1  ;;  %v531_v17 = vsel %vm491_vm1, %v481_v60, %v3199_v12 }
 0x10a   :  { %v486_v18 = vadd.f32 %v485_v16, %v369_v56  ;;  %v538_v19 = vadd.f32 %v531_v17, %v5010_v14 }
 0x10b   :  { %v502_v20 = vmin.f32 %v467_v15, 0.0  ;;  %vm494_vm4 = vcmp.gt.f32.partialorder %v467_v15, 0.0 }
 0x10c   :  { %v503_v21 = vmin.f32 %v486_v18, 0.0  ;;  %539 = vadd.xlane.f32.xlu0 %v538_v19  ;;  %vm495_vm5 = vcmp.gt.f32.partialorder %v486_v18, 0.0 }
 0x10d   :  { %v4169_v22 = vpop.eup %4168  ;;  %v514_v23 = vmul.f32 1.442695, %v502_v20 }
 0x10e   :  { %v4171_v24 = vpop.eup %4170  ;;  %v516_v25 = vmul.f32 1.442695, %v503_v21  ;;  %v3200_v26 = vadd.f32 -1.0, %v4169_v22 }
 0x10f   :  { %4172 = vpow2.f32 %v514_v23  ;;  %v3201_v27 = vadd.f32 -1.0, %v4171_v24  ;;  %v3264_v24 = vld [vmem:[#allocation4 + $0x70] sm:$0xf] }
 0x110   :  { %4174 = vpow2.f32 %v516_v25  ;;  %v468_v28 = vpop.f32.mrf.mxu0  ;;  %v532_v29 = vsel %vm492_vm2, %v464_v2, %v3200_v26  ;;  %v3981_v25 = vld [vmem:[#allocation4 + $0x74] sm:$0xf0]  ;;  %v3328_v26 = vld [vmem:[#allocation4 + $0xf0] sm:$0xf] }
 0x111   :  { %v469_v30 = vadd.f32 %v468_v28, %v368_v55  ;;  %v487_v31 = vpop.f32.mrf.mxu1  ;;  %v533_v32 = vsel %vm493_vm3, %v483_v4, %v3201_v27  ;;  %v3265_v27 = vor.u32 %v3981_v25, %v3264_v24  ;;  %v3997_v28 = vld [vmem:[#allocation4 + $0xf4] sm:$0xf0] }
 0x112   :  { %v488_v33 = vadd.f32 %v487_v31, %v369_v56  ;;  %v541_v34 = vadd.f32 %v533_v32, %v532_v29  ;;  %v3329_v31 = vor.u32 %v3997_v28, %v3328_v26  ;;  %v3988_v26 = vld [vmem:[#allocation4 + $0xb4] sm:$0xf] }
 0x113   :  { %v504_v35 = vmin.f32 %v469_v30, 0.0  ;;  %vm496_vm6 = vcmp.gt.f32.partialorder %v469_v30, 0.0  ;;  %875 = vmatpush.bf16.msra.mxu2 %v3265_v27  ;;  %v3298_v27 = vld [vmem:[#allocation4 + $0xb8] sm:$0xf0] }
 0x114   :  { %v505_v36 = vmin.f32 %v488_v33, 0.0  ;;  %542 = vadd.xlane.f32.xlu0 %v541_v34  ;;  %vm497_vm7 = vcmp.gt.f32.partialorder %v488_v33, 0.0  ;;  %v3330_v34 = vld [vmem:[#allocation4 + $0xf8] sm:$0xf0]  ;;  %894 = vmatpush.bf16.msra.mxu3 %v3329_v31  ;;  %v3301_v28 = vor.u32 %v3988_v26, %v3298_v27  ;;  %v3288_v31 = vld [vmem:[#allocation4 + $0xa0] sm:$0xf] }
 0x115   :  { %v4173_v37 = vpop.eup %4172  ;;  %v518_v38 = vmul.f32 1.442695, %v504_v35 }
 0x116   :  { %v4175_v39 = vpop.eup %4174  ;;  %v520_v40 = vmul.f32 1.442695, %v505_v36  ;;  %v3202_v41 = vadd.f32 -1.0, %v4173_v37  ;;  %v3256_v36 = vld [vmem:[#allocation4 + $0x60] sm:$0xf] }
 0x117   :  { %4176 = vpow2.f32 %v518_v38  ;;  %v3203_v42 = vadd.f32 -1.0, %v4175_v39  ;;  %v3979_v37 = vld [vmem:[#allocation4 + $0x64] sm:$0xf0]  ;;  %v3320_v38 = vld [vmem:[#allocation4 + $0xe0] sm:$0xf] }
 0x118   :  { %4178 = vpow2.f32 %v520_v40  ;;  %v534_v43 = vsel %vm494_vm4, %v467_v15, %v3202_v41  ;;  %v3257_v39 = vor.u32 %v3979_v37, %v3256_v36  ;;  %v3995_v40 = vld [vmem:[#allocation4 + $0xe4] sm:$0xf0]  ;;  %v3978_v41 = vld [vmem:[#allocation4 + $0x64] sm:$0xf] }
 0x119   :  { %v535_v44 = vsel %vm495_vm5, %v486_v18, %v3203_v42  ;;  %4180 = vrcp.f32 %v4782_v53  ;;  %v3258_v42 = vld [vmem:[#allocation4 + $0x68] sm:$0xf0]  ;;  %v3976_v53 = vld [vmem:[#allocation4 + $0x54] sm:$0xf] }
 0x11a   :  { %v544_v45 = vadd.f32 %v535_v44, %v534_v43  ;;  %876 = vmatpush.bf16.msra.mxu2 %v3257_v39  ;;  %v3290_v39 = vld [vmem:[#allocation4 + $0xa8] sm:$0xf0] }
 0x11c   :  { %545 = vadd.xlane.f32.xlu1 %v544_v45  ;;  %v3994_v45 = vld [vmem:[#allocation4 + $0xe4] sm:$0xf] }
 0x11d   :  { %v4177_v46 = vpop.eup %4176 }
 0x11e   :  { %v4179_v47 = vpop.eup %4178  ;;  %v3204_v48 = vadd.f32 -1.0, %v4177_v46  ;;  %v3322_v46 = vld [vmem:[#allocation4 + $0xe8] sm:$0xf0] }
 0x11f   :  { %v3205_v49 = vadd.f32 -1.0, %v4179_v47  ;;  %v4181_v54 = vpop.eup %4180  ;;  %v3325_v47 = vor.u32 %v3994_v45, %v3322_v46  ;;  %v3985_v45 = vld [vmem:[#allocation4 + $0x94] sm:$0xf0]  ;;  %v3968_v46 = vld [vmem:[#allocation4 + $0x14] sm:$0xf] }
 0x120   :  { %v536_v50 = vsel %vm496_vm6, %v469_v30, %v3204_v48  ;;  %v551_v55 = vmul.f32 256.0, %v4181_v54  ;;  %vm555_vm8 = vweird.f32 %v4181_v54  ;;  %v3266_v30 = vld [vmem:[#allocation4 + $0x78] sm:$0xf0]  ;;  %v3248_v48 = vld [vmem:[#allocation4 + $0x50] sm:$0xf] }
 0x121   :  { %v537_v51 = vsel %vm497_vm7, %v488_v33, %v3205_v49  ;;  %v3996_v33 = vld [vmem:[#allocation4 + $0xf4] sm:$0xf]  ;;  %v3977_v49 = vld [vmem:[#allocation4 + $0x54] sm:$0xf0] }
 0x122   :  { %v547_v52 = vadd.f32 %v537_v51, %v536_v50  ;;  %v552_v56 = vsub.f32 1.0, %v551_v55  ;;  %v3333_v35 = vor.u32 %v3996_v33, %v3330_v34  ;;  %v3987_v33 = vld [vmem:[#allocation4 + $0xa4] sm:$0xf0]  ;;  %v3970_v34 = vld [vmem:[#allocation4 + $0x24] sm:$0xf] }
 0x123   :  { %v3289_v36 = vor.u32 %v3987_v33, %v3288_v31 }
 0x124   :  { %548 = vadd.xlane.f32.xlu1 %v547_v52  ;;  %v553_v57 = vmul.f32 %v4181_v54, %v552_v56  ;;  %932 = vmatpush.bf16.msrb.mxu1 %v3333_v35  ;;  %v3993_v52 = vld [vmem:[#allocation4 + $0xd4] sm:$0xf0]  ;;  %v3226_v35 = vld [vmem:[#allocation4 + $0x28] sm:$0xf0] }
 0x125   :  { %v3229_v37 = vor.u32 %v3970_v34, %v3226_v35 }
 0x126   :  { %v554_v58 = vadd.f32 %v4181_v54, %v553_v57  ;;  %v3992_v57 = vld [vmem:[#allocation4 + $0xd4] sm:$0xf] }
 0x128   :  { %v5013_v59 = vsel %vm555_vm8, %v4181_v54, %v554_v58  ;;  %933 = vmatpush.bf16.msrb.mxu1 %v3325_v47  ;;  %v3250_v54 = vld [vmem:[#allocation4 + $0x58] sm:$0xf0] }
 0x129   :  { %v3253_v56 = vor.u32 %v3976_v53, %v3250_v54  ;;  %v3314_v58 = vld [vmem:[#allocation4 + $0xd8] sm:$0xf0] }
 0x12a   :  { %v3218_v47 = vld [vmem:[#allocation4 + $0x18] sm:$0xf0] }
 0x17f   :  { %v540_v60 = vpop.xlane.xlu0 %539 }
 0x180   :  { %v557_v61 = vmul.f32 %v5013_v59, %v540_v60  ;;  %v3317_v60 = vor.u32 %v3992_v57, %v3314_v58  ;;  %v3272_v57 = vld [vmem:[#allocation4 + $0x80] sm:$0xf] }
 0x182   :  { %v5017_v62 = vsub.f32 %v5010_v14, %v557_v61  ;;  %v5019_v63 = vsub.f32 %v531_v17, %v557_v61  ;;  %v3240_v61 = vld [vmem:[#allocation4 + $0x40] sm:$0xf]  ;;  %934 = vmatpush.bf16.msrb.mxu1 %v3317_v60  ;;  %v3983_v60 = vld [vmem:[#allocation4 + $0x84] sm:$0xf0] }
 0x184   :  { %v569_v0 = vmul.f32 %v5017_v62, %v5017_v62  ;;  %v570_v1 = vmul.f32 %v5019_v63, %v5019_v63 }
 0x186   :  { %v577_v2 = vadd.f32 %v570_v1, %v569_v0  ;;  %v3975_v0 = vld [vmem:[#allocation4 + $0x44] sm:$0xf0]  ;;  %v3304_v1 = vld [vmem:[#allocation4 + $0xc0] sm:$0xf] }
 0x187   :  { %v543_v3 = vpop.xlane.xlu0 %542 }
 0x188   :  { %v558_v4 = vmul.f32 %v5013_v59, %v543_v3  ;;  %578 = vadd.xlane.f32.xlu2 %v577_v2  ;;  %v3241_v2 = vor.u32 %v3975_v0, %v3240_v61  ;;  %v3991_v3 = vld [vmem:[#allocation4 + $0xc4] sm:$0xf0]  ;;  %v3966_v61 = vld [vmem:[#allocation4 + $0x4] sm:$0xf]  ;;  %v3210_v0 = vld [vmem:[#allocation4 + $0x8] sm:$0xf0] }
 0x18a   :  { %v5026_v5 = vsub.f32 %v532_v29, %v558_v4  ;;  %v5028_v6 = vsub.f32 %v533_v32, %v558_v4  ;;  %v3980_v29 = vld [vmem:[#allocation4 + $0x74] sm:$0xf]  ;;  %v3974_v4 = vld [vmem:[#allocation4 + $0x44] sm:$0xf] }
 0x18b   :  { %v3269_v32 = vor.u32 %v3980_v29, %v3266_v30  ;;  %v3224_v29 = vld [vmem:[#allocation4 + $0x20] sm:$0xf]  ;;  %v3971_v30 = vld [vmem:[#allocation4 + $0x24] sm:$0xf0] }
 0x18c   :  { %v571_v7 = vmul.f32 %v5026_v5, %v5026_v5  ;;  %v572_v8 = vmul.f32 %v5028_v6, %v5028_v6 }
 0x18d   :  { %913 = vmatpush.bf16.msrb.mxu0 %v3269_v32  ;;  %v3225_v32 = vor.u32 %v3971_v30, %v3224_v29 }
 0x18e   :  { %v580_v9 = vadd.f32 %v572_v8, %v571_v7  ;;  %v3242_v7 = vld [vmem:[#allocation4 + $0x48] sm:$0xf0]  ;;  %v3305_v8 = vor.u32 %v3991_v3, %v3304_v1  ;;  %v3213_v3 = vor.u32 %v3966_v61, %v3210_v0 }
 0x18f   :  { %v546_v10 = vpop.xlane.xlu1 %545 }
 0x190   :  { %v559_v11 = vmul.f32 %v5013_v59, %v546_v10  ;;  %581 = vadd.xlane.f32.xlu2 %v580_v9  ;;  %v3245_v9 = vor.u32 %v3974_v4, %v3242_v7  ;;  %v3990_v10 = vld [vmem:[#allocation4 + $0xc4] sm:$0xf]  ;;  %v3274_v7 = vld [vmem:[#allocation4 + $0x88] sm:$0xf0] }
 0x191   :  { %v3982_v4 = vld [vmem:[#allocation4 + $0x84] sm:$0xf] }
 0x192   :  { %v5035_v12 = vsub.f32 %v534_v43, %v559_v11  ;;  %v5037_v13 = vsub.f32 %v535_v44, %v559_v11  ;;  %v3321_v43 = vor.u32 %v3995_v40, %v3320_v38  ;;  %v3261_v44 = vor.u32 %v3978_v41, %v3258_v42  ;;  %v3306_v11 = vld [vmem:[#allocation4 + $0xc8] sm:$0xf0]  ;;  %v3986_v38 = vld [vmem:[#allocation4 + $0xa4] sm:$0xf]  ;;  %v3216_v41 = vld [vmem:[#allocation4 + $0x10] sm:$0xf] }
 0x193   :  { %v3293_v40 = vor.u32 %v3986_v38, %v3290_v39  ;;  %v3969_v42 = vld [vmem:[#allocation4 + $0x14] sm:$0xf0] }
 0x194   :  { %v573_v14 = vmul.f32 %v5035_v12, %v5035_v12  ;;  %v574_v15 = vmul.f32 %v5037_v13, %v5037_v13  ;;  %895 = vmatpush.bf16.msra.mxu3 %v3321_v43  ;;  %914 = vmatpush.bf16.msrb.mxu0 %v3261_v44  ;;  %v3280_v43 = vld [vmem:[#allocation4 + $0x90] sm:$0xf]  ;;  %v3217_v44 = vor.u32 %v3969_v42, %v3216_v41 }
 0x196   :  { %v583_v16 = vadd.f32 %v574_v15, %v573_v14  ;;  %v3309_v14 = vor.u32 %v3990_v10, %v3306_v11  ;;  %v3232_v15 = vld [vmem:[#allocation4 + $0x30] sm:$0xf] }
 0x197   :  { %v549_v17 = vpop.xlane.xlu1 %548 }
 0x198   :  { %v560_v18 = vmul.f32 %v5013_v59, %v549_v17  ;;  %584 = vadd.xlane.f32.xlu0 %v583_v16  ;;  %915 = vmatpush.bf16.msrb.mxu0 %v3253_v56  ;;  %v3973_v16 = vld [vmem:[#allocation4 + $0x34] sm:$0xf0]  ;;  %v3296_v17 = vld [vmem:[#allocation4 + $0xb0] sm:$0xf]  ;;  %v3967_v56 = vld [vmem:[#allocation4 + $0x4] sm:$0xf0] }
 0x199   :  { %935 = vmatpush.bf16.msrb.mxu1 %v3309_v14 }
 0x19a   :  { %v5044_v19 = vsub.f32 %v536_v50, %v560_v18  ;;  %v5046_v20 = vsub.f32 %v537_v51, %v560_v18  ;;  %v3312_v50 = vld [vmem:[#allocation4 + $0xd0] sm:$0xf]  ;;  %v3249_v51 = vor.u32 %v3977_v49, %v3248_v48  ;;  %v3233_v18 = vor.u32 %v3973_v16, %v3232_v15 }
 0x19b   :  { %v3313_v55 = vor.u32 %v3993_v52, %v3312_v50  ;;  %v3281_v48 = vor.u32 %v3985_v45, %v3280_v43  ;;  %v3221_v49 = vor.u32 %v3968_v46, %v3218_v47  ;;  %v3984_v50 = vld [vmem:[#allocation4 + $0x94] sm:$0xf] }
 0x19c   :  { %v575_v21 = vmul.f32 %v5044_v19, %v5044_v19  ;;  %v576_v22 = vmul.f32 %v5046_v20, %v5046_v20  ;;  %877 = vmatpush.bf16.msra.mxu2 %v3249_v51  ;;  %916 = vmatpush.bf16.msrb.mxu0 %v3245_v9  ;;  %v3282_v51 = vld [vmem:[#allocation4 + $0x98] sm:$0xf0] }
 0x19d   :  { %896 = vmatpush.bf16.msra.mxu3 %v3313_v55  ;;  %936 = vmatpush.bf16.msrb.mxu1 %v3301_v28  ;;  %v3285_v53 = vor.u32 %v3984_v50, %v3282_v51  ;;  %v3208_v55 = vld [vmem:[#allocation4] sm:$0xf] }
 0x19e   :  { %v586_v23 = vadd.f32 %v576_v22, %v575_v21  ;;  %v3989_v21 = vld [vmem:[#allocation4 + $0xb4] sm:$0xf0]  ;;  %v3972_v22 = vld [vmem:[#allocation4 + $0x34] sm:$0xf]  ;;  %v3209_v58 = vor.u32 %v3967_v56, %v3208_v55  ;;  %v363_v28 = vld [vmem:[%s5433_s30] sm:$0x3] }
 0x19f   :  { %v3297_v24 = vor.u32 %v3989_v21, %v3296_v17  ;;  %v646_v34 = vperm.slane %v363_v28, 0 }
 0x1a0   :  { %587 = vadd.xlane.f32.xlu1 %v586_v23  ;;  %878 = vmatpush.bf16.msra.mxu2 %v3241_v2  ;;  %v3234_v23 = vld [vmem:[#allocation4 + $0x38] sm:$0xf0]  ;;  %v3273_v2 = vor.u32 %v3983_v60, %v3272_v57 }
 0x1a1   :  { %897 = vmatpush.bf16.msra.mxu3 %v3305_v8  ;;  %v3237_v25 = vor.u32 %v3972_v22, %v3234_v23  ;;  %937 = vmatpush.bf16.msrb.mxu1 %v3293_v40  ;;  %v3277_v8 = vor.u32 %v3982_v4, %v3274_v7  ;;  %v647_v40 = vperm.slane %v363_v28, 1 }
 0x1a3   :  { %917 = vmatpush.bf16.msrb.mxu0 %v3237_v25 }
 0x1a4   :  { %879 = vmatpush.bf16.msra.mxu2 %v3233_v18 }
 0x1a5   :  { %898 = vmatpush.bf16.msra.mxu3 %v3297_v24  ;;  %938 = vmatpush.bf16.msrb.mxu1 %v3285_v53 }
 0x1a7   :  { %918 = vmatpush.bf16.msrb.mxu0 %v3229_v37  ;;  %v364_v37 = vld [vmem:[%s5434_s19] sm:$0x3] }
 0x1a8   :  { %880 = vmatpush.bf16.msra.mxu2 %v3225_v32  ;;  %v659_v45 = vperm.slane %v364_v37, 0  ;;  %v660_v46 = vperm.slane %v364_v37, 1 }
 0x1a9   :  { %899 = vmatpush.bf16.msra.mxu3 %v3289_v36  ;;  %939 = vmatpush.bf16.msrb.mxu1 %v3277_v8 }
 0x1ab   :  { %919 = vmatpush.bf16.msrb.mxu0 %v3221_v49 }
 0x1ac   :  { %881 = vmatpush.bf16.msra.mxu2 %v3217_v44 }
 0x1ad   :  { %900 = vmatpush.bf16.msra.mxu3 %v3281_v48 }
 0x1af   :  { %920 = vmatpush.bf16.msrb.mxu0 %v3213_v3 }
 0x1b0   :  { %882 = vmatpush.bf16.msra.mxu2 %v3209_v58 }
 0x1b1   :  { %901 = vmatpush.bf16.msra.mxu3 %v3273_v2 }
 0x1fb   :  { %v579_v52 = vpop.xlane.xlu2 %578 }
 0x1fc   :  { %v589_v54 = vmul.f32 %v579_v52, %v5013_v59 }
 0x1fe   :  { %v593_v1 = vadd.f32 1e-05, %v589_v54 }
 0x200   :  { %4182 = vrsqrt.f32 %v593_v1  ;;  %vm603_vm10 = vweird.f32 %v593_v1 }
 0x203   :  { %v582_v9 = vpop.xlane.xlu2 %581 }
 0x204   :  { %v590_v10 = vmul.f32 %v582_v9, %v5013_v59 }
 0x206   :  { %v4183_v11 = vpop.eup %4182  ;;  %v594_v14 = vadd.f32 1e-05, %v590_v10 }
 0x207   :  { %v598_v15 = vmul.f32 %v4183_v11, %v593_v1  ;;  %vm604_vm9 = vweird.f32 %v4183_v11 }
 0x208   :  { %4184 = vrsqrt.f32 %v594_v14  ;;  %vm605_vm11 = vmor %vm603_vm10, %vm604_vm9  ;;  %vm613_vm13 = vweird.f32 %v594_v14 }
 0x209   :  { %v599_v16 = vmul.f32 %v4183_v11, %v598_v15 }
 0x20b   :  { %v600_v17 = vmul.f32 0.5, %v599_v16  ;;  %v585_v18 = vpop.xlane.xlu0 %584 }
 0x20c   :  { %v591_v21 = vmul.f32 %v585_v18, %v5013_v59 }
 0x20d   :  { %v601_v22 = vsub.f32 1.5, %v600_v17 }
 0x20e   :  { %v4185_v23 = vpop.eup %4184  ;;  %v595_v24 = vadd.f32 1e-05, %v591_v21 }
 0x20f   :  { %v602_v25 = vmul.f32 %v4183_v11, %v601_v22  ;;  %v608_v26 = vmul.f32 %v4185_v23, %v594_v14  ;;  %vm614_vm12 = vweird.f32 %v4185_v23 }
 0x210   :  { %4186 = vrsqrt.f32 %v595_v24  ;;  %vm615_vm14 = vmor %vm613_vm13, %vm614_vm12  ;;  %vm623_vm0 = vweird.f32 %v595_v24 }
 0x211   :  { %v609_v27 = vmul.f32 %v4185_v23, %v608_v26  ;;  %v606_v31 = vsel %vm605_vm11, %v4183_v11, %v602_v25 }
 0x212   :  { %v637_v38 = vmul.f32 %v606_v31, %v5017_v62  ;;  %v638_v39 = vmul.f32 %v606_v31, %v5019_v63 }
 0x213   :  { %v610_v29 = vmul.f32 0.5, %v609_v27  ;;  %v588_v30 = vpop.xlane.xlu1 %587 }
 0x214   :  { %v592_v32 = vmul.f32 %v588_v30, %v5013_v59  ;;  %v650_v48 = vmul.f32 %v646_v34, %v637_v38  ;;  %v651_v50 = vmul.f32 %v647_v40, %v638_v39 }
 0x215   :  { %v611_v33 = vsub.f32 1.5, %v610_v29 }
 0x216   :  { %v4187_v35 = vpop.eup %4186  ;;  %v596_v36 = vadd.f32 1e-05, %v592_v32  ;;  %v663_v54 = vadd.f32 %v659_v45, %v650_v48  ;;  %v664_v56 = vadd.f32 %v660_v46, %v651_v50 }
 0x217   :  { %v612_v41 = vmul.f32 %v4185_v23, %v611_v33  ;;  %v618_v42 = vmul.f32 %v4187_v35, %v595_v24  ;;  %vm624_vm15 = vweird.f32 %v4187_v35 }
 0x218   :  { %4188 = vrsqrt.f32 %v596_v36  ;;  %vm625_vm1 = vmor %vm623_vm0, %vm624_vm15  ;;  %vm633_vm3 = vweird.f32 %v596_v36 }
 0x219   :  { %v619_v43 = vmul.f32 %v4187_v35, %v618_v42  ;;  %v616_v44 = vsel %vm615_vm14, %v4185_v23, %v612_v41 }
 0x21a   :  { %v639_v47 = vmul.f32 %v616_v44, %v5026_v5  ;;  %v640_v49 = vmul.f32 %v616_v44, %v5028_v6 }
 0x21b   :  { %v620_v51 = vmul.f32 0.5, %v619_v43 }
 0x21c   :  { %v652_v62 = vmul.f32 %v646_v34, %v639_v47  ;;  %v653_v52 = vmul.f32 %v647_v40, %v640_v49 }
 0x21d   :  { %v621_v63 = vsub.f32 1.5, %v620_v51 }
 0x21e   :  { %v4189_v53 = vpop.eup %4188  ;;  %v665_v55 = vadd.f32 %v659_v45, %v652_v62  ;;  %v666_v57 = vadd.f32 %v660_v46, %v653_v52 }
 0x21f   :  { %v622_v58 = vmul.f32 %v4187_v35, %v621_v63  ;;  %v628_v60 = vmul.f32 %v4189_v53, %v596_v36  ;;  %vm634_vm2 = vweird.f32 %v4189_v53 }
 0x220   :  { %v706_v61 = vpack.c.bf16 %v665_v55, %v663_v54  ;;  %v707_v0 = vpack.c.bf16 %v666_v57, %v664_v56  ;;  %vm635_vm4 = vmor %vm633_vm3, %vm634_vm2 }
 0x221   :  { %v629_v5 = vmul.f32 %v4189_v53, %v628_v60  ;;  %v626_v1 = vsel %vm625_vm1, %v4187_v35, %v622_v58 }
 0x222   :  { %883 = vmatmul.bf16.vlgmr.msra.gmra.mxu2 %v706_v61  ;;  %902 = vmatmul.bf16.vlgmr.msra.gmra.mxu3 %v707_v0  ;;  %v641_v3 = vmul.f32 %v626_v1, %v5035_v12  ;;  %v642_v4 = vmul.f32 %v626_v1, %v5037_v13  ;;  %v703_v13 = vld [vmem:[%s5435_s13] sm:$0x3] }
 0x223   :  { %v630_v6 = vmul.f32 0.5, %v629_v5  ;;  %921 = vmatmul.bf16.vlgmr.msrb.gmra.mxu0 %v706_v61  ;;  %940 = vmatmul.bf16.vlgmr.msrb.gmra.mxu1 %v707_v0  ;;  %v711_v26 = vperm.slane %v703_v13, 0 }
 0x224   :  { %v654_v10 = vmul.f32 %v646_v34, %v641_v3  ;;  %v655_v14 = vmul.f32 %v647_v40, %v642_v4 }
 0x225   :  { %v631_v2 = vsub.f32 1.5, %v630_v6 }
 0x226   :  { %v667_v17 = vadd.f32 %v659_v45, %v654_v10  ;;  %v668_v21 = vadd.f32 %v660_v46, %v655_v14 }
 0x227   :  { %v632_v7 = vmul.f32 %v4189_v53, %v631_v2 }
 0x229   :  { %v636_v8 = vsel %vm635_vm4, %v4189_v53, %v632_v7 }
 0x22a   :  { %v643_v9 = vmul.f32 %v636_v8, %v5044_v19  ;;  %v644_v11 = vmul.f32 %v636_v8, %v5046_v20  ;;  %v712_v19 = vperm.slane %v703_v13, 1 }
 0x22c   :  { %v656_v15 = vmul.f32 %v646_v34, %v643_v9  ;;  %v657_v16 = vmul.f32 %v647_v40, %v644_v11 }
 0x22e   :  { %v669_v18 = vadd.f32 %v659_v45, %v656_v15  ;;  %v670_v22 = vadd.f32 %v660_v46, %v657_v16 }
 0x230   :  { %v708_v23 = vpack.c.bf16 %v669_v18, %v667_v17  ;;  %v709_v12 = vpack.c.bf16 %v670_v22, %v668_v21 }
 0x232   :  { %888 = vmatmul.bf16.gmra.mxu2 %v708_v23  ;;  %907 = vmatmul.bf16.gmra.mxu3 %v709_v12 }
 0x233   :  { %926 = vmatmul.bf16.gmra.mxu0 %v708_v23  ;;  %945 = vmatmul.bf16.gmra.mxu1 %v709_v12 }
 0x2a0   :  { %v922_v24 = vpop.f32.mrf.mxu0  ;;  %v941_v20 = vpop.f32.mrf.mxu1 }
 0x2a1   :  { %v923_v25 = vadd.f32 %v922_v24, %v712_v19 }
 0x2a3   :  { %v942_v27 = vadd.f32 %v941_v20, %v923_v25 }
 0x2a5   :  { %v960_v28 = vmin.f32 %v942_v27, 0.0  ;;  %v884_v29 = vpop.f32.mrf.mxu2  ;;  %v903_v30 = vpop.f32.mrf.mxu3  ;;  %vm952_vm6 = vcmp.gt.f32.partialorder %v942_v27, 0.0 }
 0x2a6   :  { %v885_v31 = vadd.f32 %v884_v29, %v711_v26 }
 0x2a7   :  { %v969_v32 = vmul.f32 1.442695, %v960_v28 }
 0x2a8   :  { %v904_v33 = vadd.f32 %v903_v30, %v885_v31  ;;  %v924_v34 = vpop.f32.mrf.mxu0  ;;  %v943_v35 = vpop.f32.mrf.mxu1 }
 0x2a9   :  { %v925_v36 = vadd.f32 %v924_v34, %v712_v19  ;;  %4190 = vpow2.f32 %v969_v32 }
 0x2aa   :  { %v959_v37 = vmin.f32 %v904_v33, 0.0  ;;  %vm951_vm5 = vcmp.gt.f32.partialorder %v904_v33, 0.0 }
 0x2ab   :  { %v944_v38 = vadd.f32 %v943_v35, %v925_v36 }
 0x2ac   :  { %v967_v39 = vmul.f32 1.442695, %v959_v37 }
 0x2ad   :  { %v962_v40 = vmin.f32 %v944_v38, 0.0  ;;  %v886_v41 = vpop.f32.mrf.mxu2  ;;  %v905_v42 = vpop.f32.mrf.mxu3  ;;  %vm954_vm8 = vcmp.gt.f32.partialorder %v944_v38, 0.0 }
 0x2ae   :  { %4192 = vpow2.f32 %v967_v39  ;;  %v887_v43 = vadd.f32 %v886_v41, %v711_v26 }
 0x2af   :  { %v973_v44 = vmul.f32 1.442695, %v962_v40  ;;  %v4191_v45 = vpop.eup %4190 }
 0x2b0   :  { %v906_v46 = vadd.f32 %v905_v42, %v887_v43  ;;  %v927_v47 = vpop.f32.mrf.mxu0  ;;  %v946_v48 = vpop.f32.mrf.mxu1  ;;  %v3335_v62 = vadd.f32 -1.0, %v4191_v45 }
 0x2b1   :  { %v928_v49 = vadd.f32 %v927_v47, %v712_v19  ;;  %4194 = vpow2.f32 %v973_v44 }
 0x2b2   :  { %v961_v50 = vmin.f32 %v906_v46, 0.0  ;;  %v992_v61 = vsel %vm952_vm6, %v942_v27, %v3335_v62  ;;  %vm953_vm7 = vcmp.gt.f32.partialorder %v906_v46, 0.0 }
 0x2b3   :  { %v947_v51 = vadd.f32 %v946_v48, %v928_v49 }
 0x2b4   :  { %v4193_v52 = vpop.eup %4192  ;;  %v971_v63 = vmul.f32 1.442695, %v961_v50 }
 0x2b5   :  { %v964_v53 = vmin.f32 %v947_v51, 0.0  ;;  %v889_v54 = vpop.f32.mrf.mxu2  ;;  %v908_v55 = vpop.f32.mrf.mxu3  ;;  %v3334_v56 = vadd.f32 -1.0, %v4193_v52  ;;  %vm956_vm10 = vcmp.gt.f32.partialorder %v947_v51, 0.0 }
 0x2b6   :  { %4196 = vpow2.f32 %v971_v63  ;;  %v890_v57 = vadd.f32 %v889_v54, %v711_v26 }
 0x2b7   :  { %v977_v58 = vmul.f32 1.442695, %v964_v53  ;;  %v991_v60 = vsel %vm951_vm5, %v904_v33, %v3334_v56  ;;  %v4195_v0 = vpop.eup %4194 }
 0x2b8   :  { %v909_v5 = vadd.f32 %v908_v55, %v890_v57  ;;  %v929_v6 = vpop.f32.mrf.mxu0  ;;  %v999_v1 = vadd.f32 %v992_v61, %v991_v60  ;;  %v948_v4 = vpop.f32.mrf.mxu1  ;;  %v3337_v8 = vadd.f32 -1.0, %v4195_v0 }
 0x2b9   :  { %v930_v2 = vadd.f32 %v929_v6, %v712_v19  ;;  %4198 = vpow2.f32 %v977_v58  ;;  %v3400_v6 = vld [vmem:[#allocation6 + $0x70] sm:$0xf] }
 0x2ba   :  { %v963_v3 = vmin.f32 %v909_v5, 0.0  ;;  %1000 = vadd.xlane.f32.xlu2 %v999_v1  ;;  %v994_v22 = vsel %vm954_vm8, %v944_v38, %v3337_v8  ;;  %vm955_vm9 = vcmp.gt.f32.partialorder %v909_v5, 0.0  ;;  %v4013_v1 = vld [vmem:[#allocation6 + $0x74] sm:$0xf0]  ;;  %v3402_v8 = vld [vmem:[#allocation6 + $0x78] sm:$0xf0] }
 0x2bb   :  { %v949_v7 = vadd.f32 %v948_v4, %v930_v2  ;;  %v3464_v2 = vld [vmem:[#allocation6 + $0xf0] sm:$0xf]  ;;  %v4029_v4 = vld [vmem:[#allocation6 + $0xf4] sm:$0xf0] }
 0x2bc   :  { %v4197_v9 = vpop.eup %4196  ;;  %v975_v10 = vmul.f32 1.442695, %v963_v3  ;;  %v3401_v3 = vor.u32 %v4013_v1, %v3400_v6 }
 0x2bd   :  { %v966_v11 = vmin.f32 %v949_v7, 0.0  ;;  %v891_v14 = vpop.f32.mrf.mxu2  ;;  %v3336_v15 = vadd.f32 -1.0, %v4197_v9  ;;  %v910_v18 = vpop.f32.mrf.mxu3  ;;  %vm958_vm12 = vcmp.gt.f32.partialorder %v949_v7, 0.0  ;;  %v3465_v9 = vor.u32 %v4029_v4, %v3464_v2  ;;  %v4020_v2 = vld [vmem:[#allocation6 + $0xb4] sm:$0xf] }
 0x2be   :  { %4200 = vpow2.f32 %v975_v10  ;;  %v892_v16 = vadd.f32 %v891_v14, %v711_v26  ;;  %v3466_v14 = vld [vmem:[#allocation6 + $0xf8] sm:$0xf0]  ;;  %1329 = vmatpush.bf16.msrb.mxu2 %v3401_v3 }
 0x2bf   :  { %v981_v17 = vmul.f32 1.442695, %v966_v11  ;;  %v993_v21 = vsel %vm953_vm7, %v906_v46, %v3336_v15  ;;  %v4199_v23 = vpop.eup %4198  ;;  %v4028_v11 = vld [vmem:[#allocation6 + $0xf4] sm:$0xf]  ;;  %1348 = vmatpush.bf16.msrb.mxu3 %v3465_v9  ;;  %v3434_v3 = vld [vmem:[#allocation6 + $0xb8] sm:$0xf0] }
 0x2c0   :  { %v911_v12 = vadd.f32 %v910_v18, %v892_v16  ;;  %v1002_v13 = vadd.f32 %v994_v22, %v993_v21  ;;  %v3339_v24 = vadd.f32 -1.0, %v4199_v23  ;;  %v3469_v15 = vor.u32 %v4028_v11, %v3466_v14  ;;  %v3392_v16 = vld [vmem:[#allocation6 + $0x60] sm:$0xf]  ;;  %v4010_v23 = vld [vmem:[#allocation6 + $0x64] sm:$0xf] }
 0x2c1   :  { %4202 = vpow2.f32 %v981_v17  ;;  %v4011_v17 = vld [vmem:[#allocation6 + $0x64] sm:$0xf0]  ;;  %v3456_v18 = vld [vmem:[#allocation6 + $0xe0] sm:$0xf]  ;;  %v3437_v4 = vor.u32 %v4020_v2, %v3434_v3  ;;  %v4002_v14 = vld [vmem:[#allocation6 + $0x24] sm:$0xf] }
 0x2c2   :  { %v965_v19 = vmin.f32 %v911_v12, 0.0  ;;  %1003 = vadd.xlane.f32.xlu0 %v1002_v13  ;;  %v996_v28 = vsel %vm956_vm10, %v947_v51, %v3339_v24  ;;  %vm957_vm11 = vcmp.gt.f32.partialorder %v911_v12, 0.0  ;;  %1386 = vmatpush.bf16.msra.mxu1 %v3469_v15  ;;  %v4026_v24 = vld [vmem:[#allocation6 + $0xe4] sm:$0xf]  ;;  %v3424_v9 = vld [vmem:[#allocation6 + $0xa0] sm:$0xf] }
 0x2c3   :  { %v4019_v11 = vld [vmem:[#allocation6 + $0xa4] sm:$0xf0]  ;;  %v3362_v15 = vld [vmem:[#allocation6 + $0x28] sm:$0xf0] }
 0x2c4   :  { %v4201_v20 = vpop.eup %4200  ;;  %v979_v25 = vmul.f32 1.442695, %v965_v19 }
 0x2c5   :  { %v3338_v27 = vadd.f32 -1.0, %v4201_v20  ;;  %v3458_v20 = vld [vmem:[#allocation6 + $0xe8] sm:$0xf0] }
 0x2c6   :  { %4204 = vpow2.f32 %v979_v25  ;;  %v3461_v25 = vor.u32 %v4026_v24, %v3458_v20  ;;  %v4017_v24 = vld [vmem:[#allocation6 + $0x94] sm:$0xf0]  ;;  %v4000_v20 = vld [vmem:[#allocation6 + $0x14] sm:$0xf] }
 0x2c7   :  { %v995_v26 = vsel %vm955_vm9, %v909_v5, %v3338_v27  ;;  %v4203_v29 = vpop.eup %4202  ;;  %v3384_v27 = vld [vmem:[#allocation6 + $0x50] sm:$0xf] }
 0x2c8   :  { %v1005_v30 = vadd.f32 %v996_v28, %v995_v26  ;;  %v3341_v31 = vadd.f32 -1.0, %v4203_v29  ;;  %1387 = vmatpush.bf16.msra.mxu1 %v3461_v25  ;;  %v3354_v25 = vld [vmem:[#allocation6 + $0x18] sm:$0xf0] }
 0x2ca   :  { %1006 = vadd.xlane.f32.xlu1 %v1005_v30  ;;  %v998_v35 = vsel %vm958_vm12, %v949_v7, %v3341_v31  ;;  %v4012_v7 = vld [vmem:[#allocation6 + $0x74] sm:$0xf]  ;;  %v4025_v30 = vld [vmem:[#allocation6 + $0xd4] sm:$0xf0] }
 0x2cb   :  { %v3405_v10 = vor.u32 %v4012_v7, %v3402_v8  ;;  %v4008_v31 = vld [vmem:[#allocation6 + $0x54] sm:$0xf]  ;;  %v3360_v7 = vld [vmem:[#allocation6 + $0x20] sm:$0xf]  ;;  %v4003_v8 = vld [vmem:[#allocation6 + $0x24] sm:$0xf0] }
 0x2cc   :  { %v4205_v32 = vpop.eup %4204 }
 0x2cd   :  { %v3340_v33 = vadd.f32 -1.0, %v4205_v32  ;;  %1367 = vmatpush.bf16.msra.mxu0 %v3405_v10  ;;  %v3386_v32 = vld [vmem:[#allocation6 + $0x58] sm:$0xf0]  ;;  %v3361_v10 = vor.u32 %v4003_v8, %v3360_v7 }
 0x2cf   :  { %v997_v34 = vsel %vm957_vm11, %v911_v12, %v3340_v33  ;;  %v3394_v12 = vld [vmem:[#allocation6 + $0x68] sm:$0xf0] }
 0x2d0   :  { %v1008_v36 = vadd.f32 %v998_v35, %v997_v34  ;;  %v3397_v19 = vor.u32 %v4010_v23, %v3394_v12  ;;  %v3352_v23 = vld [vmem:[#allocation6 + $0x10] sm:$0xf]  ;;  %v4001_v12 = vld [vmem:[#allocation6 + $0x14] sm:$0xf0] }
 0x2d2   :  { %1009 = vadd.xlane.f32.xlu2 %v1008_v36  ;;  %1368 = vmatpush.bf16.msra.mxu0 %v3397_v19  ;;  %v3450_v36 = vld [vmem:[#allocation6 + $0xd8] sm:$0xf0]  ;;  %v3353_v19 = vor.u32 %v4001_v12, %v3352_v23 }
 0x32d   :  { %v1001_v37 = vpop.xlane.xlu2 %1000 }
 0x32e   :  { %v1011_v38 = vmul.f32 %v1001_v37, %v5013_v59 }
 0x330   :  { %v5074_v39 = vsub.f32 %v991_v60, %v1011_v38  ;;  %v5076_v40 = vsub.f32 %v992_v61, %v1011_v38  ;;  %v3376_v38 = vld [vmem:[#allocation6 + $0x40] sm:$0xf] }
 0x332   :  { %v1023_v41 = vmul.f32 %v5074_v39, %v5074_v39  ;;  %v1024_v42 = vmul.f32 %v5076_v40, %v5076_v40 }
 0x334   :  { %v1031_v43 = vadd.f32 %v1024_v42, %v1023_v41  ;;  %v4007_v41 = vld [vmem:[#allocation6 + $0x44] sm:$0xf0]  ;;  %v3440_v42 = vld [vmem:[#allocation6 + $0xc0] sm:$0xf] }
 0x335   :  { %v1004_v44 = vpop.xlane.xlu0 %1003 }
 0x336   :  { %v1012_v45 = vmul.f32 %v1004_v44, %v5013_v59  ;;  %1032 = vadd.xlane.f32.xlu0 %v1031_v43  ;;  %v3377_v43 = vor.u32 %v4007_v41, %v3376_v38  ;;  %v4023_v44 = vld [vmem:[#allocation6 + $0xc4] sm:$0xf0]  ;;  %v3998_v41 = vld [vmem:[#allocation6 + $0x4] sm:$0xf] }
 0x337   :  { %v4015_v38 = vld [vmem:[#allocation6 + $0x84] sm:$0xf0] }
 0x338   :  { %v5083_v46 = vsub.f32 %v993_v21, %v1012_v45  ;;  %v5085_v47 = vsub.f32 %v994_v22, %v1012_v45  ;;  %v3393_v21 = vor.u32 %v4011_v17, %v3392_v16  ;;  %v4027_v22 = vld [vmem:[#allocation6 + $0xe4] sm:$0xf0]  ;;  %v4006_v45 = vld [vmem:[#allocation6 + $0x44] sm:$0xf]  ;;  %v3425_v16 = vor.u32 %v4019_v11, %v3424_v9 }
 0x339   :  { %v3457_v13 = vor.u32 %v4027_v22, %v3456_v18  ;;  %v3365_v17 = vor.u32 %v4002_v14, %v3362_v15  ;;  %v4018_v18 = vld [vmem:[#allocation6 + $0xa4] sm:$0xf] }
 0x33a   :  { %v1025_v48 = vmul.f32 %v5083_v46, %v5083_v46  ;;  %v1026_v49 = vmul.f32 %v5085_v47, %v5085_v47  ;;  %1330 = vmatpush.bf16.msrb.mxu2 %v3393_v21  ;;  %v3426_v21 = vld [vmem:[#allocation6 + $0xa8] sm:$0xf0] }
 0x33b   :  { %1349 = vmatpush.bf16.msrb.mxu3 %v3457_v13  ;;  %v3429_v22 = vor.u32 %v4018_v18, %v3426_v21  ;;  %v3416_v13 = vld [vmem:[#allocation6 + $0x90] sm:$0xf]  ;;  %v705_v21 = vld [vmem:[%s5437_s22] sm:$0x3] }
 0x33c   :  { %v1034_v50 = vadd.f32 %v1026_v49, %v1025_v48  ;;  %v3378_v48 = vld [vmem:[#allocation6 + $0x48] sm:$0xf0]  ;;  %v3441_v49 = vor.u32 %v4023_v44, %v3440_v42  ;;  %v4014_v44 = vld [vmem:[#allocation6 + $0x84] sm:$0xf] }
 0x33d   :  { %v1007_v51 = vpop.xlane.xlu1 %1006 }
 0x33e   :  { %v1013_v62 = vmul.f32 %v1007_v51, %v5013_v59  ;;  %1035 = vadd.xlane.f32.xlu1 %v1034_v50  ;;  %v3381_v50 = vor.u32 %v4006_v45, %v3378_v48  ;;  %v4022_v51 = vld [vmem:[#allocation6 + $0xc4] sm:$0xf]  ;;  %v3410_v45 = vld [vmem:[#allocation6 + $0x88] sm:$0xf0] }
 0x340   :  { %v5092_v52 = vsub.f32 %v995_v26, %v1013_v62  ;;  %v5094_v63 = vsub.f32 %v996_v28, %v1013_v62  ;;  %v4009_v26 = vld [vmem:[#allocation6 + $0x54] sm:$0xf0]  ;;  %v3448_v28 = vld [vmem:[#allocation6 + $0xd0] sm:$0xf]  ;;  %v3442_v62 = vld [vmem:[#allocation6 + $0xc8] sm:$0xf0] }
 0x341   :  { %v3385_v29 = vor.u32 %v4009_v26, %v3384_v27  ;;  %v3449_v33 = vor.u32 %v4025_v30, %v3448_v28  ;;  %v3417_v26 = vor.u32 %v4017_v24, %v3416_v13  ;;  %v3357_v28 = vor.u32 %v4000_v20, %v3354_v25  ;;  %v3418_v30 = vld [vmem:[#allocation6 + $0x98] sm:$0xf0] }
 0x342   :  { %v1027_v53 = vmul.f32 %v5092_v52, %v5092_v52  ;;  %v1028_v54 = vmul.f32 %v5094_v63, %v5094_v63  ;;  %v1113_v24 = vperm.slane %v705_v21, 0  ;;  %v1114_v20 = vperm.slane %v705_v21, 1 }
 0x343   :  { %1331 = vmatpush.bf16.msrb.mxu2 %v3385_v29  ;;  %1350 = vmatpush.bf16.msrb.mxu3 %v3449_v33  ;;  %v4016_v29 = vld [vmem:[#allocation6 + $0x94] sm:$0xf]  ;;  %v3344_v33 = vld [vmem:[#allocation6] sm:$0xf] }
 0x344   :  { %v1037_v55 = vadd.f32 %v1028_v54, %v1027_v53  ;;  %v3445_v53 = vor.u32 %v4022_v51, %v3442_v62  ;;  %v3368_v54 = vld [vmem:[#allocation6 + $0x30] sm:$0xf] }
 0x345   :  { %v1010_v56 = vpop.xlane.xlu2 %1009 }
 0x346   :  { %v1014_v57 = vmul.f32 %v1010_v56, %v5013_v59  ;;  %1038 = vadd.xlane.f32.xlu2 %v1037_v55  ;;  %v4005_v55 = vld [vmem:[#allocation6 + $0x34] sm:$0xf0]  ;;  %v3432_v56 = vld [vmem:[#allocation6 + $0xb0] sm:$0xf] }
 0x347   :  { %1332 = vmatpush.bf16.msrb.mxu2 %v3377_v43  ;;  %1351 = vmatpush.bf16.msrb.mxu3 %v3441_v49  ;;  %v3346_v43 = vld [vmem:[#allocation6 + $0x8] sm:$0xf0]  ;;  %v3413_v49 = vor.u32 %v4014_v44, %v3410_v45 }
 0x348   :  { %v5101_v58 = vsub.f32 %v997_v34, %v1014_v57  ;;  %v5103_v60 = vsub.f32 %v998_v35, %v1014_v57  ;;  %v3389_v34 = vor.u32 %v4008_v31, %v3386_v32  ;;  %v4024_v35 = vld [vmem:[#allocation6 + $0xd4] sm:$0xf]  ;;  %v3369_v57 = vor.u32 %v4005_v55, %v3368_v54 }
 0x349   :  { %v3453_v37 = vor.u32 %v4024_v35, %v3450_v36  ;;  %v3421_v32 = vor.u32 %v4016_v29, %v3418_v30  ;;  %v3408_v35 = vld [vmem:[#allocation6 + $0x80] sm:$0xf]  ;;  %v3349_v48 = vor.u32 %v3998_v41, %v3346_v43 }
 0x34a   :  { %v1029_v61 = vmul.f32 %v5101_v58, %v5101_v58  ;;  %v1030_v0 = vmul.f32 %v5103_v60, %v5103_v60  ;;  %1369 = vmatpush.bf16.msra.mxu0 %v3389_v34  ;;  %v3999_v34 = vld [vmem:[#allocation6 + $0x4] sm:$0xf0]  ;;  %v3409_v42 = vor.u32 %v4015_v38, %v3408_v35 }
 0x34b   :  { %1388 = vmatpush.bf16.msra.mxu1 %v3453_v37  ;;  %1333 = vmatpush.bf16.msrb.mxu2 %v3369_v57  ;;  %v3345_v37 = vor.u32 %v3999_v34, %v3344_v33 }
 0x34c   :  { %v1040_v5 = vadd.f32 %v1030_v0, %v1029_v61  ;;  %v4021_v61 = vld [vmem:[#allocation6 + $0xb4] sm:$0xf0]  ;;  %v4004_v0 = vld [vmem:[#allocation6 + $0x34] sm:$0xf] }
 0x34d   :  { %v3433_v6 = vor.u32 %v4021_v61, %v3432_v56 }
 0x34e   :  { %1041 = vadd.xlane.f32.xlu0 %v1040_v5  ;;  %1370 = vmatpush.bf16.msra.mxu0 %v3381_v50  ;;  %v3370_v5 = vld [vmem:[#allocation6 + $0x38] sm:$0xf0] }
 0x34f   :  { %1389 = vmatpush.bf16.msra.mxu1 %v3445_v53  ;;  %v3373_v1 = vor.u32 %v4004_v0, %v3370_v5  ;;  %1352 = vmatpush.bf16.msrb.mxu3 %v3433_v6 }
 0x350   :  { %1334 = vmatpush.bf16.msrb.mxu2 %v3361_v10 }
 0x352   :  { %1371 = vmatpush.bf16.msra.mxu0 %v3373_v1 }
 0x353   :  { %1390 = vmatpush.bf16.msra.mxu1 %v3437_v4  ;;  %1353 = vmatpush.bf16.msrb.mxu3 %v3425_v16  ;;  %v704_v4 = vld [vmem:[%s5436_s2] sm:$0x3] }
 0x354   :  { %1335 = vmatpush.bf16.msrb.mxu2 %v3353_v19  ;;  %v1100_v14 = vperm.slane %v704_v4, 0 }
 0x356   :  { %1372 = vmatpush.bf16.msra.mxu0 %v3365_v17 }
 0x357   :  { %1391 = vmatpush.bf16.msra.mxu1 %v3429_v22  ;;  %1354 = vmatpush.bf16.msrb.mxu3 %v3417_v26  ;;  %v1101_v22 = vperm.slane %v704_v4, 1 }
 0x358   :  { %1336 = vmatpush.bf16.msrb.mxu2 %v3345_v37 }
 0x35a   :  { %1373 = vmatpush.bf16.msra.mxu0 %v3357_v28 }
 0x35b   :  { %1392 = vmatpush.bf16.msra.mxu1 %v3421_v32  ;;  %1355 = vmatpush.bf16.msrb.mxu3 %v3409_v42 }
 0x35e   :  { %1374 = vmatpush.bf16.msra.mxu0 %v3349_v48 }
 0x35f   :  { %1393 = vmatpush.bf16.msra.mxu1 %v3413_v49 }
 0x3a9   :  { %v1033_v27 = vpop.xlane.xlu0 %1032 }
 0x3aa   :  { %v1043_v31 = vmul.f32 %v1033_v27, %v5013_v59 }
 0x3ac   :  { %v1047_v36 = vadd.f32 1e-05, %v1043_v31 }
 0x3ae   :  { %4206 = vrsqrt.f32 %v1047_v36  ;;  %vm1057_vm14 = vweird.f32 %v1047_v36 }
 0x3b1   :  { %v1036_v50 = vpop.xlane.xlu1 %1035 }
 0x3b2   :  { %v1044_v51 = vmul.f32 %v1036_v50, %v5013_v59 }
 0x3b4   :  { %v4207_v62 = vpop.eup %4206  ;;  %v1048_v53 = vadd.f32 1e-05, %v1044_v51 }
 0x3b5   :  { %v1052_v54 = vmul.f32 %v4207_v62, %v1047_v36  ;;  %vm1058_vm13 = vweird.f32 %v4207_v62 }
 0x3b6   :  { %4208 = vrsqrt.f32 %v1048_v53  ;;  %vm1059_vm15 = vmor %vm1057_vm14, %vm1058_vm13  ;;  %vm1067_vm1 = vweird.f32 %v1048_v53 }
 0x3b7   :  { %v1053_v55 = vmul.f32 %v4207_v62, %v1052_v54 }
 0x3b9   :  { %v1054_v56 = vmul.f32 0.5, %v1053_v55  ;;  %v1039_v57 = vpop.xlane.xlu2 %1038 }
 0x3ba   :  { %v1045_v61 = vmul.f32 %v1039_v57, %v5013_v59 }
 0x3bb   :  { %v1055_v0 = vsub.f32 1.5, %v1054_v56 }
 0x3bc   :  { %v4209_v5 = vpop.eup %4208  ;;  %v1049_v6 = vadd.f32 1e-05, %v1045_v61 }
 0x3bd   :  { %v1056_v1 = vmul.f32 %v4207_v62, %v1055_v0  ;;  %v1062_v2 = vmul.f32 %v4209_v5, %v1048_v53  ;;  %vm1068_vm0 = vweird.f32 %v4209_v5 }
 0x3be   :  { %4210 = vrsqrt.f32 %v1049_v6  ;;  %vm1069_vm2 = vmor %vm1067_vm1, %vm1068_vm0  ;;  %vm1077_vm4 = vweird.f32 %v1049_v6 }
 0x3bf   :  { %v1063_v3 = vmul.f32 %v4209_v5, %v1062_v2  ;;  %v1060_v7 = vsel %vm1059_vm15, %v4207_v62, %v1056_v1 }
 0x3c0   :  { %v1091_v16 = vmul.f32 %v1060_v7, %v5074_v39  ;;  %v1092_v17 = vmul.f32 %v1060_v7, %v5076_v40 }
 0x3c1   :  { %v1064_v8 = vmul.f32 0.5, %v1063_v3  ;;  %v1042_v9 = vpop.xlane.xlu0 %1041 }
 0x3c2   :  { %v1046_v10 = vmul.f32 %v1042_v9, %v5013_v59  ;;  %v1104_v40 = vmul.f32 %v1100_v14, %v1091_v16  ;;  %v1105_v27 = vmul.f32 %v1101_v22, %v1092_v17 }
 0x3c3   :  { %v1065_v11 = vsub.f32 1.5, %v1064_v8 }
 0x3c4   :  { %v4211_v15 = vpop.eup %4210  ;;  %v1050_v18 = vadd.f32 1e-05, %v1046_v10  ;;  %v1117_v32 = vadd.f32 %v1113_v24, %v1104_v40  ;;  %v1118_v34 = vadd.f32 %v1114_v20, %v1105_v27 }
 0x3c5   :  { %v1066_v23 = vmul.f32 %v4209_v5, %v1065_v11  ;;  %v1072_v12 = vmul.f32 %v4211_v15, %v1049_v6  ;;  %vm1078_vm3 = vweird.f32 %v4211_v15 }
 0x3c6   :  { %4212 = vrsqrt.f32 %v1050_v18  ;;  %vm1079_vm5 = vmor %vm1077_vm4, %vm1078_vm3  ;;  %vm1087_vm7 = vweird.f32 %v1050_v18 }
 0x3c7   :  { %v1070_v13 = vsel %vm1069_vm2, %v4209_v5, %v1066_v23  ;;  %v1073_v19 = vmul.f32 %v4211_v15, %v1072_v12 }
 0x3c8   :  { %v1093_v25 = vmul.f32 %v1070_v13, %v5083_v46  ;;  %v1094_v39 = vmul.f32 %v1070_v13, %v5085_v47 }
 0x3c9   :  { %v1074_v26 = vmul.f32 0.5, %v1073_v19 }
 0x3ca   :  { %v1106_v28 = vmul.f32 %v1100_v14, %v1093_v25  ;;  %v1107_v29 = vmul.f32 %v1101_v22, %v1094_v39 }
 0x3cb   :  { %v1075_v30 = vsub.f32 1.5, %v1074_v26 }
 0x3cc   :  { %v4213_v31 = vpop.eup %4212  ;;  %v1119_v33 = vadd.f32 %v1113_v24, %v1106_v28  ;;  %v1120_v35 = vadd.f32 %v1114_v20, %v1107_v29 }
 0x3cd   :  { %v1076_v36 = vmul.f32 %v4211_v15, %v1075_v30  ;;  %v1082_v37 = vmul.f32 %v4213_v31, %v1050_v18  ;;  %vm1088_vm6 = vweird.f32 %v4213_v31 }
 0x3ce   :  { %v1160_v38 = vpack.c.bf16 %v1119_v33, %v1117_v32  ;;  %v1161_v41 = vpack.c.bf16 %v1120_v35, %v1118_v34  ;;  %vm1089_vm8 = vmor %vm1087_vm7, %vm1088_vm6 }
 0x3cf   :  { %v1083_v46 = vmul.f32 %v4213_v31, %v1082_v37  ;;  %v1080_v42 = vsel %vm1079_vm5, %v4211_v15, %v1076_v36 }
 0x3d0   :  { %1337 = vmatmul.bf16.vlgmr.msrb.gmra.mxu2 %v1160_v38  ;;  %1356 = vmatmul.bf16.vlgmr.msrb.gmra.mxu3 %v1161_v41  ;;  %v1095_v44 = vmul.f32 %v1080_v42, %v5092_v52  ;;  %v1096_v45 = vmul.f32 %v1080_v42, %v5094_v63  ;;  %v1157_v63 = vld [vmem:[%s5438_s24] sm:$0x3] }
 0x3d1   :  { %v1084_v47 = vmul.f32 0.5, %v1083_v46  ;;  %1375 = vmatmul.bf16.vlgmr.msra.gmra.mxu0 %v1160_v38  ;;  %1394 = vmatmul.bf16.vlgmr.msra.gmra.mxu1 %v1161_v41  ;;  %v1165_v2 = vperm.slane %v1157_v63, 0 }
 0x3d2   :  { %v1108_v51 = vmul.f32 %v1100_v14, %v1095_v44  ;;  %v1109_v53 = vmul.f32 %v1101_v22, %v1096_v45 }
 0x3d3   :  { %v1085_v43 = vsub.f32 1.5, %v1084_v47 }
 0x3d4   :  { %v1121_v56 = vadd.f32 %v1113_v24, %v1108_v51  ;;  %v1122_v61 = vadd.f32 %v1114_v20, %v1109_v53 }
 0x3d5   :  { %v1086_v48 = vmul.f32 %v4213_v31, %v1085_v43 }
 0x3d7   :  { %v1090_v49 = vsel %vm1089_vm8, %v4213_v31, %v1086_v48 }
 0x3d8   :  { %v1097_v50 = vmul.f32 %v1090_v49, %v5101_v58  ;;  %v1098_v62 = vmul.f32 %v1090_v49, %v5103_v60  ;;  %v1166_v58 = vperm.slane %v1157_v63, 1 }
 0x3da   :  { %v1110_v54 = vmul.f32 %v1100_v14, %v1097_v50  ;;  %v1111_v55 = vmul.f32 %v1101_v22, %v1098_v62 }
 0x3dc   :  { %v1123_v57 = vadd.f32 %v1113_v24, %v1110_v54  ;;  %v1124_v0 = vadd.f32 %v1114_v20, %v1111_v55 }
 0x3de   :  { %v1162_v5 = vpack.c.bf16 %v1123_v57, %v1121_v56  ;;  %v1163_v52 = vpack.c.bf16 %v1124_v0, %v1122_v61 }
 0x3e0   :  { %1342 = vmatmul.bf16.gmra.mxu2 %v1162_v5  ;;  %1361 = vmatmul.bf16.gmra.mxu3 %v1163_v52 }
 0x3e1   :  { %1380 = vmatmul.bf16.gmra.mxu0 %v1162_v5  ;;  %1399 = vmatmul.bf16.gmra.mxu1 %v1163_v52 }
 0x44e   :  { %v1376_v6 = vpop.f32.mrf.mxu0  ;;  %v1395_v60 = vpop.f32.mrf.mxu1 }
 0x44f   :  { %v1377_v1 = vadd.f32 %v1376_v6, %v1166_v58 }
 0x451   :  { %v1396_v3 = vadd.f32 %v1395_v60, %v1377_v1 }
 0x453   :  { %v1414_v4 = vmin.f32 %v1396_v3, 0.0  ;;  %v1338_v7 = vpop.f32.mrf.mxu2  ;;  %v1357_v8 = vpop.f32.mrf.mxu3  ;;  %vm1406_vm10 = vcmp.gt.f32.partialorder %v1396_v3, 0.0 }
 0x454   :  { %v1339_v9 = vadd.f32 %v1338_v7, %v1165_v2 }
 0x455   :  { %v1423_v10 = vmul.f32 1.442695, %v1414_v4 }
 0x456   :  { %v1358_v11 = vadd.f32 %v1357_v8, %v1339_v9  ;;  %v1378_v14 = vpop.f32.mrf.mxu0  ;;  %v1397_v15 = vpop.f32.mrf.mxu1 }
 0x457   :  { %v1379_v16 = vadd.f32 %v1378_v14, %v1166_v58  ;;  %4214 = vpow2.f32 %v1423_v10 }
 0x458   :  { %v1413_v17 = vmin.f32 %v1358_v11, 0.0  ;;  %vm1405_vm9 = vcmp.gt.f32.partialorder %v1358_v11, 0.0 }
 0x459   :  { %v1398_v18 = vadd.f32 %v1397_v15, %v1379_v16 }
 0x45a   :  { %v1421_v21 = vmul.f32 1.442695, %v1413_v17 }
 0x45b   :  { %v1416_v22 = vmin.f32 %v1398_v18, 0.0  ;;  %v1340_v23 = vpop.f32.mrf.mxu2  ;;  %v1359_v12 = vpop.f32.mrf.mxu3  ;;  %vm1408_vm12 = vcmp.gt.f32.partialorder %v1398_v18, 0.0 }
 0x45c   :  { %4216 = vpow2.f32 %v1421_v21  ;;  %v1341_v13 = vadd.f32 %v1340_v23, %v1165_v2 }
 0x45d   :  { %v1427_v19 = vmul.f32 1.442695, %v1416_v22  ;;  %v4215_v24 = vpop.eup %4214 }
 0x45e   :  { %v1360_v20 = vadd.f32 %v1359_v12, %v1341_v13  ;;  %v1381_v25 = vpop.f32.mrf.mxu0  ;;  %v1400_v39 = vpop.f32.mrf.mxu1  ;;  %v3471_v28 = vadd.f32 -1.0, %v4215_v24 }
 0x45f   :  { %v1382_v40 = vadd.f32 %v1381_v25, %v1166_v58  ;;  %4218 = vpow2.f32 %v1427_v19 }
 0x460   :  { %v1415_v27 = vmin.f32 %v1360_v20, 0.0  ;;  %v1446_v38 = vsel %vm1406_vm10, %v1396_v3, %v3471_v28  ;;  %vm1407_vm11 = vcmp.gt.f32.partialorder %v1360_v20, 0.0 }
 0x461   :  { %v1401_v26 = vadd.f32 %v1400_v39, %v1382_v40 }
 0x462   :  { %v4217_v29 = vpop.eup %4216  ;;  %v1425_v30 = vmul.f32 1.442695, %v1415_v27 }
 0x463   :  { %v1418_v31 = vmin.f32 %v1401_v26, 0.0  ;;  %v1343_v32 = vpop.f32.mrf.mxu2  ;;  %v1362_v33 = vpop.f32.mrf.mxu3  ;;  %v3470_v34 = vadd.f32 -1.0, %v4217_v29  ;;  %vm1410_vm14 = vcmp.gt.f32.partialorder %v1401_v26, 0.0 }
 0x464   :  { %4220 = vpow2.f32 %v1425_v30  ;;  %v1344_v35 = vadd.f32 %v1343_v32, %v1165_v2 }
 0x465   :  { %v1431_v36 = vmul.f32 1.442695, %v1418_v31  ;;  %v1445_v37 = vsel %vm1405_vm9, %v1358_v11, %v3470_v34  ;;  %v4219_v41 = vpop.eup %4218 }
 0x466   :  { %v1363_v46 = vadd.f32 %v1362_v33, %v1344_v35  ;;  %v1383_v47 = vpop.f32.mrf.mxu0  ;;  %v1453_v42 = vadd.f32 %v1446_v38, %v1445_v37  ;;  %v1402_v45 = vpop.f32.mrf.mxu1  ;;  %v3473_v49 = vadd.f32 -1.0, %v4219_v41 }
 0x467   :  { %v1384_v43 = vadd.f32 %v1383_v47, %v1166_v58  ;;  %4222 = vpow2.f32 %v1431_v36  ;;  %v3536_v47 = vld [vmem:[#allocation10 + $0x70] sm:$0xf] }
 0x468   :  { %v1417_v44 = vmin.f32 %v1363_v46, 0.0  ;;  %1454 = vadd.xlane.f32.xlu1 %v1453_v42  ;;  %v1448_v0 = vsel %vm1408_vm12, %v1398_v18, %v3473_v49  ;;  %vm1409_vm13 = vcmp.gt.f32.partialorder %v1363_v46, 0.0  ;;  %v4045_v42 = vld [vmem:[#allocation10 + $0x74] sm:$0xf0]  ;;  %v3538_v49 = vld [vmem:[#allocation10 + $0x78] sm:$0xf0] }
 0x469   :  { %v1403_v48 = vadd.f32 %v1402_v45, %v1384_v43  ;;  %v3600_v43 = vld [vmem:[#allocation10 + $0xf0] sm:$0xf]  ;;  %v4061_v45 = vld [vmem:[#allocation10 + $0xf4] sm:$0xf0] }
 0x46a   :  { %v4221_v50 = vpop.eup %4220  ;;  %v1429_v51 = vmul.f32 1.442695, %v1417_v44  ;;  %v3537_v44 = vor.u32 %v4045_v42, %v3536_v47 }
 0x46b   :  { %v1420_v62 = vmin.f32 %v1403_v48, 0.0  ;;  %v1345_v53 = vpop.f32.mrf.mxu2  ;;  %v3472_v54 = vadd.f32 -1.0, %v4221_v50  ;;  %v1364_v57 = vpop.f32.mrf.mxu3  ;;  %vm1412_vm0 = vcmp.gt.f32.partialorder %v1403_v48, 0.0  ;;  %v3601_v50 = vor.u32 %v4061_v45, %v3600_v43  ;;  %v4052_v43 = vld [vmem:[#allocation10 + $0xb4] sm:$0xf] }
 0x46c   :  { %4224 = vpow2.f32 %v1429_v51  ;;  %v1346_v55 = vadd.f32 %v1345_v53, %v1165_v2  ;;  %v3602_v53 = vld [vmem:[#allocation10 + $0xf8] sm:$0xf0]  ;;  %1783 = vmatpush.bf16.msra.mxu2 %v3537_v44 }
 0x46d   :  { %v1435_v56 = vmul.f32 1.442695, %v1420_v62  ;;  %v1447_v61 = vsel %vm1407_vm11, %v1360_v20, %v3472_v54  ;;  %v4223_v5 = vpop.eup %4222  ;;  %v4060_v62 = vld [vmem:[#allocation10 + $0xf4] sm:$0xf]  ;;  %1802 = vmatpush.bf16.msra.mxu3 %v3601_v50  ;;  %v3570_v44 = vld [vmem:[#allocation10 + $0xb8] sm:$0xf0] }
 0x46e   :  { %v1365_v52 = vadd.f32 %v1364_v57, %v1346_v55  ;;  %v1456_v63 = vadd.f32 %v1448_v0, %v1447_v61  ;;  %v3475_v6 = vadd.f32 -1.0, %v4223_v5  ;;  %v3605_v54 = vor.u32 %v4060_v62, %v3602_v53  ;;  %v3528_v55 = vld [vmem:[#allocation10 + $0x60] sm:$0xf]  ;;  %v4042_v5 = vld [vmem:[#allocation10 + $0x64] sm:$0xf] }
 0x46f   :  { %4226 = vpow2.f32 %v1435_v56  ;;  %v4043_v56 = vld [vmem:[#allocation10 + $0x64] sm:$0xf0]  ;;  %v3592_v57 = vld [vmem:[#allocation10 + $0xe0] sm:$0xf]  ;;  %v3573_v45 = vor.u32 %v4052_v43, %v3570_v44  ;;  %v4034_v53 = vld [vmem:[#allocation10 + $0x24] sm:$0xf] }
 0x470   :  { %v1419_v58 = vmin.f32 %v1365_v52, 0.0  ;;  %1457 = vadd.xlane.f32.xlu2 %v1456_v63  ;;  %v1450_v4 = vsel %vm1410_vm14, %v1401_v26, %v3475_v6  ;;  %vm1411_vm15 = vcmp.gt.f32.partialorder %v1365_v52, 0.0  ;;  %1840 = vmatpush.bf16.msrb.mxu1 %v3605_v54  ;;  %v4058_v6 = vld [vmem:[#allocation10 + $0xe4] sm:$0xf]  ;;  %v3560_v50 = vld [vmem:[#allocation10 + $0xa0] sm:$0xf] }
 0x471   :  { %v4051_v62 = vld [vmem:[#allocation10 + $0xa4] sm:$0xf0]  ;;  %v3498_v54 = vld [vmem:[#allocation10 + $0x28] sm:$0xf0] }
 0x472   :  { %v4225_v60 = vpop.eup %4224  ;;  %v1433_v1 = vmul.f32 1.442695, %v1419_v58 }
 0x473   :  { %v3474_v3 = vadd.f32 -1.0, %v4225_v60  ;;  %v3594_v60 = vld [vmem:[#allocation10 + $0xe8] sm:$0xf0] }
 0x474   :  { %4228 = vpow2.f32 %v1433_v1  ;;  %v3597_v1 = vor.u32 %v4058_v6, %v3594_v60  ;;  %v4049_v6 = vld [vmem:[#allocation10 + $0x94] sm:$0xf0]  ;;  %v4032_v60 = vld [vmem:[#allocation10 + $0x14] sm:$0xf] }
 0x475   :  { %v1449_v2 = vsel %vm1409_vm13, %v1363_v46, %v3474_v3  ;;  %v4227_v7 = vpop.eup %4226  ;;  %v3520_v3 = vld [vmem:[#allocation10 + $0x50] sm:$0xf] }
 0x476   :  { %v1459_v8 = vadd.f32 %v1450_v4, %v1449_v2  ;;  %v3477_v9 = vadd.f32 -1.0, %v4227_v7  ;;  %1841 = vmatpush.bf16.msrb.mxu1 %v3597_v1  ;;  %v3490_v1 = vld [vmem:[#allocation10 + $0x18] sm:$0xf0] }
 0x478   :  { %1460 = vadd.xlane.f32.xlu0 %v1459_v8  ;;  %v1452_v15 = vsel %vm1412_vm0, %v1403_v48, %v3477_v9  ;;  %v4044_v48 = vld [vmem:[#allocation10 + $0x74] sm:$0xf]  ;;  %v4057_v8 = vld [vmem:[#allocation10 + $0xd4] sm:$0xf0] }
 0x479   :  { %v3541_v51 = vor.u32 %v4044_v48, %v3538_v49  ;;  %v4040_v9 = vld [vmem:[#allocation10 + $0x54] sm:$0xf]  ;;  %v3496_v48 = vld [vmem:[#allocation10 + $0x20] sm:$0xf]  ;;  %v4035_v49 = vld [vmem:[#allocation10 + $0x24] sm:$0xf0] }
 0x47a   :  { %v4229_v10 = vpop.eup %4228 }
 0x47b   :  { %v3476_v11 = vadd.f32 -1.0, %v4229_v10  ;;  %1821 = vmatpush.bf16.msrb.mxu0 %v3541_v51  ;;  %v3522_v10 = vld [vmem:[#allocation10 + $0x58] sm:$0xf0]  ;;  %v3497_v51 = vor.u32 %v4035_v49, %v3496_v48 }
 0x47d   :  { %v1451_v14 = vsel %vm1411_vm15, %v1365_v52, %v3476_v11  ;;  %v3530_v52 = vld [vmem:[#allocation10 + $0x68] sm:$0xf0] }
 0x47e   :  { %v1462_v16 = vadd.f32 %v1452_v15, %v1451_v14  ;;  %v3533_v58 = vor.u32 %v4042_v5, %v3530_v52  ;;  %v3488_v5 = vld [vmem:[#allocation10 + $0x10] sm:$0xf]  ;;  %v4033_v52 = vld [vmem:[#allocation10 + $0x14] sm:$0xf0] }
 0x480   :  { %1463 = vadd.xlane.f32.xlu1 %v1462_v16  ;;  %1822 = vmatpush.bf16.msrb.mxu0 %v3533_v58  ;;  %v3586_v16 = vld [vmem:[#allocation10 + $0xd8] sm:$0xf0]  ;;  %v3489_v58 = vor.u32 %v4033_v52, %v3488_v5 }
 0x4db   :  { %v1455_v17 = vpop.xlane.xlu1 %1454 }
 0x4dc   :  { %v1465_v18 = vmul.f32 %v1455_v17, %v5013_v59 }
 0x4de   :  { %v5131_v21 = vsub.f32 %v1445_v37, %v1465_v18  ;;  %v5133_v22 = vsub.f32 %v1446_v38, %v1465_v18  ;;  %v3512_v18 = vld [vmem:[#allocation10 + $0x40] sm:$0xf] }
 0x4e0   :  { %v1477_v23 = vmul.f32 %v5131_v21, %v5131_v21  ;;  %v1478_v12 = vmul.f32 %v5133_v22, %v5133_v22 }
 0x4e2   :  { %v1485_v13 = vadd.f32 %v1478_v12, %v1477_v23  ;;  %v4039_v23 = vld [vmem:[#allocation10 + $0x44] sm:$0xf0]  ;;  %v3576_v12 = vld [vmem:[#allocation10 + $0xc0] sm:$0xf] }
 0x4e3   :  { %v1458_v19 = vpop.xlane.xlu2 %1457 }
 0x4e4   :  { %v1466_v24 = vmul.f32 %v1458_v19, %v5013_v59  ;;  %1486 = vadd.xlane.f32.xlu2 %v1485_v13  ;;  %v3513_v13 = vor.u32 %v4039_v23, %v3512_v18  ;;  %v4055_v19 = vld [vmem:[#allocation10 + $0xc4] sm:$0xf0]  ;;  %v4030_v23 = vld [vmem:[#allocation10 + $0x4] sm:$0xf] }
 0x4e5   :  { %v4047_v18 = vld [vmem:[#allocation10 + $0x84] sm:$0xf0] }
 0x4e6   :  { %v5140_v20 = vsub.f32 %v1447_v61, %v1466_v24  ;;  %v5142_v25 = vsub.f32 %v1448_v0, %v1466_v24  ;;  %v3529_v61 = vor.u32 %v4043_v56, %v3528_v55  ;;  %v4059_v0 = vld [vmem:[#allocation10 + $0xe4] sm:$0xf0]  ;;  %v4038_v24 = vld [vmem:[#allocation10 + $0x44] sm:$0xf]  ;;  %v3561_v55 = vor.u32 %v4051_v62, %v3560_v50 }
 0x4e7   :  { %v3593_v63 = vor.u32 %v4059_v0, %v3592_v57  ;;  %v3501_v56 = vor.u32 %v4034_v53, %v3498_v54  ;;  %v4050_v57 = vld [vmem:[#allocation10 + $0xa4] sm:$0xf] }
 0x4e8   :  { %v1479_v39 = vmul.f32 %v5140_v20, %v5140_v20  ;;  %v1480_v40 = vmul.f32 %v5142_v25, %v5142_v25  ;;  %1784 = vmatpush.bf16.msra.mxu2 %v3529_v61  ;;  %v3562_v61 = vld [vmem:[#allocation10 + $0xa8] sm:$0xf0] }
 0x4e9   :  { %1803 = vmatpush.bf16.msra.mxu3 %v3593_v63  ;;  %v3565_v0 = vor.u32 %v4050_v57, %v3562_v61  ;;  %v3552_v63 = vld [vmem:[#allocation10 + $0x90] sm:$0xf]  ;;  %v1159_v61 = vld [vmem:[#allocation9] sm:$0x3] }
 0x4ea   :  { %v1488_v27 = vadd.f32 %v1480_v40, %v1479_v39  ;;  %v3514_v39 = vld [vmem:[#allocation10 + $0x48] sm:$0xf0]  ;;  %v3577_v40 = vor.u32 %v4055_v19, %v3576_v12  ;;  %v4046_v19 = vld [vmem:[#allocation10 + $0x84] sm:$0xf] }
 0x4eb   :  { %v1461_v26 = vpop.xlane.xlu0 %1460 }
 0x4ec   :  { %v1467_v28 = vmul.f32 %v1461_v26, %v5013_v59  ;;  %1489 = vadd.xlane.f32.xlu0 %v1488_v27  ;;  %v3517_v27 = vor.u32 %v4038_v24, %v3514_v39  ;;  %v4054_v26 = vld [vmem:[#allocation10 + $0xc4] sm:$0xf]  ;;  %v3546_v24 = vld [vmem:[#allocation10 + $0x88] sm:$0xf0] }
 0x4ee   :  { %v5149_v29 = vsub.f32 %v1449_v2, %v1467_v28  ;;  %v5151_v30 = vsub.f32 %v1450_v4, %v1467_v28  ;;  %v4041_v2 = vld [vmem:[#allocation10 + $0x54] sm:$0xf0]  ;;  %v3584_v4 = vld [vmem:[#allocation10 + $0xd0] sm:$0xf]  ;;  %v3578_v28 = vld [vmem:[#allocation10 + $0xc8] sm:$0xf0] }
 0x4ef   :  { %v3521_v7 = vor.u32 %v4041_v2, %v3520_v3  ;;  %v3585_v11 = vor.u32 %v4057_v8, %v3584_v4  ;;  %v3553_v2 = vor.u32 %v4049_v6, %v3552_v63  ;;  %v3493_v4 = vor.u32 %v4032_v60, %v3490_v1  ;;  %v3554_v8 = vld [vmem:[#allocation10 + $0x98] sm:$0xf0] }
 0x4f0   :  { %v1481_v31 = vmul.f32 %v5149_v29, %v5149_v29  ;;  %v1482_v32 = vmul.f32 %v5151_v30, %v5151_v30  ;;  %v1567_v6 = vperm.slane %v1159_v61, 0  ;;  %v1568_v60 = vperm.slane %v1159_v61, 1 }
 0x4f1   :  { %1785 = vmatpush.bf16.msra.mxu2 %v3521_v7  ;;  %1804 = vmatpush.bf16.msra.mxu3 %v3585_v11  ;;  %v4048_v7 = vld [vmem:[#allocation10 + $0x94] sm:$0xf]  ;;  %v3480_v11 = vld [vmem:[#allocation10] sm:$0xf] }
 0x4f2   :  { %v1491_v33 = vadd.f32 %v1482_v32, %v1481_v31  ;;  %v3581_v31 = vor.u32 %v4054_v26, %v3578_v28  ;;  %v3504_v32 = vld [vmem:[#allocation10 + $0x30] sm:$0xf] }
 0x4f3   :  { %v1464_v34 = vpop.xlane.xlu1 %1463 }
 0x4f4   :  { %v1468_v35 = vmul.f32 %v1464_v34, %v5013_v59  ;;  %1492 = vadd.xlane.f32.xlu1 %v1491_v33  ;;  %v4037_v33 = vld [vmem:[#allocation10 + $0x34] sm:$0xf0]  ;;  %v3568_v34 = vld [vmem:[#allocation10 + $0xb0] sm:$0xf] }
 0x4f5   :  { %1786 = vmatpush.bf16.msra.mxu2 %v3513_v13  ;;  %1805 = vmatpush.bf16.msra.mxu3 %v3577_v40  ;;  %v3482_v13 = vld [vmem:[#allocation10 + $0x8] sm:$0xf0]  ;;  %v3549_v40 = vor.u32 %v4046_v19, %v3546_v24 }
 0x4f6   :  { %v5158_v36 = vsub.f32 %v1451_v14, %v1468_v35  ;;  %v5160_v37 = vsub.f32 %v1452_v15, %v1468_v35  ;;  %v3525_v14 = vor.u32 %v4040_v9, %v3522_v10  ;;  %v4056_v15 = vld [vmem:[#allocation10 + $0xd4] sm:$0xf]  ;;  %v3505_v35 = vor.u32 %v4037_v33, %v3504_v32 }
 0x4f7   :  { %v3589_v17 = vor.u32 %v4056_v15, %v3586_v16  ;;  %v3557_v10 = vor.u32 %v4048_v7, %v3554_v8  ;;  %v3544_v15 = vld [vmem:[#allocation10 + $0x80] sm:$0xf]  ;;  %v3485_v39 = vor.u32 %v4030_v23, %v3482_v13 }
 0x4f8   :  { %v1483_v38 = vmul.f32 %v5158_v36, %v5158_v36  ;;  %v1484_v41 = vmul.f32 %v5160_v37, %v5160_v37  ;;  %1823 = vmatpush.bf16.msrb.mxu0 %v3525_v14  ;;  %v4031_v14 = vld [vmem:[#allocation10 + $0x4] sm:$0xf0]  ;;  %v3545_v12 = vor.u32 %v4047_v18, %v3544_v15 }
 0x4f9   :  { %1842 = vmatpush.bf16.msrb.mxu1 %v3589_v17  ;;  %1787 = vmatpush.bf16.msra.mxu2 %v3505_v35  ;;  %v3481_v17 = vor.u32 %v4031_v14, %v3480_v11 }
 0x4fa   :  { %v1494_v46 = vadd.f32 %v1484_v41, %v1483_v38  ;;  %v4053_v38 = vld [vmem:[#allocation10 + $0xb4] sm:$0xf0]  ;;  %v4036_v41 = vld [vmem:[#allocation10 + $0x34] sm:$0xf] }
 0x4fb   :  { %v3569_v47 = vor.u32 %v4053_v38, %v3568_v34 }
 0x4fc   :  { %1495 = vadd.xlane.f32.xlu2 %v1494_v46  ;;  %1824 = vmatpush.bf16.msrb.mxu0 %v3517_v27  ;;  %v3506_v46 = vld [vmem:[#allocation10 + $0x38] sm:$0xf0] }
 0x4fd   :  { %1843 = vmatpush.bf16.msrb.mxu1 %v3581_v31  ;;  %v3509_v42 = vor.u32 %v4036_v41, %v3506_v46  ;;  %1806 = vmatpush.bf16.msra.mxu3 %v3569_v47 }
 0x4fe   :  { %1788 = vmatpush.bf16.msra.mxu2 %v3497_v51 }
 0x500   :  { %1825 = vmatpush.bf16.msrb.mxu0 %v3509_v42 }
 0x501   :  { %1844 = vmatpush.bf16.msrb.mxu1 %v3573_v45  ;;  %1807 = vmatpush.bf16.msra.mxu3 %v3561_v55  ;;  %v1158_v45 = vld [vmem:[#allocation7] sm:$0x3] }
 0x502   :  { %1789 = vmatpush.bf16.msra.mxu2 %v3489_v58  ;;  %v1554_v53 = vperm.slane %v1158_v45, 0 }
 0x504   :  { %1826 = vmatpush.bf16.msrb.mxu0 %v3501_v56 }
 0x505   :  { %1845 = vmatpush.bf16.msrb.mxu1 %v3565_v0  ;;  %1808 = vmatpush.bf16.msra.mxu3 %v3553_v2  ;;  %v1555_v0 = vperm.slane %v1158_v45, 1 }
 0x506   :  { %1790 = vmatpush.bf16.msra.mxu2 %v3481_v17 }
 0x508   :  { %1827 = vmatpush.bf16.msrb.mxu0 %v3493_v4 }
 0x509   :  { %1846 = vmatpush.bf16.msrb.mxu1 %v3557_v10  ;;  %1809 = vmatpush.bf16.msra.mxu3 %v3545_v12 }
 0x50c   :  { %1828 = vmatpush.bf16.msrb.mxu0 %v3485_v39 }
 0x50d   :  { %1847 = vmatpush.bf16.msrb.mxu1 %v3549_v40 }
 0x557   :  { %v1487_v3 = vpop.xlane.xlu2 %1486 }
 0x558   :  { %v1497_v9 = vmul.f32 %v1487_v3, %v5013_v59 }
 0x55a   :  { %v1501_v16 = vadd.f32 1e-05, %v1497_v9 }
 0x55c   :  { %4230 = vrsqrt.f32 %v1501_v16  ;;  %vm1511_vm2 = vweird.f32 %v1501_v16 }
 0x55f   :  { %v1490_v27 = vpop.xlane.xlu0 %1489 }
 0x560   :  { %v1498_v26 = vmul.f32 %v1490_v27, %v5013_v59 }
 0x562   :  { %v4231_v28 = vpop.eup %4230  ;;  %v1502_v31 = vadd.f32 1e-05, %v1498_v26 }
 0x563   :  { %v1506_v32 = vmul.f32 %v4231_v28, %v1501_v16  ;;  %vm1512_vm1 = vweird.f32 %v4231_v28 }
 0x564   :  { %4232 = vrsqrt.f32 %v1502_v31  ;;  %vm1513_vm3 = vmor %vm1511_vm2, %vm1512_vm1  ;;  %vm1521_vm5 = vweird.f32 %v1502_v31 }
 0x565   :  { %v1507_v33 = vmul.f32 %v4231_v28, %v1506_v32 }
 0x567   :  { %v1508_v34 = vmul.f32 0.5, %v1507_v33  ;;  %v1493_v35 = vpop.xlane.xlu1 %1492 }
 0x568   :  { %v1499_v38 = vmul.f32 %v1493_v35, %v5013_v59 }
 0x569   :  { %v1509_v41 = vsub.f32 1.5, %v1508_v34 }
 0x56a   :  { %v4233_v46 = vpop.eup %4232  ;;  %v1503_v47 = vadd.f32 1e-05, %v1499_v38 }
 0x56b   :  { %v1510_v42 = vmul.f32 %v4231_v28, %v1509_v41  ;;  %v1516_v43 = vmul.f32 %v4233_v46, %v1502_v31  ;;  %vm1522_vm4 = vweird.f32 %v4233_v46 }
 0x56c   :  { %4234 = vrsqrt.f32 %v1503_v47  ;;  %vm1523_vm6 = vmor %vm1521_vm5, %vm1522_vm4  ;;  %vm1531_vm8 = vweird.f32 %v1503_v47 }
 0x56d   :  { %v1517_v44 = vmul.f32 %v4233_v46, %v1516_v43  ;;  %v1514_v48 = vsel %vm1513_vm3, %v4231_v28, %v1510_v42 }
 0x56e   :  { %v1545_v55 = vmul.f32 %v1514_v48, %v5131_v21  ;;  %v1546_v56 = vmul.f32 %v1514_v48, %v5133_v22 }
 0x56f   :  { %v1518_v49 = vmul.f32 0.5, %v1517_v44  ;;  %v1496_v50 = vpop.xlane.xlu2 %1495 }
 0x570   :  { %v1500_v51 = vmul.f32 %v1496_v50, %v5013_v59  ;;  %v1558_v2 = vmul.f32 %v1554_v53, %v1545_v55  ;;  %v1559_v21 = vmul.f32 %v1555_v0, %v1546_v56 }
 0x571   :  { %v1519_v62 = vsub.f32 1.5, %v1518_v49 }
 0x572   :  { %v4235_v54 = vpop.eup %4234  ;;  %v1504_v57 = vadd.f32 1e-05, %v1500_v51  ;;  %v1571_v10 = vadd.f32 %v1567_v6, %v1558_v2  ;;  %v1572_v14 = vadd.f32 %v1568_v60, %v1559_v21 }
 0x573   :  { %v1520_v5 = vmul.f32 %v4233_v46, %v1519_v62  ;;  %v1526_v52 = vmul.f32 %v4235_v54, %v1503_v47  ;;  %vm1532_vm7 = vweird.f32 %v4235_v54 }
 0x574   :  { %4236 = vrsqrt.f32 %v1504_v57  ;;  %vm1533_vm9 = vmor %vm1531_vm8, %vm1532_vm7  ;;  %vm1541_vm11 = vweird.f32 %v1504_v57 }
 0x575   :  { %v1524_v63 = vsel %vm1523_vm6, %v4233_v46, %v1520_v5  ;;  %v1527_v58 = vmul.f32 %v4235_v54, %v1526_v52 }
 0x576   :  { %v1547_v1 = vmul.f32 %v1524_v63, %v5140_v20  ;;  %v1548_v3 = vmul.f32 %v1524_v63, %v5142_v25 }
 0x577   :  { %v1528_v4 = vmul.f32 0.5, %v1527_v58 }
 0x578   :  { %v1560_v22 = vmul.f32 %v1554_v53, %v1547_v1  ;;  %v1561_v7 = vmul.f32 %v1555_v0, %v1548_v3 }
 0x579   :  { %v1529_v8 = vsub.f32 1.5, %v1528_v4 }
 0x57a   :  { %v4237_v9 = vpop.eup %4236  ;;  %v1573_v11 = vadd.f32 %v1567_v6, %v1560_v22  ;;  %v1574_v15 = vadd.f32 %v1568_v60, %v1561_v7 }
 0x57b   :  { %v1530_v16 = vmul.f32 %v4235_v54, %v1529_v8  ;;  %v1536_v17 = vmul.f32 %v4237_v9, %v1504_v57  ;;  %vm1542_vm10 = vweird.f32 %v4237_v9 }
 0x57c   :  { %v1614_v18 = vpack.c.bf16 %v1573_v11, %v1571_v10  ;;  %v1615_v23 = vpack.c.bf16 %v1574_v15, %v1572_v14  ;;  %vm1543_vm12 = vmor %vm1541_vm11, %vm1542_vm10 }
 0x57d   :  { %v1537_v20 = vmul.f32 %v4237_v9, %v1536_v17  ;;  %v1534_v12 = vsel %vm1533_vm9, %v4235_v54, %v1530_v16 }
 0x57e   :  { %1791 = vmatmul.bf16.vlgmr.msra.gmra.mxu2 %v1614_v18  ;;  %1810 = vmatmul.bf16.vlgmr.msra.gmra.mxu3 %v1615_v23  ;;  %v1549_v19 = vmul.f32 %v1534_v12, %v5149_v29  ;;  %v1550_v24 = vmul.f32 %v1534_v12, %v5151_v30  ;;  %v1611_v30 = vld [vmem:[#allocation12] sm:$0x3] }
 0x57f   :  { %v1538_v25 = vmul.f32 0.5, %v1537_v20  ;;  %1829 = vmatmul.bf16.vlgmr.msrb.gmra.mxu0 %v1614_v18  ;;  %1848 = vmatmul.bf16.vlgmr.msrb.gmra.mxu1 %v1615_v23  ;;  %v1620_v47 = vperm.slane %v1611_v30, 1  ;;  %v1619_v44 = vperm.slane %v1611_v30, 0 }
 0x580   :  { %v1562_v26 = vmul.f32 %v1554_v53, %v1549_v19  ;;  %v1563_v31 = vmul.f32 %v1555_v0, %v1550_v24 }
 0x581   :  { %v1539_v13 = vsub.f32 1.5, %v1538_v25 }
 0x582   :  { %v1575_v34 = vadd.f32 %v1567_v6, %v1562_v26  ;;  %v1576_v38 = vadd.f32 %v1568_v60, %v1563_v31 }
 0x583   :  { %v1540_v39 = vmul.f32 %v4237_v9, %v1539_v13 }
 0x585   :  { %v1544_v40 = vsel %vm1543_vm12, %v4237_v9, %v1540_v39 }
 0x586   :  { %v1551_v27 = vmul.f32 %v1544_v40, %v5158_v36  ;;  %v1552_v28 = vmul.f32 %v1544_v40, %v5160_v37 }
 0x588   :  { %v1564_v32 = vmul.f32 %v1554_v53, %v1551_v27  ;;  %v1565_v33 = vmul.f32 %v1555_v0, %v1552_v28 }
 0x58a   :  { %v1577_v35 = vadd.f32 %v1567_v6, %v1564_v32  ;;  %v1578_v41 = vadd.f32 %v1568_v60, %v1565_v33 }
 0x58c   :  { %v1616_v46 = vpack.c.bf16 %v1577_v35, %v1575_v34  ;;  %v1617_v29 = vpack.c.bf16 %v1578_v41, %v1576_v38 }
 0x58e   :  { %1796 = vmatmul.bf16.gmra.mxu2 %v1616_v46  ;;  %1815 = vmatmul.bf16.gmra.mxu3 %v1617_v29 }
 0x58f   :  { %1834 = vmatmul.bf16.gmra.mxu0 %v1616_v46  ;;  %1853 = vmatmul.bf16.gmra.mxu1 %v1617_v29 }
 0x5fc   :  { %v1830_v42 = vpop.f32.mrf.mxu0  ;;  %v1849_v36 = vpop.f32.mrf.mxu1 }
 0x5fd   :  { %v1831_v43 = vadd.f32 %v1830_v42, %v1620_v47 }
 0x5ff   :  { %v1850_v37 = vadd.f32 %v1849_v36, %v1831_v43 }
 0x601   :  { %v1868_v45 = vmin.f32 %v1850_v37, 0.0  ;;  %v1792_v48 = vpop.f32.mrf.mxu2  ;;  %v1811_v49 = vpop.f32.mrf.mxu3  ;;  %vm1860_vm14 = vcmp.gt.f32.partialorder %v1850_v37, 0.0 }
 0x602   :  { %v1793_v50 = vadd.f32 %v1792_v48, %v1619_v44 }
 0x603   :  { %v1877_v51 = vmul.f32 1.442695, %v1868_v45 }
 0x604   :  { %v1812_v62 = vadd.f32 %v1811_v49, %v1793_v50  ;;  %v1832_v53 = vpop.f32.mrf.mxu0  ;;  %v1851_v54 = vpop.f32.mrf.mxu1 }
 0x605   :  { %v1833_v55 = vadd.f32 %v1832_v53, %v1620_v47  ;;  %4238 = vpow2.f32 %v1877_v51 }
 0x606   :  { %v1867_v56 = vmin.f32 %v1812_v62, 0.0  ;;  %vm1859_vm13 = vcmp.gt.f32.partialorder %v1812_v62, 0.0 }
 0x607   :  { %v1852_v57 = vadd.f32 %v1851_v54, %v1833_v55 }
 0x608   :  { %v1875_v61 = vmul.f32 1.442695, %v1867_v56 }
 0x609   :  { %v1870_v0 = vmin.f32 %v1852_v57, 0.0  ;;  %v1794_v5 = vpop.f32.mrf.mxu2  ;;  %v1813_v52 = vpop.f32.mrf.mxu3  ;;  %vm1862_vm0 = vcmp.gt.f32.partialorder %v1852_v57, 0.0 }
 0x60a   :  { %4240 = vpow2.f32 %v1875_v61  ;;  %v1795_v63 = vadd.f32 %v1794_v5, %v1619_v44 }
 0x60b   :  { %v1881_v58 = vmul.f32 1.442695, %v1870_v0  ;;  %v4239_v6 = vpop.eup %4238 }
 0x60c   :  { %v1814_v60 = vadd.f32 %v1813_v52, %v1795_v63  ;;  %v1835_v1 = vpop.f32.mrf.mxu0  ;;  %v1854_v3 = vpop.f32.mrf.mxu1  ;;  %v3607_v22 = vadd.f32 -1.0, %v4239_v6 }
 0x60d   :  { %v1836_v2 = vadd.f32 %v1835_v1, %v1620_v47  ;;  %4242 = vpow2.f32 %v1881_v58 }
 0x60e   :  { %v1869_v21 = vmin.f32 %v1814_v60, 0.0  ;;  %v1900_v18 = vsel %vm1860_vm14, %v1850_v37, %v3607_v22  ;;  %vm1861_vm15 = vcmp.gt.f32.partialorder %v1814_v60, 0.0 }
 0x60f   :  { %v1855_v4 = vadd.f32 %v1854_v3, %v1836_v2 }
 0x610   :  { %v4241_v7 = vpop.eup %4240  ;;  %v1879_v8 = vmul.f32 1.442695, %v1869_v21 }
 0x611   :  { %v1872_v9 = vmin.f32 %v1855_v4, 0.0  ;;  %v1797_v10 = vpop.f32.mrf.mxu2  ;;  %v1816_v11 = vpop.f32.mrf.mxu3  ;;  %v3606_v14 = vadd.f32 -1.0, %v4241_v7  ;;  %vm1864_vm2 = vcmp.gt.f32.partialorder %v1855_v4, 0.0 }
 0x612   :  { %4244 = vpow2.f32 %v1879_v8  ;;  %v1798_v15 = vadd.f32 %v1797_v10, %v1619_v44 }
 0x613   :  { %v1885_v16 = vmul.f32 1.442695, %v1872_v9  ;;  %v1899_v17 = vsel %vm1859_vm13, %v1812_v62, %v3606_v14  ;;  %v4243_v23 = vpop.eup %4242 }
 0x614   :  { %v1817_v20 = vadd.f32 %v1816_v11, %v1798_v15  ;;  %v1837_v25 = vpop.f32.mrf.mxu0  ;;  %v1907_v12 = vadd.f32 %v1900_v18, %v1899_v17  ;;  %v1856_v24 = vpop.f32.mrf.mxu1  ;;  %v3609_v40 = vadd.f32 -1.0, %v4243_v23 }
 0x615   :  { %v1838_v13 = vadd.f32 %v1837_v25, %v1620_v47  ;;  %4246 = vpow2.f32 %v1885_v16  ;;  %v3672_v25 = vld [vmem:[#allocation16 + $0x70] sm:$0xf] }
 0x616   :  { %v1871_v19 = vmin.f32 %v1817_v20, 0.0  ;;  %1908 = vadd.xlane.f32.xlu0 %v1907_v12  ;;  %v1902_v41 = vsel %vm1862_vm0, %v1852_v57, %v3609_v40  ;;  %vm1863_vm1 = vcmp.gt.f32.partialorder %v1817_v20, 0.0  ;;  %v4077_v12 = vld [vmem:[#allocation16 + $0x74] sm:$0xf0]  ;;  %v3674_v40 = vld [vmem:[#allocation16 + $0x78] sm:$0xf0] }
 0x617   :  { %v1857_v39 = vadd.f32 %v1856_v24, %v1838_v13  ;;  %v3736_v13 = vld [vmem:[#allocation16 + $0xf0] sm:$0xf]  ;;  %v4093_v24 = vld [vmem:[#allocation16 + $0xf4] sm:$0xf0] }
 0x618   :  { %v4245_v27 = vpop.eup %4244  ;;  %v1883_v26 = vmul.f32 1.442695, %v1871_v19  ;;  %v3673_v19 = vor.u32 %v4077_v12, %v3672_v25 }
 0x619   :  { %v1874_v28 = vmin.f32 %v1857_v39, 0.0  ;;  %v1799_v31 = vpop.f32.mrf.mxu2  ;;  %v3608_v32 = vadd.f32 -1.0, %v4245_v27  ;;  %v1818_v35 = vpop.f32.mrf.mxu3  ;;  %vm1866_vm4 = vcmp.gt.f32.partialorder %v1857_v39, 0.0  ;;  %v3737_v27 = vor.u32 %v4093_v24, %v3736_v13  ;;  %v4084_v13 = vld [vmem:[#allocation16 + $0xb4] sm:$0xf] }
 0x61a   :  { %4248 = vpow2.f32 %v1883_v26  ;;  %v1800_v33 = vadd.f32 %v1799_v31, %v1619_v44  ;;  %v3738_v31 = vld [vmem:[#allocation16 + $0xf8] sm:$0xf0]  ;;  %2237 = vmatpush.bf16.msrb.mxu2 %v3673_v19 }
 0x61b   :  { %v1889_v34 = vmul.f32 1.442695, %v1874_v28  ;;  %v1901_v38 = vsel %vm1861_vm15, %v1814_v60, %v3608_v32  ;;  %v4247_v46 = vpop.eup %4246  ;;  %v4092_v28 = vld [vmem:[#allocation16 + $0xf4] sm:$0xf]  ;;  %2256 = vmatpush.bf16.msrb.mxu3 %v3737_v27  ;;  %v3706_v19 = vld [vmem:[#allocation16 + $0xb8] sm:$0xf0] }
 0x61c   :  { %v1819_v29 = vadd.f32 %v1818_v35, %v1800_v33  ;;  %v1910_v30 = vadd.f32 %v1902_v41, %v1901_v38  ;;  %v3611_v42 = vadd.f32 -1.0, %v4247_v46  ;;  %v3741_v32 = vor.u32 %v4092_v28, %v3738_v31  ;;  %v3664_v33 = vld [vmem:[#allocation16 + $0x60] sm:$0xf]  ;;  %v4074_v46 = vld [vmem:[#allocation16 + $0x64] sm:$0xf] }
 0x61d   :  { %4250 = vpow2.f32 %v1889_v34  ;;  %v4075_v34 = vld [vmem:[#allocation16 + $0x64] sm:$0xf0]  ;;  %v3728_v35 = vld [vmem:[#allocation16 + $0xe0] sm:$0xf]  ;;  %v3709_v24 = vor.u32 %v4084_v13, %v3706_v19  ;;  %v4066_v31 = vld [vmem:[#allocation16 + $0x24] sm:$0xf] }
 0x61e   :  { %v1873_v47 = vmin.f32 %v1819_v29, 0.0  ;;  %1911 = vadd.xlane.f32.xlu1 %v1910_v30  ;;  %v1904_v45 = vsel %vm1864_vm2, %v1855_v4, %v3611_v42  ;;  %vm1865_vm3 = vcmp.gt.f32.partialorder %v1819_v29, 0.0  ;;  %2294 = vmatpush.bf16.msra.mxu1 %v3741_v32  ;;  %v4090_v42 = vld [vmem:[#allocation16 + $0xe4] sm:$0xf]  ;;  %v3696_v27 = vld [vmem:[#allocation16 + $0xa0] sm:$0xf] }
 0x61f   :  { %v4083_v28 = vld [vmem:[#allocation16 + $0xa4] sm:$0xf0]  ;;  %v3634_v32 = vld [vmem:[#allocation16 + $0x28] sm:$0xf0] }
 0x620   :  { %v4249_v36 = vpop.eup %4248  ;;  %v1887_v43 = vmul.f32 1.442695, %v1873_v47 }
 0x621   :  { %v3610_v37 = vadd.f32 -1.0, %v4249_v36  ;;  %v3730_v36 = vld [vmem:[#allocation16 + $0xe8] sm:$0xf0] }
 0x622   :  { %4252 = vpow2.f32 %v1887_v43  ;;  %v3733_v43 = vor.u32 %v4090_v42, %v3730_v36  ;;  %v4081_v42 = vld [vmem:[#allocation16 + $0x94] sm:$0xf0]  ;;  %v4064_v36 = vld [vmem:[#allocation16 + $0x14] sm:$0xf] }
 0x623   :  { %v1903_v44 = vsel %vm1863_vm1, %v1817_v20, %v3610_v37  ;;  %v4251_v48 = vpop.eup %4250  ;;  %v3656_v37 = vld [vmem:[#allocation16 + $0x50] sm:$0xf] }
 0x624   :  { %v1913_v49 = vadd.f32 %v1904_v45, %v1903_v44  ;;  %v3613_v50 = vadd.f32 -1.0, %v4251_v48  ;;  %2295 = vmatpush.bf16.msra.mxu1 %v3733_v43  ;;  %v3626_v43 = vld [vmem:[#allocation16 + $0x18] sm:$0xf0] }
 0x626   :  { %1914 = vadd.xlane.f32.xlu2 %v1913_v49  ;;  %v1906_v54 = vsel %vm1866_vm4, %v1857_v39, %v3613_v50  ;;  %v4076_v39 = vld [vmem:[#allocation16 + $0x74] sm:$0xf]  ;;  %v4089_v49 = vld [vmem:[#allocation16 + $0xd4] sm:$0xf0] }
 0x627   :  { %v3677_v26 = vor.u32 %v4076_v39, %v3674_v40  ;;  %v4072_v50 = vld [vmem:[#allocation16 + $0x54] sm:$0xf]  ;;  %v3632_v39 = vld [vmem:[#allocation16 + $0x20] sm:$0xf]  ;;  %v4067_v40 = vld [vmem:[#allocation16 + $0x24] sm:$0xf0] }
 0x628   :  { %v4253_v51 = vpop.eup %4252 }
 0x629   :  { %v3612_v62 = vadd.f32 -1.0, %v4253_v51  ;;  %2275 = vmatpush.bf16.msra.mxu0 %v3677_v26  ;;  %v3658_v51 = vld [vmem:[#allocation16 + $0x58] sm:$0xf0]  ;;  %v3633_v26 = vor.u32 %v4067_v40, %v3632_v39 }
 0x62b   :  { %v1905_v53 = vsel %vm1865_vm3, %v1819_v29, %v3612_v62  ;;  %v3666_v29 = vld [vmem:[#allocation16 + $0x68] sm:$0xf0] }
 0x62c   :  { %v1916_v55 = vadd.f32 %v1906_v54, %v1905_v53  ;;  %v3669_v47 = vor.u32 %v4074_v46, %v3666_v29  ;;  %v3624_v46 = vld [vmem:[#allocation16 + $0x10] sm:$0xf]  ;;  %v4065_v29 = vld [vmem:[#allocation16 + $0x14] sm:$0xf0] }
 0x62e   :  { %1917 = vadd.xlane.f32.xlu0 %v1916_v55  ;;  %2276 = vmatpush.bf16.msra.mxu0 %v3669_v47  ;;  %v3722_v55 = vld [vmem:[#allocation16 + $0xd8] sm:$0xf0]  ;;  %v3625_v47 = vor.u32 %v4065_v29, %v3624_v46 }
 0x689   :  { %v1909_v56 = vpop.xlane.xlu0 %1908 }
 0x68a   :  { %v1919_v57 = vmul.f32 %v1909_v56, %v5013_v59 }
 0x68c   :  { %v5179_v61 = vsub.f32 %v1899_v17, %v1919_v57  ;;  %v5181_v0 = vsub.f32 %v1900_v18, %v1919_v57  ;;  %v3648_v57 = vld [vmem:[#allocation16 + $0x40] sm:$0xf] }
 0x68e   :  { %v1931_v5 = vmul.f32 %v5179_v61, %v5179_v61  ;;  %v1932_v52 = vmul.f32 %v5181_v0, %v5181_v0 }
 0x690   :  { %v1939_v63 = vadd.f32 %v1932_v52, %v1931_v5  ;;  %v4071_v5 = vld [vmem:[#allocation16 + $0x44] sm:$0xf0]  ;;  %v3712_v52 = vld [vmem:[#allocation16 + $0xc0] sm:$0xf] }
 0x691   :  { %v1912_v58 = vpop.xlane.xlu1 %1911 }
 0x692   :  { %v1920_v6 = vmul.f32 %v1912_v58, %v5013_v59  ;;  %1940 = vadd.xlane.f32.xlu1 %v1939_v63  ;;  %v3649_v63 = vor.u32 %v4071_v5, %v3648_v57  ;;  %v4087_v58 = vld [vmem:[#allocation16 + $0xc4] sm:$0xf0]  ;;  %v4062_v5 = vld [vmem:[#allocation16 + $0x4] sm:$0xf] }
 0x693   :  { %v4079_v57 = vld [vmem:[#allocation16 + $0x84] sm:$0xf0] }
 0x694   :  { %v5188_v60 = vsub.f32 %v1901_v38, %v1920_v6  ;;  %v5190_v1 = vsub.f32 %v1902_v41, %v1920_v6  ;;  %v3665_v38 = vor.u32 %v4075_v34, %v3664_v33  ;;  %v4091_v41 = vld [vmem:[#allocation16 + $0xe4] sm:$0xf0]  ;;  %v4070_v6 = vld [vmem:[#allocation16 + $0x44] sm:$0xf]  ;;  %v3697_v33 = vor.u32 %v4083_v28, %v3696_v27 }
 0x695   :  { %v3729_v30 = vor.u32 %v4091_v41, %v3728_v35  ;;  %v3637_v34 = vor.u32 %v4066_v31, %v3634_v32  ;;  %v4082_v35 = vld [vmem:[#allocation16 + $0xa4] sm:$0xf] }
 0x696   :  { %v1933_v3 = vmul.f32 %v5188_v60, %v5188_v60  ;;  %v1934_v2 = vmul.f32 %v5190_v1, %v5190_v1  ;;  %2238 = vmatpush.bf16.msrb.mxu2 %v3665_v38  ;;  %v3698_v38 = vld [vmem:[#allocation16 + $0xa8] sm:$0xf0] }
 0x697   :  { %2257 = vmatpush.bf16.msrb.mxu3 %v3729_v30  ;;  %v3701_v41 = vor.u32 %v4082_v35, %v3698_v38  ;;  %v3688_v30 = vld [vmem:[#allocation16 + $0x90] sm:$0xf]  ;;  %v1613_v38 = vld [vmem:[#allocation15] sm:$0x3] }
 0x698   :  { %v1942_v21 = vadd.f32 %v1934_v2, %v1933_v3  ;;  %v3650_v3 = vld [vmem:[#allocation16 + $0x48] sm:$0xf0]  ;;  %v3713_v2 = vor.u32 %v4087_v58, %v3712_v52  ;;  %v4078_v58 = vld [vmem:[#allocation16 + $0x84] sm:$0xf] }
 0x699   :  { %v1915_v4 = vpop.xlane.xlu2 %1914 }
 0x69a   :  { %v1921_v22 = vmul.f32 %v1915_v4, %v5013_v59  ;;  %1943 = vadd.xlane.f32.xlu2 %v1942_v21  ;;  %v3653_v21 = vor.u32 %v4070_v6, %v3650_v3  ;;  %v4086_v4 = vld [vmem:[#allocation16 + $0xc4] sm:$0xf]  ;;  %v3682_v6 = vld [vmem:[#allocation16 + $0x88] sm:$0xf0] }
 0x69c   :  { %v5197_v7 = vsub.f32 %v1903_v44, %v1921_v22  ;;  %v5199_v8 = vsub.f32 %v1904_v45, %v1921_v22  ;;  %v4073_v44 = vld [vmem:[#allocation16 + $0x54] sm:$0xf0]  ;;  %v3720_v45 = vld [vmem:[#allocation16 + $0xd0] sm:$0xf]  ;;  %v3714_v22 = vld [vmem:[#allocation16 + $0xc8] sm:$0xf0] }
 0x69d   :  { %v3657_v48 = vor.u32 %v4073_v44, %v3656_v37  ;;  %v3721_v62 = vor.u32 %v4089_v49, %v3720_v45  ;;  %v3689_v44 = vor.u32 %v4081_v42, %v3688_v30  ;;  %v3629_v45 = vor.u32 %v4064_v36, %v3626_v43  ;;  %v3690_v49 = vld [vmem:[#allocation16 + $0x98] sm:$0xf0] }
 0x69e   :  { %v1935_v9 = vmul.f32 %v5197_v7, %v5197_v7  ;;  %v1936_v10 = vmul.f32 %v5199_v8, %v5199_v8  ;;  %v2021_v42 = vperm.slane %v1613_v38, 0  ;;  %v2022_v36 = vperm.slane %v1613_v38, 1 }
 0x69f   :  { %2239 = vmatpush.bf16.msrb.mxu2 %v3657_v48  ;;  %2258 = vmatpush.bf16.msrb.mxu3 %v3721_v62  ;;  %v4080_v48 = vld [vmem:[#allocation16 + $0x94] sm:$0xf]  ;;  %v3616_v62 = vld [vmem:[#allocation16] sm:$0xf] }
 0x6a0   :  { %v1945_v11 = vadd.f32 %v1936_v10, %v1935_v9  ;;  %v3717_v9 = vor.u32 %v4086_v4, %v3714_v22  ;;  %v3640_v10 = vld [vmem:[#allocation16 + $0x30] sm:$0xf] }
 0x6a1   :  { %v1918_v14 = vpop.xlane.xlu0 %1917 }
 0x6a2   :  { %v1922_v15 = vmul.f32 %v1918_v14, %v5013_v59  ;;  %1946 = vadd.xlane.f32.xlu0 %v1945_v11  ;;  %v4069_v11 = vld [vmem:[#allocation16 + $0x34] sm:$0xf0]  ;;  %v3704_v14 = vld [vmem:[#allocation16 + $0xb0] sm:$0xf] }
 0x6a3   :  { %2240 = vmatpush.bf16.msrb.mxu2 %v3649_v63  ;;  %2259 = vmatpush.bf16.msrb.mxu3 %v3713_v2  ;;  %v3618_v63 = vld [vmem:[#allocation16 + $0x8] sm:$0xf0]  ;;  %v3685_v2 = vor.u32 %v4078_v58, %v3682_v6 }
 0x6a4   :  { %v5206_v16 = vsub.f32 %v1905_v53, %v1922_v15  ;;  %v5208_v17 = vsub.f32 %v1906_v54, %v1922_v15  ;;  %v3661_v53 = vor.u32 %v4072_v50, %v3658_v51  ;;  %v4088_v54 = vld [vmem:[#allocation16 + $0xd4] sm:$0xf]  ;;  %v3641_v15 = vor.u32 %v4069_v11, %v3640_v10 }
 0x6a5   :  { %v3725_v56 = vor.u32 %v4088_v54, %v3722_v55  ;;  %v3693_v51 = vor.u32 %v4080_v48, %v3690_v49  ;;  %v3680_v54 = vld [vmem:[#allocation16 + $0x80] sm:$0xf]  ;;  %v3621_v3 = vor.u32 %v4062_v5, %v3618_v63 }
 0x6a6   :  { %v1937_v18 = vmul.f32 %v5206_v16, %v5206_v16  ;;  %v1938_v23 = vmul.f32 %v5208_v17, %v5208_v17  ;;  %2277 = vmatpush.bf16.msra.mxu0 %v3661_v53  ;;  %v4063_v53 = vld [vmem:[#allocation16 + $0x4] sm:$0xf0]  ;;  %v3681_v52 = vor.u32 %v4079_v57, %v3680_v54 }
 0x6a7   :  { %2296 = vmatpush.bf16.msra.mxu1 %v3725_v56  ;;  %2241 = vmatpush.bf16.msrb.mxu2 %v3641_v15  ;;  %v3617_v56 = vor.u32 %v4063_v53, %v3616_v62 }
 0x6a8   :  { %v1948_v20 = vadd.f32 %v1938_v23, %v1937_v18  ;;  %v4085_v18 = vld [vmem:[#allocation16 + $0xb4] sm:$0xf0]  ;;  %v4068_v23 = vld [vmem:[#allocation16 + $0x34] sm:$0xf] }
 0x6a9   :  { %v3705_v25 = vor.u32 %v4085_v18, %v3704_v14 }
 0x6aa   :  { %1949 = vadd.xlane.f32.xlu1 %v1948_v20  ;;  %2278 = vmatpush.bf16.msra.mxu0 %v3653_v21  ;;  %v3642_v20 = vld [vmem:[#allocation16 + $0x38] sm:$0xf0] }
 0x6ab   :  { %2297 = vmatpush.bf16.msra.mxu1 %v3717_v9  ;;  %v3645_v12 = vor.u32 %v4068_v23, %v3642_v20  ;;  %2260 = vmatpush.bf16.msrb.mxu3 %v3705_v25 }
 0x6ac   :  { %2242 = vmatpush.bf16.msrb.mxu2 %v3633_v26 }
 0x6ae   :  { %2279 = vmatpush.bf16.msra.mxu0 %v3645_v12 }
 0x6af   :  { %2298 = vmatpush.bf16.msra.mxu1 %v3709_v24  ;;  %2261 = vmatpush.bf16.msrb.mxu3 %v3697_v33  ;;  %v1612_v24 = vld [vmem:[#allocation13] sm:$0x3] }
 0x6b0   :  { %2243 = vmatpush.bf16.msrb.mxu2 %v3625_v47  ;;  %v2008_v31 = vperm.slane %v1612_v24, 0 }
 0x6b2   :  { %2280 = vmatpush.bf16.msra.mxu0 %v3637_v34 }
 0x6b3   :  { %2299 = vmatpush.bf16.msra.mxu1 %v3701_v41  ;;  %2262 = vmatpush.bf16.msrb.mxu3 %v3689_v44  ;;  %v2009_v41 = vperm.slane %v1612_v24, 1 }
 0x6b4   :  { %2244 = vmatpush.bf16.msrb.mxu2 %v3617_v56 }
 0x6b6   :  { %2281 = vmatpush.bf16.msra.mxu0 %v3629_v45 }
 0x6b7   :  { %2300 = vmatpush.bf16.msra.mxu1 %v3693_v51  ;;  %2263 = vmatpush.bf16.msrb.mxu3 %v3681_v52 }
 0x6ba   :  { %2282 = vmatpush.bf16.msra.mxu0 %v3621_v3 }
 0x6bb   :  { %2301 = vmatpush.bf16.msra.mxu1 %v3685_v2 }
 0x705   :  { %v1941_v37 = vpop.xlane.xlu1 %1940 }
 0x706   :  { %v1951_v50 = vmul.f32 %v1941_v37, %v5013_v59 }
 0x708   :  { %v1955_v55 = vadd.f32 1e-05, %v1951_v50 }
 0x70a   :  { %4254 = vrsqrt.f32 %v1955_v55  ;;  %vm1965_vm6 = vweird.f32 %v1955_v55 }
 0x70d   :  { %v1944_v21 = vpop.xlane.xlu2 %1943 }
 0x70e   :  { %v1952_v4 = vmul.f32 %v1944_v21, %v5013_v59 }
 0x710   :  { %v4255_v22 = vpop.eup %4254  ;;  %v1956_v9 = vadd.f32 1e-05, %v1952_v4 }
 0x711   :  { %v1960_v10 = vmul.f32 %v4255_v22, %v1955_v55  ;;  %vm1966_vm5 = vweird.f32 %v4255_v22 }
 0x712   :  { %4256 = vrsqrt.f32 %v1956_v9  ;;  %vm1967_vm7 = vmor %vm1965_vm6, %vm1966_vm5  ;;  %vm1975_vm9 = vweird.f32 %v1956_v9 }
 0x713   :  { %v1961_v11 = vmul.f32 %v4255_v22, %v1960_v10 }
 0x715   :  { %v1962_v14 = vmul.f32 0.5, %v1961_v11  ;;  %v1947_v15 = vpop.xlane.xlu0 %1946 }
 0x716   :  { %v1953_v18 = vmul.f32 %v1947_v15, %v5013_v59 }
 0x717   :  { %v1963_v23 = vsub.f32 1.5, %v1962_v14 }
 0x718   :  { %v4257_v20 = vpop.eup %4256  ;;  %v1957_v25 = vadd.f32 1e-05, %v1953_v18 }
 0x719   :  { %v1964_v12 = vmul.f32 %v4255_v22, %v1963_v23  ;;  %v1970_v13 = vmul.f32 %v4257_v20, %v1956_v9  ;;  %vm1976_vm8 = vweird.f32 %v4257_v20 }
 0x71a   :  { %4258 = vrsqrt.f32 %v1957_v25  ;;  %vm1977_vm10 = vmor %vm1975_vm9, %vm1976_vm8  ;;  %vm1985_vm12 = vweird.f32 %v1957_v25 }
 0x71b   :  { %v1971_v19 = vmul.f32 %v4257_v20, %v1970_v13  ;;  %v1968_v39 = vsel %vm1967_vm7, %v4255_v22, %v1964_v12 }
 0x71c   :  { %v1999_v33 = vmul.f32 %v1968_v39, %v5179_v61  ;;  %v2000_v34 = vmul.f32 %v1968_v39, %v5181_v0 }
 0x71d   :  { %v1972_v40 = vmul.f32 0.5, %v1971_v19  ;;  %v1950_v27 = vpop.xlane.xlu1 %1949 }
 0x71e   :  { %v1954_v26 = vmul.f32 %v1950_v27, %v5013_v59  ;;  %v2012_v44 = vmul.f32 %v2008_v31, %v1999_v33  ;;  %v2013_v61 = vmul.f32 %v2009_v41, %v2000_v34 }
 0x71f   :  { %v1973_v28 = vsub.f32 1.5, %v1972_v40 }
 0x720   :  { %v4259_v32 = vpop.eup %4258  ;;  %v1958_v35 = vadd.f32 1e-05, %v1954_v26  ;;  %v2025_v51 = vadd.f32 %v2021_v42, %v2012_v44  ;;  %v2026_v53 = vadd.f32 %v2022_v36, %v2013_v61 }
 0x721   :  { %v1974_v46 = vmul.f32 %v4257_v20, %v1973_v28  ;;  %v1980_v29 = vmul.f32 %v4259_v32, %v1957_v25  ;;  %vm1986_vm11 = vweird.f32 %v4259_v32 }
 0x722   :  { %4260 = vrsqrt.f32 %v1958_v35  ;;  %vm1987_vm13 = vmor %vm1985_vm12, %vm1986_vm11  ;;  %vm1995_vm15 = vweird.f32 %v1958_v35 }
 0x723   :  { %v1978_v30 = vsel %vm1977_vm10, %v4257_v20, %v1974_v46  ;;  %v1981_v47 = vmul.f32 %v4259_v32, %v1980_v29 }
 0x724   :  { %v2001_v43 = vmul.f32 %v1978_v30, %v5188_v60  ;;  %v2002_v37 = vmul.f32 %v1978_v30, %v5190_v1 }
 0x725   :  { %v1982_v45 = vmul.f32 0.5, %v1981_v47 }
 0x726   :  { %v2014_v0 = vmul.f32 %v2008_v31, %v2001_v43  ;;  %v2015_v48 = vmul.f32 %v2009_v41, %v2002_v37 }
 0x727   :  { %v1983_v49 = vsub.f32 1.5, %v1982_v45 }
 0x728   :  { %v4261_v50 = vpop.eup %4260  ;;  %v2027_v62 = vadd.f32 %v2021_v42, %v2014_v0  ;;  %v2028_v54 = vadd.f32 %v2022_v36, %v2015_v48 }
 0x729   :  { %v1984_v55 = vmul.f32 %v4259_v32, %v1983_v49  ;;  %v1990_v56 = vmul.f32 %v4261_v50, %v1958_v35  ;;  %vm1996_vm14 = vweird.f32 %v4261_v50 }
 0x72a   :  { %v2068_v57 = vpack.c.bf16 %v2027_v62, %v2025_v51  ;;  %v2069_v5 = vpack.c.bf16 %v2028_v54, %v2026_v53  ;;  %vm1997_vm0 = vmor %vm1995_vm15, %vm1996_vm14 }
 0x72b   :  { %v1991_v60 = vmul.f32 %v4261_v50, %v1990_v56  ;;  %v1988_v52 = vsel %vm1987_vm13, %v4259_v32, %v1984_v55 }
 0x72c   :  { %2245 = vmatmul.bf16.vlgmr.msrb.gmra.mxu2 %v2068_v57  ;;  %2264 = vmatmul.bf16.vlgmr.msrb.gmra.mxu3 %v2069_v5  ;;  %v2003_v58 = vmul.f32 %v1988_v52, %v5197_v7  ;;  %v2004_v6 = vmul.f32 %v1988_v52, %v5199_v8  ;;  %v2065_v8 = vld [vmem:[#allocation18] sm:$0x3] }
 0x72d   :  { %v1992_v1 = vmul.f32 0.5, %v1991_v60  ;;  %2283 = vmatmul.bf16.vlgmr.msra.gmra.mxu0 %v2068_v57  ;;  %2302 = vmatmul.bf16.vlgmr.msra.gmra.mxu1 %v2069_v5  ;;  %v2074_v25 = vperm.slane %v2065_v8, 1  ;;  %v2073_v19 = vperm.slane %v2065_v8, 0 }
 0x72e   :  { %v2016_v4 = vmul.f32 %v2008_v31, %v2003_v58  ;;  %v2017_v9 = vmul.f32 %v2009_v41, %v2004_v6 }
 0x72f   :  { %v1993_v63 = vsub.f32 1.5, %v1992_v1 }
 0x730   :  { %v2029_v14 = vadd.f32 %v2021_v42, %v2016_v4  ;;  %v2030_v18 = vadd.f32 %v2022_v36, %v2017_v9 }
 0x731   :  { %v1994_v3 = vmul.f32 %v4261_v50, %v1993_v63 }
 0x733   :  { %v1998_v2 = vsel %vm1997_vm0, %v4261_v50, %v1994_v3 }
 0x734   :  { %v2005_v21 = vmul.f32 %v1998_v2, %v5206_v16  ;;  %v2006_v22 = vmul.f32 %v1998_v2, %v5208_v17 }
 0x736   :  { %v2018_v10 = vmul.f32 %v2008_v31, %v2005_v21  ;;  %v2019_v11 = vmul.f32 %v2009_v41, %v2006_v22 }
 0x738   :  { %v2031_v15 = vadd.f32 %v2021_v42, %v2018_v10  ;;  %v2032_v23 = vadd.f32 %v2022_v36, %v2019_v11 }
 0x73a   :  { %v2070_v20 = vpack.c.bf16 %v2031_v15, %v2029_v14  ;;  %v2071_v7 = vpack.c.bf16 %v2032_v23, %v2030_v18 }
 0x73c   :  { %2250 = vmatmul.bf16.gmra.mxu2 %v2070_v20  ;;  %2269 = vmatmul.bf16.gmra.mxu3 %v2071_v7 }
 0x73d   :  { %2288 = vmatmul.bf16.gmra.mxu0 %v2070_v20  ;;  %2307 = vmatmul.bf16.gmra.mxu1 %v2071_v7 }
 0x7aa   :  { %v2284_v12 = vpop.f32.mrf.mxu0  ;;  %v2303_v16 = vpop.f32.mrf.mxu1 }
 0x7ab   :  { %v2285_v13 = vadd.f32 %v2284_v12, %v2074_v25 }
 0x7ad   :  { %v2304_v17 = vadd.f32 %v2303_v16, %v2285_v13 }
 0x7af   :  { %v2322_v24 = vmin.f32 %v2304_v17, 0.0  ;;  %v2246_v39 = vpop.f32.mrf.mxu2  ;;  %v2265_v40 = vpop.f32.mrf.mxu3  ;;  %vm2314_vm2 = vcmp.gt.f32.partialorder %v2304_v17, 0.0 }
 0x7b0   :  { %v2247_v27 = vadd.f32 %v2246_v39, %v2073_v19 }
 0x7b1   :  { %v2331_v26 = vmul.f32 1.442695, %v2322_v24 }
 0x7b2   :  { %v2266_v28 = vadd.f32 %v2265_v40, %v2247_v27  ;;  %v2286_v31 = vpop.f32.mrf.mxu0  ;;  %v2305_v32 = vpop.f32.mrf.mxu1 }
 0x7b3   :  { %v2287_v33 = vadd.f32 %v2286_v31, %v2074_v25  ;;  %4262 = vpow2.f32 %v2331_v26 }
 0x7b4   :  { %v2321_v34 = vmin.f32 %v2266_v28, 0.0  ;;  %vm2313_vm1 = vcmp.gt.f32.partialorder %v2266_v28, 0.0 }
 0x7b5   :  { %v2306_v35 = vadd.f32 %v2305_v32, %v2287_v33 }
 0x7b6   :  { %v2329_v38 = vmul.f32 1.442695, %v2321_v34 }
 0x7b7   :  { %v2324_v41 = vmin.f32 %v2306_v35, 0.0  ;;  %v2248_v46 = vpop.f32.mrf.mxu2  ;;  %v2267_v29 = vpop.f32.mrf.mxu3  ;;  %vm2316_vm4 = vcmp.gt.f32.partialorder %v2306_v35, 0.0 }
 0x7b8   :  { %4264 = vpow2.f32 %v2329_v38  ;;  %v2249_v30 = vadd.f32 %v2248_v46, %v2073_v19 }
 0x7b9   :  { %v2335_v47 = vmul.f32 1.442695, %v2324_v41  ;;  %v4263_v42 = vpop.eup %4262 }
 0x7ba   :  { %v2268_v36 = vadd.f32 %v2267_v29, %v2249_v30  ;;  %v2289_v43 = vpop.f32.mrf.mxu0  ;;  %v2308_v37 = vpop.f32.mrf.mxu1  ;;  %v3743_v0 = vadd.f32 -1.0, %v4263_v42 }
 0x7bb   :  { %v2290_v44 = vadd.f32 %v2289_v43, %v2074_v25  ;;  %4266 = vpow2.f32 %v2335_v47 }
 0x7bc   :  { %v2323_v61 = vmin.f32 %v2268_v36, 0.0  ;;  %v2354_v57 = vsel %vm2314_vm2, %v2304_v17, %v3743_v0  ;;  %vm2315_vm3 = vcmp.gt.f32.partialorder %v2268_v36, 0.0 }
 0x7bd   :  { %v2309_v45 = vadd.f32 %v2308_v37, %v2290_v44 }
 0x7be   :  { %v4265_v48 = vpop.eup %4264  ;;  %v2333_v49 = vmul.f32 1.442695, %v2323_v61 }
 0x7bf   :  { %v2326_v50 = vmin.f32 %v2309_v45, 0.0  ;;  %v2251_v51 = vpop.f32.mrf.mxu2  ;;  %v2270_v62 = vpop.f32.mrf.mxu3  ;;  %v3742_v53 = vadd.f32 -1.0, %v4265_v48  ;;  %vm2318_vm6 = vcmp.gt.f32.partialorder %v2309_v45, 0.0 }
 0x7c0   :  { %4268 = vpow2.f32 %v2333_v49  ;;  %v2252_v54 = vadd.f32 %v2251_v51, %v2073_v19 }
 0x7c1   :  { %v2339_v55 = vmul.f32 1.442695, %v2326_v50  ;;  %v2353_v56 = vsel %vm2313_vm1, %v2266_v28, %v3742_v53  ;;  %v4267_v5 = vpop.eup %4266 }
 0x7c2   :  { %v2271_v60 = vadd.f32 %v2270_v62, %v2252_v54  ;;  %v2291_v1 = vpop.f32.mrf.mxu0  ;;  %v2361_v52 = vadd.f32 %v2354_v57, %v2353_v56  ;;  %v2310_v6 = vpop.f32.mrf.mxu1  ;;  %v3745_v2 = vadd.f32 -1.0, %v4267_v5 }
 0x7c3   :  { %v2292_v63 = vadd.f32 %v2291_v1, %v2074_v25  ;;  %4270 = vpow2.f32 %v2339_v55  ;;  %v3808_v1 = vld [vmem:[#allocation22 + $0x70] sm:$0xf] }
 0x7c4   :  { %v2325_v58 = vmin.f32 %v2271_v60, 0.0  ;;  %2362 = vadd.xlane.f32.xlu2 %v2361_v52  ;;  %v2356_v23 = vsel %vm2316_vm4, %v2306_v35, %v3745_v2  ;;  %vm2317_vm5 = vcmp.gt.f32.partialorder %v2271_v60, 0.0  ;;  %v4109_v52 = vld [vmem:[#allocation22 + $0x74] sm:$0xf0]  ;;  %v3810_v2 = vld [vmem:[#allocation22 + $0x78] sm:$0xf0] }
 0x7c5   :  { %v2311_v3 = vadd.f32 %v2310_v6, %v2292_v63  ;;  %v3872_v63 = vld [vmem:[#allocation22 + $0xf0] sm:$0xf]  ;;  %v4125_v6 = vld [vmem:[#allocation22 + $0xf4] sm:$0xf0] }
 0x7c6   :  { %v4269_v21 = vpop.eup %4268  ;;  %v2337_v4 = vmul.f32 1.442695, %v2325_v58  ;;  %v3809_v58 = vor.u32 %v4109_v52, %v3808_v1 }
 0x7c7   :  { %v2328_v22 = vmin.f32 %v2311_v3, 0.0  ;;  %v2253_v9 = vpop.f32.mrf.mxu2  ;;  %v3744_v10 = vadd.f32 -1.0, %v4269_v21  ;;  %v2272_v15 = vpop.f32.mrf.mxu3  ;;  %vm2320_vm8 = vcmp.gt.f32.partialorder %v2311_v3, 0.0  ;;  %v3873_v21 = vor.u32 %v4125_v6, %v3872_v63  ;;  %v4116_v63 = vld [vmem:[#allocation22 + $0xb4] sm:$0xf] }
 0x7c8   :  { %4272 = vpow2.f32 %v2337_v4  ;;  %v2254_v11 = vadd.f32 %v2253_v9, %v2073_v19  ;;  %v3874_v9 = vld [vmem:[#allocation22 + $0xf8] sm:$0xf0]  ;;  %2691 = vmatpush.bf16.msra.mxu2 %v3809_v58 }
 0x7c9   :  { %v2343_v14 = vmul.f32 1.442695, %v2328_v22  ;;  %v2355_v18 = vsel %vm2315_vm3, %v2268_v36, %v3744_v10  ;;  %v4271_v20 = vpop.eup %4270  ;;  %v4124_v22 = vld [vmem:[#allocation22 + $0xf4] sm:$0xf]  ;;  %2710 = vmatpush.bf16.msra.mxu3 %v3873_v21  ;;  %v3842_v58 = vld [vmem:[#allocation22 + $0xb8] sm:$0xf0] }
 0x7ca   :  { %v2273_v7 = vadd.f32 %v2272_v15, %v2254_v11  ;;  %v2364_v8 = vadd.f32 %v2356_v23, %v2355_v18  ;;  %v3747_v12 = vadd.f32 -1.0, %v4271_v20  ;;  %v3877_v10 = vor.u32 %v4124_v22, %v3874_v9  ;;  %v3800_v11 = vld [vmem:[#allocation22 + $0x60] sm:$0xf]  ;;  %v4106_v20 = vld [vmem:[#allocation22 + $0x64] sm:$0xf] }
 0x7cb   :  { %4274 = vpow2.f32 %v2343_v14  ;;  %v4107_v14 = vld [vmem:[#allocation22 + $0x64] sm:$0xf0]  ;;  %v3864_v15 = vld [vmem:[#allocation22 + $0xe0] sm:$0xf]  ;;  %v3845_v6 = vor.u32 %v4116_v63, %v3842_v58  ;;  %v4098_v9 = vld [vmem:[#allocation22 + $0x24] sm:$0xf] }
 0x7cc   :  { %v2327_v25 = vmin.f32 %v2273_v7, 0.0  ;;  %2365 = vadd.xlane.f32.xlu0 %v2364_v8  ;;  %v2358_v24 = vsel %vm2318_vm6, %v2309_v45, %v3747_v12  ;;  %vm2319_vm7 = vcmp.gt.f32.partialorder %v2273_v7, 0.0  ;;  %2748 = vmatpush.bf16.msrb.mxu1 %v3877_v10  ;;  %v4122_v12 = vld [vmem:[#allocation22 + $0xe4] sm:$0xf]  ;;  %v3832_v21 = vld [vmem:[#allocation22 + $0xa0] sm:$0xf] }
 0x7cd   :  { %v4115_v22 = vld [vmem:[#allocation22 + $0xa4] sm:$0xf0]  ;;  %v3770_v10 = vld [vmem:[#allocation22 + $0x28] sm:$0xf0] }
 0x7ce   :  { %v4273_v16 = vpop.eup %4272  ;;  %v2341_v13 = vmul.f32 1.442695, %v2327_v25 }
 0x7cf   :  { %v3746_v17 = vadd.f32 -1.0, %v4273_v16  ;;  %v3866_v16 = vld [vmem:[#allocation22 + $0xe8] sm:$0xf0] }
 0x7d0   :  { %4276 = vpow2.f32 %v2341_v13  ;;  %v3869_v13 = vor.u32 %v4122_v12, %v3866_v16  ;;  %v4113_v12 = vld [vmem:[#allocation22 + $0x94] sm:$0xf0]  ;;  %v4096_v16 = vld [vmem:[#allocation22 + $0x14] sm:$0xf] }
 0x7d1   :  { %v2357_v19 = vsel %vm2317_vm5, %v2271_v60, %v3746_v17  ;;  %v4275_v39 = vpop.eup %4274  ;;  %v3792_v17 = vld [vmem:[#allocation22 + $0x50] sm:$0xf] }
 0x7d2   :  { %v2367_v40 = vadd.f32 %v2358_v24, %v2357_v19  ;;  %v3749_v27 = vadd.f32 -1.0, %v4275_v39  ;;  %2749 = vmatpush.bf16.msrb.mxu1 %v3869_v13  ;;  %v3762_v13 = vld [vmem:[#allocation22 + $0x18] sm:$0xf0] }
 0x7d4   :  { %2368 = vadd.xlane.f32.xlu1 %v2367_v40  ;;  %v2360_v32 = vsel %vm2320_vm8, %v2311_v3, %v3749_v27  ;;  %v4108_v3 = vld [vmem:[#allocation22 + $0x74] sm:$0xf]  ;;  %v4121_v40 = vld [vmem:[#allocation22 + $0xd4] sm:$0xf0] }
 0x7d5   :  { %v3813_v4 = vor.u32 %v4108_v3, %v3810_v2  ;;  %v4104_v27 = vld [vmem:[#allocation22 + $0x54] sm:$0xf]  ;;  %v3768_v3 = vld [vmem:[#allocation22 + $0x20] sm:$0xf]  ;;  %v4099_v2 = vld [vmem:[#allocation22 + $0x24] sm:$0xf0] }
 0x7d6   :  { %v4277_v26 = vpop.eup %4276 }
 0x7d7   :  { %v3748_v28 = vadd.f32 -1.0, %v4277_v26  ;;  %2729 = vmatpush.bf16.msrb.mxu0 %v3813_v4  ;;  %v3794_v26 = vld [vmem:[#allocation22 + $0x58] sm:$0xf0]  ;;  %v3769_v4 = vor.u32 %v4099_v2, %v3768_v3 }
 0x7d9   :  { %v2359_v31 = vsel %vm2319_vm7, %v2273_v7, %v3748_v28  ;;  %v3802_v7 = vld [vmem:[#allocation22 + $0x68] sm:$0xf0] }
 0x7da   :  { %v2370_v33 = vadd.f32 %v2360_v32, %v2359_v31  ;;  %v3805_v25 = vor.u32 %v4106_v20, %v3802_v7  ;;  %v3760_v20 = vld [vmem:[#allocation22 + $0x10] sm:$0xf]  ;;  %v4097_v7 = vld [vmem:[#allocation22 + $0x14] sm:$0xf0] }
 0x7dc   :  { %2371 = vadd.xlane.f32.xlu2 %v2370_v33  ;;  %2730 = vmatpush.bf16.msrb.mxu0 %v3805_v25  ;;  %v3858_v33 = vld [vmem:[#allocation22 + $0xd8] sm:$0xf0]  ;;  %v3761_v25 = vor.u32 %v4097_v7, %v3760_v20 }
 0x837   :  { %v2363_v34 = vpop.xlane.xlu2 %2362 }
 0x838   :  { %v2373_v35 = vmul.f32 %v2363_v34, %v5013_v59 }
 0x83a   :  { %v5227_v38 = vsub.f32 %v2353_v56, %v2373_v35  ;;  %v5229_v41 = vsub.f32 %v2354_v57, %v2373_v35  ;;  %v3784_v35 = vld [vmem:[#allocation22 + $0x40] sm:$0xf] }
 0x83c   :  { %v2385_v46 = vmul.f32 %v5227_v38, %v5227_v38  ;;  %v2386_v29 = vmul.f32 %v5229_v41, %v5229_v41 }
 0x83e   :  { %v2393_v30 = vadd.f32 %v2386_v29, %v2385_v46  ;;  %v4103_v46 = vld [vmem:[#allocation22 + $0x44] sm:$0xf0]  ;;  %v3848_v29 = vld [vmem:[#allocation22 + $0xc0] sm:$0xf] }
 0x83f   :  { %v2366_v47 = vpop.xlane.xlu0 %2365 }
 0x840   :  { %v2374_v42 = vmul.f32 %v2366_v47, %v5013_v59  ;;  %2394 = vadd.xlane.f32.xlu0 %v2393_v30  ;;  %v3785_v30 = vor.u32 %v4103_v46, %v3784_v35  ;;  %v4119_v47 = vld [vmem:[#allocation22 + $0xc4] sm:$0xf0]  ;;  %v4094_v46 = vld [vmem:[#allocation22 + $0x4] sm:$0xf] }
 0x841   :  { %v4111_v35 = vld [vmem:[#allocation22 + $0x84] sm:$0xf0] }
 0x842   :  { %v5236_v36 = vsub.f32 %v2355_v18, %v2374_v42  ;;  %v5238_v43 = vsub.f32 %v2356_v23, %v2374_v42  ;;  %v3801_v18 = vor.u32 %v4107_v14, %v3800_v11  ;;  %v4123_v23 = vld [vmem:[#allocation22 + $0xe4] sm:$0xf0]  ;;  %v4102_v42 = vld [vmem:[#allocation22 + $0x44] sm:$0xf]  ;;  %v3833_v11 = vor.u32 %v4115_v22, %v3832_v21 }
 0x843   :  { %v3865_v8 = vor.u32 %v4123_v23, %v3864_v15  ;;  %v3773_v14 = vor.u32 %v4098_v9, %v3770_v10  ;;  %v4114_v15 = vld [vmem:[#allocation22 + $0xa4] sm:$0xf] }
 0x844   :  { %v2387_v37 = vmul.f32 %v5236_v36, %v5236_v36  ;;  %v2388_v44 = vmul.f32 %v5238_v43, %v5238_v43  ;;  %2692 = vmatpush.bf16.msra.mxu2 %v3801_v18  ;;  %v3834_v18 = vld [vmem:[#allocation22 + $0xa8] sm:$0xf0] }
 0x845   :  { %2711 = vmatpush.bf16.msra.mxu3 %v3865_v8  ;;  %v3837_v23 = vor.u32 %v4114_v15, %v3834_v18  ;;  %v3824_v8 = vld [vmem:[#allocation22 + $0x90] sm:$0xf]  ;;  %v2067_v18 = vld [vmem:[#allocation21] sm:$0x3] }
 0x846   :  { %v2396_v61 = vadd.f32 %v2388_v44, %v2387_v37  ;;  %v3786_v37 = vld [vmem:[#allocation22 + $0x48] sm:$0xf0]  ;;  %v3849_v44 = vor.u32 %v4119_v47, %v3848_v29  ;;  %v4110_v47 = vld [vmem:[#allocation22 + $0x84] sm:$0xf] }
 0x847   :  { %v2369_v45 = vpop.xlane.xlu1 %2368 }
 0x848   :  { %v2375_v0 = vmul.f32 %v2369_v45, %v5013_v59  ;;  %2397 = vadd.xlane.f32.xlu1 %v2396_v61  ;;  %v3789_v61 = vor.u32 %v4102_v42, %v3786_v37  ;;  %v4118_v45 = vld [vmem:[#allocation22 + $0xc4] sm:$0xf]  ;;  %v3818_v42 = vld [vmem:[#allocation22 + $0x88] sm:$0xf0] }
 0x84a   :  { %v5245_v48 = vsub.f32 %v2357_v19, %v2375_v0  ;;  %v5247_v49 = vsub.f32 %v2358_v24, %v2375_v0  ;;  %v4105_v19 = vld [vmem:[#allocation22 + $0x54] sm:$0xf0]  ;;  %v3856_v24 = vld [vmem:[#allocation22 + $0xd0] sm:$0xf]  ;;  %v3850_v0 = vld [vmem:[#allocation22 + $0xc8] sm:$0xf0] }
 0x84b   :  { %v3793_v39 = vor.u32 %v4105_v19, %v3792_v17  ;;  %v3857_v28 = vor.u32 %v4121_v40, %v3856_v24  ;;  %v3825_v19 = vor.u32 %v4113_v12, %v3824_v8  ;;  %v3765_v24 = vor.u32 %v4096_v16, %v3762_v13  ;;  %v3826_v40 = vld [vmem:[#allocation22 + $0x98] sm:$0xf0] }
 0x84c   :  { %v2389_v50 = vmul.f32 %v5245_v48, %v5245_v48  ;;  %v2390_v51 = vmul.f32 %v5247_v49, %v5247_v49  ;;  %v2475_v12 = vperm.slane %v2067_v18, 0  ;;  %v2476_v16 = vperm.slane %v2067_v18, 1 }
 0x84d   :  { %2693 = vmatpush.bf16.msra.mxu2 %v3793_v39  ;;  %2712 = vmatpush.bf16.msra.mxu3 %v3857_v28  ;;  %v4112_v39 = vld [vmem:[#allocation22 + $0x94] sm:$0xf]  ;;  %v3752_v28 = vld [vmem:[#allocation22] sm:$0xf] }
 0x84e   :  { %v2399_v62 = vadd.f32 %v2390_v51, %v2389_v50  ;;  %v3853_v50 = vor.u32 %v4118_v45, %v3850_v0  ;;  %v3776_v51 = vld [vmem:[#allocation22 + $0x30] sm:$0xf] }
 0x84f   :  { %v2372_v53 = vpop.xlane.xlu2 %2371 }
 0x850   :  { %v2376_v54 = vmul.f32 %v2372_v53, %v5013_v59  ;;  %2400 = vadd.xlane.f32.xlu2 %v2399_v62  ;;  %v4101_v62 = vld [vmem:[#allocation22 + $0x34] sm:$0xf0]  ;;  %v3840_v53 = vld [vmem:[#allocation22 + $0xb0] sm:$0xf] }
 0x851   :  { %2694 = vmatpush.bf16.msra.mxu2 %v3785_v30  ;;  %2713 = vmatpush.bf16.msra.mxu3 %v3849_v44  ;;  %v3754_v30 = vld [vmem:[#allocation22 + $0x8] sm:$0xf0]  ;;  %v3821_v44 = vor.u32 %v4110_v47, %v3818_v42 }
 0x852   :  { %v5254_v55 = vsub.f32 %v2359_v31, %v2376_v54  ;;  %v5256_v56 = vsub.f32 %v2360_v32, %v2376_v54  ;;  %v3797_v31 = vor.u32 %v4104_v27, %v3794_v26  ;;  %v4120_v32 = vld [vmem:[#allocation22 + $0xd4] sm:$0xf]  ;;  %v3777_v54 = vor.u32 %v4101_v62, %v3776_v51 }
 0x853   :  { %v3861_v34 = vor.u32 %v4120_v32, %v3858_v33  ;;  %v3829_v26 = vor.u32 %v4112_v39, %v3826_v40  ;;  %v3816_v32 = vld [vmem:[#allocation22 + $0x80] sm:$0xf]  ;;  %v3757_v37 = vor.u32 %v4094_v46, %v3754_v30 }
 0x854   :  { %v2391_v57 = vmul.f32 %v5254_v55, %v5254_v55  ;;  %v2392_v5 = vmul.f32 %v5256_v56, %v5256_v56  ;;  %2731 = vmatpush.bf16.msrb.mxu0 %v3797_v31  ;;  %v4095_v31 = vld [vmem:[#allocation22 + $0x4] sm:$0xf0]  ;;  %v3817_v29 = vor.u32 %v4111_v35, %v3816_v32 }
 0x855   :  { %2750 = vmatpush.bf16.msrb.mxu1 %v3861_v34  ;;  %2695 = vmatpush.bf16.msra.mxu2 %v3777_v54  ;;  %v3753_v34 = vor.u32 %v4095_v31, %v3752_v28 }
 0x856   :  { %v2402_v60 = vadd.f32 %v2392_v5, %v2391_v57  ;;  %v4117_v57 = vld [vmem:[#allocation22 + $0xb4] sm:$0xf0]  ;;  %v4100_v5 = vld [vmem:[#allocation22 + $0x34] sm:$0xf] }
 0x857   :  { %v3841_v1 = vor.u32 %v4117_v57, %v3840_v53 }
 0x858   :  { %2403 = vadd.xlane.f32.xlu0 %v2402_v60  ;;  %2732 = vmatpush.bf16.msrb.mxu0 %v3789_v61  ;;  %v3778_v60 = vld [vmem:[#allocation22 + $0x38] sm:$0xf0] }
 0x859   :  { %2751 = vmatpush.bf16.msrb.mxu1 %v3853_v50  ;;  %v3781_v52 = vor.u32 %v4100_v5, %v3778_v60  ;;  %2714 = vmatpush.bf16.msra.mxu3 %v3841_v1 }
 0x85a   :  { %2696 = vmatpush.bf16.msra.mxu2 %v3769_v4 }
 0x85c   :  { %2733 = vmatpush.bf16.msrb.mxu0 %v3781_v52 }
 0x85d   :  { %2752 = vmatpush.bf16.msrb.mxu1 %v3845_v6  ;;  %2715 = vmatpush.bf16.msra.mxu3 %v3833_v11  ;;  %v2066_v6 = vld [vmem:[#allocation19] sm:$0x3] }
 0x85e   :  { %2697 = vmatpush.bf16.msra.mxu2 %v3761_v25  ;;  %v2462_v9 = vperm.slane %v2066_v6, 0 }
 0x860   :  { %2734 = vmatpush.bf16.msrb.mxu0 %v3773_v14 }
 0x861   :  { %2753 = vmatpush.bf16.msrb.mxu1 %v3837_v23  ;;  %2716 = vmatpush.bf16.msra.mxu3 %v3825_v19  ;;  %v2463_v23 = vperm.slane %v2066_v6, 1 }
 0x862   :  { %2698 = vmatpush.bf16.msra.mxu2 %v3753_v34 }
 0x864   :  { %2735 = vmatpush.bf16.msrb.mxu0 %v3765_v24 }
 0x865   :  { %2754 = vmatpush.bf16.msrb.mxu1 %v3829_v26  ;;  %2717 = vmatpush.bf16.msra.mxu3 %v3817_v29 }
 0x868   :  { %2736 = vmatpush.bf16.msrb.mxu0 %v3757_v37 }
 0x869   :  { %2755 = vmatpush.bf16.msrb.mxu1 %v3821_v44 }
 0x8b3   :  { %v2395_v17 = vpop.xlane.xlu0 %2394 }
 0x8b4   :  { %v2405_v27 = vmul.f32 %v2395_v17, %v5013_v59 }
 0x8b6   :  { %v2409_v33 = vadd.f32 1e-05, %v2405_v27 }
 0x8b8   :  { %4278 = vrsqrt.f32 %v2409_v33  ;;  %vm2419_vm10 = vweird.f32 %v2409_v33 }
 0x8bb   :  { %v2398_v61 = vpop.xlane.xlu1 %2397 }
 0x8bc   :  { %v2406_v45 = vmul.f32 %v2398_v61, %v5013_v59 }
 0x8be   :  { %v4279_v0 = vpop.eup %4278  ;;  %v2410_v50 = vadd.f32 1e-05, %v2406_v45 }
 0x8bf   :  { %v2414_v51 = vmul.f32 %v4279_v0, %v2409_v33  ;;  %vm2420_vm9 = vweird.f32 %v4279_v0 }
 0x8c0   :  { %4280 = vrsqrt.f32 %v2410_v50  ;;  %vm2421_vm11 = vmor %vm2419_vm10, %vm2420_vm9  ;;  %vm2429_vm13 = vweird.f32 %v2410_v50 }
 0x8c1   :  { %v2415_v62 = vmul.f32 %v4279_v0, %v2414_v51 }
 0x8c3   :  { %v2416_v53 = vmul.f32 0.5, %v2415_v62  ;;  %v2401_v54 = vpop.xlane.xlu2 %2400 }
 0x8c4   :  { %v2407_v57 = vmul.f32 %v2401_v54, %v5013_v59 }
 0x8c5   :  { %v2417_v5 = vsub.f32 1.5, %v2416_v53 }
 0x8c6   :  { %v4281_v60 = vpop.eup %4280  ;;  %v2411_v1 = vadd.f32 1e-05, %v2407_v57 }
 0x8c7   :  { %v2418_v52 = vmul.f32 %v4279_v0, %v2417_v5  ;;  %v2424_v63 = vmul.f32 %v4281_v60, %v2410_v50  ;;  %vm2430_vm12 = vweird.f32 %v4281_v60 }
 0x8c8   :  { %4282 = vrsqrt.f32 %v2411_v1  ;;  %vm2431_vm14 = vmor %vm2429_vm13, %vm2430_vm12  ;;  %vm2439_vm0 = vweird.f32 %v2411_v1 }
 0x8c9   :  { %v2425_v58 = vmul.f32 %v4281_v60, %v2424_v63  ;;  %v2422_v3 = vsel %vm2421_vm11, %v4279_v0, %v2418_v52 }
 0x8ca   :  { %v2453_v11 = vmul.f32 %v2422_v3, %v5227_v38  ;;  %v2454_v14 = vmul.f32 %v2422_v3, %v5229_v41 }
 0x8cb   :  { %v2426_v2 = vmul.f32 0.5, %v2425_v58  ;;  %v2404_v21 = vpop.xlane.xlu0 %2403 }
 0x8cc   :  { %v2408_v4 = vmul.f32 %v2404_v21, %v5013_v59  ;;  %v2466_v19 = vmul.f32 %v2462_v9, %v2453_v11  ;;  %v2467_v38 = vmul.f32 %v2463_v23, %v2454_v14 }
 0x8cd   :  { %v2427_v22 = vsub.f32 1.5, %v2426_v2 }
 0x8ce   :  { %v4283_v10 = vpop.eup %4282  ;;  %v2412_v15 = vadd.f32 1e-05, %v2408_v4  ;;  %v2479_v26 = vadd.f32 %v2475_v12, %v2466_v19  ;;  %v2480_v31 = vadd.f32 %v2476_v16, %v2467_v38 }
 0x8cf   :  { %v2428_v20 = vmul.f32 %v4281_v60, %v2427_v22  ;;  %v2434_v7 = vmul.f32 %v4283_v10, %v2411_v1  ;;  %vm2440_vm15 = vweird.f32 %v4283_v10 }
 0x8d0   :  { %4284 = vrsqrt.f32 %v2412_v15  ;;  %vm2441_vm1 = vmor %vm2439_vm0, %vm2440_vm15  ;;  %vm2449_vm3 = vweird.f32 %v2412_v15 }
 0x8d1   :  { %v2432_v8 = vsel %vm2431_vm14, %v4281_v60, %v2428_v20  ;;  %v2435_v25 = vmul.f32 %v4283_v10, %v2434_v7 }
 0x8d2   :  { %v2455_v13 = vmul.f32 %v2432_v8, %v5236_v36  ;;  %v2456_v17 = vmul.f32 %v2432_v8, %v5238_v43 }
 0x8d3   :  { %v2436_v24 = vmul.f32 0.5, %v2435_v25 }
 0x8d4   :  { %v2468_v41 = vmul.f32 %v2462_v9, %v2455_v13  ;;  %v2469_v39 = vmul.f32 %v2463_v23, %v2456_v17 }
 0x8d5   :  { %v2437_v40 = vsub.f32 1.5, %v2436_v24 }
 0x8d6   :  { %v4285_v27 = vpop.eup %4284  ;;  %v2481_v28 = vadd.f32 %v2475_v12, %v2468_v41  ;;  %v2482_v32 = vadd.f32 %v2476_v16, %v2469_v39 }
 0x8d7   :  { %v2438_v33 = vmul.f32 %v4283_v10, %v2437_v40  ;;  %v2444_v34 = vmul.f32 %v4285_v27, %v2412_v15  ;;  %vm2450_vm2 = vweird.f32 %v4285_v27 }
 0x8d8   :  { %v2522_v35 = vpack.c.bf16 %v2481_v28, %v2479_v26  ;;  %v2523_v46 = vpack.c.bf16 %v2482_v32, %v2480_v31  ;;  %vm2451_vm4 = vmor %vm2449_vm3, %vm2450_vm2 }
 0x8d9   :  { %v2445_v36 = vmul.f32 %v4285_v27, %v2444_v34  ;;  %v2442_v29 = vsel %vm2441_vm1, %v4283_v10, %v2438_v33 }
 0x8da   :  { %2699 = vmatmul.bf16.vlgmr.msra.gmra.mxu2 %v2522_v35  ;;  %2718 = vmatmul.bf16.vlgmr.msra.gmra.mxu3 %v2523_v46  ;;  %v2457_v47 = vmul.f32 %v2442_v29, %v5245_v48  ;;  %v2458_v42 = vmul.f32 %v2442_v29, %v5247_v49  ;;  %v2519_v49 = vld [vmem:[#allocation24] sm:$0x3] }
 0x8db   :  { %v2446_v43 = vmul.f32 0.5, %v2445_v36  ;;  %2737 = vmatmul.bf16.vlgmr.msrb.gmra.mxu0 %v2522_v35  ;;  %2756 = vmatmul.bf16.vlgmr.msrb.gmra.mxu1 %v2523_v46  ;;  %v2528_v1 = vperm.slane %v2519_v49, 1  ;;  %v2527_v58 = vperm.slane %v2519_v49, 0 }
 0x8dc   :  { %v2470_v45 = vmul.f32 %v2462_v9, %v2457_v47  ;;  %v2471_v50 = vmul.f32 %v2463_v23, %v2458_v42 }
 0x8dd   :  { %v2447_v30 = vsub.f32 1.5, %v2446_v43 }
 0x8de   :  { %v2483_v53 = vadd.f32 %v2475_v12, %v2470_v45  ;;  %v2484_v57 = vadd.f32 %v2476_v16, %v2471_v50 }
 0x8df   :  { %v2448_v37 = vmul.f32 %v4285_v27, %v2447_v30 }
 0x8e1   :  { %v2452_v44 = vsel %vm2451_vm4, %v4285_v27, %v2448_v37 }
 0x8e2   :  { %v2459_v61 = vmul.f32 %v2452_v44, %v5254_v55  ;;  %v2460_v0 = vmul.f32 %v2452_v44, %v5256_v56 }
 0x8e4   :  { %v2472_v51 = vmul.f32 %v2462_v9, %v2459_v61  ;;  %v2473_v62 = vmul.f32 %v2463_v23, %v2460_v0 }
 0x8e6   :  { %v2485_v54 = vadd.f32 %v2475_v12, %v2472_v51  ;;  %v2486_v5 = vadd.f32 %v2476_v16, %v2473_v62 }
 0x8e8   :  { %v2524_v60 = vpack.c.bf16 %v2485_v54, %v2483_v53  ;;  %v2525_v48 = vpack.c.bf16 %v2486_v5, %v2484_v57 }
 0x8ea   :  { %2704 = vmatmul.bf16.gmra.mxu2 %v2524_v60  ;;  %2723 = vmatmul.bf16.gmra.mxu3 %v2525_v48 }
 0x8eb   :  { %2742 = vmatmul.bf16.gmra.mxu0 %v2524_v60  ;;  %2761 = vmatmul.bf16.gmra.mxu1 %v2525_v48 }
 0x958   :  { %v2738_v52 = vpop.f32.mrf.mxu0  ;;  %v2757_v55 = vpop.f32.mrf.mxu1 }
 0x959   :  { %v2739_v63 = vadd.f32 %v2738_v52, %v2528_v1 }
 0x95b   :  { %v2758_v56 = vadd.f32 %v2757_v55, %v2739_v63 }
 0x95d   :  { %v2776_v6 = vmin.f32 %v2758_v56, 0.0  ;;  %v2700_v3 = vpop.f32.mrf.mxu2  ;;  %v2719_v2 = vpop.f32.mrf.mxu3  ;;  %vm2768_vm6 = vcmp.gt.f32.partialorder %v2758_v56, 0.0 }
 0x95e   :  { %v2701_v21 = vadd.f32 %v2700_v3, %v2527_v58 }
 0x95f   :  { %v2785_v4 = vmul.f32 1.442695, %v2776_v6 }
 0x960   :  { %v2720_v22 = vadd.f32 %v2719_v2, %v2701_v21  ;;  %v2740_v9 = vpop.f32.mrf.mxu0  ;;  %v2759_v10 = vpop.f32.mrf.mxu1 }
 0x961   :  { %v2741_v11 = vadd.f32 %v2740_v9, %v2528_v1  ;;  %4286 = vpow2.f32 %v2785_v4 }
 0x962   :  { %v2775_v14 = vmin.f32 %v2720_v22, 0.0  ;;  %vm2767_vm5 = vcmp.gt.f32.partialorder %v2720_v22, 0.0 }
 0x963   :  { %v2760_v15 = vadd.f32 %v2759_v10, %v2741_v11 }
 0x964   :  { %v2783_v18 = vmul.f32 1.442695, %v2775_v14 }
 0x965   :  { %v2778_v23 = vmin.f32 %v2760_v15, 0.0  ;;  %v2702_v20 = vpop.f32.mrf.mxu2  ;;  %v2721_v7 = vpop.f32.mrf.mxu3  ;;  %vm2770_vm8 = vcmp.gt.f32.partialorder %v2760_v15, 0.0 }
 0x966   :  { %4288 = vpow2.f32 %v2783_v18  ;;  %v2703_v8 = vadd.f32 %v2702_v20, %v2527_v58 }
 0x967   :  { %v2789_v25 = vmul.f32 1.442695, %v2778_v23  ;;  %v4287_v12 = vpop.eup %4286 }
 0x968   :  { %v2722_v16 = vadd.f32 %v2721_v7, %v2703_v8  ;;  %v2743_v13 = vpop.f32.mrf.mxu0  ;;  %v2762_v17 = vpop.f32.mrf.mxu1  ;;  %v3879_v41 = vadd.f32 -1.0, %v4287_v12 }
 0x969   :  { %v2744_v19 = vadd.f32 %v2743_v13, %v2528_v1  ;;  %4290 = vpow2.f32 %v2789_v25 }
 0x96a   :  { %v2777_v38 = vmin.f32 %v2722_v16, 0.0  ;;  %v2808_v35 = vsel %vm2768_vm6, %v2758_v56, %v3879_v41  ;;  %vm2769_vm7 = vcmp.gt.f32.partialorder %v2722_v16, 0.0 }
 0x96b   :  { %v2763_v24 = vadd.f32 %v2762_v17, %v2744_v19 }
 0x96c   :  { %v4289_v39 = vpop.eup %4288  ;;  %v2787_v40 = vmul.f32 1.442695, %v2777_v38 }
 0x96d   :  { %v2780_v27 = vmin.f32 %v2763_v24, 0.0  ;;  %v2705_v26 = vpop.f32.mrf.mxu2  ;;  %v2724_v28 = vpop.f32.mrf.mxu3  ;;  %v3878_v31 = vadd.f32 -1.0, %v4289_v39  ;;  %vm2772_vm10 = vcmp.gt.f32.partialorder %v2763_v24, 0.0 }
 0x96e   :  { %4292 = vpow2.f32 %v2787_v40  ;;  %v2706_v32 = vadd.f32 %v2705_v26, %v2527_v58 }
 0x96f   :  { %v2793_v33 = vmul.f32 1.442695, %v2780_v27  ;;  %v2807_v34 = vsel %vm2767_vm5, %v2720_v22, %v3878_v31  ;;  %v4291_v46 = vpop.eup %4290 }
 0x970   :  { %v2725_v36 = vadd.f32 %v2724_v28, %v2706_v32  ;;  %v2745_v43 = vpop.f32.mrf.mxu0  ;;  %v2815_v29 = vadd.f32 %v2808_v35, %v2807_v34  ;;  %v2764_v42 = vpop.f32.mrf.mxu1  ;;  %v3881_v44 = vadd.f32 -1.0, %v4291_v46 }
 0x971   :  { %v2746_v30 = vadd.f32 %v2745_v43, %v2528_v1  ;;  %4294 = vpow2.f32 %v2793_v33  ;;  %v4133_v43 = vld [vmem:[%s5411_s25 + $0x38] sm:$0xff] }
 0x972   :  { %v2779_v47 = vmin.f32 %v2725_v36, 0.0  ;;  %2816 = vadd.xlane.f32.xlu1 %v2815_v29  ;;  %v2810_v5 = vsel %vm2770_vm8, %v2760_v15, %v3881_v44  ;;  %vm2771_vm9 = vcmp.gt.f32.partialorder %v2725_v36, 0.0  ;;  %v4141_v29 = vld [vmem:[%s5411_s25 + $0x78] sm:$0xff]  ;;  %3077 = vmatpush.bf16.msrb.mxu2 %v4133_v43  ;;  %v4130_v44 = vld [vmem:[%s5411_s25 + $0x20] sm:$0xff] }
 0x973   :  { %v2765_v37 = vadd.f32 %v2764_v42, %v2746_v30  ;;  %3096 = vmatpush.bf16.msrb.mxu3 %v4141_v29  ;;  %v4132_v30 = vld [vmem:[%s5411_s25 + $0x30] sm:$0xff]  ;;  %v4131_v42 = vld [vmem:[%s5411_s25 + $0x28] sm:$0xff] }
 0x974   :  { %v4293_v61 = vpop.eup %4292  ;;  %v2791_v45 = vmul.f32 1.442695, %v2779_v47  ;;  %v4140_v47 = vld [vmem:[%s5411_s25 + $0x70] sm:$0xff] }
 0x975   :  { %v2782_v0 = vmin.f32 %v2765_v37, 0.0  ;;  %v2707_v50 = vpop.f32.mrf.mxu2  ;;  %v3880_v51 = vadd.f32 -1.0, %v4293_v61  ;;  %v2726_v54 = vpop.f32.mrf.mxu3  ;;  %vm2774_vm12 = vcmp.gt.f32.partialorder %v2765_v37, 0.0  ;;  %v4138_v61 = vld [vmem:[%s5411_s25 + $0x60] sm:$0xff] }
 0x976   :  { %4296 = vpow2.f32 %v2791_v45  ;;  %v2708_v62 = vadd.f32 %v2707_v50, %v2527_v58  ;;  %3078 = vmatpush.bf16.msrb.mxu2 %v4132_v30  ;;  %v4129_v45 = vld [vmem:[%s5411_s25 + $0x18] sm:$0xff]  ;;  %v4128_v50 = vld [vmem:[%s5411_s25 + $0x10] sm:$0xff] }
 0x977   :  { %v2797_v53 = vmul.f32 1.442695, %v2782_v0  ;;  %v2809_v57 = vsel %vm2769_vm7, %v2722_v16, %v3880_v51  ;;  %v4295_v60 = vpop.eup %4294  ;;  %3097 = vmatpush.bf16.msrb.mxu3 %v4140_v47  ;;  %v4137_v0 = vld [vmem:[%s5411_s25 + $0x58] sm:$0xff]  ;;  %v4136_v51 = vld [vmem:[%s5411_s25 + $0x50] sm:$0xff] }
 0x978   :  { %v2727_v48 = vadd.f32 %v2726_v54, %v2708_v62  ;;  %v2818_v49 = vadd.f32 %v2810_v5, %v2809_v57  ;;  %v3883_v52 = vadd.f32 -1.0, %v4295_v60  ;;  %v4127_v62 = vld [vmem:[%s5411_s25 + $0x8] sm:$0xff]  ;;  %v4126_v60 = vld [vmem:[%s5411_s25] sm:$0xff] }
 0x979   :  { %4298 = vpow2.f32 %v2797_v53  ;;  %v4135_v53 = vld [vmem:[%s5411_s25 + $0x48] sm:$0xff] }
 0x97a   :  { %v2781_v1 = vmin.f32 %v2727_v48, 0.0  ;;  %2819 = vadd.xlane.f32.xlu2 %v2818_v49  ;;  %v2812_v6 = vsel %vm2772_vm10, %v2763_v24, %v3883_v52  ;;  %vm2773_vm11 = vcmp.gt.f32.partialorder %v2727_v48, 0.0  ;;  %3079 = vmatpush.bf16.msrb.mxu2 %v4131_v42 }
 0x97c   :  { %v4297_v55 = vpop.eup %4296  ;;  %v2795_v63 = vmul.f32 1.442695, %v2781_v1 }
 0x97d   :  { %v3882_v56 = vadd.f32 -1.0, %v4297_v55 }
 0x97e   :  { %4300 = vpow2.f32 %v2795_v63  ;;  %3080 = vmatpush.bf16.msrb.mxu2 %v4130_v44 }
 0x97f   :  { %v2811_v58 = vsel %vm2771_vm9, %v2725_v36, %v3882_v56  ;;  %v4299_v3 = vpop.eup %4298  ;;  %vm3115_vm9 = vcmask 261120  }
 0x980   :  { %v2821_v2 = vadd.f32 %v2812_v6, %v2811_v58  ;;  %v3885_v21 = vadd.f32 -1.0, %v4299_v3 }
 0x982   :  { %2822 = vadd.xlane.f32.xlu0 %v2821_v2  ;;  %v2814_v10 = vsel %vm2774_vm12, %v2765_v37, %v3885_v21  ;;  %v4139_v37 = vld [vmem:[%s5411_s25 + $0x68] sm:$0xff]  ;;  %3081 = vmatpush.bf16.msrb.mxu2 %v4129_v45 }
 0x983   :  { %3098 = vmatpush.bf16.msrb.mxu3 %v4139_v37 }
 0x984   :  { %v4301_v4 = vpop.eup %4300 }
 0x985   :  { %v3884_v22 = vadd.f32 -1.0, %v4301_v4 }
 0x986   :  { %3082 = vmatpush.bf16.msrb.mxu2 %v4128_v50 }
 0x987   :  { %v2813_v9 = vsel %vm2773_vm11, %v2727_v48, %v3884_v22  ;;  %3099 = vmatpush.bf16.msrb.mxu3 %v4138_v61  ;;  %v4134_v48 = vld [vmem:[%s5411_s25 + $0x40] sm:$0xff] }
 0x988   :  { %v2824_v11 = vadd.f32 %v2814_v10, %v2813_v9 }
 0x98a   :  { %2825 = vadd.xlane.f32.xlu1 %v2824_v11  ;;  %3083 = vmatpush.bf16.msrb.mxu2 %v4127_v62  ;;  %v2520_v11 = vld [vmem:[#allocation25] sm:$0x3] }
 0x98b   :  { %3100 = vmatpush.bf16.msrb.mxu3 %v4137_v0 }
 0x98e   :  { %3084 = vmatpush.bf16.msrb.mxu2 %v4126_v60 }
 0x98f   :  { %3101 = vmatpush.bf16.msrb.mxu3 %v4136_v51 }
 0x993   :  { %3102 = vmatpush.bf16.msrb.mxu3 %v4135_v53 }
 0x997   :  { %3103 = vmatpush.bf16.msrb.mxu3 %v4134_v48 }
 0x9e5   :  { %v2817_v14 = vpop.xlane.xlu1 %2816 }
 0x9e6   :  { %v2827_v15 = vmul.f32 %v2817_v14, %v5013_v59 }
 0x9e8   :  { %v5275_v18 = vsub.f32 %v2807_v34, %v2827_v15  ;;  %v5277_v23 = vsub.f32 %v2808_v35, %v2827_v15 }
 0x9ea   :  { %v2839_v20 = vmul.f32 %v5275_v18, %v5275_v18  ;;  %v2840_v7 = vmul.f32 %v5277_v23, %v5277_v23 }
 0x9ec   :  { %v2847_v8 = vadd.f32 %v2840_v7, %v2839_v20 }
 0x9ed   :  { %v2820_v25 = vpop.xlane.xlu2 %2819 }
 0x9ee   :  { %v2828_v12 = vmul.f32 %v2820_v25, %v5013_v59  ;;  %2848 = vadd.xlane.f32.xlu2 %v2847_v8  ;;  %v2916_v25 = vperm.slane %v2520_v11, 0 }
 0x9f0   :  { %v5284_v16 = vsub.f32 %v2809_v57, %v2828_v12  ;;  %v5286_v13 = vsub.f32 %v2810_v5, %v2828_v12 }
 0x9f2   :  { %v2841_v17 = vmul.f32 %v5284_v16, %v5284_v16  ;;  %v2842_v19 = vmul.f32 %v5286_v13, %v5286_v13 }
 0x9f4   :  { %v2850_v38 = vadd.f32 %v2842_v19, %v2841_v17 }
 0x9f5   :  { %v2823_v24 = vpop.xlane.xlu0 %2822 }
 0x9f6   :  { %v2829_v41 = vmul.f32 %v2823_v24, %v5013_v59  ;;  %2851 = vadd.xlane.f32.xlu0 %v2850_v38  ;;  %v2521_v24 = vld [vmem:[#allocation27] sm:$0x3] }
 0x9f8   :  { %v5293_v39 = vsub.f32 %v2811_v58, %v2829_v41  ;;  %v5295_v40 = vsub.f32 %v2812_v6, %v2829_v41  ;;  %v2917_v41 = vperm.slane %v2520_v11, 1 }
 0x9fa   :  { %v2843_v27 = vmul.f32 %v5293_v39, %v5293_v39  ;;  %v2844_v26 = vmul.f32 %v5295_v40, %v5295_v40 }
 0x9fc   :  { %v2853_v28 = vadd.f32 %v2844_v26, %v2843_v27 }
 0x9fd   :  { %v2826_v31 = vpop.xlane.xlu1 %2825 }
 0x9fe   :  { %v2830_v32 = vmul.f32 %v2826_v31, %v5013_v59  ;;  %2854 = vadd.xlane.f32.xlu1 %v2853_v28 }
 0xa00   :  { %v5302_v33 = vsub.f32 %v2813_v9, %v2830_v32  ;;  %v5304_v34 = vsub.f32 %v2814_v10, %v2830_v32  ;;  %v2929_v32 = vperm.slane %v2521_v24, 0 }
 0xa02   :  { %v2845_v35 = vmul.f32 %v5302_v33, %v5302_v33  ;;  %v2846_v46 = vmul.f32 %v5304_v34, %v5304_v34 }
 0xa04   :  { %v2856_v36 = vadd.f32 %v2846_v46, %v2845_v35 }
 0xa06   :  { %2857 = vadd.xlane.f32.xlu2 %v2856_v36 }
 0xa61   :  { %v2849_v54 = vpop.xlane.xlu2 %2848 }
 0xa62   :  { %v2859_v57 = vmul.f32 %v2849_v54, %v5013_v59 }
 0xa64   :  { %v2863_v5 = vadd.f32 1e-05, %v2859_v57 }
 0xa66   :  { %4302 = vrsqrt.f32 %v2863_v5  ;;  %vm2873_vm14 = vweird.f32 %v2863_v5 }
 0xa69   :  { %v2852_v49 = vpop.xlane.xlu0 %2851 }
 0xa6a   :  { %v2860_v1 = vmul.f32 %v2852_v49, %v5013_v59 }
 0xa6c   :  { %v4303_v52 = vpop.eup %4302  ;;  %v2864_v55 = vadd.f32 1e-05, %v2860_v1 }
 0xa6d   :  { %v2868_v63 = vmul.f32 %v4303_v52, %v2863_v5  ;;  %vm2874_vm13 = vweird.f32 %v4303_v52 }
 0xa6e   :  { %4304 = vrsqrt.f32 %v2864_v55  ;;  %vm2875_vm15 = vmor %vm2873_vm14, %vm2874_vm13  ;;  %vm2883_vm1 = vweird.f32 %v2864_v55 }
 0xa6f   :  { %v2869_v56 = vmul.f32 %v4303_v52, %v2868_v63 }
 0xa71   :  { %v2870_v58 = vmul.f32 0.5, %v2869_v56  ;;  %v2855_v6 = vpop.xlane.xlu1 %2854 }
 0xa72   :  { %v2861_v3 = vmul.f32 %v2855_v6, %v5013_v59 }
 0xa73   :  { %v2871_v2 = vsub.f32 1.5, %v2870_v58 }
 0xa74   :  { %v4305_v21 = vpop.eup %4304  ;;  %v2865_v4 = vadd.f32 1e-05, %v2861_v3 }
 0xa75   :  { %v2872_v22 = vmul.f32 %v4303_v52, %v2871_v2  ;;  %v2878_v9 = vmul.f32 %v4305_v21, %v2864_v55  ;;  %vm2884_vm0 = vweird.f32 %v4305_v21 }
 0xa76   :  { %4306 = vrsqrt.f32 %v2865_v4  ;;  %vm2885_vm2 = vmor %vm2883_vm1, %vm2884_vm0  ;;  %vm2893_vm4 = vweird.f32 %v2865_v4 }
 0xa77   :  { %v2879_v10 = vmul.f32 %v4305_v21, %v2878_v9  ;;  %v2876_v14 = vsel %vm2875_vm15, %v4303_v52, %v2872_v22 }
 0xa78   :  { %v2907_v17 = vmul.f32 %v2876_v14, %v5275_v18  ;;  %v2908_v19 = vmul.f32 %v2876_v14, %v5277_v23 }
 0xa79   :  { %v2880_v15 = vmul.f32 0.5, %v2879_v10  ;;  %v2858_v20 = vpop.xlane.xlu2 %2857 }
 0xa7a   :  { %v2862_v7 = vmul.f32 %v2858_v20, %v5013_v59  ;;  %v2930_v59 = vperm.slane %v2521_v24, 1  ;;  %v2920_v36 = vmul.f32 %v2916_v25, %v2907_v17  ;;  %v2921_v18 = vmul.f32 %v2917_v41, %v2908_v19 }
 0xa7b   :  { %v2881_v8 = vsub.f32 1.5, %v2880_v15 }
 0xa7c   :  { %v4307_v12 = vpop.eup %4306  ;;  %v2866_v38 = vadd.f32 1e-05, %v2862_v7  ;;  %v2933_v42 = vadd.f32 %v2929_v32, %v2920_v36  ;;  %v2934_v44 = vadd.f32 %v2930_v59, %v2921_v18 }
 0xa7d   :  { %v2882_v27 = vmul.f32 %v4305_v21, %v2881_v8  ;;  %v2888_v26 = vmul.f32 %v4307_v12, %v2865_v4  ;;  %vm2894_vm3 = vweird.f32 %v4307_v12 }
 0xa7e   :  { %4308 = vrsqrt.f32 %v2866_v38  ;;  %vm2895_vm5 = vmor %vm2893_vm4, %vm2894_vm3  ;;  %vm2903_vm7 = vweird.f32 %v2866_v38 }
 0xa7f   :  { %v2886_v28 = vsel %vm2885_vm2, %v4305_v21, %v2882_v27  ;;  %v2889_v31 = vmul.f32 %v4307_v12, %v2888_v26 }
 0xa80   :  { %v2909_v35 = vmul.f32 %v2886_v28, %v5284_v16  ;;  %v2910_v46 = vmul.f32 %v2886_v28, %v5286_v13 }
 0xa81   :  { %v2890_v43 = vmul.f32 0.5, %v2889_v31 }
 0xa82   :  { %v2922_v23 = vmul.f32 %v2916_v25, %v2909_v35  ;;  %v2923_v29 = vmul.f32 %v2917_v41, %v2910_v46 }
 0xa83   :  { %v2891_v30 = vsub.f32 1.5, %v2890_v43 }
 0xa84   :  { %v4309_v47 = vpop.eup %4308  ;;  %v2935_v37 = vadd.f32 %v2929_v32, %v2922_v23  ;;  %v2936_v61 = vadd.f32 %v2930_v59, %v2923_v29 }
 0xa85   :  { %v2892_v45 = vmul.f32 %v4307_v12, %v2891_v30  ;;  %v2898_v0 = vmul.f32 %v4309_v47, %v2866_v38  ;;  %vm2904_vm6 = vweird.f32 %v4309_v47 }
 0xa86   :  { %v2941_v50 = vpack.c.bf16 %v2935_v37, %v2933_v42  ;;  %v2942_v51 = vpack.c.bf16 %v2936_v61, %v2934_v44  ;;  %vm2905_vm8 = vmor %vm2903_vm7, %vm2904_vm6 }
 0xa87   :  { %v2899_v16 = vmul.f32 %v4309_v47, %v2898_v0  ;;  %v2896_v62 = vsel %vm2895_vm5, %v4307_v12, %v2892_v45 }
 0xa88   :  { %3085 = vmatmul.bf16.vlgmr.msrb.gmra.mxu2 %v2941_v50  ;;  %3104 = vmatmul.bf16.vlgmr.msrb.gmra.mxu3 %v2942_v51  ;;  %v2911_v54 = vmul.f32 %v2896_v62, %v5293_v39  ;;  %v2912_v57 = vmul.f32 %v2896_v62, %v5295_v40  ;;  %v4163_v40 = vld [vmem:[#allocation28] ss:$0 sm:$0xff] }
 0xa89   :  { %v2900_v13 = vmul.f32 0.5, %v2899_v16 }
 0xa8a   :  { %v2924_v49 = vmul.f32 %v2916_v25, %v2911_v54  ;;  %v2925_v52 = vmul.f32 %v2917_v41, %v2912_v57 }
 0xa8b   :  { %v2901_v53 = vsub.f32 1.5, %v2900_v13 }
 0xa8c   :  { %v2937_v56 = vadd.f32 %v2929_v32, %v2924_v49  ;;  %v2938_v6 = vadd.f32 %v2930_v59, %v2925_v52 }
 0xa8d   :  { %v2902_v5 = vmul.f32 %v4309_v47, %v2901_v53 }
 0xa8f   :  { %v2906_v60 = vsel %vm2905_vm8, %v4309_v47, %v2902_v5 }
 0xa90   :  { %v2913_v48 = vmul.f32 %v2906_v60, %v5302_v33  ;;  %v2914_v1 = vmul.f32 %v2906_v60, %v5304_v34 }
 0xa92   :  { %v2926_v55 = vmul.f32 %v2916_v25, %v2913_v48  ;;  %v2927_v63 = vmul.f32 %v2917_v41, %v2914_v1 }
 0xa94   :  { %v2939_v58 = vadd.f32 %v2929_v32, %v2926_v55  ;;  %v2940_v3 = vadd.f32 %v2930_v59, %v2927_v63 }
 0xa96   :  { %v2943_v2 = vpack.c.bf16 %v2939_v58, %v2937_v56  ;;  %v2944_v39 = vpack.c.bf16 %v2940_v3, %v2938_v6 }
 0xa98   :  { %3090 = vmatmul.bf16.gmra.mxu2 %v2943_v2  ;;  %3109 = vmatmul.bf16.gmra.mxu3 %v2944_v39 }
 0xb0b   :  { %v3086_v21 = vpop.f32.mrf.mxu2  ;;  %v3105_v4 = vpop.f32.mrf.mxu3 }
 0xb0c   :  { %v3087_v22 = vadd.f32 %v4163_v40, %v3086_v21 }
 0xb0e   :  { %v3106_v33 = vadd.f32 %v3105_v4, %v3087_v22 }
 0xb10   :  { %3116 = vst.msk [vmem:[%s5413_s27] sm:$0xff] %vm3115_vm9, %v3106_v33 }
 0xb13   :  { %v3088_v34 = vpop.f32.mrf.mxu2  ;;  %v3107_v9 = vpop.f32.mrf.mxu3 }
 0xb14   :  { %v3089_v10 = vadd.f32 %v4163_v40, %v3088_v34 }
 0xb16   :  { %v3108_v11 = vadd.f32 %v3107_v9, %v3089_v10 }
 0xb18   :  { %3117 = vst.msk [vmem:[%s5413_s27 + $0x8] sm:$0xff] %vm3115_vm9, %v3108_v11 }
 0xb1b   :  { %v3091_v14 = vpop.f32.mrf.mxu2  ;;  %v3110_v15 = vpop.f32.mrf.mxu3 }
 0xb1c   :  { %v3092_v20 = vadd.f32 %v4163_v40, %v3091_v14 }
 0xb1e   :  { %v3111_v7 = vadd.f32 %v3110_v15, %v3092_v20 }
 0xb20   :  { %3118 = vst.msk [vmem:[%s5413_s27 + $0x10] sm:$0xff] %vm3115_vm9, %v3111_v7 }
 0xb23   :  { %v3093_v8 = vpop.f32.mrf.mxu2  ;;  %v3112_v12 = vpop.f32.mrf.mxu3 }
 0xb24   :  { %v3094_v25 = vadd.f32 %v4163_v40, %v3093_v8 }
 0xb26   :  { %v3113_v17 = vadd.f32 %v3112_v12, %v3094_v25 }
 0xb28   :  { %3119 = vst.msk [vmem:[%s5413_s27 + $0x18] sm:$0xff] %vm3115_vm9, %v3113_v17 }
 0xb29   :  { %3124 = vsyncpa [#allocation3], 1 }
 0xb2a   :  { %3125 = vsyncpa [#allocation5], 1 }
 0xb2b   :  { %3126 = vsyncpa [#allocation8], 1 }
 0xb2c   :  { %3127 = vsyncpa [#allocation11], 1 }
 0xb2d   :  { %3128 = vsyncpa [#allocation14], 1 }
 0xb2e   :  { %3129 = vsyncpa [#allocation17], 1 }
 0xb2f   :  { %3130 = vsyncpa [#allocation20], 1 }
 0xb30   :  { %3131 = vsyncpa [#allocation23], 1 }
 0xb31   :  { %3132 = vsyncpa [#allocation26], 1 }
 0xb32   :  { %3133 = vsyncpa [#allocation29], 1 }

// kernel: forward.8
= control target key start
LH: loop header
LB: loop body
LE: loop exit
PB: predicated region body
PF: predicated region fallthrough
CT: control target
= control target key end

     0   :  { %s868_s18 = smov 0   ;;  %s979_s0 = inlined_call_operand.vmem [shape: f32[2,4,8,16], index: 0, kind: input, shape index: {}]   ;;  %s980_s1 = inlined_call_operand.vmem [shape: bf16[2,16,64], index: 1, kind: input, shape index: {}]   ;;  %s981_s2 = inlined_call_operand.vmem [shape: bf16[2,16,64], index: 2, kind: input, shape index: {}]   ;;  %s982_s3 = inlined_call_operand.vmem [shape: bf16[2,16,64], index: 3, kind: input, shape index: {}]   ;;  %s983_s4 = inlined_call_operand.vmem [shape: f32[2,1,64], index: 4, kind: input, shape index: {}]   ;;  %s984_s5 = inlined_call_operand.vmem [shape: f32[2,8,16], index: 5, kind: output, shape index: {}]  }
   0x1 LB: > { %s874_s19 = sadd.s32 4294967295, %s831_s18   ;;  %p732_p0 = scmp.ge.s32.totalorder %s831_s18, 1  ;;  %s831_s18 = sphi %s868_s18, %s15_s18  }
   0x2   : > { %p215_p1 = scmp.lt.s32.totalorder %s831_s18, 3 }
   0x4   : > { %p216_p2 = pnand %p732_p0, %p215_p1 }
   0x5   : > { %p255_p3 = scmp.lt.s32.totalorder (!%p216_p2), %s874_s19, 1  ;;  %p373_p4 = scmp.eq.s32.totalorder (!%p216_p2), %s874_s19, 0 }
   0x6   : > { %219 = sbr.rel (%p216_p2) target bundleno = 2397 (0x95d), region = 40  ;;  %s834_s8 = smov (!%p216_p2), 96  }
   0x7   : > { %s835_s9 = smov (!%p216_p2), 16   ;;  %s837_s11 = smov (!%p216_p2), 80  }
   0xb   : > { %s880_s20 = scalar_select %p255_p3, %s874_s19, 1  ;;  %v740_v0 = vld [vmem:[%s979_s0 + $0x20] sm:$0xff]  ;;  %v741_v1 = vld [vmem:[%s979_s0 + $0x28] sm:$0xff]  ;;  %vm301_vm0 = vcmask 130048   ;;  %v833_v9 = vmov 0   ;;  %v742_v10 = vld [vmem:[%s979_s0 + $0x30] sm:$0xff] }
   0xc   : > { %v278_v2 = vld [vmem:[%s979_s0] sm:$0xff]  ;;  %v279_v3 = vld [vmem:[%s979_s0 + $0x8] sm:$0xff]  ;;  %v291_v6 = vpack.c.bf16 %v741_v1, %v740_v0  ;;  %v743_v11 = vld [vmem:[%s979_s0 + $0x38] sm:$0xff]  ;;  %vm366_vm1 = vcmask 523264   ;;  %s439_s12 = scalar_select %p373_p4, 1, 2 }
   0xd   : > { %s886_s23 = sshll.u32 %s880_s20, 3  ;;  %s272_s26 = scalar_lea.vmem %s983_s4, %s880_s20  ;;  %v287_v7 = vpack.c.bf16 %v279_v3, %v278_v2  ;;  %v280_v12 = vld [vmem:[%s979_s0 + $0x10] sm:$0xff]  ;;  %v281_v13 = vld [vmem:[%s979_s0 + $0x18] sm:$0xff]  ;;  %v292_v14 = vpack.c.bf16 %v743_v11, %v742_v10 }
   0xe   : > { %s264_s10 = scalar_lea.vmem %s981_s2, %s886_s23  ;;  %s259_s13 = scalar_lea.vmem %s980_s1, %s886_s23  ;;  %v288_v15 = vpack.c.bf16 %v281_v13, %v280_v12  ;;  %v792_v16 = vld [vmem:[%s272_s26] ss:$0 sm:$0xff] }
   0xf   : > { %v777_v4 = vld [vmem:[%s264_s10] sm:$0xff]  ;;  %s269_s16 = scalar_lea.vmem %s982_s3, %s886_s23  ;;  %s836_s10 = smov 32  }
  0x10   : > { %v776_v5 = vld [vmem:[%s259_s13] sm:$0xff]  ;;  %315 = vmatpush.bf16.msra.mxu0 %v777_v4  ;;  %s374_s20 = scalar_select %p373_p4, 0, 3 }
  0x11   : > { %v778_v8 = vld [vmem:[%s269_s16] sm:$0xff]  ;;  %346 = vmatpush.bf16.msra.mxu1 %v776_v5  ;;  %s762_s13 = sshll.u32 %s439_s12, 3  ;;  %s276_s27 = scalar_lea.vmem %s984_s5, %s886_s23 }
  0x12   : > { %394 = vmatpush.bf16.msra.mxu2 %v778_v8  ;;  %457 = vmatpush.bf16.msra.mxu3 %v778_v8  ;;  %s756_s26 = sshll.u32 %s374_s20, 3  ;;  %s441_s14 = scalar_lea.vmem [#allocation2], %s762_s13 }
  0x13   : > { %748 = vmatmul.msk.bf16.vlgmr.msra.gmra.mxu0 %vm301_vm0, %v291_v6  ;;  %s376_s7 = scalar_lea.vmem [#allocation2], %s756_s26 }
  0x14   : > { %754 = vmatmul.msk.bf16.vlgmr.msra.gmra.mxu1 %vm301_vm0, %v287_v7  ;;  %s502_s15 = scalar_select %p373_p4, 2, 1 }
  0x15   : > { %395 = vmatmul.bf16.vlgmr.msra.gmra.mxu2 %v833_v9  ;;  %s565_s21 = scalar_select %p373_p4, 3, 0 }
  0x16   : > { %520 = vmatpush.bf16.msrb.mxu2 %v778_v8  ;;  %583 = vmatpush.bf16.msrb.mxu3 %v778_v8  ;;  %s765_s16 = sshll.u32 %s502_s15, 3 }
  0x17   : > { %s504_s17 = scalar_lea.vmem [#allocation2], %s765_s16  ;;  %s768_s22 = sshll.u32 %s565_s21, 3 }
  0x18   : > { %s567_s24 = scalar_lea.vmem [#allocation2], %s768_s22 }
  0x23   : > { %749 = vmatmul.msk.bf16.gmra.mxu0 %vm301_vm0, %v292_v14 }
  0x24   : > { %755 = vmatmul.msk.bf16.gmra.mxu1 %vm301_vm0, %v288_v15 }
  0x90   : > { %v317_v17 = vpop.f32.mrf.mxu0 }
  0x91   : > { %v348_v18 = vpop.f32.mrf.mxu1 }
  0x92   : > { %v349_v19 = vadd.f32 %v348_v18, %v317_v17 }
  0x94   : > { %v362_v20 = vadd.f32 %v792_v16, %v349_v19 }
  0x96   : > { %367 = vst.msk [vmem:[#allocation2] sm:$0xff] %vm366_vm1, %v362_v20 }
  0x98   : > { %v396_v21 = vpop.f32.mrf.mxu2  ;;  %v319_v22 = vpop.f32.mrf.mxu0 }
  0x99   : > { %v350_v23 = vpop.f32.mrf.mxu1 }
  0x9a   : > { %v351_v24 = vadd.f32 %v350_v23, %v319_v22 }
  0x9c   : > { %v363_v25 = vadd.f32 %v792_v16, %v351_v24 }
  0x9e   : > { %368 = vst.msk [vmem:[#allocation2 + $0x8] sm:$0xff] %vm366_vm1, %v363_v25 }
  0xa0   : > { %v398_v26 = vpop.f32.mrf.mxu2  ;;  %v322_v27 = vpop.f32.mrf.mxu0 }
  0xa1   : > { %v353_v28 = vpop.f32.mrf.mxu1 }
  0xa2   : > { %v354_v29 = vadd.f32 %v353_v28, %v322_v27 }
  0xa4   : > { %v364_v30 = vadd.f32 %v792_v16, %v354_v29 }
  0xa6   : > { %369 = vst.msk [vmem:[#allocation2 + $0x10] sm:$0xff] %vm366_vm1, %v364_v30 }
  0xa8   : > { %v324_v31 = vpop.f32.mrf.mxu0 }
  0xa9   : > { %v355_v32 = vpop.f32.mrf.mxu1 }
  0xaa   : > { %v356_v33 = vadd.f32 %v355_v32, %v324_v31 }
  0xac   : > { %v365_v34 = vadd.f32 %v792_v16, %v356_v33 }
  0xae   : > { %370 = vst.msk [vmem:[#allocation2 + $0x18] sm:$0xff] %vm366_vm1, %v365_v34 }
  0xb5   : > { %v377_v35 = vld [vmem:[%s376_s7] sm:$0xff] }
  0xb6   : > { %v400_v36 = vadd.f32 %v396_v21, %v377_v35  ;;  %v442_v61 = vld [vmem:[%s441_s14] sm:$0xff] }
  0xb7   : > { %v505_v25 = vld [vmem:[%s504_s17] sm:$0xff] }
  0xb8   : > { %793 = vtanh.f32 %v400_v36  ;;  %v761_v38 = vmul.f32 -1.442695, %v400_v36 }
  0xba   : > { %795 = vpow2.f32 %v761_v38 }
  0xbe   : > { %v794_v37 = vpop.eup %793 }
  0xbf   : > { %423 = vrot.lane.b32.xlu0 %v794_v37, %s834_s8 }
  0xc0   : > { %v796_v39 = vpop.eup %795 }
  0xc1   : > { %v404_v40 = vadd.f32 1.0, %v796_v39 }
  0xc3   : > { %797 = vrcp.f32 %v404_v40  ;;  %v416_v46 = vand.u32 2147483648, %v404_v40  ;;  %vm410_vm3 = vweird.f32 %v404_v40  ;;  %v414_v47 = vand.u32 2147483647, %v404_v40 }
  0xc5   : > { %v417_v49 = vor.u32 1.1754944e-38, %v416_v46  ;;  %vm415_vm5 = vcmp.eq.f32.partialorder %v414_v47, 8.507059e+37 }
  0xc9   : > { %v798_v41 = vpop.eup %797 }
  0xca   : > { %v406_v42 = vmul.f32 %v798_v41, %v404_v40  ;;  %vm411_vm2 = vweird.f32 %v798_v41 }
  0xcb   : > { %vm412_vm4 = vmor %vm410_vm3, %vm411_vm2 }
  0xcc   : > { %v407_v43 = vsub.f32 1.0, %v406_v42 }
  0xce   : > { %v408_v44 = vmul.f32 %v798_v41, %v407_v43 }
  0xd0   : > { %v409_v45 = vadd.f32 %v798_v41, %v408_v44 }
  0xd2   : > { %v413_v48 = vsel %vm412_vm4, %v798_v41, %v409_v45 }
  0xd3   : > { %v418_v51 = vsel %vm415_vm5, %v417_v49, %v413_v48 }
  0xd4   : > { %v421_v53 = vmul.f32 0.0, %v418_v51 }
 0x131   : > { %v424_v50 = vpop.permute.xlu0 %423 }
 0x132   : > { %v426_v52 = vmul.f32 %v424_v50, %v418_v51 }
 0x134   : > { %428 = vrot.lane.b32.xlu0 %v426_v52, %s835_s9 }
 0x1a6   : > { %v429_v54 = vpop.permute.xlu0 %428 }
 0x1a7   : > { %v431_v55 = vadd.f32 %v429_v54, %v421_v53 }
 0x1a9   : > { %799 = vtanh.f32 %v431_v55 }
 0x1af   : > { %v800_v56 = vpop.eup %799 }
 0x1b0   : > { %434 = vrot.lane.b32.xlu1 %v800_v56, %s836_s10 }
 0x222   : > { %v435_v57 = vpop.permute.xlu1 %434 }
 0x223   : > { %v944_v58 = vmul.f32 %v435_v57, %v418_v51 }
 0x225   : > { %v443_v59 = vpack.c.bf16 %v944_v58, %v944_v58 }
 0x227   : > { %445 = vrot.lane.b32.xlu1 %v443_v59, %s837_s11 }
 0x299   : > { %v446_v60 = vpop.permute.xlu1 %445 }
 0x29a   : > { %763 = vmatmul.msk.bf16.vlgmr.msra.gmra.mxu3 %vm301_vm0, %v446_v60 }
 0x31d   : > { %v459_v62 = vpop.f32.mrf.mxu3 }
 0x31e   : > { %v463_v63 = vadd.f32 %v459_v62, %v442_v61 }
 0x320   : > { %801 = vtanh.f32 %v463_v63  ;;  %v764_v2 = vmul.f32 -1.442695, %v463_v63 }
 0x322   : > { %803 = vpow2.f32 %v764_v2 }
 0x325   : > { %v461_v0 = vpop.f32.mrf.mxu3 }
 0x326   : > { %v802_v1 = vpop.eup %801 }
 0x327   : > { %486 = vrot.lane.b32.xlu2 %v802_v1, %s834_s8 }
 0x328   : > { %v804_v3 = vpop.eup %803 }
 0x329   : > { %v467_v4 = vadd.f32 1.0, %v804_v3 }
 0x32b   : > { %805 = vrcp.f32 %v467_v4  ;;  %v479_v10 = vand.u32 2147483648, %v467_v4  ;;  %vm473_vm7 = vweird.f32 %v467_v4  ;;  %v477_v11 = vand.u32 2147483647, %v467_v4 }
 0x32d   : > { %v480_v13 = vor.u32 1.1754944e-38, %v479_v10  ;;  %vm478_vm9 = vcmp.eq.f32.partialorder %v477_v11, 8.507059e+37 }
 0x331   : > { %v806_v5 = vpop.eup %805 }
 0x332   : > { %v469_v6 = vmul.f32 %v806_v5, %v467_v4  ;;  %vm474_vm6 = vweird.f32 %v806_v5 }
 0x333   : > { %vm475_vm8 = vmor %vm473_vm7, %vm474_vm6 }
 0x334   : > { %v470_v7 = vsub.f32 1.0, %v469_v6 }
 0x336   : > { %v471_v8 = vmul.f32 %v806_v5, %v470_v7 }
 0x338   : > { %v472_v9 = vadd.f32 %v806_v5, %v471_v8 }
 0x33a   : > { %v476_v12 = vsel %vm475_vm8, %v806_v5, %v472_v9 }
 0x33b   : > { %v481_v15 = vsel %vm478_vm9, %v480_v13, %v476_v12 }
 0x33c   : > { %v484_v17 = vmul.f32 %v481_v15, %v431_v55  ;;  %v568_v55 = vld [vmem:[%s567_s24] sm:$0xff] }
 0x381   : > { %v487_v14 = vpop.permute.xlu2 %486 }
 0x382   : > { %v489_v16 = vmul.f32 %v487_v14, %v481_v15 }
 0x384   : > { %491 = vrot.lane.b32.xlu2 %v489_v16, %s835_s9 }
 0x3de   : > { %v492_v18 = vpop.permute.xlu2 %491 }
 0x3df   : > { %v494_v19 = vadd.f32 %v492_v18, %v484_v17 }
 0x3e1   : > { %807 = vtanh.f32 %v494_v19 }
 0x3e7   : > { %v808_v20 = vpop.eup %807 }
 0x3e8   : > { %497 = vrot.lane.b32.xlu0 %v808_v20, %s836_s10 }
 0x45a   : > { %v498_v21 = vpop.permute.xlu0 %497 }
 0x45b   : > { %v500_v22 = vmul.f32 %v498_v21, %v481_v15 }
 0x45d   : > { %v506_v23 = vpack.c.bf16 %v500_v22, %v500_v22  ;;  %v501_v50 = vadd.f32 %v500_v22, %v944_v58 }
 0x45f   : > { %508 = vrot.lane.b32.xlu1 %v506_v23, %s837_s11 }
 0x4d1   : > { %v509_v24 = vpop.permute.xlu1 %508 }
 0x4d2   : > { %766 = vmatmul.msk.bf16.vlgmr.msrb.gmra.mxu2 %vm301_vm0, %v509_v24 }
 0x555   : > { %v522_v26 = vpop.f32.mrf.mxu2 }
 0x556   : > { %v526_v27 = vadd.f32 %v522_v26, %v505_v25 }
 0x558   : > { %809 = vtanh.f32 %v526_v27  ;;  %v767_v30 = vmul.f32 -1.442695, %v526_v27 }
 0x55a   : > { %811 = vpow2.f32 %v767_v30 }
 0x55d   : > { %v524_v28 = vpop.f32.mrf.mxu2 }
 0x55e   : > { %v810_v29 = vpop.eup %809 }
 0x55f   : > { %549 = vrot.lane.b32.xlu2 %v810_v29, %s834_s8 }
 0x560   : > { %v812_v31 = vpop.eup %811 }
 0x561   : > { %v530_v32 = vadd.f32 1.0, %v812_v31 }
 0x563   : > { %813 = vrcp.f32 %v530_v32  ;;  %v542_v38 = vand.u32 2147483648, %v530_v32  ;;  %vm536_vm11 = vweird.f32 %v530_v32  ;;  %v540_v39 = vand.u32 2147483647, %v530_v32 }
 0x565   : > { %v543_v41 = vor.u32 1.1754944e-38, %v542_v38  ;;  %vm541_vm13 = vcmp.eq.f32.partialorder %v540_v39, 8.507059e+37 }
 0x569   : > { %v814_v33 = vpop.eup %813 }
 0x56a   : > { %v532_v34 = vmul.f32 %v814_v33, %v530_v32  ;;  %vm537_vm10 = vweird.f32 %v814_v33 }
 0x56b   : > { %vm538_vm12 = vmor %vm536_vm11, %vm537_vm10 }
 0x56c   : > { %v533_v35 = vsub.f32 1.0, %v532_v34 }
 0x56e   : > { %v534_v36 = vmul.f32 %v814_v33, %v533_v35 }
 0x570   : > { %v535_v37 = vadd.f32 %v814_v33, %v534_v36 }
 0x572   : > { %v539_v40 = vsel %vm538_vm12, %v814_v33, %v535_v37 }
 0x573   : > { %v544_v43 = vsel %vm541_vm13, %v543_v41, %v539_v40 }
 0x574   : > { %v547_v45 = vmul.f32 %v544_v43, %v494_v19 }
 0x5b9   : > { %v550_v42 = vpop.permute.xlu2 %549 }
 0x5ba   : > { %v552_v44 = vmul.f32 %v550_v42, %v544_v43 }
 0x5bc   : > { %554 = vrot.lane.b32.xlu0 %v552_v44, %s835_s9 }
 0x62e   : > { %v555_v46 = vpop.permute.xlu0 %554 }
 0x62f   : > { %v557_v47 = vadd.f32 %v555_v46, %v547_v45 }
 0x631   : > { %815 = vtanh.f32 %v557_v47 }
 0x637   : > { %v816_v48 = vpop.eup %815 }
 0x638   : > { %560 = vrot.lane.b32.xlu1 %v816_v48, %s836_s10 }
 0x6aa   : > { %v561_v49 = vpop.permute.xlu1 %560 }
 0x6ab   : > { %v563_v51 = vmul.f32 %v561_v49, %v544_v43 }
 0x6ad   : > { %v564_v52 = vadd.f32 %v563_v51, %v501_v50  ;;  %v569_v53 = vpack.c.bf16 %v563_v51, %v563_v51 }
 0x6af   : > { %571 = vrot.lane.b32.xlu2 %v569_v53, %s837_s11 }
 0x709   : > { %v572_v54 = vpop.permute.xlu2 %571 }
 0x70a   : > { %769 = vmatmul.msk.bf16.vlgmr.msrb.gmra.mxu3 %vm301_vm0, %v572_v54 }
 0x78d   : > { %v585_v56 = vpop.f32.mrf.mxu3 }
 0x78e   : > { %v589_v57 = vadd.f32 %v585_v56, %v568_v55 }
 0x790   : > { %817 = vtanh.f32 %v589_v57  ;;  %v770_v58 = vmul.f32 -1.442695, %v589_v57 }
 0x792   : > { %819 = vpow2.f32 %v770_v58 }
 0x795   : > { %v587_v59 = vpop.f32.mrf.mxu3 }
 0x796   : > { %v818_v60 = vpop.eup %817 }
 0x797   : > { %612 = vrot.lane.b32.xlu0 %v818_v60, %s834_s8 }
 0x798   : > { %v820_v61 = vpop.eup %819 }
 0x799   : > { %v593_v62 = vadd.f32 1.0, %v820_v61 }
 0x79b   : > { %821 = vrcp.f32 %v593_v62  ;;  %v605_v4 = vand.u32 2147483648, %v593_v62  ;;  %vm599_vm15 = vweird.f32 %v593_v62  ;;  %v603_v5 = vand.u32 2147483647, %v593_v62 }
 0x79d   : > { %v606_v7 = vor.u32 1.1754944e-38, %v605_v4  ;;  %vm604_vm2 = vcmp.eq.f32.partialorder %v603_v5, 8.507059e+37 }
 0x7a1   : > { %v822_v63 = vpop.eup %821 }
 0x7a2   : > { %v595_v0 = vmul.f32 %v822_v63, %v593_v62  ;;  %vm600_vm14 = vweird.f32 %v822_v63 }
 0x7a3   : > { %vm601_vm1 = vmor %vm599_vm15, %vm600_vm14 }
 0x7a4   : > { %v596_v1 = vsub.f32 1.0, %v595_v0 }
 0x7a6   : > { %v597_v2 = vmul.f32 %v822_v63, %v596_v1 }
 0x7a8   : > { %v598_v3 = vadd.f32 %v822_v63, %v597_v2 }
 0x7aa   : > { %v602_v6 = vsel %vm601_vm1, %v822_v63, %v598_v3 }
 0x7ab   : > { %v607_v9 = vsel %vm604_vm2, %v606_v7, %v602_v6 }
 0x7ac   : > { %v610_v11 = vmul.f32 %v607_v9, %v557_v47 }
 0x809   : > { %v613_v8 = vpop.permute.xlu0 %612 }
 0x80a   : > { %v615_v10 = vmul.f32 %v613_v8, %v607_v9 }
 0x80c   : > { %617 = vrot.lane.b32.xlu1 %v615_v10, %s835_s9 }
 0x87e   : > { %v618_v12 = vpop.permute.xlu1 %617 }
 0x87f   : > { %v620_v13 = vadd.f32 %v618_v12, %v610_v11 }
 0x881   : > { %823 = vtanh.f32 %v620_v13 }
 0x887   : > { %v824_v14 = vpop.eup %823 }
 0x888   : > { %623 = vrot.lane.b32.xlu2 %v824_v14, %s836_s10 }
 0x8e2   : > { %v624_v15 = vpop.permute.xlu2 %623 }
 0x8e3   : > { %v626_v16 = vmul.f32 %v624_v15, %v607_v9 }
 0x8e5   : > { %v627_v17 = vadd.f32 %v626_v16, %v564_v52 }
 0x8e7   : > { %v628_v18 = vmul.f32 0.25, %v627_v17 }
 0x8e9   : > { %630 = vrot.lane.b32.xlu0 %v628_v18, %s837_s11 }
 0x95b   : > { %v631_v19 = vpop.permute.xlu0 %630 }
 0x95c   : > { %633 = vst.msk [vmem:[%s276_s27] sm:$0xff] %vm301_vm0, %v631_v19 }
 0x95d PF: > { %s15_s18 = sadd.s32 1, %s831_s18  }
 0x95e   : > { %p12_p5 = scmp.ge.s32.totalorder %s15_s18, 4  }
 0x960   :  { %14 = sbr.rel (!%p12_p5) target bundleno = 1 (0x1), region = 84 }

// kernel: forward.9
= control target key start
LH: loop header
LB: loop body
LE: loop exit
PB: predicated region body
PF: predicated region fallthrough
CT: control target
= control target key end

     0   :  { %vm44_vm0 = vcmask 1040384   ;;  %vm40_vm1 = vcmask 15360   ;;  %vm74_vm2 = vcmask 130048   ;;  %vm119_vm3 = vcmask 1043456   ;;  %s240_s2 = inlined_call_operand.vmem [shape: bf16[2,8], index: 2, kind: input, shape index: {}]   ;;  %s241_s1 = inlined_call_operand.vmem [shape: f32[8,2], index: 1, kind: input, shape index: {}]   ;;  %s242_s4 = inlined_call_operand.vmem [shape: bf16[16,5], index: 4, kind: input, shape index: {}]   ;;  %s243_s0 = inlined_call_operand.vmem [shape: f32[2,8,16], index: 0, kind: input, shape index: {}]   ;;  %s244_s3 = inlined_call_operand.vmem [shape: f32[1,8], index: 3, kind: input, shape index: {}]   ;;  %s245_s5 = inlined_call_operand.vmem [shape: bf16[16,5], index: 5, kind: input, shape index: {}]   ;;  %s246_s6 = inlined_call_operand.vmem [shape: bf16[8,5], index: 6, kind: input, shape index: {}]   ;;  %s247_s7 = inlined_call_operand.vmem [shape: f32[1,5], index: 7, kind: input, shape index: {}]   ;;  %s248_s8 = inlined_call_operand.vmem [shape: f32[8,5], index: 8, kind: output, shape index: {}]  }
   0x1   :  { %v35_v0 = vld [vmem:[%s240_s2] sm:$0x1]  ;;  %v148_v9 = vld [vmem:[%s243_s0 + $0x8] sm:$0xff]  ;;  %vm115_vm4 = vcmask 64512   ;;  %vm142_vm5 = vcmask 39936  }
   0x2   :  { %v33_v1 = vld [vmem:[%s241_s1] sm:$0xff]  ;;  %v46_v3 = vsel %vm44_vm0, %v35_v0, 0  ;;  %v65_v11 = vpack.c.bf16 %v148_v9, %v148_v9 }
   0x3   :  { %v161_v2 = vld [vmem:[%s242_s4] sm:$0xff]  ;;  %v34_v4 = vpack.c.bf16 %v33_v1, %v33_v1  ;;  %55 = vmatpush.bf16.msra.mxu0 %v46_v3 }
   0x4   :  { %v30_v5 = vld [vmem:[%s243_s0] sm:$0xff]  ;;  %107 = vmatpush.bf16.msra.mxu2 %v161_v2 }
   0x5   :  { %v62_v6 = vpack.c.bf16 %v30_v5, %v30_v5  ;;  %v162_v7 = vld [vmem:[%s245_s5] sm:$0xff] }
   0x6   :  { %149 = vmatmul.msk.bf16.vlgmr.msra.gmra.mxu0 %vm40_vm1, %v34_v4  ;;  %85 = vmatpush.bf16.msra.mxu1 %v162_v7  ;;  %v114_v8 = vld [vmem:[%s246_s6] sm:$0xf] }
   0x7   :  { %159 = vmatmul.msk.bf16.vlgmr.msra.gmra.mxu2 %vm74_vm2, %v62_v6  ;;  %v121_v10 = vsel %vm119_vm3, %v114_v8, 0  ;;  %v163_v12 = vld [vmem:[%s244_s3] ss:$0 sm:$0xff] }
   0x8   :  { %130 = vmatpush.bf16.msra.mxu3 %v121_v10  ;;  %v164_v23 = vld [vmem:[%s247_s7] ss:$0 sm:$0xff] }
   0x9   :  { %154 = vmatmul.msk.bf16.vlgmr.msra.gmra.mxu1 %vm74_vm2, %v65_v11 }
  0x83   :  { %v57_v13 = vpop.f32.mrf.mxu0 }
  0x84   :  { %v58_v14 = vadd.f32 %v163_v12, %v57_v13 }
  0x86   :  { %v61_v15 = vmax.f32 %v58_v14, 0.0  ;;  %v87_v20 = vpop.f32.mrf.mxu1 }
  0x88   :  { %v113_v16 = vpack.c.bf16 %v61_v15, %v61_v15 }
  0x8a   :  { %160 = vmatmul.msk.bf16.vlgmr.msra.gmra.mxu3 %vm115_vm4, %v113_v16  ;;  %v109_v18 = vpop.f32.mrf.mxu2 }
  0x8b   :  { %v59_v17 = vpop.f32.mrf.mxu0  ;;  %v110_v22 = vadd.f32 %v109_v18, %v87_v20 }
  0x8e   :  { %v89_v21 = vpop.f32.mrf.mxu1 }
  0x92   :  { %v111_v19 = vpop.f32.mrf.mxu2 }
 0x10d   :  { %v132_v24 = vpop.f32.mrf.mxu3 }
 0x10e   :  { %v136_v25 = vadd.f32 %v132_v24, %v110_v22 }
 0x110   :  { %v141_v26 = vadd.f32 %v164_v23, %v136_v25 }
 0x112   :  { %143 = vst.msk [vmem:[%s248_s8] sm:$0xff] %vm142_vm5, %v141_v26 }
 0x115   :  { %v134_v27 = vpop.f32.mrf.mxu3 }

// kernel: forward.6
= control target key start
LH: loop header
LB: loop body
LE: loop exit
PB: predicated region body
PF: predicated region fallthrough
CT: control target
= control target key end

     0   :  { %vm109_vm0 = vcmask 261120   ;;  %s6674_s17 = smov 96   ;;  %s6676_s18 = smov 88   ;;  %vm170_vm1 = vcmask 64512   ;;  %vm597_vm2 = vcmask 1041408   ;;  %vm390_vm3 = vcmask 27648   ;;  %s8957_s2 = inlined_call_operand.vmem [shape: bf16[32,96], index: 2, kind: input, shape index: {}]   ;;  %s8958_s0 = inlined_call_operand.vmem [shape: f32[8,4,32], index: 0, kind: input, shape index: {}]   ;;  %s8959_s3 = inlined_call_operand.vmem [shape: f32[1,96], index: 3, kind: input, shape index: {}]   ;;  %s8960_s1 = inlined_call_operand.vmem [shape: f32[8,4], index: 1, kind: input, shape index: {}]   ;;  %s8961_s5 = inlined_call_operand.vmem [shape: f32[1,32], index: 5, kind: input, shape index: {}]   ;;  %s8962_s4 = inlined_call_operand.vmem [shape: bf16[32,32], index: 4, kind: input, shape index: {}]   ;;  %s8963_s6 = inlined_call_operand.vmem [shape: f32[1,32], index: 6, kind: input, shape index: {}]   ;;  %s8964_s7 = inlined_call_operand.vmem [shape: f32[1,32], index: 7, kind: input, shape index: {}]   ;;  %s8965_s8 = inlined_call_operand.vmem [shape: bf16[32,2048], index: 8, kind: input, shape index: {}]   ;;  %s8966_s10 = inlined_call_operand.vmem [shape: bf16[2048,32], index: 10, kind: input, shape index: {}]   ;;  %s8967_s9 = inlined_call_operand.vmem [shape: f32[1,2048], index: 9, kind: input, shape index: {}]   ;;  %s8968_s11 = inlined_call_operand.vmem [shape: f32[1,32], index: 11, kind: input, shape index: {}]   ;;  %s8969_s12 = inlined_call_operand.vmem [shape: f32[1,32], index: 12, kind: input, shape index: {}]   ;;  %s8970_s13 = inlined_call_operand.vmem [shape: f32[1,32], index: 13, kind: input, shape index: {}]   ;;  %s8971_s14 = inlined_call_operand.vmem [shape: f32[8,32], index: 14, kind: output, shape index: {}]  }
   0x1   :  { %v6321_v0 = vld [vmem:[%s8957_s2 + $0x8] sm:$0xff]  ;;  %v6772_v1 = vld [vmem:[%s8958_s0] sm:$0xf]  ;;  %v6777_v2 = vld [vmem:[%s8958_s0 + $0x4] sm:$0xf]  ;;  %s6677_s21 = smov 120  }
   0x2   :  { %v6782_v3 = vld [vmem:[%s8958_s0 + $0x8] sm:$0xf]  ;;  %122 = vmatpush.bf16.msra.mxu0 %v6321_v0  ;;  %v6320_v4 = vld [vmem:[%s8957_s2] sm:$0xff]  ;;  %v6790_v5 = vld [vmem:[%s8958_s0 + $0xc] sm:$0xf]  ;;  %s6678_s22 = smov 56  }
   0x3   :  { %8977 = vst [vmem:[#allocation2_spill] sm:$0xff] %v6790_v5  ;;  %v6797_v6 = vld [vmem:[%s8958_s0 + $0x10] sm:$0xf]  ;;  %v6803_v7 = vld [vmem:[%s8958_s0 + $0x14] sm:$0xf]  ;;  %vm593_vm8 = vcmask 31744  }
   0x4   :  { %64 = vst [vmem:[#allocation1] ss:$2 sm:$0xff] %v6772_v1  ;;  %v6809_v8 = vld [vmem:[%s8958_s0 + $0x18] sm:$0xf]  ;;  %v6814_v9 = vld [vmem:[%s8958_s0 + $0x1c] sm:$0xf] }
   0x5   :  { %66 = vst [vmem:[#allocation1 + $0x1] ss:$2 sm:$0xff] %v6777_v2  ;;  %v6504_v16 = vld [vmem:[%s8959_s3] ss:$0 sm:$0xff]  ;;  %s6675_s3 = smov 64   ;;  %s6679_s23 = smov 80  }
   0x6   :  { %8978 = vst [vmem:[#allocation3_spill] sm:$0xff] %v6797_v6  ;;  %123 = vmatpush.bf16.msra.mxu0 %v6320_v4  ;;  %s6680_s24 = smov 112   ;;  %s6681_s25 = smov 48  }
   0x7   :  { %68 = vst [vmem:[#allocation1 + $0x10] ss:$2 sm:$0xff] %v6782_v3  ;;  %s6682_s26 = smov 72   ;;  %s6683_s27 = smov 104  }
   0x8   :  { %8979 = vst [vmem:[#allocation4_spill] sm:$0xff] %v6803_v7  ;;  %s6684_s28 = smov 40   ;;  %s6685_s2 = smov 8  }
   0x9   :  { %70 = vst [vmem:[#allocation1 + $0x11] ss:$2 sm:$0xff] %v6790_v5  ;;  %s6686_s29 = smov 16   ;;  %s6687_s30 = smov 24  }
   0xa   :  { %8980 = vst [vmem:[#allocation5_spill] sm:$0xff] %v6809_v8 }
   0xb   :  { %8981 = vst [vmem:[#allocation6_spill] sm:$0xff] %v6814_v9 }
   0xc   :  { %72 = vst [vmem:[#allocation1 + $0x20] ss:$2 sm:$0xff] %v6797_v6  ;;  %v79_v10 = vld.sshfl [vmem:[#allocation1] sm:$0xff pattern:$0x75316420] }
   0xd   :  { %74 = vst [vmem:[#allocation1 + $0x21] ss:$2 sm:$0xff] %v6803_v7 }
   0xe   :  { %76 = vst [vmem:[#allocation1 + $0x30] ss:$2 sm:$0xff] %v6809_v8 }
   0xf   :  { %78 = vst [vmem:[#allocation1 + $0x31] ss:$2 sm:$0xff] %v6814_v9 }
  0x10   :  { %v80_v11 = vld.sshfl [vmem:[#allocation1 + $0x10] sm:$0xff pattern:$0x75316420] }
  0x11   :  { %v87_v12 = vpack.c.bf16 %v80_v11, %v79_v10 }
  0x13   :  { %5572 = vmatmul.msk.bf16.vlgmr.msra.gmra.mxu0 %vm109_vm0, %v87_v12 }
  0x14   :  { %v81_v13 = vld.sshfl [vmem:[#allocation1 + $0x20] sm:$0xff pattern:$0x75316420] }
  0x16   :  { %v82_v14 = vld.sshfl [vmem:[#allocation1 + $0x30] sm:$0xff pattern:$0x75316420] }
  0x17   :  { %v88_v15 = vpack.c.bf16 %v82_v14, %v81_v13 }
  0x23   :  { %5573 = vmatmul.msk.bf16.gmra.mxu0 %vm109_vm0, %v88_v15 }
  0x90   :  { %v125_v17 = vpop.f32.mrf.mxu0 }
  0x91   :  { %v126_v18 = vadd.f32 %v6504_v16, %v125_v17 }
  0x93   :  { %v149_v19 = vrot.slane %v126_v18, 4  ;;  %v6825_v20 = vpack.c.bf16 %v126_v18, %v126_v18 }
  0x95   :  { %v6827_v21 = vpack.c.bf16 %v149_v19, %v149_v19  ;;  %v166_v22 = vunpack.c.l.b16 %v6825_v20 }
  0x97   :  { %v6830_v23 = vpack.c.b16 %v166_v22, %v166_v22  ;;  %v191_v24 = vunpack.c.l.b16 %v6827_v21 }
  0x98   :  { %v127_v25 = vpop.f32.mrf.mxu0 }
  0x99   :  { %v6833_v26 = vpack.c.b16 %v191_v24, %v191_v24  ;;  %v128_v27 = vadd.f32 %v6504_v16, %v127_v25  ;;  %168 = vrot.lane.b32.xlu1 %v6830_v23, %s6674_s17 }
  0x9b   :  { %v6837_v28 = vpack.c.bf16 %v128_v27, %v128_v27  ;;  %193 = vrot.lane.b32.xlu0 %v6833_v26, %s6674_s17  ;;  %v150_v35 = vrot.slane %v128_v27, 4  ;;  %v135_v27 = vld [vmem:[%s8960_s1] sm:$0xff] }
  0x9d   :  { %v215_v29 = vunpack.c.l.b16 %v6837_v28  ;;  %v160_v41 = vpack.c.bf16 %v150_v35, %v150_v35 }
  0x9f   :  { %v6842_v31 = vpack.c.b16 %v215_v29, %v215_v29  ;;  %v239_v46 = vunpack.c.l.b16 %v160_v41 }
  0xa0   :  { %v130_v30 = vpop.f32.mrf.mxu0 }
  0xa1   :  { %v131_v32 = vadd.f32 %v6504_v16, %v130_v30  ;;  %v6859_v51 = vpack.c.b16 %v239_v46, %v239_v46 }
  0xa3   :  { %v151_v33 = vrot.slane %v131_v32, 4  ;;  %v161_v34 = vpack.c.bf16 %v131_v32, %v131_v32  ;;  %217 = vrot.lane.b32.xlu0 %v6842_v31, %s6674_s17 }
  0xa5   :  { %v6846_v36 = vpack.c.bf16 %v151_v33, %v151_v33  ;;  %v263_v37 = vunpack.c.l.b16 %v161_v34 }
  0xa7   :  { %v6848_v38 = vpack.c.b16 %v263_v37, %v263_v37  ;;  %v287_v39 = vunpack.c.l.b16 %v6846_v36 }
  0xa8   :  { %v132_v40 = vpop.f32.mrf.mxu0 }
  0xa9   :  { %v6851_v42 = vpack.c.b16 %v287_v39, %v287_v39  ;;  %v133_v43 = vadd.f32 %v6504_v16, %v132_v40  ;;  %265 = vrot.lane.b32.xlu1 %v6848_v38, %s6674_s17 }
  0xab   :  { %v152_v44 = vrot.slane %v133_v43, 4  ;;  %v163_v45 = vpack.c.bf16 %v133_v43, %v133_v43  ;;  %289 = vrot.lane.b32.xlu2 %v6851_v42, %s6674_s17 }
  0xad   :  { %v164_v47 = vpack.c.bf16 %v152_v44, %v152_v44  ;;  %v311_v48 = vunpack.c.l.b16 %v163_v45 }
  0xaf   :  { %v6857_v49 = vpack.c.b16 %v311_v48, %v311_v48  ;;  %v335_v50 = vunpack.c.l.b16 %v164_v47 }
  0xb1   :  { %v6861_v52 = vpack.c.b16 %v335_v50, %v335_v50  ;;  %313 = vrot.lane.b32.xlu0 %v6857_v49, %s6674_s17 }
  0xb3   :  { %241 = vrot.lane.b32.xlu2 %v6859_v51, %s6674_s17  ;;  %337 = vrot.lane.b32.xlu1 %v6861_v52, %s6674_s17 }
  0xb9   :  { %677 = vrot.lane.b32.xlu0 %v6848_v38, %s6675_s3 }
  0xbb   :  { %591 = vrot.lane.b32.xlu1 %v6830_v23, %s6675_s3  ;;  %614 = vrot.lane.b32.xlu2 %v6833_v26, %s6675_s3 }
  0xc1   :  { %635 = vrot.lane.b32.xlu0 %v6842_v31, %s6675_s3 }
  0xc3   :  { %698 = vrot.lane.b32.xlu1 %v6851_v42, %s6675_s3 }
  0xc9   :  { %656 = vrot.lane.b32.xlu0 %v6859_v51, %s6675_s3 }
  0xd1   :  { %763 = vrot.lane.b32.xlu0 %v6830_v23, %s6676_s18 }
  0xd9   :  { %786 = vrot.lane.b32.xlu0 %v6833_v26, %s6676_s18 }
 0x105   :  { %v290_v53 = vpop.permute.xlu2 %289 }
 0x106   :  { %v295_v60 = vsel %vm170_vm1, %v290_v53, 0 }
 0x10b   :  { %v169_v54 = vpop.permute.xlu1 %168 }
 0x10c   :  { %v175_v55 = vsel %vm170_vm1, %v169_v54, 0 }
 0x10d   :  { %v242_v56 = vpop.permute.xlu2 %241  ;;  %184 = vmatpush.bf16.xpose.msra.mxu1 %v175_v55  ;;  %v194_v57 = vpop.permute.xlu0 %193 }
 0x10e   :  { %v199_v58 = vsel %vm170_vm1, %v194_v57, 0  ;;  %v247_v59 = vsel %vm170_vm1, %v242_v56, 0 }
 0x10f   :  { %208 = vmatpush.bf16.xpose.msra.mxu3 %v199_v58 }
 0x114   :  { %5574 = vmatmul.msk.bf16.vlgmr.msra.gmra.mxu1 %vm170_vm1, %v6825_v20 }
 0x115   :  { %256 = vmatpush.bf16.xpose.msrb.mxu1 %v247_v59  ;;  %v218_v61 = vpop.permute.xlu0 %217  ;;  %v615_v4 = vpop.permute.xlu2 %614 }
 0x116   :  { %5575 = vmatmul.msk.bf16.vlgmr.msra.gmra.mxu3 %vm170_vm1, %v6827_v21  ;;  %v223_v62 = vsel %vm170_vm1, %v218_v61, 0  ;;  %v620_v13 = vsel %vm597_vm2, %v615_v4, 0 }
 0x117   :  { %232 = vmatpush.bf16.xpose.msrb.mxu3 %v223_v62 }
 0x11b   :  { %v266_v63 = vpop.permute.xlu1 %265 }
 0x11c   :  { %v271_v0 = vsel %vm170_vm1, %v266_v63, 0 }
 0x11d   :  { %280 = vmatpush.bf16.xpose.msra.mxu2 %v271_v0 }
 0x11f   :  { %304 = vmatpush.bf16.xpose.msra.mxu3 %v295_v60 }
 0x123   :  { %v314_v10 = vpop.permute.xlu0 %313 }
 0x124   :  { %5577 = vmatmul.msk.bf16.vlgmr.msrb.gmra.mxu1 %vm170_vm1, %v160_v41  ;;  %5578 = vmatmul.msk.bf16.vlgmr.msra.gmra.mxu2 %vm170_vm1, %v161_v34  ;;  %v319_v11 = vsel %vm170_vm1, %v314_v10, 0 }
 0x125   :  { %v338_v12 = vpop.permute.xlu1 %337  ;;  %328 = vmatpush.bf16.xpose.msrb.mxu0 %v319_v11 }
 0x126   :  { %v343_v14 = vsel %vm170_vm1, %v338_v12, 0  ;;  %5576 = vmatmul.msk.bf16.vlgmr.msrb.gmra.mxu3 %vm170_vm1, %v6837_v28  ;;  %v136_v28 = vmul.f32 -1e+30, %v135_v27 }
 0x127   :  { %629 = vmatpush.bf16.msrb.mxu3 %v620_v13  ;;  %352 = vmatpush.bf16.xpose.msra.mxu1 %v343_v14 }
 0x128   :  { %v6914_v29 = vperm.slane %v136_v28, 0  ;;  %v138_v34 = vrot.slane %v136_v28, 1  ;;  %v140_v43 = vrot.slane %v136_v28, 3  ;;  %v141_v50 = vrot.slane %v136_v28, 4 }
 0x129   :  { %v139_v54 = vrot.slane %v136_v28, 2  ;;  %v143_v58 = vrot.slane %v136_v28, 6  ;;  %v144_v14 = vrot.slane %v136_v28, 7  ;;  %v142_v27 = vrot.slane %v136_v28, 5 }
 0x12a   :  { %v6935_v56 = vperm.slane %v141_v50, 0 }
 0x12b   :  { %v678_v15 = vpop.permute.xlu0 %677  ;;  %v6937_v60 = vperm.slane %v139_v54, 0  ;;  %v6940_v10 = vperm.slane %v143_v58, 0 }
 0x12c   :  { %5580 = vmatmul.msk.bf16.vlgmr.msrb.gmra.mxu0 %vm170_vm1, %v163_v45  ;;  %v683_v16 = vsel %vm597_vm2, %v678_v15, 0  ;;  %v6928_v45 = vperm.slane %v140_v43, 0 }
 0x12d   :  { %v592_v17 = vpop.permute.xlu1 %591 }
 0x12e   :  { %v599_v18 = vsel %vm597_vm2, %v592_v17, 0 }
 0x12f   :  { %608 = vmatpush.bf16.msrb.mxu2 %v599_v18  ;;  %v6949_v18 = vperm.slane %v144_v14, 0 }
 0x133   :  { %692 = vmatpush.bf16.msra.mxu2 %v683_v16  ;;  %v636_v19 = vpop.permute.xlu0 %635 }
 0x134   :  { %v641_v20 = vsel %vm597_vm2, %v636_v19, 0  ;;  %5581 = vmatmul.msk.bf16.vlgmr.msra.gmra.mxu1 %vm170_vm1, %v164_v47 }
 0x135   :  { %650 = vmatpush.bf16.msra.mxu0 %v641_v20  ;;  %v699_v21 = vpop.permute.xlu1 %698 }
 0x136   :  { %5579 = vmatmul.msk.bf16.vlgmr.msra.gmra.mxu3 %vm170_vm1, %v6846_v36  ;;  %v704_v22 = vsel %vm597_vm2, %v699_v21, 0  ;;  %v6921_v36 = vperm.slane %v138_v34, 0 }
 0x137   :  { %713 = vmatpush.bf16.msra.mxu3 %v704_v22 }
 0x13b   :  { %v657_v24 = vpop.permute.xlu0 %656 }
 0x13c   :  { %v662_v25 = vsel %vm597_vm2, %v657_v24, 0 }
 0x13d   :  { %671 = vmatpush.bf16.msrb.mxu1 %v662_v25 }
 0x143   :  { %v6960_v28 = vpop.permute.xlu0 %763 }
 0x191   :  { %v186_v30 = vpop.f32.mrf.mxu1 }
 0x192   :  { %v358_v32 = vmul.f32 0.35355338, %v186_v30 }
 0x194   :  { %v6917_v33 = vadd.f32 %v6914_v29, %v358_v32  ;;  %v6954_v32 = vperm.slane %v142_v27, 0 }
 0x196   :  { %v391_v35 = vsel %vm390_vm3, %v6917_v33, -inf }
 0x197   :  { %392 = vmax.xlane.f32.xlu2 %v391_v35 }
 0x199   :  { %v188_v37 = vpop.f32.mrf.mxu1  ;;  %v210_v39 = vpop.f32.mrf.mxu3 }
 0x19a   :  { %v359_v40 = vmul.f32 0.35355338, %v210_v39 }
 0x19c   :  { %v6924_v41 = vadd.f32 %v6921_v36, %v359_v40 }
 0x19e   :  { %v394_v44 = vsel %vm390_vm3, %v6924_v41, -inf }
 0x19f   :  { %395 = vmax.xlane.f32.xlu0 %v394_v44  ;;  %v6962_v44 = vpop.permute.xlu0 %786 }
 0x1a1   :  { %v212_v46 = vpop.f32.mrf.mxu3  ;;  %v258_v47 = vpop.f32.mrf.mxu1 }
 0x1a2   :  { %v361_v48 = vmul.f32 0.35355338, %v258_v47 }
 0x1a4   :  { %v6931_v53 = vadd.f32 %v6928_v45, %v361_v48 }
 0x1a6   :  { %v400_v55 = vsel %vm390_vm3, %v6931_v53, -inf }
 0x1a7   :  { %v282_v57 = vpop.f32.mrf.mxu2  ;;  %401 = vmax.xlane.f32.xlu0 %v400_v55 }
 0x1a8   :  { %v362_v59 = vmul.f32 0.35355338, %v282_v57 }
 0x1a9   :  { %v234_v61 = vpop.f32.mrf.mxu3  ;;  %v260_v62 = vpop.f32.mrf.mxu1 }
 0x1aa   :  { %v360_v63 = vmul.f32 0.35355338, %v234_v61  ;;  %v330_v0 = vpop.f32.mrf.mxu0  ;;  %v386_v4 = vadd.f32 %v6935_v56, %v362_v59 }
 0x1ab   :  { %v364_v11 = vmul.f32 0.35355338, %v330_v0 }
 0x1ac   :  { %v403_v12 = vsel %vm390_vm3, %v386_v4, -inf  ;;  %v6944_v13 = vadd.f32 %v6937_v60, %v360_v63 }
 0x1ad   :  { %404 = vmax.xlane.f32.xlu1 %v403_v12  ;;  %v388_v17 = vadd.f32 %v6940_v10, %v364_v11 }
 0x1ae   :  { %v397_v15 = vsel %vm390_vm3, %v6944_v13, -inf }
 0x1af   :  { %v284_v16 = vpop.f32.mrf.mxu2  ;;  %398 = vmax.xlane.f32.xlu2 %v397_v15  ;;  %v409_v24 = vsel %vm390_vm3, %v388_v17, -inf }
 0x1b1   :  { %v236_v19 = vpop.f32.mrf.mxu3  ;;  %v354_v20 = vpop.f32.mrf.mxu1 }
 0x1b2   :  { %v332_v21 = vpop.f32.mrf.mxu0  ;;  %v365_v22 = vmul.f32 0.35355338, %v354_v20 }
 0x1b4   :  { %v389_v25 = vadd.f32 %v6949_v18, %v365_v22 }
 0x1b5   :  { %410 = vmax.xlane.f32.xlu1 %v409_v24 }
 0x1b6   :  { %v412_v30 = vsel %vm390_vm3, %v389_v25, -inf }
 0x1b7   :  { %413 = vmax.xlane.f32.xlu2 %v412_v30 }
 0x1b9   :  { %v306_v34 = vpop.f32.mrf.mxu3  ;;  %v356_v35 = vpop.f32.mrf.mxu1 }
 0x1ba   :  { %v363_v37 = vmul.f32 0.35355338, %v306_v34 }
 0x1bc   :  { %v387_v39 = vadd.f32 %v6954_v32, %v363_v37 }
 0x1be   :  { %v406_v40 = vsel %vm390_vm3, %v387_v39, -inf }
 0x1bf   :  { %407 = vmax.xlane.f32.xlu2 %v406_v40 }
 0x1c1   :  { %v308_v43 = vpop.f32.mrf.mxu3 }
 0x1d7   :  { %761 = vrot.lane.b32.xlu2 %v6830_v23, %s6677_s21 }
 0x20a   :  { %v393_v46 = vpop.xlane.xlu2 %392 }
 0x20b   :  { %v415_v47 = vsub.f32 %v6917_v33, %v393_v46 }
 0x20d   :  { %v423_v48 = vmul.f32 1.442695, %v415_v47 }
 0x20f   :  { %6511 = vpow2.f32 %v423_v48 }
 0x212   :  { %v396_v50 = vpop.xlane.xlu0 %395 }
 0x213   :  { %v416_v54 = vsub.f32 %v6924_v41, %v396_v50 }
 0x215   :  { %v6966_v55 = vpop.eup %6511  ;;  %v425_v57 = vmul.f32 1.442695, %v416_v54 }
 0x216   :  { %v439_v58 = vsel %vm390_vm3, %v6966_v55, 0.0 }
 0x217   :  { %6513 = vpow2.f32 %v425_v57  ;;  %440 = vadd.xlane.f32.xlu0 %v439_v58 }
 0x21d   :  { %v6970_v59 = vpop.eup %6513 }
 0x21e   :  { %v442_v61 = vsel %vm390_vm3, %v6970_v59, 0.0 }
 0x21f   :  { %443 = vadd.xlane.f32.xlu1 %v442_v61 }
 0x220   :  { %v405_v33 = vpop.xlane.xlu1 %404 }
 0x221   :  { %v419_v62 = vsub.f32 %v386_v4, %v405_v33 }
 0x222   :  { %v399_v16 = vpop.xlane.xlu2 %398 }
 0x223   :  { %v431_v63 = vmul.f32 1.442695, %v419_v62  ;;  %v417_v24 = vsub.f32 %v6944_v13, %v399_v16 }
 0x225   :  { %6515 = vpow2.f32 %v431_v63  ;;  %v427_v30 = vmul.f32 1.442695, %v417_v24 }
 0x228   :  { %v411_v0 = vpop.xlane.xlu1 %410 }
 0x229   :  { %v421_v41 = vsub.f32 %v388_v17, %v411_v0  ;;  %v402_v17 = vpop.xlane.xlu0 %401 }
 0x22a   :  { %v418_v19 = vsub.f32 %v6931_v53, %v402_v17  ;;  %v414_v20 = vpop.xlane.xlu2 %413 }
 0x22b   :  { %v6974_v11 = vpop.eup %6515  ;;  %v435_v12 = vmul.f32 1.442695, %v421_v41  ;;  %719 = vrot.lane.b32.xlu0 %v6857_v49, %s6675_s3  ;;  %v422_v22 = vsub.f32 %v389_v25, %v414_v20 }
 0x22c   :  { %v451_v14 = vsel %vm390_vm3, %v6974_v11, 0.0  ;;  %v429_v21 = vmul.f32 1.442695, %v418_v19 }
 0x22d   :  { %6517 = vpow2.f32 %v435_v12  ;;  %452 = vadd.xlane.f32.xlu2 %v451_v14  ;;  %v437_v27 = vmul.f32 1.442695, %v422_v22 }
 0x22e   :  { %6519 = vpow2.f32 %v429_v21 }
 0x22f   :  { %6521 = vpow2.f32 %v437_v27 }
 0x230   :  { %6523 = vpow2.f32 %v427_v30 }
 0x232   :  { %v408_v34 = vpop.xlane.xlu2 %407 }
 0x233   :  { %v6980_v15 = vpop.eup %6517  ;;  %740 = vrot.lane.b32.xlu0 %v6861_v52, %s6675_s3  ;;  %v420_v53 = vsub.f32 %v387_v39, %v408_v34  ;;  %v769_v34 = vsel %vm170_vm1, %v6960_v28, 0 }
 0x234   :  { %v457_v4 = vsel %vm390_vm3, %v6980_v15, 0.0  ;;  %v6994_v35 = vpop.eup %6519 }
 0x235   :  { %458 = vadd.xlane.f32.xlu2 %v457_v4  ;;  %v448_v37 = vsel %vm390_vm3, %v6994_v35, 0.0  ;;  %v7000_v25 = vpop.eup %6521  ;;  %v433_v13 = vmul.f32 1.442695, %v420_v53 }
 0x236   :  { %v7002_v40 = vpop.eup %6523  ;;  %v460_v43 = vsel %vm390_vm3, %v7000_v25, 0.0 }
 0x237   :  { %6525 = vpow2.f32 %v433_v13  ;;  %v445_v39 = vsel %vm390_vm3, %v7002_v40, 0.0 }
 0x238   :  { %784 = vrot.lane.b32.xlu1 %v6833_v26, %s6677_s21 }
 0x23a   :  { %v762_v63 = vpop.permute.xlu2 %761 }
 0x23d   :  { %v7010_v46 = vpop.eup %6525 }
 0x23e   :  { %v454_v47 = vsel %vm390_vm3, %v7010_v46, 0.0 }
 0x24d   :  { %878 = vrot.lane.b32.xlu2 %v6851_v42, %s6676_s18 }
 0x255   :  { %853 = vrot.lane.b32.xlu2 %v6848_v38, %s6677_s21 }
 0x25d   :  { %830 = vrot.lane.b32.xlu2 %v6859_v51, %s6677_s21  ;;  %449 = vadd.xlane.f32.xlu0 %v448_v37 }
 0x262   :  { %461 = vadd.xlane.f32.xlu1 %v460_v43 }
 0x265   :  { %899 = vrot.lane.b32.xlu2 %v6857_v49, %s6677_s21  ;;  %446 = vadd.xlane.f32.xlu0 %v445_v39 }
 0x26d   :  { %1245 = vrot.lane.b32.xlu2 %v6848_v38, %s6678_s22  ;;  %455 = vadd.xlane.f32.xlu0 %v454_v47 }
 0x27b   :  { %832 = vrot.lane.b32.xlu1 %v6859_v51, %s6676_s18 }
 0x281   :  { %855 = vrot.lane.b32.xlu0 %v6848_v38, %s6676_s18 }
 0x283   :  { %807 = vrot.lane.b32.xlu1 %v6842_v31, %s6677_s21 }
 0x289   :  { %809 = vrot.lane.b32.xlu0 %v6842_v31, %s6676_s18 }
 0x28a   :  { %v441_v48 = vpop.xlane.xlu0 %440 }
 0x28b   :  { %6527 = vrcp.f32 %v441_v48  ;;  %924 = vrot.lane.b32.xlu1 %v6861_v52, %s6676_s18  ;;  %v474_v61 = vand.u32 2147483648, %v441_v48  ;;  %v472_v62 = vand.u32 2147483647, %v441_v48  ;;  %vm468_vm5 = vweird.f32 %v441_v48 }
 0x28d   :  { %v475_v12 = vor.u32 1.1754944e-38, %v474_v61  ;;  %vm473_vm7 = vcmp.eq.f32.partialorder %v472_v62, 8.507059e+37 }
 0x291   :  { %v6528_v50 = vpop.eup %6527  ;;  %876 = vrot.lane.b32.xlu0 %v6851_v42, %s6677_s21 }
 0x292   :  { %v464_v54 = vmul.f32 %v6528_v50, %v441_v48  ;;  %v444_v57 = vpop.xlane.xlu1 %443  ;;  %vm469_vm4 = vweird.f32 %v6528_v50 }
 0x293   :  { %6529 = vrcp.f32 %v444_v57  ;;  %1182 = vrot.lane.b32.xlu1 %v6833_v26, %s6678_s22  ;;  %vm470_vm6 = vmor %vm468_vm5, %vm469_vm4  ;;  %v487_v20 = vand.u32 2147483647, %v444_v57  ;;  %v489_v21 = vand.u32 2147483648, %v444_v57  ;;  %vm483_vm10 = vweird.f32 %v444_v57 }
 0x294   :  { %v465_v58 = vsub.f32 1.0, %v464_v54  ;;  %v792_v54 = vsel %vm170_vm1, %v6962_v44, 0 }
 0x295   :  { %vm488_vm12 = vcmp.eq.f32.partialorder %v487_v20, 8.507059e+37 }
 0x296   :  { %v466_v33 = vmul.f32 %v6528_v50, %v465_v58 }
 0x298   :  { %v467_v0 = vadd.f32 %v6528_v50, %v466_v33 }
 0x299   :  { %v6530_v41 = vpop.eup %6529  ;;  %901 = vrot.lane.b32.xlu0 %v6857_v49, %s6676_s18 }
 0x29a   :  { %v479_v14 = vmul.f32 %v6530_v41, %v444_v57  ;;  %v471_v4 = vsel %vm470_vm6, %v6528_v50, %v467_v0  ;;  %vm484_vm9 = vweird.f32 %v6530_v41 }
 0x29b   :  { %v476_v16 = vsel %vm473_vm7, %v475_v12, %v471_v4  ;;  %vm485_vm11 = vmor %vm483_vm10, %vm484_vm9 }
 0x29c   :  { %v480_v17 = vsub.f32 1.0, %v479_v14  ;;  %v477_v19 = vmul.f32 %v6966_v55, %v476_v16  ;;  %v490_v55 = vor.u32 1.1754944e-38, %v489_v21 }
 0x29d   :  { %v720_v22 = vpop.permute.xlu0 %719 }
 0x29e   :  { %v481_v24 = vmul.f32 %v6530_v41, %v480_v17  ;;  %v725_v27 = vsel %vm597_vm2, %v720_v22, 0  ;;  %v583_v30 = vpack.c.bf16 %v477_v19, %v477_v19 }
 0x29f   :  { %734 = vmatpush.bf16.msrb.mxu0 %v725_v27 }
 0x2a0   :  { %v482_v53 = vadd.f32 %v6530_v41, %v481_v24  ;;  %v453_v37 = vpop.xlane.xlu2 %452  ;;  %5582 = vmatmul.msk.bf16.vlgmr.msrb.gmra.mxu2 %vm593_vm8, %v583_v30 }
 0x2a1   :  { %6531 = vrcp.f32 %v453_v37  ;;  %778 = vmatpush.bf16.xpose.msrb.mxu2 %v769_v34  ;;  %922 = vrot.lane.b32.xlu0 %v6861_v52, %s6677_s21  ;;  %v534_v61 = vand.u32 2147483648, %v453_v37  ;;  %vm528_vm14 = vweird.f32 %v453_v37 }
 0x2a2   :  { %v486_v13 = vsel %vm485_vm11, %v6530_v41, %v482_v53 }
 0x2a3   :  { %v491_v43 = vsel %vm488_vm12, %v490_v55, %v486_v13  ;;  %v535_v0 = vor.u32 1.1754944e-38, %v534_v61 }
 0x2a4   :  { %v492_v39 = vmul.f32 %v6970_v59, %v491_v43  ;;  %v532_v59 = vand.u32 2147483647, %v453_v37 }
 0x2a5   :  { %v741_v47 = vpop.permute.xlu0 %740 }
 0x2a6   :  { %v746_v28 = vsel %vm597_vm2, %v741_v47, 0  ;;  %v584_v48 = vpack.c.bf16 %v492_v39, %v492_v39  ;;  %vm533_vm4 = vcmp.eq.f32.partialorder %v532_v59, 8.507059e+37 }
 0x2a7   :  { %v6532_v50 = vpop.eup %6531  ;;  %755 = vmatpush.bf16.msra.mxu1 %v746_v28 }
 0x2a8   :  { %v524_v57 = vmul.f32 %v6532_v50, %v453_v37  ;;  %5583 = vmatmul.msk.bf16.vlgmr.msrb.gmra.mxu3 %vm593_vm8, %v584_v48  ;;  %vm529_vm13 = vweird.f32 %v6532_v50  ;;  %v7053_v17 = vpop.xlane.xlu2 %458 }
 0x2a9   :  { %801 = vmatpush.bf16.xpose.msrb.mxu3 %v792_v54  ;;  %1161 = vrot.lane.b32.xlu0 %v6830_v23, %s6678_s22  ;;  %vm530_vm15 = vmor %vm528_vm14, %vm529_vm13 }
 0x2aa   :  { %v525_v58 = vsub.f32 1.0, %v524_v57  ;;  %v7051_v4 = vpop.permute.xlu1 %784 }
 0x2ac   :  { %v526_v33 = vmul.f32 %v6532_v50, %v525_v58 }
 0x2ae   :  { %v527_v62 = vadd.f32 %v6532_v50, %v526_v33 }
 0x2b0   :  { %v531_v41 = vsel %vm530_vm15, %v6532_v50, %v527_v62 }
 0x2b1   :  { %1266 = vrot.lane.b32.xlu0 %v6851_v42, %s6678_s22  ;;  %v536_v44 = vsel %vm533_vm4, %v535_v0, %v531_v41 }
 0x2b2   :  { %v537_v12 = vmul.f32 %v6974_v11, %v536_v44 }
 0x2b4   :  { %v587_v14 = vpack.c.bf16 %v537_v12, %v537_v12 }
 0x2b6   :  { %5586 = vmatmul.msk.bf16.vlgmr.msra.gmra.mxu2 %vm593_vm8, %v587_v14 }
 0x2c6   :  { %5590 = vmatmul.msk.bf16.vlgmr.msrb.gmra.mxu2 %vm170_vm1, %v762_v63 }
 0x2d0   :  { %v450_v16 = vpop.xlane.xlu0 %449 }
 0x2d1   :  { %6533 = vrcp.f32 %v450_v16  ;;  %v519_v27 = vand.u32 2147483648, %v450_v16  ;;  %v517_v30 = vand.u32 2147483647, %v450_v16  ;;  %vm513_vm6 = vweird.f32 %v450_v16 }
 0x2d3   :  { %v520_v39 = vor.u32 1.1754944e-38, %v519_v27  ;;  %vm518_vm9 = vcmp.eq.f32.partialorder %v517_v30, 8.507059e+37 }
 0x2d5   :  { %v7055_v19 = vpop.xlane.xlu1 %461 }
 0x2d6   :  { %6535 = vrcp.f32 %v7055_v19  ;;  %v579_v14 = vand.u32 2147483648, %v7055_v19  ;;  %vm573_vm15 = vweird.f32 %v7055_v19 }
 0x2d7   :  { %v6534_v20 = vpop.eup %6533  ;;  %6537 = vrcp.f32 %v7053_v17 }
 0x2d8   :  { %v509_v21 = vmul.f32 %v6534_v20, %v450_v16  ;;  %v447_v11 = vpop.xlane.xlu0 %446  ;;  %vm514_vm5 = vweird.f32 %v6534_v20 }
 0x2d9   :  { %6539 = vrcp.f32 %v447_v11  ;;  %vm515_vm7 = vmor %vm513_vm6, %vm514_vm5  ;;  %v504_v58 = vand.u32 2147483648, %v447_v11  ;;  %v502_v59 = vand.u32 2147483647, %v447_v11  ;;  %vm498_vm11 = vweird.f32 %v447_v11 }
 0x2da   :  { %v510_v22 = vsub.f32 1.0, %v509_v21 }
 0x2db   :  { %v505_v16 = vor.u32 1.1754944e-38, %v504_v58  ;;  %vm503_vm14 = vcmp.eq.f32.partialorder %v502_v59, 8.507059e+37 }
 0x2dc   :  { %v7059_v24 = vpop.eup %6535  ;;  %v511_v63 = vmul.f32 %v6534_v20, %v510_v22 }
 0x2dd   :  { %v569_v34 = vmul.f32 %v7059_v24, %v7055_v19  ;;  %v7063_v53 = vpop.eup %6537  ;;  %vm574_vm12 = vweird.f32 %v7059_v24 }
 0x2de   :  { %v512_v37 = vadd.f32 %v6534_v20, %v511_v63  ;;  %v554_v48 = vmul.f32 %v7063_v53, %v7053_v17  ;;  %vm7076_vm4 = vmor %vm573_vm15, %vm574_vm12  ;;  %vm559_vm6 = vweird.f32 %v7063_v53 }
 0x2df   :  { %v6540_v55 = vpop.eup %6539  ;;  %v570_v13 = vsub.f32 1.0, %v569_v34 }
 0x2e0   :  { %v516_v43 = vsel %vm515_vm7, %v6534_v20, %v512_v37  ;;  %v494_v47 = vmul.f32 %v6540_v55, %v447_v11  ;;  %v456_v28 = vpop.xlane.xlu0 %455  ;;  %vm499_vm10 = vweird.f32 %v6540_v55  ;;  %v555_v62 = vsub.f32 1.0, %v554_v48 }
 0x2e1   :  { %6541 = vrcp.f32 %v456_v28  ;;  %v521_v54 = vsel %vm518_vm9, %v520_v39, %v516_v43  ;;  %v571_v57 = vmul.f32 %v7059_v24, %v570_v13  ;;  %vm500_vm13 = vmor %vm498_vm11, %vm499_vm10  ;;  %v577_v11 = vand.u32 2147483647, %v7055_v19 }
 0x2e2   :  { %v495_v50 = vsub.f32 1.0, %v494_v47  ;;  %v522_v61 = vmul.f32 %v6994_v35, %v521_v54  ;;  %v556_v21 = vmul.f32 %v7063_v53, %v555_v62  ;;  %v580_v37 = vor.u32 1.1754944e-38, %v579_v14 }
 0x2e3   :  { %v572_v12 = vadd.f32 %v7059_v24, %v571_v57  ;;  %v547_v43 = vand.u32 2147483647, %v456_v28  ;;  %vm578_vm7 = vcmp.eq.f32.partialorder %v577_v11, 8.507059e+37  ;;  %vm543_vm9 = vweird.f32 %v456_v28 }
 0x2e4   :  { %v496_v33 = vmul.f32 %v6540_v55, %v495_v50  ;;  %v586_v0 = vpack.c.bf16 %v522_v61, %v522_v61  ;;  %v557_v19 = vadd.f32 %v7063_v53, %v556_v21  ;;  %vm558_vm11 = vweird.f32 %v7053_v17 }
 0x2e5   :  { %v576_v34 = vsel %vm7076_vm4, %v7059_v24, %v572_v12  ;;  %v564_v24 = vand.u32 2147483648, %v7053_v17  ;;  %v562_v57 = vand.u32 2147483647, %v7053_v17  ;;  %vm548_vm12 = vcmp.eq.f32.partialorder %v547_v43, 8.507059e+37 }
 0x2e6   :  { %v497_v41 = vadd.f32 %v6540_v55, %v496_v33  ;;  %5585 = vmatmul.msk.bf16.vlgmr.msrb.gmra.mxu1 %vm593_vm8, %v586_v0  ;;  %v581_v50 = vsel %vm578_vm7, %v580_v37, %v576_v34 }
 0x2e7   :  { %v6542_v44 = vpop.eup %6541  ;;  %v582_v33 = vmul.f32 %v7000_v25, %v581_v50  ;;  %v565_v0 = vor.u32 1.1754944e-38, %v564_v24 }
 0x2e8   :  { %v501_v20 = vsel %vm500_vm13, %v6540_v55, %v497_v41  ;;  %v539_v35 = vmul.f32 %v6542_v44, %v456_v28  ;;  %v549_v55 = vand.u32 2147483648, %v456_v28  ;;  %vm544_vm5 = vweird.f32 %v6542_v44  ;;  %vm560_vm13 = vmor %vm558_vm11, %vm559_vm6  ;;  %v879_v28 = vpop.permute.xlu2 %878 }
 0x2e9   :  { %v506_v22 = vsel %vm503_vm14, %v505_v16, %v501_v20  ;;  %vm545_vm10 = vmor %vm543_vm9, %vm544_vm5  ;;  %v561_v59 = vsel %vm560_vm13, %v7063_v53, %v557_v19  ;;  %vm563_vm14 = vcmp.eq.f32.partialorder %v562_v57, 8.507059e+37  ;;  %v884_v20 = vsel %vm170_vm1, %v879_v28, 0 }
 0x2ea   :  { %v540_v27 = vsub.f32 1.0, %v539_v35  ;;  %v507_v30 = vmul.f32 %v7002_v40, %v506_v22  ;;  %v550_v54 = vor.u32 1.1754944e-38, %v549_v55  ;;  %v566_v16 = vsel %vm563_vm14, %v565_v0, %v561_v59 }
 0x2eb   :  { %v567_v25 = vmul.f32 %v6980_v15, %v566_v16 }
 0x2ec   :  { %v541_v13 = vmul.f32 %v6542_v44, %v540_v27  ;;  %v585_v39 = vpack.c.bf16 %v507_v30, %v507_v30 }
 0x2ed   :  { %v833_v47 = vpop.permute.xlu1 %832  ;;  %v589_v21 = vpack.c.bf16 %v567_v25, %v567_v25 }
 0x2ee   :  { %v542_v48 = vadd.f32 %v6542_v44, %v541_v13  ;;  %v838_v40 = vsel %vm170_vm1, %v833_v47, 0  ;;  %5584 = vmatmul.msk.bf16.vlgmr.msra.gmra.mxu0 %vm593_vm8, %v585_v39 }
 0x2ef   :  { %847 = vmatpush.bf16.xpose.msrb.mxu1 %v838_v40 }
 0x2f0   :  { %v546_v58 = vsel %vm545_vm10, %v6542_v44, %v542_v48  ;;  %v590_v44 = vpack.c.bf16 %v582_v33, %v582_v33 }
 0x2f1   :  { %v551_v61 = vsel %vm548_vm12, %v550_v54, %v546_v58 }
 0x2f2   :  { %v552_v62 = vmul.f32 %v7010_v46, %v551_v61  ;;  %v854_v46 = vpop.permute.xlu2 %853 }
 0x2f3   :  { %v856_v41 = vpop.permute.xlu0 %855 }
 0x2f4   :  { %v861_v12 = vsel %vm170_vm1, %v856_v41, 0  ;;  %v588_v14 = vpack.c.bf16 %v552_v62, %v552_v62 }
 0x2f5   :  { %v808_v17 = vpop.permute.xlu1 %807  ;;  %870 = vmatpush.bf16.xpose.msra.mxu2 %v861_v12 }
 0x2f6   :  { %5587 = vmatmul.msk.bf16.vlgmr.msra.gmra.mxu3 %vm593_vm8, %v588_v14  ;;  %5589 = vmatmul.msk.bf16.vlgmr.msra.gmra.mxu1 %vm593_vm8, %v590_v44 }
 0x2f7   :  { %893 = vmatpush.bf16.xpose.msra.mxu3 %v884_v20 }
 0x2fa   :  { %v831_v30 = vpop.permute.xlu2 %830 }
 0x2fb   :  { %v810_v53 = vpop.permute.xlu0 %809 }
 0x2fc   :  { %v815_v35 = vsel %vm170_vm1, %v810_v53, 0  ;;  %5594 = vmatmul.msk.bf16.vlgmr.msra.gmra.mxu2 %vm170_vm1, %v854_v46 }
 0x2fd   :  { %v925_v11 = vpop.permute.xlu1 %924  ;;  %824 = vmatpush.bf16.xpose.msra.mxu0 %v815_v35 }
 0x2fe   :  { %v930_v22 = vsel %vm170_vm1, %v925_v11, 0  ;;  %5588 = vmatmul.msk.bf16.vlgmr.msrb.gmra.mxu0 %vm593_vm8, %v589_v21 }
 0x2ff   :  { %939 = vmatpush.bf16.xpose.msra.mxu1 %v930_v22 }
 0x302   :  { %v900_v55 = vpop.permute.xlu2 %899 }
 0x303   :  { %v877_v63 = vpop.permute.xlu0 %876 }
 0x305   :  { %v1183_v27 = vpop.permute.xlu1 %1182 }
 0x306   :  { %v1188_v34 = vsel %vm597_vm2, %v1183_v27, 0  ;;  %5591 = vmatmul.msk.bf16.vlgmr.msrb.gmra.mxu3 %vm170_vm1, %v7051_v4  ;;  %5593 = vmatmul.msk.bf16.vlgmr.msrb.gmra.mxu1 %vm170_vm1, %v831_v30 }
 0x307   :  { %1197 = vmatpush.bf16.msrb.mxu3 %v1188_v34 }
 0x30a   :  { %v1246_v43 = vpop.permute.xlu2 %1245 }
 0x30b   :  { %v902_v15 = vpop.permute.xlu0 %901  ;;  %v1251_v4 = vsel %vm597_vm2, %v1246_v43, 0 }
 0x30c   :  { %v907_v37 = vsel %vm170_vm1, %v902_v15, 0 }
 0x30d   :  { %916 = vmatpush.bf16.xpose.msrb.mxu0 %v907_v37 }
 0x30e   :  { %5592 = vmatmul.msk.bf16.vlgmr.msra.gmra.mxu0 %vm170_vm1, %v808_v17 }
 0x313   :  { %v923_v13 = vpop.permute.xlu0 %922 }
 0x316   :  { %5595 = vmatmul.msk.bf16.vlgmr.msra.gmra.mxu3 %vm170_vm1, %v877_v63  ;;  %5597 = vmatmul.msk.bf16.vlgmr.msra.gmra.mxu1 %vm170_vm1, %v923_v13 }
 0x31b   :  { %v1162_v39 = vpop.permute.xlu0 %1161 }
 0x31c   :  { %v1167_v19 = vsel %vm597_vm2, %v1162_v39, 0 }
 0x31d   :  { %1176 = vmatpush.bf16.msrb.mxu2 %v1167_v19 }
 0x31e   :  { %5596 = vmatmul.msk.bf16.vlgmr.msrb.gmra.mxu0 %vm170_vm1, %v900_v55 }
 0x321   :  { %1260 = vmatpush.bf16.msra.mxu2 %v1251_v4 }
 0x323   :  { %v7116_v47 = vpop.f32.mrf.mxu2  ;;  %v1267_v48 = vpop.permute.xlu0 %1266 }
 0x324   :  { %v1272_v40 = vsel %vm597_vm2, %v1267_v48, 0 }
 0x325   :  { %1281 = vmatpush.bf16.msra.mxu3 %v1272_v40 }
 0x32b   :  { %v612_v50 = vpop.f32.mrf.mxu2  ;;  %v7119_v24 = vpop.f32.mrf.mxu3 }
 0x333   :  { %v633_v54 = vpop.f32.mrf.mxu3 }
 0x339   :  { %v7121_v57 = vpop.f32.mrf.mxu2 }
 0x341   :  { %v696_v58 = vpop.f32.mrf.mxu2 }
 0x349   :  { %v780_v28 = vpop.f32.mrf.mxu2 }
 0x34a   :  { %v945_v61 = vmul.f32 0.35355338, %v780_v28 }
 0x34c   :  { %v953_v33 = vadd.f32 %v945_v61, %v6914_v29 }
 0x34e   :  { %v961_v59 = vsel %vm390_vm3, %v953_v33, -inf }
 0x34f   :  { %962 = vmax.xlane.f32.xlu1 %v961_v59 }
 0x351   :  { %v782_v62 = vpop.f32.mrf.mxu2 }
 0x363   :  { %v7125_v0 = vpop.f32.mrf.mxu1 }
 0x36b   :  { %v7127_v41 = vpop.f32.mrf.mxu0  ;;  %v675_v12 = vpop.f32.mrf.mxu1 }
 0x373   :  { %v654_v14 = vpop.f32.mrf.mxu0  ;;  %v7129_v17 = vpop.f32.mrf.mxu1 }
 0x379   :  { %v7131_v44 = vpop.f32.mrf.mxu3 }
 0x37b   :  { %v7133_v16 = vpop.f32.mrf.mxu0  ;;  %v759_v20 = vpop.f32.mrf.mxu1 }
 0x37f   :  { %v872_v25 = vpop.f32.mrf.mxu2 }
 0x380   :  { %v949_v63 = vmul.f32 0.35355338, %v872_v25 }
 0x381   :  { %v717_v46 = vpop.f32.mrf.mxu3 }
 0x382   :  { %v957_v55 = vadd.f32 %v949_v63, %v6935_v56 }
 0x383   :  { %v738_v53 = vpop.f32.mrf.mxu0  ;;  %v849_v35 = vpop.f32.mrf.mxu1 }
 0x384   :  { %v948_v21 = vmul.f32 0.35355338, %v849_v35  ;;  %v973_v4 = vsel %vm390_vm3, %v957_v55, -inf }
 0x386   :  { %v956_v22 = vadd.f32 %v948_v21, %v6928_v45 }
 0x387   :  { %v874_v11 = vpop.f32.mrf.mxu2 }
 0x388   :  { %v970_v27 = vsel %vm390_vm3, %v956_v22, -inf }
 0x389   :  { %v803_v30 = vpop.f32.mrf.mxu3  ;;  %971 = vmax.xlane.f32.xlu0 %v970_v27 }
 0x38a   :  { %v946_v43 = vmul.f32 0.35355338, %v803_v30 }
 0x38b   :  { %v826_v34 = vpop.f32.mrf.mxu0  ;;  %v851_v37 = vpop.f32.mrf.mxu1 }
 0x38c   :  { %v947_v15 = vmul.f32 0.35355338, %v826_v34  ;;  %v954_v50 = vadd.f32 %v946_v43, %v6921_v36 }
 0x38e   :  { %v955_v13 = vadd.f32 %v947_v15, %v6937_v60  ;;  %v964_v58 = vsel %vm390_vm3, %v954_v50, -inf }
 0x390   :  { %v967_v39 = vsel %vm390_vm3, %v955_v13, -inf }
 0x391   :  { %v805_v19 = vpop.f32.mrf.mxu3  ;;  %968 = vmax.xlane.f32.xlu2 %v967_v39  ;;  %974 = vmax.xlane.f32.xlu0 %v973_v4 }
 0x393   :  { %v828_v48 = vpop.f32.mrf.mxu0  ;;  %v941_v40 = vpop.f32.mrf.mxu1 }
 0x394   :  { %v952_v54 = vmul.f32 0.35355338, %v941_v40 }
 0x396   :  { %v7144_v12 = vadd.f32 %v952_v54, %v6949_v18 }
 0x398   :  { %v982_v46 = vsel %vm390_vm3, %v7144_v12, -inf }
 0x399   :  { %965 = vmax.xlane.f32.xlu2 %v964_v58  ;;  %v895_v28 = vpop.f32.mrf.mxu3 }
 0x39a   :  { %v950_v20 = vmul.f32 0.35355338, %v895_v28 }
 0x39b   :  { %v918_v61 = vpop.f32.mrf.mxu0  ;;  %v943_v62 = vpop.f32.mrf.mxu1 }
 0x39c   :  { %v951_v59 = vmul.f32 0.35355338, %v918_v61  ;;  %v958_v21 = vadd.f32 %v950_v20, %v6954_v32 }
 0x39e   :  { %v7147_v14 = vadd.f32 %v951_v59, %v6940_v10  ;;  %v976_v11 = vsel %vm390_vm3, %v958_v21, -inf }
 0x3a0   :  { %v979_v25 = vsel %vm390_vm3, %v7147_v14, -inf }
 0x3a1   :  { %v897_v53 = vpop.f32.mrf.mxu3  ;;  %980 = vmax.xlane.f32.xlu1 %v979_v25  ;;  %983 = vmax.xlane.f32.xlu2 %v982_v46 }
 0x3a3   :  { %v920_v35 = vpop.f32.mrf.mxu0 }
 0x3a5   :  { %1224 = vrot.lane.b32.xlu0 %v6859_v51, %s6678_s22 }
 0x3a9   :  { %977 = vmax.xlane.f32.xlu1 %v976_v11 }
 0x3c2   :  { %v963_v63 = vpop.xlane.xlu1 %962  ;;  %1203 = vrot.lane.b32.xlu1 %v6842_v31, %s6678_s22 }
 0x3c3   :  { %v985_v27 = vsub.f32 %v953_v33, %v963_v63 }
 0x3c5   :  { %v993_v30 = vmul.f32 1.442695, %v985_v27 }
 0x3c7   :  { %6543 = vpow2.f32 %v993_v30 }
 0x3cd   :  { %v7159_v34 = vpop.eup %6543 }
 0x3ce   :  { %v1009_v15 = vsel %vm390_vm3, %v7159_v34, 0.0 }
 0x3cf   :  { %1010 = vadd.xlane.f32.xlu0 %v1009_v15 }
 0x3e3   :  { %1354 = vrot.lane.b32.xlu0 %v6833_v26, %s6679_s23 }
 0x3eb   :  { %1329 = vrot.lane.b32.xlu0 %v6830_v23, %s6680_s24 }
 0x3fc   :  { %v972_v37 = vpop.xlane.xlu0 %971 }
 0x3fd   :  { %v988_v43 = vsub.f32 %v956_v22, %v972_v37 }
 0x3ff   :  { %v999_v39 = vmul.f32 1.442695, %v988_v43 }
 0x401   :  { %6545 = vpow2.f32 %v999_v39 }
 0x404   :  { %v969_v33 = vpop.xlane.xlu2 %968  ;;  %v975_v4 = vpop.xlane.xlu0 %974 }
 0x405   :  { %v987_v19 = vsub.f32 %v955_v13, %v969_v33  ;;  %v989_v48 = vsub.f32 %v957_v55, %v975_v4 }
 0x407   :  { %v997_v40 = vmul.f32 1.442695, %v987_v19  ;;  %v7167_v54 = vpop.eup %6545  ;;  %v1001_v58 = vmul.f32 1.442695, %v989_v48 }
 0x408   :  { %v1018_v28 = vsel %vm390_vm3, %v7167_v54, 0.0 }
 0x409   :  { %6547 = vpow2.f32 %v997_v40  ;;  %1019 = vadd.xlane.f32.xlu2 %v1018_v28 }
 0x40a   :  { %6549 = vpow2.f32 %v1001_v58 }
 0x40c   :  { %v966_v61 = vpop.xlane.xlu2 %965 }
 0x40d   :  { %v986_v59 = vsub.f32 %v954_v50, %v966_v61 }
 0x40f   :  { %v7171_v62 = vpop.eup %6547  ;;  %v995_v22 = vmul.f32 1.442695, %v986_v59 }
 0x410   :  { %v7173_v20 = vpop.eup %6549  ;;  %v1015_v55 = vsel %vm390_vm3, %v7171_v62, 0.0 }
 0x411   :  { %6551 = vpow2.f32 %v995_v22  ;;  %1016 = vadd.xlane.f32.xlu1 %v1015_v55  ;;  %v1021_v13 = vsel %vm390_vm3, %v7173_v20, 0.0 }
 0x412   :  { %1022 = vadd.xlane.f32.xlu2 %v1021_v13 }
 0x414   :  { %v981_v25 = vpop.xlane.xlu1 %980  ;;  %v984_v39 = vpop.xlane.xlu2 %983 }
 0x415   :  { %v992_v33 = vsub.f32 %v7144_v12, %v984_v39  ;;  %v991_v59 = vsub.f32 %v7147_v14, %v981_v25 }
 0x417   :  { %v7179_v46 = vpop.eup %6551  ;;  %v1225_v53 = vpop.permute.xlu0 %1224  ;;  %v1007_v48 = vmul.f32 1.442695, %v992_v33 }
 0x418   :  { %v1012_v50 = vsel %vm390_vm3, %v7179_v46, 0.0  ;;  %v1230_v35 = vsel %vm597_vm2, %v1225_v53, 0  ;;  %v1005_v53 = vmul.f32 1.442695, %v991_v59 }
 0x419   :  { %1013 = vadd.xlane.f32.xlu1 %v1012_v50  ;;  %1239 = vmatpush.bf16.msrb.mxu1 %v1230_v35 }
 0x41c   :  { %v978_v11 = vpop.xlane.xlu1 %977 }
 0x41d   :  { %v990_v63 = vsub.f32 %v958_v21, %v978_v11 }
 0x41f   :  { %v1003_v27 = vmul.f32 1.442695, %v990_v63 }
 0x421   :  { %6553 = vpow2.f32 %v1003_v27 }
 0x427   :  { %v7184_v30 = vpop.eup %6553 }
 0x428   :  { %v1024_v15 = vsel %vm390_vm3, %v7184_v30, 0.0 }
 0x429   :  { %1025 = vadd.xlane.f32.xlu0 %v1024_v15 }
 0x42a   :  { %1308 = vrot.lane.b32.xlu2 %v6861_v52, %s6678_s22 }
 0x432   :  { %1423 = vrot.lane.b32.xlu2 %v6848_v38, %s6679_s23  ;;  %1331 = vrot.lane.b32.xlu1 %v6830_v23, %s6679_s23 }
 0x434   :  { %v1204_v37 = vpop.permute.xlu1 %1203 }
 0x435   :  { %v1209_v21 = vsel %vm597_vm2, %v1204_v37, 0 }
 0x436   :  { %1218 = vmatpush.bf16.msra.mxu0 %v1209_v21 }
 0x43a   :  { %1287 = vrot.lane.b32.xlu1 %v6857_v49, %s6678_s22 }
 0x43d   :  { %1446 = vrot.lane.b32.xlu0 %v6851_v42, %s6679_s23 }
 0x442   :  { %1352 = vrot.lane.b32.xlu1 %v6833_v26, %s6680_s24  ;;  %v1011_v43 = vpop.xlane.xlu0 %1010 }
 0x443   :  { %6555 = vrcp.f32 %v1011_v43  ;;  %v1044_v58 = vand.u32 2147483648, %v1011_v43  ;;  %v1042_v61 = vand.u32 2147483647, %v1011_v43  ;;  %vm1038_vm4 = vweird.f32 %v1011_v43 }
 0x444   :  { %6557 = vpow2.f32 %v1007_v48 }
 0x445   :  { %1421 = vrot.lane.b32.xlu0 %v6848_v38, %s6680_s24  ;;  %v1045_v12 = vor.u32 1.1754944e-38, %v1044_v58  ;;  %vm1043_vm6 = vcmp.eq.f32.partialorder %v1042_v61, 8.507059e+37  ;;  %6559 = vpow2.f32 %v1005_v53 }
 0x449   :  { %v6556_v19 = vpop.eup %6555 }
 0x44a   :  { %1377 = vrot.lane.b32.xlu1 %v6842_v31, %s6679_s23  ;;  %v1034_v4 = vmul.f32 %v6556_v19, %v1011_v43  ;;  %vm1039_vm15 = vweird.f32 %v6556_v19  ;;  %v7214_v35 = vpop.eup %6557 }
 0x44b   :  { %vm1040_vm5 = vmor %vm1038_vm4, %vm1039_vm15  ;;  %v1030_v25 = vsel %vm390_vm3, %v7214_v35, 0.0 }
 0x44c   :  { %v1035_v40 = vsub.f32 1.0, %v1034_v4 }
 0x44d   :  { %1398 = vrot.lane.b32.xlu0 %v6859_v51, %s6680_s24 }
 0x44e   :  { %v1036_v28 = vmul.f32 %v6556_v19, %v1035_v40 }
 0x450   :  { %v1037_v22 = vadd.f32 %v6556_v19, %v1036_v28 }
 0x452   :  { %1444 = vrot.lane.b32.xlu1 %v6851_v42, %s6680_s24  ;;  %v1041_v55 = vsel %vm1040_vm5, %v6556_v19, %v1037_v22 }
 0x453   :  { %v1046_v13 = vsel %vm1043_vm6, %v1045_v12, %v1041_v55 }
 0x454   :  { %v1047_v50 = vmul.f32 %v7159_v34, %v1046_v13  ;;  %v7223_v34 = vpop.eup %6559 }
 0x455   :  { %1467 = vrot.lane.b32.xlu0 %v6857_v49, %s6680_s24  ;;  %v1027_v11 = vsel %vm390_vm3, %v7223_v34, 0.0  ;;  %v7237_v4 = vpop.permute.xlu0 %1354 }
 0x456   :  { %v1153_v14 = vpack.c.bf16 %v1047_v50, %v1047_v50 }
 0x458   :  { %5598 = vmatmul.msk.bf16.vlgmr.msrb.gmra.mxu2 %vm593_vm8, %v1153_v14 }
 0x45a   :  { %1469 = vrot.lane.b32.xlu1 %v6857_v49, %s6679_s23 }
 0x45b   :  { %1031 = vadd.xlane.f32.xlu2 %v1030_v25 }
 0x45d   :  { %1771 = vrot.lane.b32.xlu0 %v6842_v31, %s6681_s25 }
 0x462   :  { %1490 = vrot.lane.b32.xlu1 %v6861_v52, %s6680_s24 }
 0x463   :  { %1028 = vadd.xlane.f32.xlu2 %v1027_v11 }
 0x46a   :  { %1729 = vrot.lane.b32.xlu1 %v6830_v23, %s6681_s25 }
 0x472   :  { %1792 = vrot.lane.b32.xlu1 %v6859_v51, %s6681_s25 }
 0x47b   :  { %1400 = vrot.lane.b32.xlu2 %v6859_v51, %s6679_s23 }
 0x47c   :  { %v1020_v63 = vpop.xlane.xlu2 %1019 }
 0x47d   :  { %6561 = vrcp.f32 %v1020_v63  ;;  %v1089_v39 = vand.u32 2147483648, %v1020_v63  ;;  %v1087_v19 = vand.u32 2147483647, %v1020_v63  ;;  %vm1083_vm9 = vweird.f32 %v1020_v63 }
 0x47f   :  { %v1090_v28 = vor.u32 1.1754944e-38, %v1089_v39  ;;  %vm1088_vm11 = vcmp.eq.f32.partialorder %v1087_v19, 8.507059e+37 }
 0x483   :  { %1375 = vrot.lane.b32.xlu2 %v6842_v31, %s6680_s24  ;;  %v6562_v27 = vpop.eup %6561 }
 0x484   :  { %v1017_v15 = vpop.xlane.xlu1 %1016  ;;  %v1079_v37 = vmul.f32 %v6562_v27, %v1020_v63  ;;  %vm1084_vm7 = vweird.f32 %v6562_v27 }
 0x485   :  { %6563 = vrcp.f32 %v1017_v15  ;;  %v1023_v21 = vpop.xlane.xlu2 %1022  ;;  %vm1085_vm10 = vmor %vm1083_vm9, %vm1084_vm7  ;;  %v1074_v14 = vand.u32 2147483648, %v1017_v15  ;;  %vm1068_vm14 = vweird.f32 %v1017_v15 }
 0x486   :  { %6565 = vrcp.f32 %v1023_v21  ;;  %v1080_v43 = vsub.f32 1.0, %v1079_v37  ;;  %v1072_v37 = vand.u32 2147483647, %v1017_v15  ;;  %vm1098_vm4 = vweird.f32 %v1023_v21 }
 0x488   :  { %v1081_v33 = vmul.f32 %v6562_v27, %v1080_v43  ;;  %v1104_v43 = vand.u32 2147483648, %v1023_v21  ;;  %vm1073_vm5 = vcmp.eq.f32.partialorder %v1072_v37, 8.507059e+37 }
 0x48a   :  { %v1082_v40 = vadd.f32 %v6562_v27, %v1081_v33 }
 0x48b   :  { %v6564_v48 = vpop.eup %6563  ;;  %1492 = vrot.lane.b32.xlu2 %v6861_v52, %s6679_s23 }
 0x48c   :  { %v6566_v58 = vpop.eup %6565  ;;  %v1064_v61 = vmul.f32 %v6564_v48, %v1017_v15  ;;  %v1014_v59 = vpop.xlane.xlu1 %1013  ;;  %v1086_v22 = vsel %vm1085_vm10, %v6562_v27, %v1082_v40  ;;  %vm1069_vm12 = vweird.f32 %v6564_v48  ;;  %v1102_v27 = vand.u32 2147483647, %v1023_v21 }
 0x48d   :  { %v1094_v12 = vmul.f32 %v6566_v58, %v1023_v21  ;;  %6567 = vrcp.f32 %v1014_v59  ;;  %v1309_v55 = vpop.permute.xlu2 %1308  ;;  %v1091_v13 = vsel %vm1088_vm11, %v1090_v28, %v1086_v22  ;;  %vm1099_vm13 = vweird.f32 %v6566_v58  ;;  %vm1070_vm15 = vmor %vm1068_vm14, %vm1069_vm12 }
 0x48e   :  { %v1065_v53 = vsub.f32 1.0, %v1064_v61  ;;  %v1092_v50 = vmul.f32 %v7167_v54, %v1091_v13  ;;  %v1314_v11 = vsel %vm597_vm2, %v1309_v55, 0  ;;  %v1075_v28 = vor.u32 1.1754944e-38, %v1074_v14  ;;  %v1330_v54 = vpop.permute.xlu0 %1329  ;;  %vm1100_vm6 = vmor %vm1098_vm4, %vm1099_vm13 }
 0x48f   :  { %v1095_v25 = vsub.f32 1.0, %v1094_v12  ;;  %1323 = vmatpush.bf16.msra.mxu1 %v1314_v11  ;;  %v1105_v12 = vor.u32 1.1754944e-38, %v1104_v43  ;;  %vm1103_vm7 = vcmp.eq.f32.partialorder %v1102_v27, 8.507059e+37  ;;  %vm1053_vm10 = vweird.f32 %v1014_v59 }
 0x490   :  { %v1066_v63 = vmul.f32 %v6564_v48, %v1065_v53  ;;  %v1156_v33 = vpack.c.bf16 %v1092_v50, %v1092_v50 }
 0x491   :  { %v1096_v39 = vmul.f32 %v6566_v58, %v1095_v25  ;;  %v1059_v25 = vand.u32 2147483648, %v1014_v59 }
 0x492   :  { %v1067_v19 = vadd.f32 %v6564_v48, %v1066_v63  ;;  %5601 = vmatmul.msk.bf16.vlgmr.msrb.gmra.mxu1 %vm593_vm8, %v1156_v33  ;;  %v1057_v63 = vand.u32 2147483647, %v1014_v59 }
 0x493   :  { %v6568_v40 = vpop.eup %6567  ;;  %v1097_v61 = vadd.f32 %v6566_v58, %v1096_v39  ;;  %1750 = vrot.lane.b32.xlu2 %v6833_v26, %s6681_s25  ;;  %v1060_v43 = vor.u32 1.1754944e-38, %v1059_v25 }
 0x494   :  { %v1071_v22 = vsel %vm1070_vm15, %v6564_v48, %v1067_v19  ;;  %v1049_v55 = vmul.f32 %v6568_v40, %v1014_v59  ;;  %vm1054_vm9 = vweird.f32 %v6568_v40  ;;  %vm1058_vm12 = vcmp.eq.f32.partialorder %v1057_v63, 8.507059e+37 }
 0x495   :  { %v1076_v13 = vsel %vm1073_vm5, %v1075_v28, %v1071_v22  ;;  %v1101_v53 = vsel %vm1100_vm6, %v6566_v58, %v1097_v61  ;;  %vm1055_vm11 = vmor %vm1053_vm10, %vm1054_vm9  ;;  %v1360_v19 = vsel %vm170_vm1, %v7237_v4, 0  ;;  %v1424_v28 = vpop.permute.xlu2 %1423 }
 0x496   :  { %v1077_v15 = vmul.f32 %v7171_v62, %v1076_v13  ;;  %v1106_v50 = vsel %vm1103_vm7, %v1105_v12, %v1101_v53  ;;  %v1050_v14 = vsub.f32 1.0, %v1049_v55 }
 0x497   :  { %v1107_v21 = vmul.f32 %v7173_v20, %v1106_v50 }
 0x498   :  { %v1051_v11 = vmul.f32 %v6568_v40, %v1050_v14  ;;  %v1155_v39 = vpack.c.bf16 %v1077_v15, %v1077_v15 }
 0x499   :  { %v1157_v48 = vpack.c.bf16 %v1107_v21, %v1107_v21 }
 0x49a   :  { %v1052_v37 = vadd.f32 %v6568_v40, %v1051_v11  ;;  %5600 = vmatmul.msk.bf16.vlgmr.msra.gmra.mxu0 %vm593_vm8, %v1155_v39 }
 0x49b   :  { %5602 = vmatmul.msk.bf16.vlgmr.msra.gmra.mxu2 %vm593_vm8, %v1157_v48 }
 0x49c   :  { %v1056_v58 = vsel %vm1055_vm11, %v6568_v40, %v1052_v37  ;;  %v1026_v62 = vpop.xlane.xlu0 %1025  ;;  %v1429_v40 = vsel %vm170_vm1, %v1424_v28, 0 }
 0x49d   :  { %v1061_v27 = vsel %vm1058_vm12, %v1060_v43, %v1056_v58  ;;  %6569 = vrcp.f32 %v1026_v62  ;;  %v1119_v13 = vand.u32 2147483648, %v1026_v62  ;;  %v1117_v53 = vand.u32 2147483647, %v1026_v62 }
 0x49e   :  { %v1062_v20 = vmul.f32 %v7179_v46, %v1061_v27  ;;  %vm1113_vm14 = vweird.f32 %v1026_v62 }
 0x49f   :  { %v1120_v4 = vor.u32 1.1754944e-38, %v1119_v13  ;;  %vm1118_vm4 = vcmp.eq.f32.partialorder %v1117_v53, 8.507059e+37 }
 0x4a0   :  { %v1154_v33 = vpack.c.bf16 %v1062_v20, %v1062_v20 }
 0x4a2   :  { %5599 = vmatmul.msk.bf16.vlgmr.msrb.gmra.mxu3 %vm593_vm8, %v1154_v33 }
 0x4a3   :  { %v6570_v59 = vpop.eup %6569  ;;  %1369 = vmatpush.bf16.xpose.msrb.mxu3 %v1360_v19 }
 0x4a4   :  { %v1109_v61 = vmul.f32 %v6570_v59, %v1026_v62  ;;  %v1332_v22 = vpop.permute.xlu1 %1331  ;;  %vm1114_vm13 = vweird.f32 %v6570_v59 }
 0x4a5   :  { %v1337_v12 = vsel %vm170_vm1, %v1332_v22, 0  ;;  %vm1115_vm15 = vmor %vm1113_vm14, %vm1114_vm13 }
 0x4a6   :  { %v1110_v55 = vsub.f32 1.0, %v1109_v61  ;;  %1346 = vmatpush.bf16.xpose.msrb.mxu2 %v1337_v12 }
 0x4a8   :  { %v1111_v46 = vmul.f32 %v6570_v59, %v1110_v55 }
 0x4aa   :  { %v1112_v15 = vadd.f32 %v6570_v59, %v1111_v46 }
 0x4ac   :  { %v1116_v50 = vsel %vm1115_vm15, %v6570_v59, %v1112_v15  ;;  %v1288_v14 = vpop.permute.xlu1 %1287 }
 0x4ad   :  { %v1121_v21 = vsel %vm1118_vm4, %v1120_v4, %v1116_v50  ;;  %v1293_v25 = vsel %vm597_vm2, %v1288_v14, 0  ;;  %5606 = vmatmul.msk.bf16.vlgmr.msrb.gmra.mxu2 %vm170_vm1, %v1330_v54 }
 0x4ae   :  { %1438 = vmatpush.bf16.xpose.msra.mxu2 %v1429_v40  ;;  %v1122_v11 = vmul.f32 %v7184_v30, %v1121_v21  ;;  %1302 = vmatpush.bf16.msrb.mxu0 %v1293_v25 }
 0x4af   :  { %v1447_v63 = vpop.permute.xlu0 %1446 }
 0x4b0   :  { %v1452_v39 = vsel %vm170_vm1, %v1447_v63, 0  ;;  %v1158_v48 = vpack.c.bf16 %v1122_v11, %v1122_v11 }
 0x4b2   :  { %5603 = vmatmul.msk.bf16.vlgmr.msra.gmra.mxu3 %vm593_vm8, %v1158_v48 }
 0x4b3   :  { %1461 = vmatpush.bf16.xpose.msra.mxu3 %v1452_v39 }
 0x4b4   :  { %v1353_v37 = vpop.permute.xlu1 %1352 }
 0x4b7   :  { %v1422_v43 = vpop.permute.xlu0 %1421 }
 0x4bc   :  { %v1378_v58 = vpop.permute.xlu1 %1377 }
 0x4bd   :  { %v1383_v62 = vsel %vm170_vm1, %v1378_v58, 0  ;;  %5610 = vmatmul.msk.bf16.vlgmr.msra.gmra.mxu2 %vm170_vm1, %v1422_v43 }
 0x4be   :  { %1392 = vmatpush.bf16.xpose.msra.mxu0 %v1383_v62 }
 0x4c2   :  { %5607 = vmatmul.msk.bf16.vlgmr.msrb.gmra.mxu3 %vm170_vm1, %v1353_v37 }
 0x4c4   :  { %v1445_v54 = vpop.permute.xlu1 %1444 }
 0x4cc   :  { %v1470_v30 = vpop.permute.xlu1 %1469 }
 0x4ce   :  { %v1032_v27 = vpop.xlane.xlu2 %1031 }
 0x4cf   :  { %6571 = vrcp.f32 %v1032_v27  ;;  %v1149_v61 = vand.u32 2147483648, %v1032_v27  ;;  %v1147_v12 = vand.u32 2147483647, %v1032_v27  ;;  %vm1143_vm6 = vweird.f32 %v1032_v27 }
 0x4d1   :  { %v1150_v53 = vor.u32 1.1754944e-38, %v1149_v61  ;;  %vm1148_vm9 = vcmp.eq.f32.partialorder %v1147_v12, 8.507059e+37 }
 0x4d2   :  { %5611 = vmatmul.msk.bf16.vlgmr.msra.gmra.mxu3 %vm170_vm1, %v1445_v54  ;;  %v1399_v54 = vpop.permute.xlu0 %1398 }
 0x4d4   :  { %v7266_v20 = vpop.permute.xlu1 %1490 }
 0x4d5   :  { %v6572_v33 = vpop.eup %6571 }
 0x4d6   :  { %v1139_v19 = vmul.f32 %v6572_v33, %v1032_v27  ;;  %v1029_v59 = vpop.xlane.xlu2 %1028  ;;  %vm1144_vm5 = vweird.f32 %v6572_v33 }
 0x4d7   :  { %6573 = vrcp.f32 %v1029_v59  ;;  %vm1145_vm7 = vmor %vm1143_vm6, %vm1144_vm5  ;;  %v1134_v39 = vand.u32 2147483648, %v1029_v59  ;;  %v1132_v37 = vand.u32 2147483647, %v1029_v59  ;;  %vm1128_vm11 = vweird.f32 %v1029_v59 }
 0x4d8   :  { %v1140_v28 = vsub.f32 1.0, %v1139_v19 }
 0x4d9   :  { %v1135_v27 = vor.u32 1.1754944e-38, %v1134_v39  ;;  %vm1133_vm13 = vcmp.eq.f32.partialorder %v1132_v37, 8.507059e+37 }
 0x4da   :  { %v1141_v22 = vmul.f32 %v6572_v33, %v1140_v28 }
 0x4db   :  { %v7268_v55 = vpop.f32.mrf.mxu2 }
 0x4dc   :  { %v1142_v40 = vadd.f32 %v6572_v33, %v1141_v22  ;;  %v1730_v13 = vpop.permute.xlu1 %1729  ;;  %v1475_v22 = vsel %vm170_vm1, %v1470_v30, 0 }
 0x4dd   :  { %v6574_v46 = vpop.eup %6573  ;;  %v1735_v15 = vsel %vm597_vm2, %v1730_v13, 0 }
 0x4de   :  { %v1146_v4 = vsel %vm1145_vm7, %v6572_v33, %v1142_v40  ;;  %v1124_v50 = vmul.f32 %v6574_v46, %v1029_v59  ;;  %v1401_v14 = vpop.permute.xlu2 %1400  ;;  %1744 = vmatpush.bf16.msrb.mxu2 %v1735_v15  ;;  %vm1129_vm10 = vweird.f32 %v6574_v46  ;;  %v1468_v59 = vpop.permute.xlu0 %1467 }
 0x4df   :  { %v1151_v21 = vsel %vm1148_vm9, %v1150_v53, %v1146_v4  ;;  %v1406_v25 = vsel %vm170_vm1, %v1401_v14, 0  ;;  %vm1130_vm12 = vmor %vm1128_vm11, %vm1129_vm10 }
 0x4e0   :  { %v1152_v11 = vmul.f32 %v7214_v35, %v1151_v21  ;;  %v1125_v63 = vsub.f32 1.0, %v1124_v50  ;;  %1415 = vmatpush.bf16.xpose.msrb.mxu1 %v1406_v25 }
 0x4e2   :  { %v1126_v48 = vmul.f32 %v6574_v46, %v1125_v63  ;;  %v1160_v43 = vpack.c.bf16 %v1152_v11, %v1152_v11 }
 0x4e3   :  { %v1180_v62 = vpop.f32.mrf.mxu2 }
 0x4e4   :  { %v1127_v58 = vadd.f32 %v6574_v46, %v1126_v48  ;;  %5605 = vmatmul.msk.bf16.vlgmr.msra.gmra.mxu1 %vm593_vm8, %v1160_v43  ;;  %v1793_v13 = vpop.permute.xlu1 %1792 }
 0x4e5   :  { %v1798_v53 = vsel %vm597_vm2, %v1793_v13, 0 }
 0x4e6   :  { %v1131_v33 = vsel %vm1130_vm12, %v6574_v46, %v1127_v58  ;;  %v1376_v19 = vpop.permute.xlu2 %1375  ;;  %v1772_v15 = vpop.permute.xlu0 %1771 }
 0x4e7   :  { %v1136_v28 = vsel %vm1133_vm13, %v1135_v27, %v1131_v33  ;;  %v1777_v30 = vsel %vm597_vm2, %v1772_v15, 0 }
 0x4e8   :  { %v1137_v35 = vmul.f32 %v7223_v34, %v1136_v28 }
 0x4ea   :  { %v1159_v61 = vpack.c.bf16 %v1137_v35, %v1137_v35 }
 0x4ec   :  { %5604 = vmatmul.msk.bf16.vlgmr.msrb.gmra.mxu0 %vm593_vm8, %v1159_v61 }
 0x4ed   :  { %1484 = vmatpush.bf16.xpose.msrb.mxu0 %v1475_v22 }
 0x4ee   :  { %v1493_v12 = vpop.permute.xlu2 %1492 }
 0x4ef   :  { %v1498_v40 = vsel %vm170_vm1, %v1493_v12, 0 }
 0x4f0   :  { %1507 = vmatpush.bf16.xpose.msra.mxu1 %v1498_v40 }
 0x4f4   :  { %5609 = vmatmul.msk.bf16.vlgmr.msrb.gmra.mxu1 %vm170_vm1, %v1399_v54 }
 0x4f6   :  { %v1751_v46 = vpop.permute.xlu2 %1750 }
 0x4f7   :  { %v1756_v34 = vsel %vm597_vm2, %v1751_v46, 0 }
 0x4f8   :  { %1807 = vmatpush.bf16.msrb.mxu1 %v1798_v53  ;;  %1765 = vmatpush.bf16.msrb.mxu3 %v1756_v34 }
 0x4fc   :  { %5608 = vmatmul.msk.bf16.vlgmr.msra.gmra.mxu0 %vm170_vm1, %v1376_v19 }
 0x4fd   :  { %1786 = vmatpush.bf16.msra.mxu0 %v1777_v30 }
 0x504   :  { %5613 = vmatmul.msk.bf16.vlgmr.msra.gmra.mxu1 %vm170_vm1, %v7266_v20 }
 0x50c   :  { %5612 = vmatmul.msk.bf16.vlgmr.msrb.gmra.mxu0 %vm170_vm1, %v1468_v59 }
 0x50f   :  { %v7286_v4 = vpop.f32.mrf.mxu1 }
 0x517   :  { %v7288_v50 = vpop.f32.mrf.mxu0  ;;  %v1243_v14 = vpop.f32.mrf.mxu1 }
 0x51e   :  { %v7290_v21 = vpop.f32.mrf.mxu2 }
 0x51f   :  { %v1222_v25 = vpop.f32.mrf.mxu0 }
 0x525   :  { %v7292_v11 = vpop.f32.mrf.mxu3 }
 0x526   :  { %v1264_v63 = vpop.f32.mrf.mxu2 }
 0x52d   :  { %v1201_v39 = vpop.f32.mrf.mxu3 }
 0x530   :  { %v1348_v48 = vpop.f32.mrf.mxu2 }
 0x531   :  { %v1513_v13 = vmul.f32 0.35355338, %v1348_v48 }
 0x533   :  { %v1521_v30 = vadd.f32 %v1513_v13, %v6914_v29 }
 0x535   :  { %v7294_v37 = vpop.f32.mrf.mxu3  ;;  %v1529_v39 = vsel %vm390_vm3, %v1521_v30, -inf }
 0x538   :  { %v1350_v43 = vpop.f32.mrf.mxu2 }
 0x53d   :  { %v1285_v58 = vpop.f32.mrf.mxu3 }
 0x540   :  { %v1440_v20 = vpop.f32.mrf.mxu2 }
 0x545   :  { %v1371_v62 = vpop.f32.mrf.mxu3 }
 0x548   :  { %v1442_v54 = vpop.f32.mrf.mxu2 }
 0x54d   :  { %v1373_v27 = vpop.f32.mrf.mxu3 }
 0x555   :  { %v1463_v33 = vpop.f32.mrf.mxu3 }
 0x556   :  { %v1518_v25 = vmul.f32 0.35355338, %v1463_v33 }
 0x558   :  { %v7307_v54 = vadd.f32 %v1518_v25, %v6954_v32 }
 0x55d   :  { %v1465_v19 = vpop.f32.mrf.mxu3 }
 0x55e   :  { %v1517_v19 = vmul.f32 0.35355338, %v1440_v20 }
 0x560   :  { %v1525_v13 = vadd.f32 %v1517_v19, %v6935_v56 }
 0x561   :  { %v7296_v28 = vpop.f32.mrf.mxu1 }
 0x569   :  { %v7298_v35 = vpop.f32.mrf.mxu0  ;;  %v1327_v61 = vpop.f32.mrf.mxu1 }
 0x56a   :  { %v1544_v61 = vsel %vm390_vm3, %v7307_v54, -inf }
 0x571   :  { %v1306_v22 = vpop.f32.mrf.mxu0  ;;  %v1417_v12 = vpop.f32.mrf.mxu1 }
 0x572   :  { %v1516_v59 = vmul.f32 0.35355338, %v1417_v12 }
 0x574   :  { %v1524_v40 = vadd.f32 %v1516_v59, %v6928_v45 }
 0x576   :  { %v1538_v53 = vsel %vm390_vm3, %v1524_v40, -inf }
 0x577   :  { %1539 = vmax.xlane.f32.xlu2 %v1538_v53 }
 0x579   :  { %v1394_v46 = vpop.f32.mrf.mxu0  ;;  %v1419_v34 = vpop.f32.mrf.mxu1 }
 0x57a   :  { %v1515_v15 = vmul.f32 0.35355338, %v1394_v46  ;;  %v1514_v46 = vmul.f32 0.35355338, %v1371_v62  ;;  %v1541_v34 = vsel %vm390_vm3, %v1525_v13, -inf }
 0x57c   :  { %v1523_v14 = vadd.f32 %v1515_v15, %v6937_v60  ;;  %v1522_v25 = vadd.f32 %v1514_v46, %v6921_v36 }
 0x57e   :  { %v1535_v63 = vsel %vm390_vm3, %v1523_v14, -inf }
 0x57f   :  { %1536 = vmax.xlane.f32.xlu1 %v1535_v63  ;;  %1530 = vmax.xlane.f32.xlu2 %v1529_v39  ;;  %v1532_v63 = vsel %vm390_vm3, %v1522_v25, -inf }
 0x581   :  { %v1396_v43 = vpop.f32.mrf.mxu0  ;;  %v1509_v58 = vpop.f32.mrf.mxu1 }
 0x582   :  { %v1520_v48 = vmul.f32 0.35355338, %v1509_v58 }
 0x584   :  { %v1528_v27 = vadd.f32 %v1520_v48, %v6949_v18 }
 0x586   :  { %v1550_v33 = vsel %vm390_vm3, %v1528_v27, -inf }
 0x587   :  { %1545 = vmax.xlane.f32.xlu1 %v1544_v61  ;;  %1551 = vmax.xlane.f32.xlu0 %v1550_v33 }
 0x589   :  { %v1486_v22 = vpop.f32.mrf.mxu0  ;;  %v1511_v12 = vpop.f32.mrf.mxu1 }
 0x58a   :  { %v1519_v59 = vmul.f32 0.35355338, %v1486_v22 }
 0x58c   :  { %v7315_v53 = vadd.f32 %v1519_v59, %v6940_v10 }
 0x58e   :  { %v1547_v20 = vsel %vm390_vm3, %v7315_v53, -inf }
 0x58f   :  { %1542 = vmax.xlane.f32.xlu0 %v1541_v34  ;;  %1548 = vmax.xlane.f32.xlu2 %v1547_v20 }
 0x591   :  { %v1488_v15 = vpop.f32.mrf.mxu0 }
 0x597   :  { %1533 = vmax.xlane.f32.xlu0 %v1532_v63 }
 0x5a0   :  { %1834 = vrot.lane.b32.xlu1 %v6851_v42, %s6681_s25 }
 0x5a7   :  { %1813 = vrot.lane.b32.xlu2 %v6848_v38, %s6681_s25 }
 0x5ea   :  { %v1540_v62 = vpop.xlane.xlu2 %1539 }
 0x5eb   :  { %v1556_v39 = vsub.f32 %v1524_v40, %v1540_v62 }
 0x5ed   :  { %v1567_v43 = vmul.f32 1.442695, %v1556_v39 }
 0x5ef   :  { %6575 = vpow2.f32 %v1567_v43 }
 0x5f2   :  { %v1537_v58 = vpop.xlane.xlu1 %1536  ;;  %v1531_v48 = vpop.xlane.xlu2 %1530 }
 0x5f3   :  { %v1555_v19 = vsub.f32 %v1523_v14, %v1537_v58  ;;  %v1553_v61 = vsub.f32 %v1521_v30, %v1531_v48 }
 0x5f5   :  { %v7326_v33 = vpop.eup %6575  ;;  %v1565_v22 = vmul.f32 1.442695, %v1555_v19  ;;  %v1561_v12 = vmul.f32 1.442695, %v1553_v61 }
 0x5f6   :  { %v1586_v59 = vsel %vm390_vm3, %v7326_v33, 0.0 }
 0x5f7   :  { %6577 = vpow2.f32 %v1565_v22  ;;  %1587 = vadd.xlane.f32.xlu1 %v1586_v59 }
 0x5f8   :  { %6579 = vpow2.f32 %v1561_v12 }
 0x5fa   :  { %v1552_v46 = vpop.xlane.xlu0 %1551  ;;  %v1546_v48 = vpop.xlane.xlu1 %1545 }
 0x5fb   :  { %v1560_v34 = vsub.f32 %v1528_v27, %v1552_v46 }
 0x5fd   :  { %v7330_v20 = vpop.eup %6577  ;;  %v1575_v40 = vmul.f32 1.442695, %v1560_v34 }
 0x5fe   :  { %v7332_v15 = vpop.eup %6579  ;;  %v1583_v30 = vsel %vm390_vm3, %v7330_v20, 0.0 }
 0x5ff   :  { %v1577_v14 = vsel %vm390_vm3, %v7332_v15, 0.0  ;;  %1584 = vadd.xlane.f32.xlu0 %v1583_v30  ;;  %6581 = vpow2.f32 %v1575_v40 }
 0x600   :  { %1578 = vadd.xlane.f32.xlu1 %v1577_v14 }
 0x602   :  { %v1549_v63 = vpop.xlane.xlu2 %1548  ;;  %v1543_v62 = vpop.xlane.xlu0 %1542 }
 0x603   :  { %v1557_v39 = vsub.f32 %v1525_v13, %v1543_v62 }
 0x605   :  { %v1569_v43 = vmul.f32 1.442695, %v1557_v39  ;;  %v7338_v58 = vpop.eup %6581  ;;  %v1558_v39 = vsub.f32 %v7307_v54, %v1546_v48 }
 0x606   :  { %v1598_v27 = vsel %vm390_vm3, %v7338_v58, 0.0 }
 0x607   :  { %6583 = vpow2.f32 %v1569_v43  ;;  %1599 = vadd.xlane.f32.xlu0 %v1598_v27  ;;  %v1571_v43 = vmul.f32 1.442695, %v1558_v39 }
 0x60a   :  { %v1814_v19 = vpop.permute.xlu2 %1813  ;;  %v1534_v61 = vpop.xlane.xlu0 %1533 }
 0x60b   :  { %v1819_v22 = vsel %vm597_vm2, %v1814_v19, 0  ;;  %v1554_v12 = vsub.f32 %v1522_v25, %v1534_v61  ;;  %v1559_v25 = vsub.f32 %v7315_v53, %v1549_v63 }
 0x60c   :  { %1828 = vmatpush.bf16.msra.mxu2 %v1819_v22 }
 0x60d   :  { %v1563_v59 = vmul.f32 1.442695, %v1554_v12  ;;  %v7343_v46 = vpop.eup %6583  ;;  %v1573_v62 = vmul.f32 1.442695, %v1559_v25 }
 0x60e   :  { %v1589_v13 = vsel %vm390_vm3, %v7343_v46, 0.0 }
 0x60f   :  { %6585 = vpow2.f32 %v1563_v59  ;;  %1590 = vadd.xlane.f32.xlu2 %v1589_v13 }
 0x610   :  { %6587 = vpow2.f32 %v1573_v62 }
 0x611   :  { %6589 = vpow2.f32 %v1571_v43 }
 0x612   :  { %v1835_v34 = vpop.permute.xlu1 %1834 }
 0x613   :  { %v1840_v40 = vsel %vm597_vm2, %v1835_v34, 0 }
 0x614   :  { %1849 = vmatpush.bf16.msra.mxu3 %v1840_v40 }
 0x615   :  { %v7348_v30 = vpop.eup %6585 }
 0x616   :  { %v1580_v14 = vsel %vm390_vm3, %v7348_v30, 0.0  ;;  %v7372_v27 = vpop.eup %6587 }
 0x617   :  { %1581 = vadd.xlane.f32.xlu2 %v1580_v14  ;;  %v1595_v19 = vsel %vm390_vm3, %v7372_v27, 0.0  ;;  %v7378_v53 = vpop.eup %6589 }
 0x618   :  { %v1592_v63 = vsel %vm390_vm3, %v7378_v53, 0.0 }
 0x619   :  { %1899 = vrot.lane.b32.xlu1 %v6830_v23, %s6682_s26 }
 0x61b   :  { %1876 = vrot.lane.b32.xlu0 %v6861_v52, %s6681_s25 }
 0x621   :  { %1920 = vrot.lane.b32.xlu1 %v6833_v26, %s6683_s27 }
 0x623   :  { %1897 = vrot.lane.b32.xlu0 %v6830_v23, %s6683_s27 }
 0x629   :  { %1991 = vrot.lane.b32.xlu1 %v6848_v38, %s6682_s26 }
 0x62f   :  { %1855 = vrot.lane.b32.xlu2 %v6857_v49, %s6681_s25 }
 0x631   :  { %1966 = vrot.lane.b32.xlu1 %v6859_v51, %s6683_s27 }
 0x637   :  { %1922 = vrot.lane.b32.xlu2 %v6833_v26, %s6682_s26 }
 0x639   :  { %2037 = vrot.lane.b32.xlu1 %v6857_v49, %s6682_s26 }
 0x63f   :  { %1945 = vrot.lane.b32.xlu2 %v6842_v31, %s6682_s26 }
 0x641   :  { %2058 = vrot.lane.b32.xlu1 %v6861_v52, %s6683_s27 }
 0x647   :  { %2014 = vrot.lane.b32.xlu2 %v6851_v42, %s6682_s26 }
 0x64d   :  { %1596 = vadd.xlane.f32.xlu0 %v1595_v19 }
 0x64f   :  { %1989 = vrot.lane.b32.xlu2 %v6848_v38, %s6683_s27 }
 0x655   :  { %1593 = vadd.xlane.f32.xlu0 %v1592_v63 }
 0x657   :  { %2060 = vrot.lane.b32.xlu2 %v6861_v52, %s6682_s26 }
 0x669   :  { %1968 = vrot.lane.b32.xlu0 %v6859_v51, %s6682_s26 }
 0x66a   :  { %v1588_v54 = vpop.xlane.xlu1 %1587 }
 0x66b   :  { %6591 = vrcp.f32 %v1588_v54  ;;  %v1657_v13 = vand.u32 2147483648, %v1588_v54  ;;  %v1655_v40 = vand.u32 2147483647, %v1588_v54  ;;  %vm1651_vm15 = vweird.f32 %v1588_v54 }
 0x66d   :  { %v1658_v62 = vor.u32 1.1754944e-38, %v1657_v13  ;;  %vm1656_vm5 = vcmp.eq.f32.partialorder %v1655_v40, 8.507059e+37 }
 0x671   :  { %v6592_v48 = vpop.eup %6591  ;;  %1943 = vrot.lane.b32.xlu0 %v6842_v31, %s6683_s27 }
 0x672   :  { %v1647_v61 = vmul.f32 %v6592_v48, %v1588_v54  ;;  %v1585_v22 = vpop.xlane.xlu0 %1584  ;;  %vm1652_vm14 = vweird.f32 %v6592_v48 }
 0x673   :  { %v1579_v12 = vpop.xlane.xlu1 %1578  ;;  %6593 = vrcp.f32 %v1585_v22  ;;  %vm1653_vm4 = vmor %vm1651_vm15, %vm1652_vm14  ;;  %v1642_v54 = vand.u32 2147483648, %v1585_v22  ;;  %vm1636_vm9 = vweird.f32 %v1585_v22 }
 0x674   :  { %v1648_v59 = vsub.f32 1.0, %v1647_v61  ;;  %6595 = vrcp.f32 %v1579_v12  ;;  %v1612_v6 = vand.u32 2147483648, %v1579_v12  ;;  %v1610_v40 = vand.u32 2147483647, %v1579_v12 }
 0x675   :  { %vm1606_vm10 = vweird.f32 %v1579_v12 }
 0x676   :  { %v1649_v34 = vmul.f32 %v6592_v48, %v1648_v59  ;;  %vm1611_vm14 = vcmp.eq.f32.partialorder %v1610_v40, 8.507059e+37 }
 0x678   :  { %v1650_v14 = vadd.f32 %v6592_v48, %v1649_v34  ;;  %v1640_v34 = vand.u32 2147483647, %v1585_v22 }
 0x679   :  { %v6594_v25 = vpop.eup %6593  ;;  %2012 = vrot.lane.b32.xlu0 %v6851_v42, %s6683_s27 }
 0x67a   :  { %v6596_v39 = vpop.eup %6595  ;;  %v1654_v43 = vsel %vm1653_vm4, %v6592_v48, %v1650_v14  ;;  %v1632_v19 = vmul.f32 %v6594_v25, %v1585_v22  ;;  %v1600_v61 = vpop.xlane.xlu0 %1599  ;;  %vm1637_vm6 = vweird.f32 %v6594_v25  ;;  %vm1641_vm13 = vcmp.eq.f32.partialorder %v1640_v34, 8.507059e+37 }
 0x67b   :  { %v1659_v63 = vsel %vm1656_vm5, %v1658_v62, %v1654_v43  ;;  %v1602_v9 = vmul.f32 %v6596_v39, %v1579_v12  ;;  %6597 = vrcp.f32 %v1600_v61  ;;  %vm1607_vm7 = vweird.f32 %v6596_v39  ;;  %vm1638_vm11 = vmor %vm1636_vm9, %vm1637_vm6 }
 0x67c   :  { %v1660_v8 = vmul.f32 %v7326_v33, %v1659_v63  ;;  %v1633_v59 = vsub.f32 1.0, %v1632_v19  ;;  %v1643_v33 = vor.u32 1.1754944e-38, %v1642_v54  ;;  %vm1608_vm12 = vmor %vm1606_vm10, %vm1607_vm7  ;;  %vm1711_vm4 = vweird.f32 %v1600_v61 }
 0x67d   :  { %v1603_v7 = vsub.f32 1.0, %v1602_v9  ;;  %v1613_v9 = vor.u32 1.1754944e-38, %v1612_v6 }
 0x67e   :  { %v1634_v5 = vmul.f32 %v6594_v25, %v1633_v59  ;;  %v1724_v13 = vpack.c.bf16 %v1660_v8, %v1660_v8 }
 0x67f   :  { %v1604_v48 = vmul.f32 %v6596_v39, %v1603_v7 }
 0x680   :  { %v1635_v14 = vadd.f32 %v6594_v25, %v1634_v5  ;;  %5617 = vmatmul.msk.bf16.vlgmr.msrb.gmra.mxu1 %vm593_vm8, %v1724_v13  ;;  %v1717_v13 = vand.u32 2147483648, %v1600_v61 }
 0x681   :  { %v1605_v62 = vadd.f32 %v6596_v39, %v1604_v48  ;;  %v6598_v43 = vpop.eup %6597  ;;  %2035 = vrot.lane.b32.xlu0 %v6857_v49, %s6683_s27 }
 0x682   :  { %v1639_v19 = vsel %vm1638_vm11, %v6594_v25, %v1635_v14  ;;  %v1707_v63 = vmul.f32 %v6598_v43, %v1600_v61  ;;  %v1591_v5 = vpop.xlane.xlu2 %1590  ;;  %vm1712_vm15 = vweird.f32 %v6598_v43  ;;  %v1715_v25 = vand.u32 2147483647, %v1600_v61 }
 0x683   :  { %v1609_v8 = vsel %vm1608_vm12, %v6596_v39, %v1605_v62  ;;  %v1644_v7 = vsel %vm1641_vm13, %v1643_v33, %v1639_v19  ;;  %6599 = vrcp.f32 %v1591_v5  ;;  %vm1713_vm5 = vmor %vm1711_vm4, %vm1712_vm15  ;;  %v1718_v14 = vor.u32 1.1754944e-38, %v1717_v13 }
 0x684   :  { %v1614_v22 = vsel %vm1611_vm14, %v1613_v9, %v1609_v8  ;;  %v1645_v59 = vmul.f32 %v7330_v20, %v1644_v7  ;;  %v1708_v54 = vsub.f32 1.0, %v1707_v63  ;;  %vm1716_vm6 = vcmp.eq.f32.partialorder %v1715_v25, 8.507059e+37 }
 0x685   :  { %v1615_v12 = vmul.f32 %v7332_v15, %v1614_v22  ;;  %v1672_v63 = vand.u32 2147483648, %v1591_v5  ;;  %vm1666_vm9 = vweird.f32 %v1591_v5 }
 0x686   :  { %v1723_v48 = vpack.c.bf16 %v1645_v59, %v1645_v59  ;;  %v1709_v6 = vmul.f32 %v6598_v43, %v1708_v54  ;;  %v1670_v59 = vand.u32 2147483647, %v1591_v5 }
 0x687   :  { %v1721_v34 = vpack.c.bf16 %v1615_v12, %v1615_v12 }
 0x688   :  { %5616 = vmatmul.msk.bf16.vlgmr.msra.gmra.mxu0 %vm593_vm8, %v1723_v48  ;;  %v1710_v39 = vadd.f32 %v6598_v43, %v1709_v6  ;;  %v1673_v48 = vor.u32 1.1754944e-38, %v1672_v63  ;;  %vm1671_vm11 = vcmp.eq.f32.partialorder %v1670_v59, 8.507059e+37 }
 0x689   :  { %5614 = vmatmul.msk.bf16.vlgmr.msrb.gmra.mxu2 %vm593_vm8, %v1721_v34  ;;  %v6600_v40 = vpop.eup %6599 }
 0x68a   :  { %v1714_v20 = vsel %vm1713_vm5, %v6598_v43, %v1710_v39  ;;  %v1662_v62 = vmul.f32 %v6600_v40, %v1591_v5  ;;  %v1582_v33 = vpop.xlane.xlu2 %1581  ;;  %vm1667_vm7 = vweird.f32 %v6600_v40 }
 0x68b   :  { %v1900_v15 = vpop.permute.xlu1 %1899  ;;  %v1719_v9 = vsel %vm1716_vm6, %v1718_v14, %v1714_v20  ;;  %6601 = vrcp.f32 %v1582_v33  ;;  %vm1668_vm10 = vmor %vm1666_vm9, %vm1667_vm7  ;;  %v1627_v5 = vand.u32 2147483648, %v1582_v33  ;;  %vm1621_vm13 = vweird.f32 %v1582_v33 }
 0x68c   :  { %v1905_v19 = vsel %vm170_vm1, %v1900_v15, 0  ;;  %v1663_v8 = vsub.f32 1.0, %v1662_v62  ;;  %v1720_v7 = vmul.f32 %v7338_v58, %v1719_v9  ;;  %v1625_v9 = vand.u32 2147483647, %v1582_v33 }
 0x68d   :  { %1914 = vmatpush.bf16.xpose.msrb.mxu2 %v1905_v19  ;;  %v1877_v61 = vpop.permute.xlu0 %1876 }
 0x68e   :  { %v1664_v22 = vmul.f32 %v6600_v40, %v1663_v8  ;;  %v1882_v12 = vsel %vm597_vm2, %v1877_v61, 0  ;;  %v1728_v13 = vpack.c.bf16 %v1720_v7, %v1720_v7  ;;  %v1628_v8 = vor.u32 1.1754944e-38, %v1627_v5 }
 0x68f   :  { %1891 = vmatpush.bf16.msra.mxu1 %v1882_v12  ;;  %vm1626_vm15 = vcmp.eq.f32.partialorder %v1625_v9, 8.507059e+37 }
 0x690   :  { %v1665_v43 = vadd.f32 %v6600_v40, %v1664_v22 }
 0x691   :  { %v6602_v54 = vpop.eup %6601 }
 0x692   :  { %v1669_v6 = vsel %vm1668_vm10, %v6600_v40, %v1665_v43  ;;  %v1617_v25 = vmul.f32 %v6602_v54, %v1582_v33  ;;  %v1856_v58 = vpop.permute.xlu2 %1855  ;;  %5621 = vmatmul.msk.bf16.vlgmr.msra.gmra.mxu1 %vm593_vm8, %v1728_v13  ;;  %vm1622_vm12 = vweird.f32 %v6602_v54 }
 0x693   :  { %v7399_v34 = vpop.permute.xlu1 %1920  ;;  %v1674_v39 = vsel %vm1671_vm11, %v1673_v48, %v1669_v6  ;;  %v1861_v14 = vsel %vm597_vm2, %v1856_v58, 0  ;;  %vm1623_vm14 = vmor %vm1621_vm13, %vm1622_vm12 }
 0x694   :  { %v1675_v20 = vmul.f32 %v7343_v46, %v1674_v39  ;;  %v1618_v62 = vsub.f32 1.0, %v1617_v25  ;;  %1870 = vmatpush.bf16.msrb.mxu0 %v1861_v14 }
 0x696   :  { %v1619_v15 = vmul.f32 %v6602_v54, %v1618_v62  ;;  %v1725_v19 = vpack.c.bf16 %v1675_v20, %v1675_v20 }
 0x698   :  { %v1620_v40 = vadd.f32 %v6602_v54, %v1619_v15 }
 0x699   :  { %5618 = vmatmul.msk.bf16.vlgmr.msra.gmra.mxu2 %vm593_vm8, %v1725_v19 }
 0x69a   :  { %v1624_v7 = vsel %vm1623_vm14, %v6602_v54, %v1620_v40  ;;  %v1923_v61 = vpop.permute.xlu2 %1922  ;;  %v1898_v54 = vpop.permute.xlu0 %1897 }
 0x69b   :  { %v1992_v63 = vpop.permute.xlu1 %1991  ;;  %v1629_v22 = vsel %vm1626_vm15, %v1628_v8, %v1624_v7  ;;  %v1928_v43 = vsel %vm170_vm1, %v1923_v61, 0 }
 0x69c   :  { %v1997_v46 = vsel %vm170_vm1, %v1992_v63, 0  ;;  %v1630_v59 = vmul.f32 %v7348_v30, %v1629_v22 }
 0x69d   :  { %2006 = vmatpush.bf16.xpose.msra.mxu2 %v1997_v46 }
 0x69e   :  { %v1722_v12 = vpack.c.bf16 %v1630_v59, %v1630_v59 }
 0x6a0   :  { %5615 = vmatmul.msk.bf16.vlgmr.msrb.gmra.mxu3 %vm593_vm8, %v1722_v12 }
 0x6a1   :  { %1937 = vmatpush.bf16.xpose.msrb.mxu3 %v1928_v43 }
 0x6a2   :  { %v1946_v33 = vpop.permute.xlu2 %1945 }
 0x6a3   :  { %v1951_v13 = vsel %vm170_vm1, %v1946_v33, 0  ;;  %v1967_v14 = vpop.permute.xlu1 %1966 }
 0x6a4   :  { %1960 = vmatpush.bf16.xpose.msra.mxu0 %v1951_v13 }
 0x6a9   :  { %5622 = vmatmul.msk.bf16.vlgmr.msrb.gmra.mxu2 %vm170_vm1, %v1898_v54 }
 0x6aa   :  { %v2015_v48 = vpop.permute.xlu2 %2014 }
 0x6ab   :  { %v2038_v46 = vpop.permute.xlu1 %2037 }
 0x6ac   :  { %v2043_v13 = vsel %vm170_vm1, %v2038_v46, 0 }
 0x6b2   :  { %v1990_v6 = vpop.permute.xlu2 %1989 }
 0x6b9   :  { %5626 = vmatmul.msk.bf16.vlgmr.msra.gmra.mxu2 %vm170_vm1, %v1990_v6 }
 0x6c0   :  { %v1597_v25 = vpop.xlane.xlu0 %1596 }
 0x6c1   :  { %6603 = vrcp.f32 %v1597_v25  ;;  %v1702_v62 = vand.u32 2147483648, %v1597_v25  ;;  %v1700_v15 = vand.u32 2147483647, %v1597_v25  ;;  %vm1696_vm5 = vweird.f32 %v1597_v25 }
 0x6c3   :  { %v1703_v40 = vor.u32 1.1754944e-38, %v1702_v62  ;;  %vm1701_vm7 = vcmp.eq.f32.partialorder %v1700_v15, 8.507059e+37 }
 0x6c7   :  { %v6604_v30 = vpop.eup %6603 }
 0x6c8   :  { %v1692_v58 = vmul.f32 %v6604_v30, %v1597_v25  ;;  %v1594_v39 = vpop.xlane.xlu0 %1593  ;;  %vm1697_vm4 = vweird.f32 %v6604_v30 }
 0x6c9   :  { %6605 = vrcp.f32 %v1594_v39  ;;  %vm1698_vm6 = vmor %vm1696_vm5, %vm1697_vm4  ;;  %v1687_v59 = vand.u32 2147483648, %v1594_v39  ;;  %v1685_v33 = vand.u32 2147483647, %v1594_v39  ;;  %vm1681_vm10 = vweird.f32 %v1594_v39 }
 0x6ca   :  { %v1693_v20 = vsub.f32 1.0, %v1692_v58 }
 0x6cb   :  { %v1688_v6 = vor.u32 1.1754944e-38, %v1687_v59  ;;  %vm1686_vm12 = vcmp.eq.f32.partialorder %v1685_v33, 8.507059e+37 }
 0x6cc   :  { %v1694_v5 = vmul.f32 %v6604_v30, %v1693_v20 }
 0x6ce   :  { %v1695_v9 = vadd.f32 %v6604_v30, %v1694_v5 }
 0x6cf   :  { %v6606_v19 = vpop.eup %6605 }
 0x6d0   :  { %v1699_v8 = vsel %vm1698_vm6, %v6604_v30, %v1695_v9  ;;  %v1677_v7 = vmul.f32 %v6606_v19, %v1594_v39  ;;  %vm1682_vm9 = vweird.f32 %v6606_v19  ;;  %v2020_v39 = vsel %vm170_vm1, %v2015_v48, 0 }
 0x6d1   :  { %v1704_v63 = vsel %vm1701_vm7, %v1703_v40, %v1699_v8  ;;  %vm1683_vm11 = vmor %vm1681_vm10, %vm1682_vm9 }
 0x6d2   :  { %v1705_v61 = vmul.f32 %v7372_v27, %v1704_v63  ;;  %v1678_v22 = vsub.f32 1.0, %v1677_v7  ;;  %v2061_v27 = vpop.permute.xlu2 %2060 }
 0x6d3   :  { %v2066_v15 = vsel %vm170_vm1, %v2061_v27, 0 }
 0x6d4   :  { %v1727_v12 = vpack.c.bf16 %v1705_v61, %v1705_v61  ;;  %v1679_v43 = vmul.f32 %v6606_v19, %v1678_v22 }
 0x6d6   :  { %v1680_v54 = vadd.f32 %v6606_v19, %v1679_v43  ;;  %5620 = vmatmul.msk.bf16.vlgmr.msrb.gmra.mxu0 %vm593_vm8, %v1727_v12 }
 0x6d7   :  { %2052 = vmatpush.bf16.xpose.msrb.mxu0 %v2043_v13 }
 0x6d8   :  { %v1684_v25 = vsel %vm1683_vm11, %v6606_v19, %v1680_v54 }
 0x6d9   :  { %v1689_v30 = vsel %vm1686_vm12, %v1688_v6, %v1684_v25 }
 0x6da   :  { %v1690_v58 = vmul.f32 %v7378_v53, %v1689_v30  ;;  %v2059_v53 = vpop.permute.xlu1 %2058 }
 0x6db   :  { %v1969_v20 = vpop.permute.xlu0 %1968 }
 0x6dc   :  { %v1726_v62 = vpack.c.bf16 %v1690_v58, %v1690_v58  ;;  %v1974_v5 = vsel %vm170_vm1, %v1969_v20, 0 }
 0x6dd   :  { %1983 = vmatpush.bf16.xpose.msrb.mxu1 %v1974_v5 }
 0x6de   :  { %5619 = vmatmul.msk.bf16.vlgmr.msra.gmra.mxu3 %vm593_vm8, %v1726_v62 }
 0x6df   :  { %2029 = vmatpush.bf16.xpose.msra.mxu3 %v2020_v39 }
 0x6e3   :  { %v1944_v9 = vpop.permute.xlu0 %1943 }
 0x6e4   :  { %5625 = vmatmul.msk.bf16.vlgmr.msrb.gmra.mxu1 %vm170_vm1, %v1967_v14 }
 0x6e5   :  { %2075 = vmatpush.bf16.xpose.msra.mxu1 %v2066_v15 }
 0x6e6   :  { %5624 = vmatmul.msk.bf16.vlgmr.msra.gmra.mxu0 %vm170_vm1, %v1944_v9 }
 0x6eb   :  { %v2013_v19 = vpop.permute.xlu0 %2012 }
 0x6ee   :  { %5623 = vmatmul.msk.bf16.vlgmr.msrb.gmra.mxu3 %vm170_vm1, %v7399_v34 }
 0x6f3   :  { %v2036_v40 = vpop.permute.xlu0 %2035 }
 0x6f4   :  { %5629 = vmatmul.msk.bf16.vlgmr.msra.gmra.mxu1 %vm170_vm1, %v2059_v53 }
 0x6f6   :  { %5628 = vmatmul.msk.bf16.vlgmr.msrb.gmra.mxu0 %vm170_vm1, %v2036_v40 }
 0x6fd   :  { %v7426_v48 = vpop.f32.mrf.mxu1 }
 0x6fe   :  { %5627 = vmatmul.msk.bf16.vlgmr.msra.gmra.mxu3 %vm170_vm1, %v2013_v19 }
 0x705   :  { %v7429_v8 = vpop.f32.mrf.mxu0  ;;  %v1811_v7 = vpop.f32.mrf.mxu1 }
 0x70c   :  { %v7431_v14 = vpop.f32.mrf.mxu2 }
 0x70d   :  { %v1790_v63 = vpop.f32.mrf.mxu0 }
 0x70f   :  { %v7433_v61 = vpop.f32.mrf.mxu1 }
 0x714   :  { %v1748_v22 = vpop.f32.mrf.mxu2 }
 0x717   :  { %v1895_v34 = vpop.f32.mrf.mxu1 }
 0x71c   :  { %v7435_v46 = vpop.f32.mrf.mxu2 }
 0x723   :  { %v7437_v59 = vpop.f32.mrf.mxu3 }
 0x724   :  { %v1832_v12 = vpop.f32.mrf.mxu2 }
 0x72b   :  { %v1769_v43 = vpop.f32.mrf.mxu3 }
 0x72c   :  { %v1916_v33 = vpop.f32.mrf.mxu2 }
 0x72d   :  { %v2081_v53 = vmul.f32 0.35355338, %v1916_v33 }
 0x72f   :  { %v2089_v34 = vadd.f32 %v2081_v53, %v6914_v29 }
 0x731   :  { %v2097_v43 = vsel %vm390_vm3, %v2089_v34, -inf }
 0x734   :  { %v1918_v13 = vpop.f32.mrf.mxu2 }
 0x73c   :  { %v2008_v54 = vpop.f32.mrf.mxu2 }
 0x73d   :  { %v2085_v6 = vmul.f32 0.35355338, %v2008_v54 }
 0x73f   :  { %v2093_v25 = vadd.f32 %v2085_v6, %v6935_v56 }
 0x741   :  { %v2109_v30 = vsel %vm390_vm3, %v2093_v25, -inf }
 0x742   :  { %2110 = vmax.xlane.f32.xlu0 %v2109_v30 }
 0x744   :  { %v2010_v27 = vpop.f32.mrf.mxu2 }
 0x753   :  { %v7441_v58 = vpop.f32.mrf.mxu0 }
 0x75b   :  { %v1874_v20 = vpop.f32.mrf.mxu0 }
 0x761   :  { %v7443_v62 = vpop.f32.mrf.mxu3  ;;  %v1985_v5 = vpop.f32.mrf.mxu1 }
 0x762   :  { %v2084_v15 = vmul.f32 0.35355338, %v1985_v5 }
 0x763   :  { %v1962_v39 = vpop.f32.mrf.mxu0 }
 0x764   :  { %v2083_v9 = vmul.f32 0.35355338, %v1962_v39  ;;  %v2092_v19 = vadd.f32 %v2084_v15, %v6928_v45 }
 0x766   :  { %v2106_v40 = vsel %vm390_vm3, %v2092_v19, -inf  ;;  %v2091_v56 = vadd.f32 %v2083_v9, %v6937_v60 }
 0x767   :  { %2107 = vmax.xlane.f32.xlu2 %v2106_v40 }
 0x768   :  { %v2103_v7 = vsel %vm390_vm3, %v2091_v56, -inf }
 0x769   :  { %v1853_v63 = vpop.f32.mrf.mxu3  ;;  %v1987_v22 = vpop.f32.mrf.mxu1  ;;  %2104 = vmax.xlane.f32.xlu1 %v2103_v7 }
 0x76b   :  { %v1964_v12 = vpop.f32.mrf.mxu0 }
 0x76f   :  { %2098 = vmax.xlane.f32.xlu2 %v2097_v43 }
 0x771   :  { %v1939_v13 = vpop.f32.mrf.mxu3  ;;  %v2077_v54 = vpop.f32.mrf.mxu1 }
 0x772   :  { %v2082_v45 = vmul.f32 0.35355338, %v1939_v13  ;;  %v2088_v60 = vmul.f32 0.35355338, %v2077_v54 }
 0x773   :  { %v2054_v33 = vpop.f32.mrf.mxu0 }
 0x774   :  { %v2090_v6 = vadd.f32 %v2082_v45, %v6921_v36  ;;  %v2087_v30 = vmul.f32 0.35355338, %v2054_v33  ;;  %v2096_v39 = vadd.f32 %v2088_v60, %v6949_v18 }
 0x776   :  { %v2100_v27 = vsel %vm390_vm3, %v2090_v6, -inf  ;;  %v2095_v20 = vadd.f32 %v2087_v30, %v6940_v10  ;;  %v2118_v53 = vsel %vm390_vm3, %v2096_v39, -inf }
 0x777   :  { %2101 = vmax.xlane.f32.xlu0 %v2100_v27 }
 0x778   :  { %v2115_v5 = vsel %vm390_vm3, %v2095_v20, -inf }
 0x779   :  { %v1941_v29 = vpop.f32.mrf.mxu3  ;;  %v2079_v15 = vpop.f32.mrf.mxu1  ;;  %2116 = vmax.xlane.f32.xlu1 %v2115_v5 }
 0x77b   :  { %v2056_v9 = vpop.f32.mrf.mxu0 }
 0x77f   :  { %2119 = vmax.xlane.f32.xlu0 %v2118_v53 }
 0x781   :  { %v2031_v40 = vpop.f32.mrf.mxu3 }
 0x782   :  { %v2086_v36 = vmul.f32 0.35355338, %v2031_v40 }
 0x784   :  { %v2094_v7 = vadd.f32 %v2086_v36, %v6954_v32 }
 0x786   :  { %v2112_v63 = vsel %vm390_vm3, %v2094_v7, -inf }
 0x787   :  { %2113 = vmax.xlane.f32.xlu2 %v2112_v63 }
 0x789   :  { %v2033_v10 = vpop.f32.mrf.mxu3 }
 0x792   :  { %2318 = vrot.lane.b32.xlu1 %v6833_v26, %s6684_s28 }
 0x79f   :  { %2297 = vrot.lane.b32.xlu2 %v6830_v23, %s6684_s28 }
 0x7b5   :  { %v2111_v18 = vpop.xlane.xlu0 %2110 }
 0x7b6   :  { %v2125_v22 = vsub.f32 %v2093_v25, %v2111_v18 }
 0x7b8   :  { %v2137_v12 = vmul.f32 1.442695, %v2125_v22 }
 0x7ba   :  { %6607 = vpow2.f32 %v2137_v12 }
 0x7c0   :  { %v7463_v43 = vpop.eup %6607 }
 0x7c1   :  { %v2157_v32 = vsel %vm390_vm3, %v7463_v43, 0.0 }
 0x7c2   :  { %2158 = vadd.xlane.f32.xlu1 %v2157_v32 }
 0x7da   :  { %v2108_v13 = vpop.xlane.xlu2 %2107 }
 0x7db   :  { %v2124_v54 = vsub.f32 %v2092_v19, %v2108_v13 }
 0x7dc   :  { %v2105_v45 = vpop.xlane.xlu1 %2104 }
 0x7dd   :  { %v2135_v33 = vmul.f32 1.442695, %v2124_v54  ;;  %v2123_v30 = vsub.f32 %v2091_v56, %v2105_v45 }
 0x7df   :  { %6609 = vpow2.f32 %v2135_v33  ;;  %v2133_v26 = vmul.f32 1.442695, %v2123_v30 }
 0x7e1   :  { %6611 = vpow2.f32 %v2133_v26 }
 0x7e2   :  { %v2099_v60 = vpop.xlane.xlu2 %2098 }
 0x7e3   :  { %v2121_v23 = vsub.f32 %v2089_v34, %v2099_v60 }
 0x7e5   :  { %v7467_v27 = vpop.eup %6609  ;;  %v2129_v25 = vmul.f32 1.442695, %v2121_v23 }
 0x7e6   :  { %v2154_v5 = vsel %vm390_vm3, %v7467_v27, 0.0 }
 0x7e7   :  { %v7471_v29 = vpop.eup %6611  ;;  %6613 = vpow2.f32 %v2129_v25  ;;  %2155 = vadd.xlane.f32.xlu2 %v2154_v5 }
 0x7e8   :  { %v2151_v19 = vsel %vm390_vm3, %v7471_v29, 0.0 }
 0x7e9   :  { %2152 = vadd.xlane.f32.xlu0 %v2151_v19 }
 0x7ea   :  { %v2102_v56 = vpop.xlane.xlu0 %2101 }
 0x7eb   :  { %v2122_v15 = vsub.f32 %v2090_v6, %v2102_v56 }
 0x7ec   :  { %v2117_v40 = vpop.xlane.xlu1 %2116 }
 0x7ed   :  { %v7475_v9 = vpop.eup %6613  ;;  %v2131_v53 = vmul.f32 1.442695, %v2122_v15  ;;  %v2127_v18 = vsub.f32 %v2095_v20, %v2117_v40 }
 0x7ee   :  { %v2145_v34 = vsel %vm390_vm3, %v7475_v9, 0.0 }
 0x7ef   :  { %6615 = vpow2.f32 %v2131_v53  ;;  %2146 = vadd.xlane.f32.xlu2 %v2145_v34  ;;  %v2141_v6 = vmul.f32 1.442695, %v2127_v18 }
 0x7f2   :  { %v2120_v36 = vpop.xlane.xlu0 %2119 }
 0x7f3   :  { %v2128_v63 = vsub.f32 %v2096_v39, %v2120_v36 }
 0x7f5   :  { %v7479_v10 = vpop.eup %6615  ;;  %v2143_v22 = vmul.f32 1.442695, %v2128_v63 }
 0x7f6   :  { %v2148_v12 = vsel %vm390_vm3, %v7479_v10, 0.0 }
 0x7f7   :  { %6617 = vpow2.f32 %v2143_v22  ;;  %2149 = vadd.xlane.f32.xlu1 %v2148_v12 }
 0x7f8   :  { %6619 = vpow2.f32 %v2141_v6 }
 0x7fa   :  { %v2114_v32 = vpop.xlane.xlu2 %2113 }
 0x7fb   :  { %v2126_v54 = vsub.f32 %v2094_v7, %v2114_v32 }
 0x7fd   :  { %v7483_v13 = vpop.eup %6617  ;;  %v2139_v39 = vmul.f32 1.442695, %v2126_v54 }
 0x7fe   :  { %v2166_v45 = vsel %vm390_vm3, %v7483_v13, 0.0  ;;  %v7487_v30 = vpop.eup %6619 }
 0x7ff   :  { %2167 = vadd.xlane.f32.xlu0 %v2166_v45  ;;  %6621 = vpow2.f32 %v2139_v39  ;;  %v2163_v23 = vsel %vm390_vm3, %v7487_v30, 0.0 }
 0x802   :  { %v2298_v33 = vpop.permute.xlu2 %2297 }
 0x803   :  { %v2303_v20 = vsel %vm597_vm2, %v2298_v33, 0 }
 0x804   :  { %2312 = vmatpush.bf16.msrb.mxu2 %v2303_v20  ;;  %v2319_v26 = vpop.permute.xlu1 %2318 }
 0x805   :  { %v2324_v60 = vsel %vm597_vm2, %v2319_v26, 0  ;;  %v7495_v7 = vpop.eup %6621 }
 0x806   :  { %2333 = vmatpush.bf16.msrb.mxu3 %v2324_v60  ;;  %v2160_v25 = vsel %vm390_vm3, %v7495_v7, 0.0 }
 0x807   :  { %2360 = vrot.lane.b32.xlu2 %v6859_v51, %s6684_s28  ;;  %2164 = vadd.xlane.f32.xlu0 %v2163_v23 }
 0x80f   :  { %2402 = vrot.lane.b32.xlu2 %v6851_v42, %s6684_s28  ;;  %2161 = vadd.xlane.f32.xlu0 %v2160_v25 }
 0x810   :  { %2381 = vrot.lane.b32.xlu1 %v6848_v38, %s6684_s28 }
 0x817   :  { %2444 = vrot.lane.b32.xlu2 %v6861_v52, %s6684_s28 }
 0x818   :  { %2423 = vrot.lane.b32.xlu1 %v6857_v49, %s6684_s28 }
 0x81f   :  { %2477 = vrot.lane.b32.xlu2 %v7288_v50, %s6685_s2 }
 0x820   :  { %2473 = vrot.lane.b32.xlu1 %v7268_v55, %s6685_s2 }
 0x823   :  { %2339 = vrot.lane.b32.xlu0 %v6842_v31, %s6684_s28 }
 0x827   :  { %2507 = vrot.lane.b32.xlu2 %v7437_v59, %s6686_s29 }
 0x828   :  { %2479 = vrot.lane.b32.xlu1 %v7286_v4, %s6685_s2 }
 0x82b   :  { %2475 = vrot.lane.b32.xlu0 %v7292_v11, %s6685_s2 }
 0x82f   :  { %2485 = vrot.lane.b32.xlu2 %v7298_v35, %s6685_s2 }
 0x830   :  { %2509 = vrot.lane.b32.xlu1 %v7429_v8, %s6686_s29 }
 0x833   :  { %2505 = vrot.lane.b32.xlu0 %v7431_v14, %s6686_s29 }
 0x835   :  { %v7529_v38 = vpop.xlane.xlu1 %2158 }
 0x837   :  { %2515 = vrot.lane.b32.xlu2 %v7443_v62, %s6686_s29 }
 0x838   :  { %2481 = vrot.lane.b32.xlu1 %v7290_v21, %s6685_s2 }
 0x83b   :  { %2511 = vrot.lane.b32.xlu0 %v7426_v48, %s6686_s29 }
 0x840   :  { %2487 = vrot.lane.b32.xlu1 %v7296_v28, %s6685_s2 }
 0x843   :  { %2483 = vrot.lane.b32.xlu0 %v7294_v37, %s6685_s2 }
 0x84b   :  { %2513 = vrot.lane.b32.xlu0 %v7435_v46, %s6686_s29 }
 0x85a   :  { %v2156_v31 = vpop.xlane.xlu2 %2155 }
 0x85b   :  { %6623 = vrcp.f32 %v2156_v31  ;;  %v2225_v55 = vand.u32 2147483648, %v2156_v31  ;;  %v2223_v50 = vand.u32 2147483647, %v2156_v31  ;;  %vm2219_vm13 = vweird.f32 %v2156_v31 }
 0x85c   :  { %6625 = vrcp.f32 %v7529_v38  ;;  %v7534_v35 = vpop.xlane.xlu0 %2152 }
 0x85d   :  { %v2226_v28 = vor.u32 1.1754944e-38, %v2225_v55  ;;  %vm2224_vm15 = vcmp.eq.f32.partialorder %v2223_v50, 8.507059e+37 }
 0x861   :  { %v6624_v42 = vpop.eup %6623 }
 0x862   :  { %v2215_v49 = vmul.f32 %v6624_v42, %v2156_v31  ;;  %v2147_v51 = vpop.xlane.xlu2 %2146  ;;  %vm2220_vm3 = vweird.f32 %v6624_v42  ;;  %v7532_v21 = vpop.eup %6625 }
 0x863   :  { %6627 = vrcp.f32 %v2147_v51  ;;  %vm2221_vm14 = vmor %vm2219_vm13, %vm2220_vm3  ;;  %v2230_v5 = vmul.f32 %v7532_v21, %v7529_v38  ;;  %v2180_v15 = vand.u32 2147483648, %v2147_v51  ;;  %v2178_v40 = vand.u32 2147483647, %v2147_v51 }
 0x864   :  { %v2216_v52 = vsub.f32 1.0, %v2215_v49  ;;  %vm2174_vm5 = vweird.f32 %v2147_v51  ;;  %vm2235_vm10 = vweird.f32 %v7532_v21  ;;  %vm2234_vm3 = vweird.f32 %v7529_v38 }
 0x865   :  { %v2231_v36 = vsub.f32 1.0, %v2230_v5  ;;  %v2181_v22 = vor.u32 1.1754944e-38, %v2180_v15  ;;  %vm2179_vm7 = vcmp.eq.f32.partialorder %v2178_v40, 8.507059e+37 }
 0x866   :  { %v2217_v4 = vmul.f32 %v6624_v42, %v2216_v52 }
 0x867   :  { %v2232_v39 = vmul.f32 %v7532_v21, %v2231_v36 }
 0x868   :  { %v2218_v11 = vadd.f32 %v6624_v42, %v2217_v4 }
 0x869   :  { %v6628_v37 = vpop.eup %6627  ;;  %v2233_v31 = vadd.f32 %v7532_v21, %v2232_v39 }
 0x86a   :  { %v2222_v48 = vsel %vm2221_vm14, %v6624_v42, %v2218_v11  ;;  %v2170_v8 = vmul.f32 %v6628_v37, %v2147_v51  ;;  %v2361_v14 = vpop.permute.xlu2 %2360  ;;  %v2150_v46 = vpop.xlane.xlu1 %2149  ;;  %vm2175_vm4 = vweird.f32 %v6628_v37  ;;  %v2238_v51 = vand.u32 2147483647, %v7529_v38  ;;  %vm7557_vm14 = vmor %vm2234_vm3, %vm2235_vm10 }
 0x86b   :  { %v2227_v59 = vsel %vm2224_vm15, %v2226_v28, %v2222_v48  ;;  %v2366_v62 = vsel %vm597_vm2, %v2361_v14, 0  ;;  %6629 = vrcp.f32 %v2150_v46  ;;  %vm2176_vm6 = vmor %vm2174_vm5, %vm2175_vm4  ;;  %v2195_v26 = vand.u32 2147483648, %v2150_v46 }
 0x86c   :  { %v2228_v19 = vmul.f32 %v7467_v27, %v2227_v59  ;;  %v2171_v56 = vsub.f32 1.0, %v2170_v8  ;;  %2375 = vmatpush.bf16.msrb.mxu1 %v2366_v62  ;;  %v2193_v25 = vand.u32 2147483647, %v2150_v46  ;;  %vm2189_vm11 = vweird.f32 %v2150_v46 }
 0x86d   :  { %v2196_v52 = vor.u32 1.1754944e-38, %v2195_v26  ;;  %v2237_v14 = vsel %vm7557_vm14, %v7532_v21, %v2233_v31  ;;  %vm2239_vm15 = vcmp.eq.f32.partialorder %v2238_v51, 8.507059e+37  ;;  %vm2204_vm10 = vweird.f32 %v7534_v35 }
 0x86e   :  { %v2292_v53 = vpack.c.bf16 %v2228_v19, %v2228_v19  ;;  %v2172_v34 = vmul.f32 %v6628_v37, %v2171_v56  ;;  %vm2194_vm13 = vcmp.eq.f32.partialorder %v2193_v25, 8.507059e+37 }
 0x870   :  { %v2173_v63 = vadd.f32 %v6628_v37, %v2172_v34  ;;  %5633 = vmatmul.msk.bf16.vlgmr.msrb.gmra.mxu1 %vm593_vm8, %v2292_v53 }
 0x871   :  { %v6630_v18 = vpop.eup %6629 }
 0x872   :  { %v2177_v12 = vsel %vm2176_vm6, %v6628_v37, %v2173_v63  ;;  %v2185_v6 = vmul.f32 %v6630_v18, %v2150_v46  ;;  %v2403_v32 = vpop.permute.xlu2 %2402  ;;  %v2168_v27 = vpop.xlane.xlu0 %2167  ;;  %vm2190_vm9 = vweird.f32 %v6630_v18 }
 0x873   :  { %v2182_v54 = vsel %vm2179_vm7, %v2181_v22, %v2177_v12  ;;  %v2408_v45 = vsel %vm597_vm2, %v2403_v32, 0  ;;  %6631 = vrcp.f32 %v2168_v27  ;;  %vm2191_vm12 = vmor %vm2189_vm11, %vm2190_vm9  ;;  %v2285_v5 = vand.u32 2147483648, %v2168_v27 }
 0x874   :  { %6633 = vrcp.f32 %v7534_v35  ;;  %v2183_v33 = vmul.f32 %v7475_v9, %v2182_v54  ;;  %v2186_v20 = vsub.f32 1.0, %v2185_v6  ;;  %2417 = vmatpush.bf16.msra.mxu3 %v2408_v45  ;;  %v2240_v9 = vand.u32 2147483648, %v7529_v38 }
 0x875   :  { %v2283_v15 = vand.u32 2147483647, %v2168_v27  ;;  %vm2279_vm5 = vweird.f32 %v2168_v27  ;;  %v2286_v21 = vor.u32 1.1754944e-38, %v2285_v5 }
 0x876   :  { %v2289_v60 = vpack.c.bf16 %v2183_v33, %v2183_v33  ;;  %v2187_v23 = vmul.f32 %v6630_v18, %v2186_v20  ;;  %v2241_v59 = vor.u32 1.1754944e-38, %v2240_v9  ;;  %v2208_v20 = vand.u32 2147483647, %v7534_v35 }
 0x877   :  { %vm2284_vm7 = vcmp.eq.f32.partialorder %v2283_v15, 8.507059e+37 }
 0x878   :  { %v2188_v42 = vadd.f32 %v6630_v18, %v2187_v23  ;;  %5630 = vmatmul.msk.bf16.vlgmr.msrb.gmra.mxu2 %vm593_vm8, %v2289_v60  ;;  %v2242_v53 = vsel %vm2239_vm15, %v2241_v59, %v2237_v14  ;;  %vm2209_vm3 = vcmp.eq.f32.partialorder %v2208_v20, 8.507059e+37 }
 0x879   :  { %v6632_v49 = vpop.eup %6631 }
 0x87a   :  { %v7550_v55 = vpop.eup %6633  ;;  %v2192_v4 = vsel %vm2191_vm12, %v6630_v18, %v2188_v42  ;;  %v2275_v50 = vmul.f32 %v6632_v49, %v2168_v27  ;;  %v2445_v11 = vpop.permute.xlu2 %2444  ;;  %vm2280_vm4 = vweird.f32 %v6632_v49 }
 0x87b   :  { %v7553_v37 = vpop.xlane.xlu0 %2164  ;;  %v2197_v48 = vsel %vm2194_vm13, %v2196_v52, %v2192_v4  ;;  %v2450_v8 = vsel %vm597_vm2, %v2445_v11, 0  ;;  %v2200_v62 = vmul.f32 %v7550_v55, %v7534_v35  ;;  %vm2281_vm6 = vmor %vm2279_vm5, %vm2280_vm4  ;;  %vm2205_vm9 = vweird.f32 %v7550_v55 }
 0x87c   :  { %v2198_v38 = vmul.f32 %v7479_v10, %v2197_v48  ;;  %v2276_v46 = vsub.f32 1.0, %v2275_v50  ;;  %2459 = vmatpush.bf16.msra.mxu1 %v2450_v8  ;;  %v2243_v10 = vmul.f32 %v7463_v43, %v2242_v53  ;;  %vm2206_vm11 = vmor %vm2204_vm10, %vm2205_vm9  ;;  %vm2264_vm5 = vweird.f32 %v7553_v37 }
 0x87d   :  { %v2201_v40 = vsub.f32 1.0, %v2200_v62  ;;  %vm2569_vm9 = vcmask 130048  }
 0x87e   :  { %v2290_v19 = vpack.c.bf16 %v2198_v38, %v2198_v38  ;;  %v2277_v56 = vmul.f32 %v6632_v49, %v2276_v46  ;;  %v2293_v32 = vpack.c.bf16 %v2243_v10, %v2243_v10 }
 0x87f   :  { %v2202_v27 = vmul.f32 %v7550_v55, %v2201_v40 }
 0x880   :  { %v2278_v34 = vadd.f32 %v6632_v49, %v2277_v56  ;;  %5631 = vmatmul.msk.bf16.vlgmr.msrb.gmra.mxu3 %vm593_vm8, %v2290_v19 }
 0x881   :  { %v2203_v45 = vadd.f32 %v7550_v55, %v2202_v27 }
 0x882   :  { %v2282_v36 = vsel %vm2281_vm6, %v6632_v49, %v2278_v34  ;;  %v2382_v63 = vpop.permute.xlu1 %2381  ;;  %v2478_v27 = vpop.permute.xlu2 %2477 }
 0x883   :  { %v2287_v18 = vsel %vm2284_vm7, %v2286_v21, %v2282_v36  ;;  %v2387_v22 = vsel %vm597_vm2, %v2382_v63, 0  ;;  %v2162_v12 = vpop.xlane.xlu0 %2161  ;;  %v2207_v60 = vsel %vm2206_vm11, %v7550_v55, %v2203_v45 }
 0x884   :  { %v2288_v6 = vmul.f32 %v7483_v13, %v2287_v18  ;;  %6635 = vrcp.f32 %v2162_v12  ;;  %2396 = vmatpush.bf16.msra.mxu2 %v2387_v22  ;;  %v2210_v13 = vand.u32 2147483648, %v7534_v35  ;;  %v2255_v25 = vand.u32 2147483648, %v2162_v12 }
 0x885   :  { %6637 = vrcp.f32 %v7553_v37  ;;  %v2253_v49 = vand.u32 2147483647, %v2162_v12  ;;  %vm2249_vm13 = vweird.f32 %v2162_v12 }
 0x886   :  { %v2296_v54 = vpack.c.bf16 %v2288_v6, %v2288_v6  ;;  %v2211_v31 = vor.u32 1.1754944e-38, %v2210_v13  ;;  %v2256_v4 = vor.u32 1.1754944e-38, %v2255_v25 }
 0x887   :  { %vm2254_vm15 = vcmp.eq.f32.partialorder %v2253_v49, 8.507059e+37 }
 0x888   :  { %5634 = vmatmul.msk.bf16.vlgmr.msra.gmra.mxu2 %vm593_vm8, %v2293_v32  ;;  %5637 = vmatmul.msk.bf16.vlgmr.msra.gmra.mxu1 %vm593_vm8, %v2296_v54  ;;  %v2212_v51 = vsel %vm2209_vm3, %v2211_v31, %v2207_v60 }
 0x889   :  { %v2213_v35 = vmul.f32 %v7471_v29, %v2212_v51  ;;  %v2270_v29 = vand.u32 2147483648, %v7553_v37 }
 0x88a   :  { %v6636_v43 = vpop.eup %6635  ;;  %v2424_v55 = vpop.permute.xlu1 %2423 }
 0x88b   :  { %v6638_v39 = vpop.eup %6637  ;;  %v2245_v33 = vmul.f32 %v6636_v43, %v2162_v12  ;;  %vm2250_vm12 = vweird.f32 %v6636_v43  ;;  %v2429_v46 = vsel %vm597_vm2, %v2424_v55, 0  ;;  %v2291_v59 = vpack.c.bf16 %v2213_v35, %v2213_v35  ;;  %v2508_v45 = vpop.permute.xlu2 %2507 }
 0x88c   :  { %v2260_v23 = vmul.f32 %v6638_v39, %v7553_v37  ;;  %vm2251_vm14 = vmor %vm2249_vm13, %vm2250_vm12  ;;  %vm2265_vm4 = vweird.f32 %v6638_v39  ;;  %v2271_v19 = vor.u32 1.1754944e-38, %v2270_v29  ;;  %v2563_v29 = vsel %vm170_vm1, %v7127_v41, %v2478_v27 }
 0x88d   :  { %v2246_v26 = vsub.f32 1.0, %v2245_v33  ;;  %vm2266_vm6 = vmor %vm2264_vm5, %vm2265_vm4 }
 0x88e   :  { %v2261_v52 = vsub.f32 1.0, %v2260_v23 }
 0x88f   :  { %v2247_v42 = vmul.f32 %v6636_v43, %v2246_v26 }
 0x890   :  { %v2262_v8 = vmul.f32 %v6638_v39, %v2261_v52 }
 0x891   :  { %v2248_v9 = vadd.f32 %v6636_v43, %v2247_v42 }
 0x892   :  { %v2263_v62 = vadd.f32 %v6638_v39, %v2262_v8  ;;  %v2474_v33 = vpop.permute.xlu1 %2473  ;;  %v6323_v8 = vld [vmem:[%s8962_s4 + $0x8] sm:$0xff] }
 0x893   :  { %v2252_v50 = vsel %vm2251_vm14, %v6636_v43, %v2248_v9  ;;  %v2561_v49 = vsel %vm170_vm1, %v7116_v47, %v2474_v33  ;;  %2652 = vmatpush.bf16.msrb.mxu2 %v6323_v8  ;;  %v6688_v8 = vmov 32.0  }
 0x894   :  { %v2257_v11 = vsel %vm2254_vm15, %v2256_v4, %v2252_v50  ;;  %v2267_v5 = vsel %vm2266_vm6, %v6638_v39, %v2263_v62  ;;  %6639 = vrcp.f32 %v6688_v8  ;;  %v5716_v8 = vld [vmem:[%s8965_s8 + $0xc0] sm:$0xf0] }
 0x895   :  { %v2258_v28 = vmul.f32 %v7495_v7, %v2257_v11  ;;  %v2340_v48 = vpop.permute.xlu0 %2339  ;;  %v2268_v7 = vand.u32 2147483647, %v7553_v37 }
 0x896   :  { %v2345_v14 = vsel %vm597_vm2, %v2340_v48, 0  ;;  %vm2578_vm2 = vcmask 195584  }
 0x897   :  { %v2294_v38 = vpack.c.bf16 %v2258_v28, %v2258_v28  ;;  %2354 = vmatpush.bf16.msra.mxu0 %v2345_v14  ;;  %vm2269_vm7 = vcmp.eq.f32.partialorder %v2268_v7, 8.507059e+37 }
 0x898   :  { %v2272_v56 = vsel %vm2269_vm7, %v2271_v19, %v2267_v5 }
 0x899   :  { %5635 = vmatmul.msk.bf16.vlgmr.msra.gmra.mxu3 %vm593_vm8, %v2294_v38  ;;  %v2273_v15 = vmul.f32 %v7487_v30, %v2272_v56  ;;  %v6322_v38 = vld [vmem:[%s8962_s4] sm:$0xff] }
 0x89a   :  { %5632 = vmatmul.msk.bf16.vlgmr.msra.gmra.mxu0 %vm593_vm8, %v2291_v59  ;;  %v2480_v60 = vpop.permute.xlu1 %2479  ;;  %2653 = vmatpush.bf16.msrb.mxu2 %v6322_v38 }
 0x89b   :  { %2438 = vmatpush.bf16.msrb.mxu0 %v2429_v46  ;;  %v2295_v53 = vpack.c.bf16 %v2273_v15, %v2273_v15  ;;  %v2564_v25 = vsel %vm170_vm1, %v7125_v0, %v2480_v60 }
 0x89d   :  { %v2476_v13 = vpop.permute.xlu0 %2475 }
 0x89e   :  { %v2562_v14 = vsel %vm170_vm1, %v7119_v24, %v2476_v13 }
 0x89f   :  { %v2571_v46 = vsel %vm2569_vm9, %v2562_v14, %v2508_v45  ;;  %v6640_v14 = vpop.eup %6639 }
 0x8a0   :  { %v2731_v38 = vmul.f32 32.0, %v6640_v14 }
 0x8a2   :  { %v2510_v4 = vpop.permute.xlu1 %2509 }
 0x8a3   :  { %v2572_v7 = vsel %vm2569_vm9, %v2563_v29, %v2510_v4 }
 0x8a5   :  { %v2506_v20 = vpop.permute.xlu0 %2505 }
 0x8a6   :  { %v2570_v51 = vsel %vm2569_vm9, %v2561_v49, %v2506_v20  ;;  %v8986_v20 = vld [vmem:[#allocation2_spill] sm:$0xff] }
 0x8aa   :  { %5636 = vmatmul.msk.bf16.vlgmr.msrb.gmra.mxu0 %vm593_vm8, %v2295_v53  ;;  %v2482_v35 = vpop.permute.xlu1 %2481 }
 0x8ab   :  { %v2565_v11 = vsel %vm170_vm1, %v7121_v57, %v2482_v35 }
 0x8ad   :  { %v2512_v23 = vpop.permute.xlu0 %2511 }
 0x8b2   :  { %v2488_v47 = vpop.permute.xlu1 %2487 }
 0x8b5   :  { %v2484_v50 = vpop.permute.xlu0 %2483 }
 0x8b6   :  { %v2566_v19 = vsel %vm170_vm1, %v7131_v44, %v2484_v50  ;;  %v8989_v50 = vld [vmem:[#allocation5_spill] sm:$0xff] }
 0x8bd   :  { %v2514_v0 = vpop.permute.xlu0 %2513 }
 0x8be   :  { %v2574_v55 = vsel %vm2569_vm9, %v2565_v11, %v2514_v0  ;;  %v8990_v0 = vld [vmem:[#allocation6_spill] sm:$0xff] }
 0x8ed   :  { %v2377_v34 = vpop.f32.mrf.mxu1 }
 0x8ee   :  { %2543 = vrot.lane.b32.xlu2 %v2377_v34, %s6687_s30  ;;  %v2568_v34 = vsel %vm170_vm1, %v7129_v17, %v2488_v47 }
 0x8f5   :  { %v2379_v21 = vpop.f32.mrf.mxu1 }
 0x8fb   :  { %v2314_v10 = vpop.f32.mrf.mxu2 }
 0x8fc   :  { %2537 = vrot.lane.b32.xlu2 %v2314_v10, %s6687_s30 }
 0x903   :  { %v2316_v40 = vpop.f32.mrf.mxu2  ;;  %v2335_v36 = vpop.f32.mrf.mxu3 }
 0x904   :  { %2539 = vrot.lane.b32.xlu1 %v2335_v36, %s6687_s30 }
 0x905   :  { %v2461_v37 = vpop.f32.mrf.mxu1 }
 0x90b   :  { %v2337_v63 = vpop.f32.mrf.mxu3  ;;  %v2398_v18 = vpop.f32.mrf.mxu2 }
 0x90c   :  { %2517 = vrot.lane.b32.xlu1 %v7441_v58, %s6686_s29  ;;  %2545 = vrot.lane.b32.xlu2 %v2398_v18, %s6687_s30  ;;  %v2486_v58 = vpop.permute.xlu2 %2485 }
 0x90d   :  { %v2463_v30 = vpop.f32.mrf.mxu1  ;;  %v2567_v44 = vsel %vm170_vm1, %v7133_v16, %v2486_v58  ;;  %vm2735_vm1 = vweird.f32 %v6640_v14 }
 0x913   :  { %v2400_v22 = vpop.f32.mrf.mxu2 }
 0x914   :  { %2551 = vrot.lane.b32.xlu2 %v2461_v37, %s6687_s30  ;;  %v2516_v26 = vpop.permute.xlu2 %2515 }
 0x915   :  { %v2575_v15 = vsel %vm2569_vm9, %v2566_v19, %v2516_v26 }
 0x917   :  { %v2356_v12 = vpop.f32.mrf.mxu0 }
 0x918   :  { %2541 = vrot.lane.b32.xlu0 %v2356_v12, %s6687_s30 }
 0x91c   :  { %v2419_v6 = vpop.f32.mrf.mxu3 }
 0x91d   :  { %2547 = vrot.lane.b32.xlu1 %v2419_v6, %s6687_s30 }
 0x91f   :  { %v2358_v32 = vpop.f32.mrf.mxu0 }
 0x920   :  { %2519 = vrot.lane.b32.xlu0 %v7433_v61, %s6686_s29  ;;  %v2573_v61 = vsel %vm2569_vm9, %v2564_v25, %v2512_v23  ;;  %v6505_v32 = vld [vmem:[%s8961_s5] ss:$0 sm:$0xff] }
 0x924   :  { %v2421_v54 = vpop.f32.mrf.mxu3 }
 0x927   :  { %v2440_v43 = vpop.f32.mrf.mxu0 }
 0x928   :  { %2549 = vrot.lane.b32.xlu0 %v2440_v43, %s6687_s30 }
 0x92f   :  { %v2442_v39 = vpop.f32.mrf.mxu0 }
 0x948   :  { %v2544_v31 = vpop.permute.xlu2 %2543 }
 0x949   :  { %v2582_v42 = vsel %vm2578_vm2, %v2573_v61, %v2544_v31  ;;  %v8987_v31 = vld [vmem:[#allocation3_spill] sm:$0xff] }
 0x94a   :  { %2601 = vst [vmem:[#allocation1 + $0x11] ss:$2 sm:$0xff] %v2582_v42  ;;  %v8988_v42 = vld [vmem:[#allocation4_spill] sm:$0xff] }
 0x956   :  { %v2538_v9 = vpop.permute.xlu2 %2537 }
 0x957   :  { %v2579_v52 = vsel %vm2578_vm2, %v2570_v51, %v2538_v9 }
 0x958   :  { %2595 = vst [vmem:[#allocation1] ss:$2 sm:$0xff] %v2579_v52 }
 0x966   :  { %v2546_v28 = vpop.permute.xlu2 %2545 }
 0x967   :  { %v2583_v48 = vsel %vm2578_vm2, %v2574_v55, %v2546_v28 }
 0x968   :  { %2603 = vst [vmem:[#allocation1 + $0x20] ss:$2 sm:$0xff] %v2583_v48 }
 0x96e   :  { %v2552_v41 = vpop.permute.xlu2 %2551 }
 0x976   :  { %v2540_v57 = vpop.permute.xlu1 %2539 }
 0x977   :  { %v2580_v59 = vsel %vm2578_vm2, %v2571_v46, %v2540_v57  ;;  %v2732_v57 = vsub.f32 1.0, %v2731_v38 }
 0x978   :  { %2597 = vst [vmem:[#allocation1 + $0x1] ss:$2 sm:$0xff] %v2580_v59 }
 0x979   :  { %v2733_v46 = vmul.f32 %v6640_v14, %v2732_v57  ;;  %v5722_v57 = vld [vmem:[%s8965_s8 + $0x88] sm:$0xf] }
 0x97b   :  { %v2734_v59 = vadd.f32 %v6640_v14, %v2733_v46  ;;  %v6349_v46 = vld [vmem:[%s8965_s8 + $0xc4] sm:$0xf0] }
 0x97e   :  { %v2518_v62 = vpop.permute.xlu1 %2517 }
 0x97f   :  { %v2610_v10 = vld.sshfl [vmem:[#allocation1] sm:$0xff pattern:$0x75316420]  ;;  %v2576_v18 = vsel %vm2569_vm9, %v2567_v44, %v2518_v62  ;;  %v6689_v62 = vmov 839922192  }
 0x980   :  { %v2746_v29 = vunpack.c.l.s4 %v6689_v62 }
 0x982   :  { %v7667_v19 = vunpack.c.0.s8 %v2746_v29  ;;  %v5723_v29 = vor.u32 %v6349_v46, %v5722_v57 }
 0x984   :  { %3281 = vmatpush.bf16.msrb.mxu1 %v5723_v29 }
 0x98a   :  { %v2542_v5 = vpop.permute.xlu0 %2541 }
 0x98b   :  { %v2581_v24 = vsel %vm2578_vm2, %v2572_v7, %v2542_v5  ;;  %v6690_v7 = vmov 1985246804  }
 0x98c   :  { %2599 = vst [vmem:[#allocation1 + $0x10] ss:$2 sm:$0xff] %v2581_v24  ;;  %v2750_v5 = vunpack.c.l.s4 %v6690_v7  ;;  %v7665_v24 = vsel %vm2735_vm1, %v6640_v14, %v2734_v59 }
 0x98f   :  { %v2548_v56 = vpop.permute.xlu1 %2547 }
 0x990   :  { %v2584_v53 = vsel %vm2578_vm2, %v2575_v15, %v2548_v56  ;;  %v7669_v56 = vunpack.c.0.s8 %v2750_v5  ;;  %v5650_v5 = vld [vmem:[%s8965_s8] sm:$0xf] }
 0x991   :  { %2605 = vst [vmem:[#allocation1 + $0x21] ss:$2 sm:$0xff] %v2584_v53 }
 0x992   :  { %v2520_v21 = vpop.permute.xlu0 %2519 }
 0x993   :  { %v2611_v40 = vld.sshfl [vmem:[#allocation1 + $0x10] sm:$0xff pattern:$0x75316420]  ;;  %v2577_v36 = vsel %vm2569_vm9, %v2568_v34, %v2520_v21 }
 0x994   :  { %v2586_v37 = vsel %vm2578_vm2, %v2577_v36, %v2552_v41  ;;  %v2618_v63 = vpack.c.bf16 %v2611_v40, %v2610_v10 }
 0x995   :  { %2609 = vst [vmem:[#allocation1 + $0x31] ss:$2 sm:$0xff] %v2586_v37 }
 0x996   :  { %5646 = vmatmul.msk.bf16.vlgmr.msrb.gmra.mxu2 %vm109_vm0, %v2618_v63 }
 0x998   :  { %v2612_v22 = vld.sshfl [vmem:[#allocation1 + $0x20] sm:$0xff pattern:$0x75316420] }
 0x99a   :  { %v2550_v30 = vpop.permute.xlu0 %2549 }
 0x99b   :  { %v2585_v17 = vsel %vm2578_vm2, %v2576_v18, %v2550_v30 }
 0x99c   :  { %2607 = vst [vmem:[#allocation1 + $0x30] ss:$2 sm:$0xff] %v2585_v17 }
 0x9a3   :  { %v2613_v12 = vld.sshfl [vmem:[#allocation1 + $0x30] sm:$0xff pattern:$0x75316420] }
 0x9a4   :  { %v2619_v6 = vpack.c.bf16 %v2613_v12, %v2612_v22 }
 0x9a6   :  { %5647 = vmatmul.msk.bf16.gmra.mxu2 %vm109_vm0, %v2619_v6 }
 0xa19   :  { %v2655_v27 = vpop.f32.mrf.mxu2 }
 0xa1a   :  { %v2656_v54 = vadd.f32 %v6505_v32, %v2655_v27 }
 0xa1c   :  { %v2669_v43 = vrot.slane %v2656_v54, 4  ;;  %v2677_v16 = vadd.f32 %v2656_v54, %v6772_v1 }
 0xa1e   :  { %v2678_v45 = vadd.f32 %v2669_v43, %v6777_v2  ;;  %2695 = vst [vmem:[#allocation1] ss:$2 sm:$0xff] %v2677_v16 }
 0xa20   :  { %2697 = vst [vmem:[#allocation1 + $0x1] ss:$2 sm:$0xff] %v2678_v45 }
 0xa21   :  { %v2657_v39 = vpop.f32.mrf.mxu2 }
 0xa22   :  { %v2658_v13 = vadd.f32 %v6505_v32, %v2657_v39 }
 0xa24   :  { %v2670_v58 = vrot.slane %v2658_v13, 4  ;;  %v2679_v33 = vadd.f32 %v2658_v13, %v6782_v3 }
 0xa26   :  { %v2680_v26 = vadd.f32 %v2670_v58, %v8986_v20  ;;  %2699 = vst [vmem:[#allocation1 + $0x10] ss:$2 sm:$0xff] %v2679_v33 }
 0xa27   :  { %v2710_v60 = vld.sshfl [vmem:[#allocation1] sm:$0xff pattern:$0x75316420] }
 0xa28   :  { %2701 = vst [vmem:[#allocation1 + $0x11] ss:$2 sm:$0xff] %v2680_v26  ;;  %v2718_v23 = vsel %vm109_vm0, %v2710_v60, 0.0 }
 0xa29   :  { %2719 = vadd.xlane.f32.xlu1 %v2718_v23  ;;  %v2660_v25 = vpop.f32.mrf.mxu2 }
 0xa2a   :  { %v2661_v61 = vadd.f32 %v6505_v32, %v2660_v25 }
 0xa2c   :  { %v2671_v1 = vrot.slane %v2661_v61, 4  ;;  %v7647_v2 = vadd.f32 %v2661_v61, %v8987_v31 }
 0xa2e   :  { %v7650_v49 = vadd.f32 %v2671_v1, %v8988_v42  ;;  %2703 = vst [vmem:[#allocation1 + $0x20] ss:$2 sm:$0xff] %v7647_v2 }
 0xa2f   :  { %v2711_v3 = vld.sshfl [vmem:[#allocation1 + $0x10] sm:$0xff pattern:$0x75316420] }
 0xa30   :  { %2705 = vst [vmem:[#allocation1 + $0x21] ss:$2 sm:$0xff] %v7650_v49  ;;  %v2721_v51 = vsel %vm109_vm0, %v2711_v3, 0.0 }
 0xa31   :  { %2722 = vadd.xlane.f32.xlu0 %v2721_v51  ;;  %v2662_v9 = vpop.f32.mrf.mxu2 }
 0xa32   :  { %v2663_v52 = vadd.f32 %v6505_v32, %v2662_v9 }
 0xa34   :  { %v2672_v4 = vrot.slane %v2663_v52, 4  ;;  %v7656_v35 = vadd.f32 %v2663_v52, %v8989_v50 }
 0xa36   :  { %v7659_v11 = vadd.f32 %v2672_v4, %v8990_v0  ;;  %2707 = vst [vmem:[#allocation1 + $0x30] ss:$2 sm:$0xff] %v7656_v35  ;;  %v5724_v0 = vld [vmem:[%s8965_s8 + $0xc8] sm:$0xf0] }
 0xa37   :  { %v2712_v55 = vld.sshfl [vmem:[#allocation1 + $0x20] sm:$0xff pattern:$0x75316420] }
 0xa38   :  { %2709 = vst [vmem:[#allocation1 + $0x31] ss:$2 sm:$0xff] %v7659_v11  ;;  %v2724_v28 = vsel %vm109_vm0, %v2712_v55, 0.0 }
 0xa39   :  { %2725 = vadd.xlane.f32.xlu2 %v2724_v28 }
 0xa3f   :  { %v2713_v48 = vld.sshfl [vmem:[#allocation1 + $0x30] sm:$0xff pattern:$0x75316420] }
 0xa40   :  { %v2727_v47 = vsel %vm109_vm0, %v2713_v48, 0.0  ;;  %v6348_v48 = vld [vmem:[%s8965_s8 + $0xbc] sm:$0xf0] }
 0xa41   :  { %2728 = vadd.xlane.f32.xlu1 %v2727_v47  ;;  %v6340_v47 = vld [vmem:[%s8965_s8 + $0x84] sm:$0xf] }
 0xa42   :  { %v5719_v38 = vor.u32 %v6340_v47, %v5716_v8 }
 0xa44   :  { %3262 = vmatpush.bf16.msra.mxu0 %v5719_v38  ;;  %v5730_v38 = vld [vmem:[%s8965_s8 + $0x90] sm:$0xf] }
 0xa9c   :  { %v2720_v15 = vpop.xlane.xlu1 %2719 }
 0xa9d   :  { %v2737_v53 = vmul.f32 %v7665_v24, %v2720_v15  ;;  %v6332_v15 = vld [vmem:[%s8965_s8 + $0x3c] sm:$0xf0] }
 0xa9f   :  { %v2748_v34 = vperm.slane %v2737_v53, %v7667_v19  ;;  %v2752_v21 = vperm.slane %v2737_v53, %v7669_v56  ;;  %v6324_v53 = vld [vmem:[%s8965_s8 + $0x4] sm:$0xf] }
 0xaa1   :  { %v7674_v41 = vsub.f32 %v2677_v16, %v2748_v34  ;;  %v7676_v10 = vsub.f32 %v2678_v45, %v2752_v21  ;;  %v5651_v34 = vor.u32 %v6332_v15, %v5650_v5  ;;  %v5652_v21 = vld [vmem:[%s8965_s8 + $0x40] sm:$0xf0] }
 0xaa3   :  { %v2793_v40 = vmul.f32 %v7674_v41, %v7674_v41  ;;  %v2794_v36 = vmul.f32 %v7676_v10, %v7676_v10 }
 0xaa4   :  { %v2723_v37 = vpop.xlane.xlu0 %2722 }
 0xaa5   :  { %2809 = vst [vmem:[#allocation1] ss:$2 sm:$0xff] %v2793_v40  ;;  %v2738_v63 = vmul.f32 %v7665_v24, %v2723_v37  ;;  %v5658_v40 = vld [vmem:[%s8965_s8 + $0x8] sm:$0xf]  ;;  %v5655_v37 = vor.u32 %v6324_v53, %v5652_v21  ;;  %v6343_v53 = vld [vmem:[%s8965_s8 + $0x9c] sm:$0xf] }
 0xaa6   :  { %2811 = vst [vmem:[#allocation1 + $0x1] ss:$2 sm:$0xff] %v2794_v36 }
 0xaa7   :  { %v2756_v44 = vperm.slane %v2738_v63, %v7667_v19  ;;  %v2760_v18 = vperm.slane %v2738_v63, %v7669_v56  ;;  %v6333_v63 = vld [vmem:[%s8965_s8 + $0x44] sm:$0xf0]  ;;  %3263 = vmatpush.bf16.msra.mxu0 %v5655_v37  ;;  %v5738_v37 = vld [vmem:[%s8965_s8 + $0x98] sm:$0xf] }
 0xaa9   :  { %v7685_v30 = vsub.f32 %v2679_v33, %v2756_v44  ;;  %v7687_v17 = vsub.f32 %v2680_v26, %v2760_v18  ;;  %v6325_v44 = vld [vmem:[%s8965_s8 + $0xc] sm:$0xf] }
 0xaaa   :  { %v5660_v18 = vld [vmem:[%s8965_s8 + $0x48] sm:$0xf0] }
 0xaab   :  { %v2795_v22 = vmul.f32 %v7685_v30, %v7685_v30  ;;  %v2796_v12 = vmul.f32 %v7687_v17, %v7687_v17 }
 0xaac   :  { %v2726_v6 = vpop.xlane.xlu2 %2725 }
 0xaad   :  { %2813 = vst [vmem:[#allocation1 + $0x10] ss:$2 sm:$0xff] %v2795_v22  ;;  %v2739_v32 = vmul.f32 %v7665_v24, %v2726_v6  ;;  %v2824_v27 = vld.sshfl [vmem:[#allocation1] sm:$0xff pattern:$0x75316420]  ;;  %v5659_v22 = vor.u32 %v6333_v63, %v5658_v40 }
 0xaae   :  { %2815 = vst [vmem:[#allocation1 + $0x11] ss:$2 sm:$0xff] %v2796_v12  ;;  %v2832_v54 = vsel %vm109_vm0, %v2824_v27, 0.0  ;;  %v5663_v12 = vor.u32 %v6325_v44, %v5660_v18  ;;  %v6351_v63 = vld [vmem:[%s8965_s8 + $0xd4] sm:$0xf0] }
 0xaaf   :  { %v2764_v43 = vperm.slane %v2739_v32, %v7667_v19  ;;  %v2768_v16 = vperm.slane %v2739_v32, %v7669_v56  ;;  %2833 = vadd.xlane.f32.xlu0 %v2832_v54  ;;  %3282 = vmatpush.bf16.msrb.mxu1 %v5659_v22 }
 0xab1   :  { %v7698_v45 = vsub.f32 %v7647_v2, %v2764_v43  ;;  %v7701_v39 = vsub.f32 %v7650_v49, %v2768_v16  ;;  %v7777_v16 = vld [vmem:[%s8963_s6] ss:$0 sm:$0xff] }
 0xab3   :  { %v2797_v13 = vmul.f32 %v7698_v45, %v7698_v45  ;;  %v2798_v58 = vmul.f32 %v7701_v39, %v7701_v39 }
 0xab4   :  { %v2729_v33 = vpop.xlane.xlu1 %2728 }
 0xab5   :  { %2817 = vst [vmem:[#allocation1 + $0x20] ss:$2 sm:$0xff] %v2797_v13  ;;  %v2740_v20 = vmul.f32 %v7665_v24, %v2729_v33  ;;  %v2825_v26 = vld.sshfl [vmem:[#allocation1 + $0x10] sm:$0xff pattern:$0x75316420] }
 0xab6   :  { %2819 = vst [vmem:[#allocation1 + $0x21] ss:$2 sm:$0xff] %v2798_v58  ;;  %v2835_v60 = vsel %vm109_vm0, %v2825_v26, 0.0 }
 0xab7   :  { %v2772_v23 = vperm.slane %v2740_v20, %v7667_v19  ;;  %v2776_v25 = vperm.slane %v2740_v20, %v7669_v56  ;;  %2836 = vadd.xlane.f32.xlu2 %v2835_v60  ;;  %v7782_v20 = vld [vmem:[%s8964_s7] ss:$0 sm:$0xff] }
 0xab9   :  { %v7712_v61 = vsub.f32 %v7656_v35, %v2772_v23  ;;  %v7715_v1 = vsub.f32 %v7659_v11, %v2776_v25  ;;  %v6341_v35 = vld [vmem:[%s8965_s8 + $0x8c] sm:$0xf]  ;;  %v5714_v11 = vld [vmem:[%s8965_s8 + $0x80] sm:$0xf]  ;;  %v7785_v23 = vrot.slane %v7777_v16, 4 }
 0xaba   :  { %v5727_v28 = vor.u32 %v6341_v35, %v5724_v0  ;;  %v5715_v14 = vor.u32 %v6348_v48, %v5714_v11 }
 0xabb   :  { %v2799_v31 = vmul.f32 %v7712_v61, %v7712_v61  ;;  %v2800_v2 = vmul.f32 %v7715_v1, %v7715_v1 }
 0xabc   :  { %3300 = vmatpush.bf16.msra.mxu2 %v5727_v28  ;;  %3243 = vmatpush.bf16.msrb.mxu3 %v5715_v14 }
 0xabd   :  { %2821 = vst [vmem:[#allocation1 + $0x30] ss:$2 sm:$0xff] %v2799_v31  ;;  %v2826_v42 = vld.sshfl [vmem:[#allocation1 + $0x20] sm:$0xff pattern:$0x75316420] }
 0xabe   :  { %2823 = vst [vmem:[#allocation1 + $0x31] ss:$2 sm:$0xff] %v2800_v2  ;;  %v2838_v49 = vsel %vm109_vm0, %v2826_v42, 0.0 }
 0xabf   :  { %2839 = vadd.xlane.f32.xlu1 %v2838_v49  ;;  %v7790_v49 = vrot.slane %v7782_v20, 4 }
 0xac0   :  { %3244 = vmatpush.bf16.msrb.mxu3 %v5651_v34  ;;  %3301 = vmatpush.bf16.msra.mxu2 %v5663_v12  ;;  %v5739_v12 = vor.u32 %v6351_v63, %v5738_v37  ;;  %v6336_v37 = vld [vmem:[%s8965_s8 + $0x5c] sm:$0xf0]  ;;  %v6328_v63 = vld [vmem:[%s8965_s8 + $0x24] sm:$0xf] }
 0xac2   :  { %3357 = vmatpush.bf16.msra.mxu1 %v5739_v12  ;;  %v5684_v12 = vld [vmem:[%s8965_s8 + $0x60] sm:$0xf0] }
 0xac5   :  { %v2827_v3 = vld.sshfl [vmem:[#allocation1 + $0x30] sm:$0xff pattern:$0x75316420] }
 0xac6   :  { %v2841_v51 = vsel %vm109_vm0, %v2827_v3, 0.0 }
 0xac7   :  { %2842 = vadd.xlane.f32.xlu0 %v2841_v51 }
 0xb22   :  { %v2834_v9 = vpop.xlane.xlu0 %2833 }
 0xb23   :  { %v2844_v52 = vmul.f32 %v2834_v9, %v7665_v24 }
 0xb25   :  { %v2848_v4 = vadd.f32 1e-05, %v2844_v52 }
 0xb27   :  { %6641 = vrsqrt.f32 %v2848_v4  ;;  %vm2858_vm11 = vweird.f32 %v2848_v4 }
 0xb2a   :  { %v2837_v50 = vpop.xlane.xlu2 %2836 }
 0xb2b   :  { %v2845_v55 = vmul.f32 %v2837_v50, %v7665_v24 }
 0xb2d   :  { %v6642_v59 = vpop.eup %6641  ;;  %v2849_v62 = vadd.f32 1e-05, %v2845_v55 }
 0xb2e   :  { %v2853_v7 = vmul.f32 %v6642_v59, %v2848_v4  ;;  %vm2859_vm10 = vweird.f32 %v6642_v59 }
 0xb2f   :  { %6643 = vrsqrt.f32 %v2849_v62  ;;  %vm2860_vm12 = vmor %vm2858_vm11, %vm2859_vm10  ;;  %vm2868_vm13 = vweird.f32 %v2849_v62 }
 0xb30   :  { %v2854_v36 = vmul.f32 %v6642_v59, %v2853_v7 }
 0xb32   :  { %v2855_v6 = vmul.f32 0.5, %v2854_v36  ;;  %v2840_v32 = vpop.xlane.xlu1 %2839  ;;  %v5732_v36 = vld [vmem:[%s8965_s8 + $0xd0] sm:$0xf0] }
 0xb33   :  { %v2846_v27 = vmul.f32 %v2840_v32, %v7665_v24  ;;  %v6334_v32 = vld [vmem:[%s8965_s8 + $0x4c] sm:$0xf0] }
 0xb34   :  { %v2856_v54 = vsub.f32 1.5, %v2855_v6  ;;  %v5666_v6 = vld [vmem:[%s8965_s8 + $0x10] sm:$0xf] }
 0xb35   :  { %v6644_v43 = vpop.eup %6643  ;;  %v2850_v13 = vadd.f32 1e-05, %v2846_v27 }
 0xb36   :  { %v2857_v58 = vmul.f32 %v6642_v59, %v2856_v54  ;;  %v2863_v33 = vmul.f32 %v6644_v43, %v2849_v62  ;;  %vm2869_vm3 = vweird.f32 %v6644_v43 }
 0xb37   :  { %6645 = vrsqrt.f32 %v2850_v13  ;;  %vm2870_vm14 = vmor %vm2868_vm13, %vm2869_vm3  ;;  %vm2878_vm4 = vweird.f32 %v2850_v13 }
 0xb38   :  { %v2861_v26 = vsel %vm2860_vm12, %v6642_v59, %v2857_v58  ;;  %v2864_v60 = vmul.f32 %v6644_v43, %v2863_v33  ;;  %v6350_v59 = vld [vmem:[%s8965_s8 + $0xcc] sm:$0xf0]  ;;  %v5668_v58 = vld [vmem:[%s8965_s8 + $0x50] sm:$0xf0]  ;;  %v5674_v33 = vld [vmem:[%s8965_s8 + $0x18] sm:$0xf] }
 0xb39   :  { %v2899_v25 = vperm.slane %v2861_v26, %v7667_v19  ;;  %v2903_v31 = vperm.slane %v2861_v26, %v7669_v56  ;;  %v5731_v29 = vor.u32 %v6350_v59, %v5730_v38 }
 0xb3a   :  { %v2865_v2 = vmul.f32 0.5, %v2864_v60  ;;  %v2843_v42 = vpop.xlane.xlu0 %2842 }
 0xb3b   :  { %v2936_v3 = vmul.f32 %v2899_v25, %v7674_v41  ;;  %v2937_v51 = vmul.f32 %v2903_v31, %v7676_v10  ;;  %v2847_v9 = vmul.f32 %v2843_v42, %v7665_v24  ;;  %3319 = vmatpush.bf16.msra.mxu3 %v5731_v29 }
 0xb3c   :  { %v2866_v52 = vsub.f32 1.5, %v2865_v2  ;;  %v6335_v2 = vld [vmem:[%s8965_s8 + $0x54] sm:$0xf0] }
 0xb3d   :  { %v6646_v4 = vpop.eup %6645  ;;  %v2949_v50 = vmul.f32 %v7777_v16, %v2936_v3  ;;  %v2950_v35 = vmul.f32 %v7785_v23, %v2937_v51  ;;  %v7797_v0 = vadd.f32 1e-05, %v2847_v9  ;;  %v5675_v51 = vor.u32 %v6335_v2, %v5674_v33  ;;  %v6327_v9 = vld [vmem:[%s8965_s8 + $0x1c] sm:$0xf]  ;;  %v5762_v33 = vld [vmem:[%s8965_s8 + $0xb0] sm:$0xf] }
 0xb3e   :  { %v2867_v11 = vmul.f32 %v6644_v43, %v2866_v52  ;;  %v2873_v55 = vmul.f32 %v6646_v4, %v2850_v13  ;;  %vm2879_vm15 = vweird.f32 %v6646_v4  ;;  %v6326_v13 = vld [vmem:[%s8965_s8 + $0x14] sm:$0xf]  ;;  %v5676_v52 = vld [vmem:[%s8965_s8 + $0x58] sm:$0xf0] }
 0xb3f   :  { %v7800_v28 = vadd.f32 %v7782_v20, %v2949_v50  ;;  %v7803_v41 = vadd.f32 %v7790_v49, %v2950_v35  ;;  %6647 = vrsqrt.f32 %v7797_v0  ;;  %vm2880_vm5 = vmor %vm2878_vm4, %vm2879_vm15  ;;  %v5671_v25 = vor.u32 %v6326_v13, %v5668_v58  ;;  %3358 = vmatpush.bf16.msra.mxu1 %v5675_v51  ;;  %v5692_v13 = vld [vmem:[%s8965_s8 + $0x68] sm:$0xf0]  ;;  %v6346_v2 = vld [vmem:[%s8965_s8 + $0xb4] sm:$0xf] }
 0xb40   :  { %v2871_v10 = vsel %vm2870_vm14, %v6644_v43, %v2867_v11  ;;  %v2874_v48 = vmul.f32 %v6646_v4, %v2873_v55  ;;  %v5667_v43 = vor.u32 %v6334_v32, %v5666_v6  ;;  %v5679_v50 = vor.u32 %v6327_v9, %v5676_v52  ;;  %v5690_v6 = vld [vmem:[%s8965_s8 + $0x28] sm:$0xf]  ;;  %v5770_v51 = vld [vmem:[%s8965_s8 + $0xb8] sm:$0xf] }
 0xb41   :  { %2978 = vst [vmem:[#allocation1] ss:$2 sm:$0xff] %v7800_v28  ;;  %v2907_v47 = vperm.slane %v2871_v10, %v7667_v19  ;;  %v2911_v8 = vperm.slane %v2871_v10, %v7669_v56  ;;  %vm2888_vm7 = vweird.f32 %v7797_v0  ;;  %v6337_v32 = vld [vmem:[%s8965_s8 + $0x64] sm:$0xf0]  ;;  %v6355_v9 = vld [vmem:[%s8965_s8 + $0xf4] sm:$0xf0] }
 0xb42   :  { %2980 = vst [vmem:[#allocation1 + $0x1] ss:$2 sm:$0xff] %v7803_v41  ;;  %v2875_v14 = vmul.f32 0.5, %v2874_v48  ;;  %3320 = vmatpush.bf16.msra.mxu3 %v5667_v43  ;;  %v6329_v43 = vld [vmem:[%s8965_s8 + $0x2c] sm:$0xf] }
 0xb43   :  { %v2938_v57 = vmul.f32 %v2907_v47, %v7685_v30  ;;  %v2939_v46 = vmul.f32 %v2911_v8, %v7687_v17  ;;  %v5740_v30 = vld [vmem:[%s8965_s8 + $0xd8] sm:$0xf0]  ;;  %v6342_v17 = vld [vmem:[%s8965_s8 + $0x94] sm:$0xf]  ;;  %v5695_v58 = vor.u32 %v6329_v43, %v5692_v13  ;;  %v6364_v13 = vld [vmem:[%s8966_s10 + $0x40] sm:$0xff] }
 0xb44   :  { %v2876_v62 = vsub.f32 1.5, %v2875_v14  ;;  %v5743_v40 = vor.u32 %v6343_v53, %v5740_v30  ;;  %v5735_v22 = vor.u32 %v6342_v17, %v5732_v36  ;;  %v5748_v30 = vld [vmem:[%s8965_s8 + $0xe0] sm:$0xf0]  ;;  %v5754_v17 = vld [vmem:[%s8965_s8 + $0xa8] sm:$0xf]  ;;  %v6382_v43 = vld [vmem:[%s8966_s10 + $0xd0] sm:$0xff] }
 0xb45   :  { %v6648_v7 = vpop.eup %6647  ;;  %v2951_v5 = vmul.f32 %v7777_v16, %v2938_v57  ;;  %v2952_v15 = vmul.f32 %v7785_v23, %v2939_v46  ;;  %v5682_v36 = vld [vmem:[%s8965_s8 + $0x20] sm:$0xf] }
 0xb46   :  { %v2877_v34 = vmul.f32 %v6646_v4, %v2876_v62  ;;  %v2883_v21 = vmul.f32 %v6648_v7, %v7797_v0  ;;  %3376 = vmatpush.bf16.msrb.mxu2 %v5743_v40  ;;  %3338 = vmatpush.bf16.msrb.mxu0 %v5735_v22  ;;  %vm2889_vm6 = vweird.f32 %v6648_v7  ;;  %v5683_v22 = vor.u32 %v6336_v37, %v5682_v36  ;;  %v6375_v36 = vld [vmem:[%s8966_s10 + $0x98] sm:$0xff]  ;;  %v6360_v37 = vld [vmem:[%s8966_s10 + $0x20] sm:$0xff] }
 0xb47   :  { %v7840_v44 = vadd.f32 %v7782_v20, %v2951_v5  ;;  %v7843_v18 = vadd.f32 %v7790_v49, %v2952_v15  ;;  %vm2890_vm2 = vmor %vm2888_vm7, %vm2889_vm6  ;;  %v6344_v15 = vld [vmem:[%s8965_s8 + $0xa4] sm:$0xf]  ;;  %vm5332_vm6 = vcmask 257024  }
 0xb48   :  { %v2881_v27 = vsel %vm2880_vm5, %v6646_v4, %v2877_v34  ;;  %v2884_v54 = vmul.f32 %v6648_v7, %v2883_v21  ;;  %v6353_v34 = vld [vmem:[%s8965_s8 + $0xe4] sm:$0xf0]  ;;  %v5751_v21 = vor.u32 %v6344_v15, %v5748_v30  ;;  %v6362_v15 = vld [vmem:[%s8966_s10 + $0x30] sm:$0xff]  ;;  %v6368_v30 = vld [vmem:[%s8966_s10 + $0x60] sm:$0xff] }
 0xb49   :  { %2982 = vst [vmem:[#allocation1 + $0x10] ss:$2 sm:$0xff] %v7840_v44  ;;  %v2915_v26 = vperm.slane %v2881_v27, %v7667_v19  ;;  %v2919_v60 = vperm.slane %v2881_v27, %v7669_v56  ;;  %v2993_v10 = vld.sshfl [vmem:[#allocation1] sm:$0xff pattern:$0x75316420]  ;;  %v5755_v40 = vor.u32 %v6353_v34, %v5754_v17  ;;  %v5687_v27 = vor.u32 %v6328_v63, %v5684_v12  ;;  %v6361_v34 = vld [vmem:[%s8966_s10 + $0x28] sm:$0xff] }
 0xb4a   :  { %2984 = vst [vmem:[#allocation1 + $0x11] ss:$2 sm:$0xff] %v7843_v18  ;;  %v2885_v31 = vmul.f32 0.5, %v2884_v54  ;;  %3339 = vmatpush.bf16.msrb.mxu0 %v5671_v25  ;;  %3377 = vmatpush.bf16.msrb.mxu2 %v5679_v50  ;;  %v5691_v54 = vor.u32 %v6337_v32, %v5690_v6  ;;  %v6347_v25 = vld [vmem:[%s8965_s8 + $0xbc] sm:$0xf]  ;;  %v6376_v17 = vld [vmem:[%s8966_s10 + $0xa0] sm:$0xff] }
 0xb4b   :  { %v2940_v42 = vmul.f32 %v2915_v26, %v7698_v45  ;;  %v2941_v3 = vmul.f32 %v2919_v60, %v7701_v39  ;;  %v6354_v26 = vld [vmem:[%s8965_s8 + $0xec] sm:$0xf0]  ;;  %v6384_v63 = vld [vmem:[%s8966_s10 + $0xe0] sm:$0xff]  ;;  %v6359_v6 = vld [vmem:[%s8966_s10 + $0x18] sm:$0xff] }
 0xb4c   :  { %v2886_v4 = vsub.f32 1.5, %v2885_v31  ;;  %v5763_v60 = vor.u32 %v6354_v26, %v5762_v33  ;;  %v5772_v31 = vld [vmem:[%s8965_s8 + $0xf8] sm:$0xf0]  ;;  %v5698_v50 = vld [vmem:[%s8965_s8 + $0x30] sm:$0xf]  ;;  %v6357_v33 = vld [vmem:[%s8966_s10 + $0x8] sm:$0xff] }
 0xb4d   :  { %v2953_v35 = vmul.f32 %v7777_v16, %v2940_v42  ;;  %v2954_v11 = vmul.f32 %v7785_v23, %v2941_v3  ;;  %v5775_v42 = vor.u32 %v6347_v25, %v5772_v31  ;;  %v5764_v3 = vld [vmem:[%s8965_s8 + $0xf0] sm:$0xf0]  ;;  %v6383_v32 = vld [vmem:[%s8966_s10 + $0xd8] sm:$0xff]  ;;  %v6381_v26 = vld [vmem:[%s8966_s10 + $0xc8] sm:$0xff] }
 0xb4e   :  { %v2887_v45 = vmul.f32 %v6648_v7, %v2886_v4  ;;  %v5767_v52 = vor.u32 %v6346_v2, %v5764_v3  ;;  %v5771_v4 = vor.u32 %v6355_v9, %v5770_v51  ;;  %v6374_v12 = vld [vmem:[%s8966_s10 + $0x90] sm:$0xff]  ;;  %v6411_v25 = vld [vmem:[%s8966_s10 + $0x1b8] sm:$0xff]  ;;  %v6356_v31 = vld [vmem:[%s8966_s10] sm:$0xff] }
 0xb4f   :  { %v7880_v39 = vadd.f32 %v7782_v20, %v2953_v35  ;;  %v7883_v55 = vadd.f32 %v7790_v49, %v2954_v11  ;;  %v6338_v35 = vld [vmem:[%s8965_s8 + $0x6c] sm:$0xf0]  ;;  %v6330_v11 = vld [vmem:[%s8965_s8 + $0x34] sm:$0xf]  ;;  %v6380_v2 = vld [vmem:[%s8966_s10 + $0xc0] sm:$0xff] }
 0xb50   :  { %v2891_v48 = vsel %vm2890_vm2, %v6648_v7, %v2887_v45  ;;  %v5699_v45 = vor.u32 %v6338_v35, %v5698_v50  ;;  %v6410_v3 = vld [vmem:[%s8966_s10 + $0x1b0] sm:$0xff]  ;;  %v6395_v51 = vld [vmem:[%s8966_s10 + $0x138] sm:$0xff]  ;;  %v6400_v35 = vld [vmem:[%s8966_s10 + $0x160] sm:$0xff] }
 0xb51   :  { %v2994_v47 = vld.sshfl [vmem:[#allocation1 + $0x10] sm:$0xff pattern:$0x75316420]  ;;  %2986 = vst [vmem:[#allocation1 + $0x20] ss:$2 sm:$0xff] %v7880_v39  ;;  %v2923_v8 = vperm.slane %v2891_v48, %v7667_v19  ;;  %v2927_v14 = vperm.slane %v2891_v48, %v7669_v56  ;;  %v6419_v9 = vld [vmem:[%s8966_s10 + $0x1f8] sm:$0xff] }
 0xb52   :  { %v7888_v38 = vpack.c.bf16 %v2994_v47, %v2993_v10  ;;  %2988 = vst [vmem:[#allocation1 + $0x21] ss:$2 sm:$0xff] %v7883_v55  ;;  %v5700_v10 = vld [vmem:[%s8965_s8 + $0x70] sm:$0xf0]  ;;  %v5706_v48 = vld [vmem:[%s8965_s8 + $0x38] sm:$0xf] }
 0xb53   :  { %v2942_v0 = vmul.f32 %v2923_v8, %v7712_v61  ;;  %v2943_v57 = vmul.f32 %v2927_v14, %v7715_v1  ;;  %v5746_v61 = vld [vmem:[%s8965_s8 + $0xa0] sm:$0xf]  ;;  %v6339_v47 = vld [vmem:[%s8965_s8 + $0x74] sm:$0xf0]  ;;  %v5703_v8 = vor.u32 %v6330_v11, %v5700_v10  ;;  %v6418_v50 = vld [vmem:[%s8966_s10 + $0x1f0] sm:$0xff] }
 0xb54   :  { %5776 = vmatmul.msk.bf16.vlgmr.msrb.gmra.mxu3 %vm109_vm0, %v7888_v38  ;;  %5778 = vmatmul.msk.bf16.vlgmr.msra.gmra.mxu0 %vm109_vm0, %v7888_v38  ;;  %v6352_v1 = vld [vmem:[%s8965_s8 + $0xdc] sm:$0xf0]  ;;  %v5707_v14 = vor.u32 %v6339_v47, %v5706_v48  ;;  %v6417_v10 = vld [vmem:[%s8966_s10 + $0x1e8] sm:$0xff]  ;;  %v6399_v48 = vld [vmem:[%s8966_s10 + $0x158] sm:$0xff] }
 0xb55   :  { %v2955_v46 = vmul.f32 %v7777_v16, %v2942_v0  ;;  %v2956_v59 = vmul.f32 %v7785_v23, %v2943_v57  ;;  %5780 = vmatmul.msk.bf16.vlgmr.msrb.gmra.mxu1 %vm109_vm0, %v7888_v38  ;;  %5782 = vmatmul.msk.bf16.vlgmr.msra.gmra.mxu2 %vm109_vm0, %v7888_v38  ;;  %v5747_v62 = vor.u32 %v6352_v1, %v5746_v61  ;;  %v6331_v0 = vld [vmem:[%s8965_s8 + $0x3c] sm:$0xf]  ;;  %v6370_v1 = vld [vmem:[%s8966_s10 + $0x70] sm:$0xff]  ;;  %v6408_v11 = vld [vmem:[%s8966_s10 + $0x1a0] sm:$0xff] }
 0xb56   :  { %3414 = vmatpush.bf16.msra.mxu0 %v5751_v21  ;;  %3433 = vmatpush.bf16.msrb.mxu1 %v5755_v40  ;;  %v5708_v57 = vld [vmem:[%s8965_s8 + $0x78] sm:$0xf0]  ;;  %v6385_v21 = vld [vmem:[%s8966_s10 + $0xe8] sm:$0xff] }
 0xb57   :  { %v7910_v29 = vadd.f32 %v7782_v20, %v2955_v46  ;;  %v7913_v16 = vadd.f32 %v7790_v49, %v2956_v59  ;;  %3395 = vmatpush.bf16.msrb.mxu3 %v5747_v62  ;;  %v6345_v20 = vld [vmem:[%s8965_s8 + $0xac] sm:$0xf]  ;;  %v5711_v46 = vor.u32 %v6331_v0, %v5708_v57  ;;  %v6371_v59 = vld [vmem:[%s8966_s10 + $0x78] sm:$0xff]  ;;  %v6378_v62 = vld [vmem:[%s8966_s10 + $0xb0] sm:$0xff] }
 0xb58   :  { %v5756_v49 = vld [vmem:[%s8965_s8 + $0xe8] sm:$0xf0]  ;;  %v6379_v61 = vld [vmem:[%s8966_s10 + $0xb8] sm:$0xff]  ;;  %v6392_v57 = vld [vmem:[%s8966_s10 + $0x120] sm:$0xff] }
 0xb59   :  { %2990 = vst [vmem:[#allocation1 + $0x30] ss:$2 sm:$0xff] %v7910_v29  ;;  %v2995_v23 = vld.sshfl [vmem:[#allocation1 + $0x20] sm:$0xff pattern:$0x75316420]  ;;  %v5759_v53 = vor.u32 %v6345_v20, %v5756_v49  ;;  %v6369_v20 = vld [vmem:[%s8966_s10 + $0x68] sm:$0xff] }
 0xb5a   :  { %2992 = vst [vmem:[#allocation1 + $0x31] ss:$2 sm:$0xff] %v7913_v16  ;;  %3415 = vmatpush.bf16.msra.mxu0 %v5687_v27  ;;  %3434 = vmatpush.bf16.msrb.mxu1 %v5691_v54  ;;  %v6377_v49 = vld [vmem:[%s8966_s10 + $0xa8] sm:$0xff]  ;;  %v6367_v40 = vld [vmem:[%s8966_s10 + $0x58] sm:$0xff]  ;;  %v6358_v54 = vld [vmem:[%s8966_s10 + $0x10] sm:$0xff] }
 0xb5b   :  { %3452 = vmatpush.bf16.msra.mxu2 %v5759_v53  ;;  %3396 = vmatpush.bf16.msrb.mxu3 %v5683_v22  ;;  %v6386_v53 = vld [vmem:[%s8966_s10 + $0xf0] sm:$0xff]  ;;  %v6365_v27 = vld [vmem:[%s8966_s10 + $0x48] sm:$0xff]  ;;  %v6407_v47 = vld [vmem:[%s8966_s10 + $0x198] sm:$0xff] }
 0xb5c   :  { %v6366_v22 = vld [vmem:[%s8966_s10 + $0x50] sm:$0xff] }
 0xb5f   :  { %3453 = vmatpush.bf16.msra.mxu2 %v5695_v58  ;;  %v6372_v58 = vld [vmem:[%s8966_s10 + $0x80] sm:$0xff] }
 0xb61   :  { %v2996_v7 = vld.sshfl [vmem:[#allocation1 + $0x30] sm:$0xff pattern:$0x75316420] }
 0xb62   :  { %v7917_v5 = vpack.c.bf16 %v2996_v7, %v2995_v23  ;;  %v6363_v23 = vld [vmem:[%s8966_s10 + $0x38] sm:$0xff] }
 0xb63   :  { %v6387_v7 = vld [vmem:[%s8966_s10 + $0xf8] sm:$0xff] }
 0xb64   :  { %5777 = vmatmul.msk.bf16.gmra.mxu3 %vm109_vm0, %v7917_v5  ;;  %5779 = vmatmul.msk.bf16.gmra.mxu0 %vm109_vm0, %v7917_v5 }
 0xb65   :  { %5781 = vmatmul.msk.bf16.gmra.mxu1 %vm109_vm0, %v7917_v5  ;;  %5783 = vmatmul.msk.bf16.gmra.mxu2 %vm109_vm0, %v7917_v5 }
 0xb74   :  { %5784 = vmatmul.msk.bf16.vlgmr.msra.gmra.mxu3 %vm109_vm0, %v7888_v38  ;;  %5786 = vmatmul.msk.bf16.vlgmr.msrb.gmra.mxu0 %vm109_vm0, %v7888_v38 }
 0xb75   :  { %5788 = vmatmul.msk.bf16.vlgmr.msra.gmra.mxu1 %vm109_vm0, %v7888_v38  ;;  %5790 = vmatmul.msk.bf16.vlgmr.msrb.gmra.mxu2 %vm109_vm0, %v7888_v38 }
 0xb76   :  { %3471 = vmatpush.bf16.msra.mxu3 %v5763_v60  ;;  %3528 = vmatpush.bf16.msrb.mxu2 %v5775_v42  ;;  %v6403_v60 = vld [vmem:[%s8966_s10 + $0x178] sm:$0xff]  ;;  %v6402_v42 = vld [vmem:[%s8966_s10 + $0x170] sm:$0xff] }
 0xb77   :  { %3490 = vmatpush.bf16.msrb.mxu0 %v5767_v52  ;;  %3509 = vmatpush.bf16.msra.mxu1 %v5771_v4  ;;  %v6401_v52 = vld [vmem:[%s8966_s10 + $0x168] sm:$0xff]  ;;  %v6394_v4 = vld [vmem:[%s8966_s10 + $0x130] sm:$0xff] }
 0xb7a   :  { %3472 = vmatpush.bf16.msra.mxu3 %v5699_v45  ;;  %3529 = vmatpush.bf16.msrb.mxu2 %v5711_v46  ;;  %v6393_v45 = vld [vmem:[%s8966_s10 + $0x128] sm:$0xff]  ;;  %v6416_v46 = vld [vmem:[%s8966_s10 + $0x1e0] sm:$0xff] }
 0xb7b   :  { %3491 = vmatpush.bf16.msrb.mxu0 %v5703_v8  ;;  %3510 = vmatpush.bf16.msra.mxu1 %v5707_v14  ;;  %v8212_v8 = vld [vmem:[%s8967_s9] sm:$0xff] }
 0xb84   :  { %5785 = vmatmul.msk.bf16.gmra.mxu3 %vm109_vm0, %v7917_v5  ;;  %5787 = vmatmul.msk.bf16.gmra.mxu0 %vm109_vm0, %v7917_v5 }
 0xb85   :  { %5789 = vmatmul.msk.bf16.gmra.mxu1 %vm109_vm0, %v7917_v5  ;;  %5791 = vmatmul.msk.bf16.gmra.mxu2 %vm109_vm0, %v7917_v5 }
 0xb94   :  { %5792 = vmatmul.msk.bf16.vlgmr.msrb.gmra.mxu3 %vm109_vm0, %v7888_v38  ;;  %5794 = vmatmul.msk.bf16.vlgmr.msra.gmra.mxu0 %vm109_vm0, %v7888_v38 }
 0xb95   :  { %5796 = vmatmul.msk.bf16.vlgmr.msrb.gmra.mxu1 %vm109_vm0, %v7888_v38  ;;  %5798 = vmatmul.msk.bf16.vlgmr.msra.gmra.mxu2 %vm109_vm0, %v7888_v38 }
 0xb96   :  { %4684 = vmatpush.bf16.msra.mxu0 %v6371_v59  ;;  %4703 = vmatpush.bf16.msrb.mxu1 %v6379_v61  ;;  %v8221_v59 = vperm.slane %v8212_v8, 1  ;;  %v6398_v61 = vld [vmem:[%s8966_s10 + $0x150] sm:$0xff] }
 0xb97   :  { %4665 = vmatpush.bf16.msrb.mxu3 %v6363_v23  ;;  %4722 = vmatpush.bf16.msra.mxu2 %v6387_v7  ;;  %v6391_v23 = vld [vmem:[%s8966_s10 + $0x118] sm:$0xff] }
 0xb98   :  { %v6415_v7 = vld [vmem:[%s8966_s10 + $0x1d8] sm:$0xff] }
 0xb9a   :  { %4685 = vmatpush.bf16.msra.mxu0 %v6370_v1  ;;  %4704 = vmatpush.bf16.msrb.mxu1 %v6378_v62  ;;  %v6406_v1 = vld [vmem:[%s8966_s10 + $0x190] sm:$0xff]  ;;  %v8230_v62 = vperm.slane %v8212_v8, 2 }
 0xb9b   :  { %4666 = vmatpush.bf16.msrb.mxu3 %v6362_v15  ;;  %4723 = vmatpush.bf16.msra.mxu2 %v6386_v53  ;;  %v6397_v53 = vld [vmem:[%s8966_s10 + $0x148] sm:$0xff] }
 0xb9e   :  { %4686 = vmatpush.bf16.msra.mxu0 %v6369_v20  ;;  %4705 = vmatpush.bf16.msrb.mxu1 %v6377_v49 }
 0xb9f   :  { %4667 = vmatpush.bf16.msrb.mxu3 %v6361_v34  ;;  %4724 = vmatpush.bf16.msra.mxu2 %v6385_v21  ;;  %v8247_v21 = vperm.slane %v8212_v8, 0 }
 0xba2   :  { %4687 = vmatpush.bf16.msra.mxu0 %v6368_v30  ;;  %4706 = vmatpush.bf16.msrb.mxu1 %v6376_v17  ;;  %v6405_v30 = vld [vmem:[%s8966_s10 + $0x188] sm:$0xff] }
 0xba3   :  { %4668 = vmatpush.bf16.msrb.mxu3 %v6360_v37  ;;  %4725 = vmatpush.bf16.msra.mxu2 %v6384_v63  ;;  %v6390_v37 = vld [vmem:[%s8966_s10 + $0x110] sm:$0xff] }
 0xba4   :  { %5793 = vmatmul.msk.bf16.gmra.mxu3 %vm109_vm0, %v7917_v5  ;;  %5795 = vmatmul.msk.bf16.gmra.mxu0 %vm109_vm0, %v7917_v5  ;;  %v6414_v63 = vld [vmem:[%s8966_s10 + $0x1d0] sm:$0xff] }
 0xba5   :  { %5797 = vmatmul.msk.bf16.gmra.mxu1 %vm109_vm0, %v7917_v5  ;;  %5799 = vmatmul.msk.bf16.gmra.mxu2 %vm109_vm0, %v7917_v5 }
 0xba6   :  { %4688 = vmatpush.bf16.msra.mxu0 %v6367_v40  ;;  %4707 = vmatpush.bf16.msrb.mxu1 %v6375_v36 }
 0xba7   :  { %4669 = vmatpush.bf16.msrb.mxu3 %v6359_v6  ;;  %4726 = vmatpush.bf16.msra.mxu2 %v6383_v32 }
 0xbaa   :  { %4689 = vmatpush.bf16.msra.mxu0 %v6366_v22  ;;  %4708 = vmatpush.bf16.msrb.mxu1 %v6374_v12  ;;  %v8257_v22 = vperm.slane %v8212_v8, 3 }
 0xbab   :  { %4670 = vmatpush.bf16.msrb.mxu3 %v6358_v54  ;;  %4727 = vmatpush.bf16.msra.mxu2 %v6382_v43 }
 0xbae   :  { %4690 = vmatpush.bf16.msra.mxu0 %v6365_v27  ;;  %v6396_v27 = vld [vmem:[%s8966_s10 + $0x140] sm:$0xff] }
 0xbaf   :  { %4671 = vmatpush.bf16.msrb.mxu3 %v6357_v33  ;;  %4728 = vmatpush.bf16.msra.mxu2 %v6381_v26  ;;  %v6389_v33 = vld [vmem:[%s8966_s10 + $0x108] sm:$0xff] }
 0xbb0   :  { %v6413_v26 = vld [vmem:[%s8966_s10 + $0x1c8] sm:$0xff] }
 0xbb2   :  { %4691 = vmatpush.bf16.msra.mxu0 %v6364_v13 }
 0xbb3   :  { %4672 = vmatpush.bf16.msrb.mxu3 %v6356_v31  ;;  %4729 = vmatpush.bf16.msra.mxu2 %v6380_v2 }
 0xbb4   :  { %5800 = vmatmul.msk.bf16.vlgmr.msra.gmra.mxu3 %vm109_vm0, %v7888_v38  ;;  %5802 = vmatmul.msk.bf16.vlgmr.msrb.gmra.mxu0 %vm109_vm0, %v7888_v38 }
 0xbb5   :  { %5804 = vmatmul.msk.bf16.vlgmr.msra.gmra.mxu1 %vm109_vm0, %v7888_v38  ;;  %5806 = vmatmul.msk.bf16.vlgmr.msrb.gmra.mxu2 %vm109_vm0, %v7888_v38  ;;  %v6373_v38 = vld [vmem:[%s8966_s10 + $0x88] sm:$0xff] }
 0xbb6   :  { %4709 = vmatpush.bf16.msrb.mxu1 %v6373_v38  ;;  %4760 = vmatpush.bf16.msrb.mxu0 %v6403_v60  ;;  %v6404_v38 = vld [vmem:[%s8966_s10 + $0x180] sm:$0xff] }
 0xbb7   :  { %4741 = vmatpush.bf16.msra.mxu3 %v6395_v51  ;;  %4798 = vmatpush.bf16.msrb.mxu2 %v6419_v9  ;;  %v6443_v51 = vld [vmem:[%s8966_s10 + $0x2b8] sm:$0xff] }
 0xbba   :  { %4710 = vmatpush.bf16.msrb.mxu1 %v6372_v58  ;;  %4761 = vmatpush.bf16.msrb.mxu0 %v6402_v42 }
 0xbbb   :  { %4742 = vmatpush.bf16.msra.mxu3 %v6394_v4  ;;  %4799 = vmatpush.bf16.msrb.mxu2 %v6418_v50 }
 0xbbe   :  { %4779 = vmatpush.bf16.msra.mxu1 %v6411_v25  ;;  %4762 = vmatpush.bf16.msrb.mxu0 %v6401_v52 }
 0xbbf   :  { %4743 = vmatpush.bf16.msra.mxu3 %v6393_v45  ;;  %4800 = vmatpush.bf16.msrb.mxu2 %v6417_v10 }
 0xbc2   :  { %4780 = vmatpush.bf16.msra.mxu1 %v6410_v3  ;;  %4763 = vmatpush.bf16.msrb.mxu0 %v6400_v35  ;;  %v6435_v3 = vld [vmem:[%s8966_s10 + $0x278] sm:$0xff]  ;;  %v6388_v35 = vld [vmem:[%s8966_s10 + $0x100] sm:$0xff] }
 0xbc3   :  { %4744 = vmatpush.bf16.msra.mxu3 %v6392_v57  ;;  %4801 = vmatpush.bf16.msrb.mxu2 %v6416_v46  ;;  %v6427_v57 = vld [vmem:[%s8966_s10 + $0x238] sm:$0xff] }
 0xbc4   :  { %5801 = vmatmul.msk.bf16.gmra.mxu3 %vm109_vm0, %v7917_v5  ;;  %5803 = vmatmul.msk.bf16.gmra.mxu0 %vm109_vm0, %v7917_v5  ;;  %v6451_v46 = vld [vmem:[%s8966_s10 + $0x2f8] sm:$0xff] }
 0xbc5   :  { %5805 = vmatmul.msk.bf16.gmra.mxu1 %vm109_vm0, %v7917_v5  ;;  %5807 = vmatmul.msk.bf16.gmra.mxu2 %vm109_vm0, %v7917_v5  ;;  %v6409_v5 = vld [vmem:[%s8966_s10 + $0x1a8] sm:$0xff] }
 0xbc6   :  { %4781 = vmatpush.bf16.msra.mxu1 %v6409_v5  ;;  %4764 = vmatpush.bf16.msrb.mxu0 %v6399_v48 }
 0xbc7   :  { %4745 = vmatpush.bf16.msra.mxu3 %v6391_v23  ;;  %4802 = vmatpush.bf16.msrb.mxu2 %v6415_v7  ;;  %v6433_v7 = vld [vmem:[%s8966_s10 + $0x268] sm:$0xff] }
 0xbca   :  { %4782 = vmatpush.bf16.msra.mxu1 %v6408_v11  ;;  %4765 = vmatpush.bf16.msrb.mxu0 %v6398_v61  ;;  %v6412_v11 = vld [vmem:[%s8966_s10 + $0x1c0] sm:$0xff] }
 0xbcb   :  { %4746 = vmatpush.bf16.msra.mxu3 %v6390_v37  ;;  %4803 = vmatpush.bf16.msrb.mxu2 %v6414_v63  ;;  %v6440_v63 = vld [vmem:[%s8966_s10 + $0x2a0] sm:$0xff] }
 0xbce   :  { %4783 = vmatpush.bf16.msra.mxu1 %v6407_v47  ;;  %4766 = vmatpush.bf16.msrb.mxu0 %v6397_v53  ;;  %v6434_v47 = vld [vmem:[%s8966_s10 + $0x270] sm:$0xff] }
 0xbcf   :  { %4747 = vmatpush.bf16.msra.mxu3 %v6389_v33  ;;  %4804 = vmatpush.bf16.msrb.mxu2 %v6413_v26  ;;  %v6431_v26 = vld [vmem:[%s8966_s10 + $0x258] sm:$0xff] }
 0xbd1   :  { %v3265_v14 = vpop.f32.mrf.mxu0 }
 0xbd2   :  { %v3284_v0 = vpop.f32.mrf.mxu1  ;;  %4784 = vmatpush.bf16.msra.mxu1 %v6406_v1  ;;  %v3266_v49 = vadd.f32 %v3265_v14, %v8221_v59  ;;  %4767 = vmatpush.bf16.msrb.mxu0 %v6396_v27  ;;  %v6442_v14 = vld [vmem:[%s8966_s10 + $0x2b0] sm:$0xff] }
 0xbd3   :  { %v3285_v17 = vadd.f32 %v3284_v0, %v8230_v62  ;;  %4748 = vmatpush.bf16.msra.mxu3 %v6388_v35  ;;  %4805 = vmatpush.bf16.msrb.mxu2 %v6412_v11  ;;  %v8354_v35 = vperm.slane %v8212_v8, 6 }
 0xbd4   :  { %v3542_v6 = vmax.f32 %v3266_v49, 0.0 }
 0xbd5   :  { %v3543_v54 = vmax.f32 %v3285_v17, 0.0  ;;  %v6426_v17 = vld [vmem:[%s8966_s10 + $0x230] sm:$0xff] }
 0xbd6   :  { %4785 = vmatpush.bf16.msra.mxu1 %v6405_v30 }
 0xbd7   :  { %v3246_v20 = vpop.f32.mrf.mxu3 }
 0xbd8   :  { %v3303_v15 = vpop.f32.mrf.mxu2  ;;  %v3247_v13 = vadd.f32 %v3246_v20, %v8247_v21  ;;  %v6441_v20 = vld [vmem:[%s8966_s10 + $0x2a8] sm:$0xff] }
 0xbd9   :  { %v3267_v34 = vpop.f32.mrf.mxu0  ;;  %v3304_v60 = vadd.f32 %v3303_v15, %v8257_v22 }
 0xbda   :  { %v3268_v40 = vadd.f32 %v3267_v34, %v8221_v59  ;;  %v3286_v36 = vpop.f32.mrf.mxu1  ;;  %4786 = vmatpush.bf16.msra.mxu1 %v6404_v38  ;;  %v3541_v5 = vmax.f32 %v3247_v13, 0.0  ;;  %v6450_v34 = vld [vmem:[%s8966_s10 + $0x2f0] sm:$0xff]  ;;  %v6449_v38 = vld [vmem:[%s8966_s10 + $0x2e8] sm:$0xff] }
 0xbdb   :  { %v3287_v12 = vadd.f32 %v3286_v36, %v8230_v62  ;;  %v3544_v45 = vmax.f32 %v3304_v60, 0.0  ;;  %v6439_v60 = vld [vmem:[%s8966_s10 + $0x298] sm:$0xff] }
 0xbdc   :  { %v3558_v32 = vmax.f32 %v3268_v40, 0.0 }
 0xbdd   :  { %v3559_v43 = vmax.f32 %v3287_v12, 0.0 }
 0xbde   :  { %v3606_v58 = vpack.c.bf16 %v3558_v32, %v3542_v6 }
 0xbdf   :  { %v3607_v25 = vpack.c.bf16 %v3559_v43, %v3543_v54  ;;  %v3248_v31 = vpop.f32.mrf.mxu3 }
 0xbe0   :  { %v3249_v2 = vadd.f32 %v3248_v31, %v8247_v21  ;;  %v3305_v42 = vpop.f32.mrf.mxu2  ;;  %4692 = vmatmul.bf16.vlgmr.msra.gmra.mxu0 %v3606_v58 }
 0xbe1   :  { %v3306_v9 = vadd.f32 %v3305_v42, %v8257_v22  ;;  %4711 = vmatmul.bf16.vlgmr.msrb.gmra.mxu1 %v3607_v25  ;;  %v3270_v52 = vpop.f32.mrf.mxu0  ;;  %4836 = vmatpush.bf16.msra.mxu0 %v6435_v3 }
 0xbe2   :  { %v3557_v4 = vmax.f32 %v3249_v2, 0.0  ;;  %v3289_v50 = vpop.f32.mrf.mxu1  ;;  %4855 = vmatpush.bf16.msrb.mxu1 %v6443_v51  ;;  %v3271_v1 = vadd.f32 %v3270_v52, %v8221_v59  ;;  %v6448_v51 = vld [vmem:[%s8966_s10 + $0x2e0] sm:$0xff] }
 0xbe3   :  { %v3560_v10 = vmax.f32 %v3306_v9, 0.0  ;;  %v3290_v49 = vadd.f32 %v3289_v50, %v8230_v62  ;;  %v6438_v50 = vld [vmem:[%s8966_s10 + $0x290] sm:$0xff] }
 0xbe4   :  { %v3605_v48 = vpack.c.bf16 %v3557_v4, %v3541_v5  ;;  %v3574_v36 = vmax.f32 %v3271_v1, 0.0  ;;  %v6430_v4 = vld [vmem:[%s8966_s10 + $0x250] sm:$0xff]  ;;  %v8371_v1 = vperm.slane %v8212_v8, 4 }
 0xbe5   :  { %v3608_v0 = vpack.c.bf16 %v3560_v10, %v3544_v45  ;;  %4837 = vmatpush.bf16.msra.mxu0 %v6434_v47  ;;  %v3575_v12 = vmax.f32 %v3290_v49, 0.0  ;;  %v6423_v45 = vld [vmem:[%s8966_s10 + $0x218] sm:$0xff]  ;;  %v6446_v49 = vld [vmem:[%s8966_s10 + $0x2d0] sm:$0xff] }
 0xbe6   :  { %4673 = vmatmul.bf16.vlgmr.msrb.gmra.mxu3 %v3605_v48  ;;  %4856 = vmatpush.bf16.msrb.mxu1 %v6442_v14  ;;  %v6447_v10 = vld [vmem:[%s8966_s10 + $0x2d8] sm:$0xff] }
 0xbe7   :  { %4730 = vmatmul.bf16.vlgmr.msra.gmra.mxu2 %v3608_v0  ;;  %v3251_v61 = vpop.f32.mrf.mxu3  ;;  %4817 = vmatpush.bf16.msrb.mxu3 %v6427_v57  ;;  %v6429_v0 = vld [vmem:[%s8966_s10 + $0x248] sm:$0xff] }
 0xbe8   :  { %v3308_v23 = vpop.f32.mrf.mxu2  ;;  %4874 = vmatpush.bf16.msra.mxu2 %v6451_v46  ;;  %v3252_v32 = vadd.f32 %v3251_v61, %v8247_v21  ;;  %v6437_v57 = vld [vmem:[%s8966_s10 + $0x288] sm:$0xff] }
 0xbe9   :  { %v3272_v15 = vpop.f32.mrf.mxu0  ;;  %4838 = vmatpush.bf16.msra.mxu0 %v6433_v7  ;;  %v3309_v54 = vadd.f32 %v3308_v23, %v8257_v22 }
 0xbea   :  { %v3273_v53 = vadd.f32 %v3272_v15, %v8221_v59  ;;  %v3291_v30 = vpop.f32.mrf.mxu1  ;;  %4857 = vmatpush.bf16.msrb.mxu1 %v6441_v20  ;;  %v6432_v59 = vld [vmem:[%s8966_s10 + $0x260] sm:$0xff]  ;;  %v3573_v2 = vmax.f32 %v3252_v32, 0.0  ;;  %v6422_v20 = vld [vmem:[%s8966_s10 + $0x210] sm:$0xff]  ;;  %v8381_v15 = vperm.slane %v8212_v8, 7 }
 0xbeb   :  { %v3292_v40 = vadd.f32 %v3291_v30, %v8230_v62  ;;  %4818 = vmatpush.bf16.msrb.mxu3 %v6426_v17  ;;  %v6425_v62 = vld [vmem:[%s8966_s10 + $0x228] sm:$0xff]  ;;  %v3576_v9 = vmax.f32 %v3309_v54, 0.0  ;;  %v6467_v54 = vld [vmem:[%s8966_s10 + $0x378] sm:$0xff] }
 0xbec   :  { %v3590_v37 = vmax.f32 %v3273_v53, 0.0  ;;  %4875 = vmatpush.bf16.msra.mxu2 %v6450_v34  ;;  %v6428_v34 = vld [vmem:[%s8966_s10 + $0x240] sm:$0xff] }
 0xbed   :  { %v3591_v6 = vmax.f32 %v3292_v40, 0.0  ;;  %4839 = vmatpush.bf16.msra.mxu0 %v6432_v59  ;;  %v6436_v40 = vld [vmem:[%s8966_s10 + $0x280] sm:$0xff] }
 0xbee   :  { %v3622_v27 = vpack.c.bf16 %v3590_v37, %v3574_v36  ;;  %4858 = vmatpush.bf16.msrb.mxu1 %v6440_v63  ;;  %v6421_v63 = vld [vmem:[%s8966_s10 + $0x208] sm:$0xff] }
 0xbef   :  { %v3253_v43 = vpop.f32.mrf.mxu3  ;;  %v3623_v13 = vpack.c.bf16 %v3591_v6, %v3575_v12  ;;  %4819 = vmatpush.bf16.msrb.mxu3 %v6425_v62  ;;  %v6445_v12 = vld [vmem:[%s8966_s10 + $0x2c8] sm:$0xff] }
 0xbf0   :  { %v3254_v58 = vadd.f32 %v3253_v43, %v8247_v21  ;;  %v3310_v33 = vpop.f32.mrf.mxu2  ;;  %4697 = vmatmul.bf16.gmra.mxu0 %v3622_v27  ;;  %4876 = vmatpush.bf16.msra.mxu2 %v6449_v38  ;;  %v6424_v21 = vld [vmem:[%s8966_s10 + $0x220] sm:$0xff]  ;;  %v6475_v43 = vld [vmem:[%s8966_s10 + $0x3b8] sm:$0xff] }
 0xbf1   :  { %v3311_v25 = vadd.f32 %v3310_v33, %v8257_v22  ;;  %4716 = vmatmul.bf16.gmra.mxu1 %v3623_v13  ;;  %v3341_v31 = vpop.f32.mrf.mxu0  ;;  %4840 = vmatpush.bf16.msra.mxu0 %v6431_v26  ;;  %v8345_v22 = vperm.slane %v8212_v8, 5 }
 0xbf2   :  { %v3589_v42 = vmax.f32 %v3254_v58, 0.0  ;;  %v3360_v3 = vpop.f32.mrf.mxu1  ;;  %4859 = vmatpush.bf16.msrb.mxu1 %v6439_v60 }
 0xbf3   :  { %v3592_v52 = vmax.f32 %v3311_v25, 0.0  ;;  %4820 = vmatpush.bf16.msrb.mxu3 %v6424_v21  ;;  %v3342_v47 = vadd.f32 %v3341_v31, %v8345_v22  ;;  %v3361_v46 = vadd.f32 %v3360_v3, %v8354_v35  ;;  %v6420_v25 = vld [vmem:[%s8966_s10 + $0x200] sm:$0xff]  ;;  %v6466_v21 = vld [vmem:[%s8966_s10 + $0x370] sm:$0xff] }
 0xbf4   :  { %v3621_v5 = vpack.c.bf16 %v3589_v42, %v3573_v2  ;;  %4877 = vmatpush.bf16.msra.mxu2 %v6448_v51  ;;  %v6444_v31 = vld [vmem:[%s8966_s10 + $0x2c0] sm:$0xff]  ;;  %v6474_v51 = vld [vmem:[%s8966_s10 + $0x3b0] sm:$0xff] }
 0xbf5   :  { %v3624_v11 = vpack.c.bf16 %v3592_v52, %v3576_v9  ;;  %4841 = vmatpush.bf16.msra.mxu0 %v6430_v4  ;;  %v3546_v30 = vmax.f32 %v3342_v47, 0.0  ;;  %v3547_v36 = vmax.f32 %v3361_v46, 0.0  ;;  %v6459_v52 = vld [vmem:[%s8966_s10 + $0x338] sm:$0xff]  ;;  %v6482_v46 = vld [vmem:[%s8966_s10 + $0x3f0] sm:$0xff] }
 0xbf6   :  { %4678 = vmatmul.bf16.gmra.mxu3 %v3621_v5  ;;  %4860 = vmatpush.bf16.msrb.mxu1 %v6438_v50  ;;  %v6483_v5 = vld [vmem:[%s8966_s10 + $0x3f8] sm:$0xff] }
 0xbf7   :  { %4735 = vmatmul.bf16.gmra.mxu2 %v3624_v11  ;;  %v3322_v48 = vpop.f32.mrf.mxu3  ;;  %4821 = vmatpush.bf16.msrb.mxu3 %v6423_v45  ;;  %v6465_v45 = vld [vmem:[%s8966_s10 + $0x368] sm:$0xff] }
 0xbf8   :  { %v3379_v14 = vpop.f32.mrf.mxu2  ;;  %4878 = vmatpush.bf16.msra.mxu2 %v6447_v10  ;;  %v3323_v8 = vadd.f32 %v3322_v48, %v8371_v1  ;;  %v6473_v10 = vld [vmem:[%s8966_s10 + $0x3a8] sm:$0xff] }
 0xbf9   :  { %v3343_v61 = vpop.f32.mrf.mxu0  ;;  %4842 = vmatpush.bf16.msra.mxu0 %v6429_v0  ;;  %v3380_v6 = vadd.f32 %v3379_v14, %v8381_v15 }
 0xbfa   :  { %v3344_v23 = vadd.f32 %v3343_v61, %v8345_v22  ;;  %v3362_v7 = vpop.f32.mrf.mxu1  ;;  %4861 = vmatpush.bf16.msrb.mxu1 %v6437_v57  ;;  %v3545_v33 = vmax.f32 %v3323_v8, 0.0  ;;  %v6458_v57 = vld [vmem:[%s8966_s10 + $0x330] sm:$0xff] }
 0xbfb   :  { %v3363_v53 = vadd.f32 %v3362_v7, %v8354_v35  ;;  %4822 = vmatpush.bf16.msrb.mxu3 %v6422_v20  ;;  %v3548_v2 = vmax.f32 %v3380_v6, 0.0  ;;  %v6472_v20 = vld [vmem:[%s8966_s10 + $0x3a0] sm:$0xff] }
 0xbfc   :  { %v3562_v17 = vmax.f32 %v3344_v23, 0.0  ;;  %4879 = vmatpush.bf16.msra.mxu2 %v6446_v49 }
 0xbfd   :  { %v3563_v37 = vmax.f32 %v3363_v53, 0.0  ;;  %4843 = vmatpush.bf16.msra.mxu0 %v6428_v34  ;;  %v6481_v34 = vld [vmem:[%s8966_s10 + $0x3e8] sm:$0xff] }
 0xbfe   :  { %v3610_v59 = vpack.c.bf16 %v3562_v17, %v3546_v30  ;;  %4862 = vmatpush.bf16.msrb.mxu1 %v6436_v40 }
 0xbff   :  { %v3611_v32 = vpack.c.bf16 %v3563_v37, %v3547_v36  ;;  %v3324_v27 = vpop.f32.mrf.mxu3  ;;  %4823 = vmatpush.bf16.msrb.mxu3 %v6421_v63  ;;  %v6463_v63 = vld [vmem:[%s8966_s10 + $0x358] sm:$0xff] }
 0xc00   :  { %v3325_v62 = vadd.f32 %v3324_v27, %v8371_v1  ;;  %v3381_v38 = vpop.f32.mrf.mxu2  ;;  %4768 = vmatmul.bf16.vlgmr.msrb.gmra.mxu0 %v3610_v59  ;;  %4880 = vmatpush.bf16.msra.mxu2 %v6445_v12  ;;  %v6471_v12 = vld [vmem:[%s8966_s10 + $0x398] sm:$0xff] }
 0xc01   :  { %v3382_v13 = vadd.f32 %v3381_v38, %v8381_v15  ;;  %4787 = vmatmul.bf16.vlgmr.msra.gmra.mxu1 %v3611_v32  ;;  %v3346_v58 = vpop.f32.mrf.mxu0  ;;  %4912 = vmatpush.bf16.msrb.mxu0 %v6467_v54  ;;  %v8465_v32 = vld [vmem:[%s8967_s9 + $0x8] sm:$0xff]  ;;  %v6456_v54 = vld [vmem:[%s8966_s10 + $0x320] sm:$0xff] }
 0xc02   :  { %v3561_v26 = vmax.f32 %v3325_v62, 0.0  ;;  %v3365_v60 = vpop.f32.mrf.mxu1  ;;  %4931 = vmatpush.bf16.msra.mxu1 %v6475_v43  ;;  %v3347_v50 = vadd.f32 %v3346_v58, %v8345_v22  ;;  %v8474_v58 = vperm.slane %v8465_v32, 1 }
 0xc03   :  { %v3564_v42 = vmax.f32 %v3382_v13, 0.0  ;;  %4824 = vmatpush.bf16.msrb.mxu3 %v6420_v25  ;;  %v3366_v48 = vadd.f32 %v3365_v60, %v8354_v35  ;;  %v6470_v60 = vld [vmem:[%s8966_s10 + $0x390] sm:$0xff]  ;;  %v8483_v25 = vperm.slane %v8465_v32, 2 }
 0xc04   :  { %v3609_v3 = vpack.c.bf16 %v3561_v26, %v3545_v33  ;;  %4881 = vmatpush.bf16.msra.mxu2 %v6444_v31  ;;  %v3578_v23 = vmax.f32 %v3347_v50, 0.0  ;;  %v6462_v26 = vld [vmem:[%s8966_s10 + $0x350] sm:$0xff]  ;;  %v8500_v50 = vperm.slane %v8465_v32, 0 }
 0xc05   :  { %v3612_v9 = vpack.c.bf16 %v3564_v42, %v3548_v2  ;;  %4913 = vmatpush.bf16.msrb.mxu0 %v6466_v21  ;;  %v3579_v49 = vmax.f32 %v3366_v48, 0.0  ;;  %v6455_v2 = vld [vmem:[%s8966_s10 + $0x318] sm:$0xff]  ;;  %v6478_v48 = vld [vmem:[%s8966_s10 + $0x3d0] sm:$0xff] }
 0xc06   :  { %4749 = vmatmul.bf16.vlgmr.msra.gmra.mxu3 %v3609_v3  ;;  %4932 = vmatpush.bf16.msra.mxu1 %v6474_v51  ;;  %v6479_v42 = vld [vmem:[%s8966_s10 + $0x3d8] sm:$0xff] }
 0xc07   :  { %4806 = vmatmul.bf16.vlgmr.msrb.gmra.mxu2 %v3612_v9  ;;  %v3327_v4 = vpop.f32.mrf.mxu3  ;;  %4893 = vmatpush.bf16.msra.mxu3 %v6459_v52  ;;  %v6461_v9 = vld [vmem:[%s8966_s10 + $0x348] sm:$0xff] }
 0xc08   :  { %v3384_v11 = vpop.f32.mrf.mxu2  ;;  %4950 = vmatpush.bf16.msrb.mxu2 %v6483_v5  ;;  %v3328_v30 = vadd.f32 %v3327_v4, %v8371_v1  ;;  %v6469_v52 = vld [vmem:[%s8966_s10 + $0x388] sm:$0xff] }
 0xc09   :  { %v3348_v47 = vpop.f32.mrf.mxu0  ;;  %4914 = vmatpush.bf16.msrb.mxu0 %v6465_v45  ;;  %v3385_v40 = vadd.f32 %v3384_v11, %v8381_v15 }
 0xc0a   :  { %v3349_v14 = vadd.f32 %v3348_v47, %v8345_v22  ;;  %v3367_v0 = vpop.f32.mrf.mxu1  ;;  %4933 = vmatpush.bf16.msra.mxu1 %v6473_v10  ;;  %v6464_v22 = vld [vmem:[%s8966_s10 + $0x360] sm:$0xff]  ;;  %v3577_v27 = vmax.f32 %v3328_v30, 0.0  ;;  %v6454_v10 = vld [vmem:[%s8966_s10 + $0x310] sm:$0xff]  ;;  %v3050_v47 = vperm.slane %v8465_v32, 3 }
 0xc0b   :  { %v3368_v61 = vadd.f32 %v3367_v0, %v8354_v35  ;;  %4894 = vmatpush.bf16.msra.mxu3 %v6458_v57  ;;  %v6457_v35 = vld [vmem:[%s8966_s10 + $0x328] sm:$0xff]  ;;  %v3580_v43 = vmax.f32 %v3385_v40, 0.0 }
 0xc0c   :  { %v3594_v7 = vmax.f32 %v3349_v14, 0.0  ;;  %4951 = vmatpush.bf16.msrb.mxu2 %v6482_v46  ;;  %v6460_v46 = vld [vmem:[%s8966_s10 + $0x340] sm:$0xff] }
 0xc0d   :  { %v3595_v53 = vmax.f32 %v3368_v61, 0.0  ;;  %4915 = vmatpush.bf16.msrb.mxu0 %v6464_v22  ;;  %v6468_v61 = vld [vmem:[%s8966_s10 + $0x380] sm:$0xff] }
 0xc0e   :  { %v3626_v17 = vpack.c.bf16 %v3594_v7, %v3578_v23  ;;  %4934 = vmatpush.bf16.msra.mxu1 %v6472_v20 }
 0xc0f   :  { %v3329_v36 = vpop.f32.mrf.mxu3  ;;  %v3627_v37 = vpack.c.bf16 %v3595_v53, %v3579_v49  ;;  %4895 = vmatpush.bf16.msra.mxu3 %v6457_v35  ;;  %v6453_v49 = vld [vmem:[%s8966_s10 + $0x308] sm:$0xff] }
 0xc10   :  { %v3330_v8 = vadd.f32 %v3329_v36, %v8371_v1  ;;  %v3386_v59 = vpop.f32.mrf.mxu2  ;;  %4773 = vmatmul.bf16.gmra.mxu0 %v3626_v17  ;;  %4952 = vmatpush.bf16.msrb.mxu2 %v6481_v34  ;;  %v6477_v53 = vld [vmem:[%s8966_s10 + $0x3c8] sm:$0xff] }
 0xc11   :  { %v3387_v6 = vadd.f32 %v3386_v59, %v8381_v15  ;;  %4792 = vmatmul.bf16.gmra.mxu1 %v3627_v37  ;;  %v3417_v1 = vpop.f32.mrf.mxu0  ;;  %4916 = vmatpush.bf16.msrb.mxu0 %v6463_v63  ;;  %v6480_v15 = vld [vmem:[%s8966_s10 + $0x3e0] sm:$0xff] }
 0xc12   :  { %v3593_v62 = vmax.f32 %v3330_v8, 0.0  ;;  %v3436_v38 = vpop.f32.mrf.mxu1  ;;  %4935 = vmatpush.bf16.msra.mxu1 %v6471_v12  ;;  %v3418_v21 = vadd.f32 %v3417_v1, %v8474_v58  ;;  %v6452_v12 = vld [vmem:[%s8966_s10 + $0x300] sm:$0xff] }
 0xc13   :  { %v3596_v13 = vmax.f32 %v3387_v6, 0.0  ;;  %4896 = vmatpush.bf16.msra.mxu3 %v6456_v54  ;;  %v3437_v5 = vadd.f32 %v3436_v38, %v8483_v25  ;;  %v6476_v6 = vld [vmem:[%s8966_s10 + $0x3c0] sm:$0xff] }
 0xc14   :  { %v3625_v33 = vpack.c.bf16 %v3593_v62, %v3577_v27  ;;  %4953 = vmatpush.bf16.msrb.mxu2 %v6480_v15  ;;  %v3550_v0 = vmax.f32 %v3418_v21, 0.0 }
 0xc15   :  { %v3628_v31 = vpack.c.bf16 %v3596_v13, %v3580_v43  ;;  %4917 = vmatpush.bf16.msrb.mxu0 %v6462_v26  ;;  %v3551_v23 = vmax.f32 %v3437_v5, 0.0 }
 0xc16   :  { %4754 = vmatmul.bf16.gmra.mxu3 %v3625_v33  ;;  %4936 = vmatpush.bf16.msra.mxu1 %v6470_v60 }
 0xc17   :  { %4811 = vmatmul.bf16.gmra.mxu2 %v3628_v31  ;;  %v3398_v3 = vpop.f32.mrf.mxu3  ;;  %4897 = vmatpush.bf16.msra.mxu3 %v6455_v2 }
 0xc18   :  { %v3455_v51 = vpop.f32.mrf.mxu2  ;;  %4954 = vmatpush.bf16.msrb.mxu2 %v6479_v42  ;;  %v3399_v22 = vadd.f32 %v3398_v3, %v8500_v50 }
 0xc19   :  { %v3419_v4 = vpop.f32.mrf.mxu0  ;;  %4918 = vmatpush.bf16.msrb.mxu0 %v6461_v9  ;;  %v3456_v30 = vadd.f32 %v3455_v51, %v3050_v47 }
 0xc1a   :  { %v3420_v11 = vadd.f32 %v3419_v4, %v8474_v58  ;;  %v3438_v45 = vpop.f32.mrf.mxu1  ;;  %4937 = vmatpush.bf16.msra.mxu1 %v6469_v52  ;;  %v3549_v8 = vmax.f32 %v3399_v22, 0.0 }
 0xc1b   :  { %v3439_v14 = vadd.f32 %v3438_v45, %v8483_v25  ;;  %4898 = vmatpush.bf16.msra.mxu3 %v6454_v10  ;;  %v3552_v1 = vmax.f32 %v3456_v30, 0.0 }
 0xc1c   :  { %v3566_v57 = vmax.f32 %v3420_v11, 0.0  ;;  %4955 = vmatpush.bf16.msrb.mxu2 %v6478_v48 }
 0xc1d   :  { %v3567_v7 = vmax.f32 %v3439_v14, 0.0  ;;  %4919 = vmatpush.bf16.msrb.mxu0 %v6460_v46 }
 0xc1e   :  { %v3614_v20 = vpack.c.bf16 %v3566_v57, %v3550_v0  ;;  %4938 = vmatpush.bf16.msra.mxu1 %v6468_v61  ;;  %v3052_v61 = vperm.slane %v8465_v32, 5 }
 0xc1f   :  { %v3615_v17 = vpack.c.bf16 %v3567_v7, %v3551_v23  ;;  %v3400_v35 = vpop.f32.mrf.mxu3  ;;  %4899 = vmatpush.bf16.msra.mxu3 %v6453_v49  ;;  %v3053_v7 = vperm.slane %v8465_v32, 6 }
 0xc20   :  { %v3401_v34 = vadd.f32 %v3400_v35, %v8500_v50  ;;  %v3457_v40 = vpop.f32.mrf.mxu2  ;;  %4844 = vmatmul.bf16.vlgmr.msra.gmra.mxu0 %v3614_v20  ;;  %4956 = vmatpush.bf16.msrb.mxu2 %v6477_v53  ;;  %v3051_v53 = vperm.slane %v8465_v32, 4  ;;  %v3054_v35 = vperm.slane %v8465_v32, 7 }
 0xc21   :  { %v3458_v36 = vadd.f32 %v3457_v40, %v3050_v47  ;;  %4863 = vmatmul.bf16.vlgmr.msrb.gmra.mxu1 %v3615_v17  ;;  %v3422_v37 = vpop.f32.mrf.mxu0 }
 0xc22   :  { %v3565_v59 = vmax.f32 %v3401_v34, 0.0  ;;  %v3441_v63 = vpop.f32.mrf.mxu1  ;;  %v3423_v15 = vadd.f32 %v3422_v37, %v8474_v58 }
 0xc23   :  { %v3568_v27 = vmax.f32 %v3458_v36, 0.0  ;;  %4900 = vmatpush.bf16.msra.mxu3 %v6452_v12  ;;  %v3442_v13 = vadd.f32 %v3441_v63, %v8483_v25 }
 0xc24   :  { %v3613_v62 = vpack.c.bf16 %v3565_v59, %v3549_v8  ;;  %4957 = vmatpush.bf16.msrb.mxu2 %v6476_v6  ;;  %v3582_v2 = vmax.f32 %v3423_v15, 0.0 }
 0xc25   :  { %v3616_v38 = vpack.c.bf16 %v3568_v27, %v3552_v1  ;;  %v3583_v3 = vmax.f32 %v3442_v13, 0.0 }
 0xc26   :  { %4825 = vmatmul.bf16.vlgmr.msrb.gmra.mxu3 %v3613_v62 }
 0xc27   :  { %4882 = vmatmul.bf16.vlgmr.msra.gmra.mxu2 %v3616_v38  ;;  %v3403_v54 = vpop.f32.mrf.mxu3 }
 0xc28   :  { %v3460_v43 = vpop.f32.mrf.mxu2  ;;  %v3404_v51 = vadd.f32 %v3403_v54, %v8500_v50 }
 0xc29   :  { %v3424_v33 = vpop.f32.mrf.mxu0  ;;  %v3461_v52 = vadd.f32 %v3460_v43, %v3050_v47 }
 0xc2a   :  { %v3425_v26 = vadd.f32 %v3424_v33, %v8474_v58  ;;  %v3443_v60 = vpop.f32.mrf.mxu1  ;;  %v3581_v48 = vmax.f32 %v3404_v51, 0.0 }
 0xc2b   :  { %v3444_v31 = vadd.f32 %v3443_v60, %v8483_v25  ;;  %v3584_v0 = vmax.f32 %v3461_v52, 0.0 }
 0xc2c   :  { %v3598_v42 = vmax.f32 %v3425_v26, 0.0 }
 0xc2d   :  { %v3599_v21 = vmax.f32 %v3444_v31, 0.0 }
 0xc2e   :  { %v3630_v9 = vpack.c.bf16 %v3598_v42, %v3582_v2 }
 0xc2f   :  { %v3631_v5 = vpack.c.bf16 %v3599_v21, %v3583_v3  ;;  %v3405_v4 = vpop.f32.mrf.mxu3 }
 0xc30   :  { %v3406_v11 = vadd.f32 %v3405_v4, %v8500_v50  ;;  %v3462_v45 = vpop.f32.mrf.mxu2  ;;  %4849 = vmatmul.bf16.gmra.mxu0 %v3630_v9 }
 0xc31   :  { %v3463_v10 = vadd.f32 %v3462_v45, %v3050_v47  ;;  %4868 = vmatmul.bf16.gmra.mxu1 %v3631_v5  ;;  %v3493_v58 = vpop.f32.mrf.mxu0 }
 0xc32   :  { %v3597_v14 = vmax.f32 %v3406_v11, 0.0  ;;  %v3512_v25 = vpop.f32.mrf.mxu1  ;;  %v3494_v50 = vadd.f32 %v3493_v58, %v3052_v61 }
 0xc33   :  { %v3600_v57 = vmax.f32 %v3463_v10, 0.0  ;;  %v3513_v49 = vadd.f32 %v3512_v25, %v3053_v7 }
 0xc34   :  { %v3629_v46 = vpack.c.bf16 %v3597_v14, %v3581_v48  ;;  %v3554_v40 = vmax.f32 %v3494_v50, 0.0 }
 0xc35   :  { %v3632_v23 = vpack.c.bf16 %v3600_v57, %v3584_v0  ;;  %v3555_v37 = vmax.f32 %v3513_v49, 0.0 }
 0xc36   :  { %4830 = vmatmul.bf16.gmra.mxu3 %v3629_v46 }
 0xc37   :  { %4887 = vmatmul.bf16.gmra.mxu2 %v3632_v23  ;;  %v3474_v22 = vpop.f32.mrf.mxu3 }
 0xc38   :  { %v3531_v20 = vpop.f32.mrf.mxu2  ;;  %v3475_v59 = vadd.f32 %v3474_v22, %v3051_v53 }
 0xc39   :  { %v3495_v47 = vpop.f32.mrf.mxu0  ;;  %v3532_v12 = vadd.f32 %v3531_v20, %v3054_v35 }
 0xc3a   :  { %v3496_v30 = vadd.f32 %v3495_v47, %v3052_v61  ;;  %v3514_v17 = vpop.f32.mrf.mxu1  ;;  %v3553_v15 = vmax.f32 %v3475_v59, 0.0 }
 0xc3b   :  { %v3515_v34 = vadd.f32 %v3514_v17, %v3053_v7  ;;  %v3556_v32 = vmax.f32 %v3532_v12, 0.0 }
 0xc3c   :  { %v3570_v36 = vmax.f32 %v3496_v30, 0.0 }
 0xc3d   :  { %v3571_v8 = vmax.f32 %v3515_v34, 0.0 }
 0xc3e   :  { %v3618_v63 = vpack.c.bf16 %v3570_v36, %v3554_v40 }
 0xc3f   :  { %v3619_v6 = vpack.c.bf16 %v3571_v8, %v3555_v37  ;;  %v3476_v1 = vpop.f32.mrf.mxu3 }
 0xc40   :  { %v3477_v27 = vadd.f32 %v3476_v1, %v3051_v53  ;;  %v3533_v62 = vpop.f32.mrf.mxu2  ;;  %4920 = vmatmul.bf16.vlgmr.msrb.gmra.mxu0 %v3618_v63 }
 0xc41   :  { %v3534_v38 = vadd.f32 %v3533_v62, %v3054_v35  ;;  %4939 = vmatmul.bf16.vlgmr.msra.gmra.mxu1 %v3619_v6  ;;  %v3498_v54 = vpop.f32.mrf.mxu0 }
 0xc42   :  { %v3569_v43 = vmax.f32 %v3477_v27, 0.0  ;;  %v3517_v13 = vpop.f32.mrf.mxu1  ;;  %v3499_v2 = vadd.f32 %v3498_v54, %v3052_v61 }
 0xc43   :  { %v3572_v33 = vmax.f32 %v3534_v38, 0.0  ;;  %v3518_v3 = vadd.f32 %v3517_v13, %v3053_v7 }
 0xc44   :  { %v3617_v26 = vpack.c.bf16 %v3569_v43, %v3553_v15  ;;  %v3586_v5 = vmax.f32 %v3499_v2, 0.0 }
 0xc45   :  { %v3620_v60 = vpack.c.bf16 %v3572_v33, %v3556_v32  ;;  %v3587_v11 = vmax.f32 %v3518_v3, 0.0 }
 0xc46   :  { %4901 = vmatmul.bf16.vlgmr.msra.gmra.mxu3 %v3617_v26 }
 0xc47   :  { %4958 = vmatmul.bf16.vlgmr.msrb.gmra.mxu2 %v3620_v60  ;;  %v3479_v31 = vpop.f32.mrf.mxu3 }
 0xc48   :  { %v3536_v42 = vpop.f32.mrf.mxu2  ;;  %v3480_v10 = vadd.f32 %v3479_v31, %v3051_v53 }
 0xc49   :  { %v3500_v21 = vpop.f32.mrf.mxu0  ;;  %v3537_v48 = vadd.f32 %v3536_v42, %v3054_v35 }
 0xc4a   :  { %v3501_v51 = vadd.f32 %v3500_v21, %v3052_v61  ;;  %v3519_v9 = vpop.f32.mrf.mxu1  ;;  %v3585_v23 = vmax.f32 %v3480_v10, 0.0 }
 0xc4b   :  { %v3520_v52 = vadd.f32 %v3519_v9, %v3053_v7  ;;  %v3588_v50 = vmax.f32 %v3537_v48, 0.0 }
 0xc4c   :  { %v3602_v4 = vmax.f32 %v3501_v51, 0.0 }
 0xc4d   :  { %v3603_v45 = vmax.f32 %v3520_v52, 0.0 }
 0xc4e   :  { %v3634_v58 = vpack.c.bf16 %v3602_v4, %v3586_v5 }
 0xc4f   :  { %v3635_v14 = vpack.c.bf16 %v3603_v45, %v3587_v11  ;;  %v3481_v25 = vpop.f32.mrf.mxu3 }
 0xc50   :  { %v3482_v0 = vadd.f32 %v3481_v25, %v3051_v53  ;;  %v3538_v57 = vpop.f32.mrf.mxu2  ;;  %4925 = vmatmul.bf16.gmra.mxu0 %v3634_v58  ;;  %v6508_v53 = vld [vmem:[%s8968_s11] ss:$0 sm:$0xff] }
 0xc51   :  { %v3539_v46 = vadd.f32 %v3538_v57, %v3054_v35  ;;  %4944 = vmatmul.bf16.gmra.mxu1 %v3635_v14 }
 0xc52   :  { %v3601_v22 = vmax.f32 %v3482_v0, 0.0 }
 0xc53   :  { %v3604_v61 = vmax.f32 %v3539_v46, 0.0 }
 0xc54   :  { %v3633_v20 = vpack.c.bf16 %v3601_v22, %v3585_v23 }
 0xc55   :  { %v3636_v7 = vpack.c.bf16 %v3604_v61, %v3588_v50 }
 0xc56   :  { %4906 = vmatmul.bf16.gmra.mxu3 %v3633_v20 }
 0xc57   :  { %4963 = vmatmul.bf16.gmra.mxu2 %v3636_v7 }
 0xc5d   :  { %v4693_v49 = vpop.f32.mrf.mxu0 }
 0xc5e   :  { %v4712_v47 = vpop.f32.mrf.mxu1 }
 0xc65   :  { %v4695_v30 = vpop.f32.mrf.mxu0 }
 0xc66   :  { %v4714_v17 = vpop.f32.mrf.mxu1 }
 0xc69   :  { %v4674_v34 = vpop.f32.mrf.mxu3 }
 0xc6a   :  { %v4675_v40 = vadd.f32 %v6508_v53, %v4674_v34  ;;  %v4731_v35 = vpop.f32.mrf.mxu2 }
 0xc6c   :  { %v4694_v36 = vadd.f32 %v4693_v49, %v4675_v40 }
 0xc6d   :  { %v4698_v37 = vpop.f32.mrf.mxu0 }
 0xc6e   :  { %v4713_v8 = vadd.f32 %v4712_v47, %v4694_v36  ;;  %v4717_v59 = vpop.f32.mrf.mxu1 }
 0xc70   :  { %v4732_v63 = vadd.f32 %v4731_v35, %v4713_v8 }
 0xc71   :  { %v4676_v12 = vpop.f32.mrf.mxu3 }
 0xc72   :  { %v4677_v6 = vadd.f32 %v6508_v53, %v4676_v12  ;;  %v4733_v1 = vpop.f32.mrf.mxu2 }
 0xc74   :  { %v4696_v27 = vadd.f32 %v4695_v30, %v4677_v6 }
 0xc75   :  { %v4700_v62 = vpop.f32.mrf.mxu0 }
 0xc76   :  { %v4715_v38 = vadd.f32 %v4714_v17, %v4696_v27  ;;  %v4719_v54 = vpop.f32.mrf.mxu1 }
 0xc78   :  { %v4734_v15 = vadd.f32 %v4733_v1, %v4715_v38 }
 0xc79   :  { %v4679_v43 = vpop.f32.mrf.mxu3 }
 0xc7a   :  { %v4680_v13 = vadd.f32 %v6508_v53, %v4679_v43  ;;  %v4736_v32 = vpop.f32.mrf.mxu2 }
 0xc7c   :  { %v4699_v33 = vadd.f32 %v4698_v37, %v4680_v13 }
 0xc7d   :  { %v4769_v26 = vpop.f32.mrf.mxu0 }
 0xc7e   :  { %v4718_v60 = vadd.f32 %v4717_v59, %v4699_v33  ;;  %v4788_v31 = vpop.f32.mrf.mxu1 }
 0xc80   :  { %v4737_v2 = vadd.f32 %v4736_v32, %v4718_v60 }
 0xc81   :  { %v4681_v42 = vpop.f32.mrf.mxu3 }
 0xc82   :  { %v4682_v3 = vadd.f32 %v6508_v53, %v4681_v42  ;;  %v4738_v21 = vpop.f32.mrf.mxu2 }
 0xc84   :  { %v4701_v51 = vadd.f32 %v4700_v62, %v4682_v3 }
 0xc85   :  { %v4771_v9 = vpop.f32.mrf.mxu0 }
 0xc86   :  { %v4720_v52 = vadd.f32 %v4719_v54, %v4701_v51  ;;  %v4790_v5 = vpop.f32.mrf.mxu1 }
 0xc88   :  { %v4739_v4 = vadd.f32 %v4738_v21, %v4720_v52 }
 0xc89   :  { %v4750_v11 = vpop.f32.mrf.mxu3 }
 0xc8a   :  { %v4807_v45 = vpop.f32.mrf.mxu2  ;;  %v4751_v30 = vadd.f32 %v4750_v11, %v4732_v63 }
 0xc8c   :  { %v4770_v34 = vadd.f32 %v4769_v26, %v4751_v30 }
 0xc8d   :  { %v4774_v10 = vpop.f32.mrf.mxu0 }
 0xc8e   :  { %v4793_v58 = vpop.f32.mrf.mxu1  ;;  %v4789_v36 = vadd.f32 %v4788_v31, %v4770_v34 }
 0xc90   :  { %v4808_v59 = vadd.f32 %v4807_v45, %v4789_v36 }
 0xc91   :  { %v4752_v48 = vpop.f32.mrf.mxu3 }
 0xc92   :  { %v4809_v14 = vpop.f32.mrf.mxu2  ;;  %v4753_v37 = vadd.f32 %v4752_v48, %v4734_v15 }
 0xc94   :  { %v4772_v12 = vadd.f32 %v4771_v9, %v4753_v37 }
 0xc95   :  { %v4776_v25 = vpop.f32.mrf.mxu0 }
 0xc96   :  { %v4795_v0 = vpop.f32.mrf.mxu1  ;;  %v4791_v38 = vadd.f32 %v4790_v5, %v4772_v12 }
 0xc98   :  { %v4810_v32 = vadd.f32 %v4809_v14, %v4791_v38 }
 0xc99   :  { %v4755_v57 = vpop.f32.mrf.mxu3 }
 0xc9a   :  { %v4812_v46 = vpop.f32.mrf.mxu2  ;;  %v4756_v54 = vadd.f32 %v4755_v57, %v4737_v2 }
 0xc9c   :  { %v4775_v63 = vadd.f32 %v4774_v10, %v4756_v54 }
 0xc9d   :  { %v4845_v23 = vpop.f32.mrf.mxu0 }
 0xc9e   :  { %v4864_v22 = vpop.f32.mrf.mxu1  ;;  %v4794_v3 = vadd.f32 %v4793_v58, %v4775_v63 }
 0xca0   :  { %v4813_v52 = vadd.f32 %v4812_v46, %v4794_v3 }
 0xca1   :  { %v4757_v50 = vpop.f32.mrf.mxu3 }
 0xca2   :  { %v4814_v61 = vpop.f32.mrf.mxu2  ;;  %v4758_v31 = vadd.f32 %v4757_v50, %v4739_v4 }
 0xca4   :  { %v4777_v11 = vadd.f32 %v4776_v25, %v4758_v31 }
 0xca5   :  { %v4847_v20 = vpop.f32.mrf.mxu0 }
 0xca6   :  { %v4866_v7 = vpop.f32.mrf.mxu1  ;;  %v4796_v14 = vadd.f32 %v4795_v0, %v4777_v11 }
 0xca8   :  { %v4815_v46 = vadd.f32 %v4814_v61, %v4796_v14 }
 0xca9   :  { %v4826_v49 = vpop.f32.mrf.mxu3 }
 0xcaa   :  { %v4883_v47 = vpop.f32.mrf.mxu2  ;;  %v4827_v27 = vadd.f32 %v4826_v49, %v4808_v59 }
 0xcac   :  { %v4846_v43 = vadd.f32 %v4845_v23, %v4827_v27  ;;  %v5269_v23 = vlaneseq }
 0xcad   :  { %v4850_v17 = vpop.f32.mrf.mxu0 }
 0xcae   :  { %v4869_v35 = vpop.f32.mrf.mxu1  ;;  %v4865_v60 = vadd.f32 %v4864_v22, %v4846_v43  ;;  %v5270_v49 = vshrl.u32 %v5269_v23, 7 }
 0xcb0   :  { %v4884_v21 = vadd.f32 %v4883_v47, %v4865_v60  ;;  %6501 = vset.pattern.permute.xlu2 %v5270_v49  ;;  %6502 = vset.pattern.permute.xlu1 %v5270_v49 }
 0xcb1   :  { %v4828_v53 = vpop.f32.mrf.mxu3  ;;  %6503 = vset.pattern.permute.xlu0 %v5270_v49 }
 0xcb2   :  { %v4885_v40 = vpop.f32.mrf.mxu2  ;;  %v4829_v26 = vadd.f32 %v4828_v53, %v4810_v32 }
 0xcb4   :  { %v4848_v51 = vadd.f32 %v4847_v20, %v4829_v26 }
 0xcb5   :  { %v4852_v1 = vpop.f32.mrf.mxu0 }
 0xcb6   :  { %v4871_v62 = vpop.f32.mrf.mxu1  ;;  %v4867_v5 = vadd.f32 %v4866_v7, %v4848_v51 }
 0xcb8   :  { %v4886_v30 = vadd.f32 %v4885_v40, %v4867_v5  ;;  %v6673_v5 = vld [vmem:[%s8960_s1] sm:$0xff] }
 0xcb9   :  { %v4831_v8 = vpop.f32.mrf.mxu3 }
 0xcba   :  { %v4888_v6 = vpop.f32.mrf.mxu2  ;;  %v4832_v2 = vadd.f32 %v4831_v8, %v4813_v52 }
 0xcbc   :  { %v4851_v53 = vadd.f32 %v4850_v17, %v4832_v2  ;;  %v8582_v2 = vsub.f32 1.0, %v6673_v5 }
 0xcbd   :  { %v4921_v42 = vpop.f32.mrf.mxu0 }
 0xcbe   :  { %v4940_v15 = vpop.f32.mrf.mxu1  ;;  %v4870_v34 = vadd.f32 %v4869_v35, %v4851_v53  ;;  %v5289_v14 = vperm.slane %v8582_v2, 3  ;;  %v5389_v49 = vsel %vm593_vm8, %v8582_v2, 0.0 }
 0xcc0   :  { %v4889_v37 = vadd.f32 %v4888_v6, %v4870_v34 }
 0xcc1   :  { %v4833_v13 = vpop.f32.mrf.mxu3 }
 0xcc2   :  { %v4890_v33 = vpop.f32.mrf.mxu2  ;;  %v4834_v0 = vadd.f32 %v4833_v13, %v4815_v46 }
 0xcc4   :  { %v4853_v8 = vadd.f32 %v4852_v1, %v4834_v0 }
 0xcc5   :  { %v4923_v22 = vpop.f32.mrf.mxu0 }
 0xcc6   :  { %v4942_v4 = vpop.f32.mrf.mxu1  ;;  %v4872_v54 = vadd.f32 %v4871_v62, %v4853_v8 }
 0xcc8   :  { %v4891_v63 = vadd.f32 %v4890_v33, %v4872_v54 }
 0xcc9   :  { %v4902_v9 = vpop.f32.mrf.mxu3 }
 0xcca   :  { %v4903_v45 = vadd.f32 %v4902_v9, %v4884_v21  ;;  %v4959_v48 = vpop.f32.mrf.mxu2 }
 0xccc   :  { %v4922_v57 = vadd.f32 %v4921_v42, %v4903_v45 }
 0xccd   :  { %v4926_v59 = vpop.f32.mrf.mxu0 }
 0xcce   :  { %v4941_v10 = vadd.f32 %v4940_v15, %v4922_v57  ;;  %v4945_v38 = vpop.f32.mrf.mxu1 }
 0xcd0   :  { %v4960_v58 = vadd.f32 %v4959_v48, %v4941_v10  ;;  %v5303_v10 = vperm.slane %v8582_v2, 5 }
 0xcd1   :  { %v4904_v50 = vpop.f32.mrf.mxu3 }
 0xcd2   :  { %v4973_v25 = vrot.slane %v4960_v58, 4  ;;  %v8545_v20 = vadd.f32 %v4960_v58, %v7800_v28  ;;  %v4905_v7 = vadd.f32 %v4904_v50, %v4886_v30  ;;  %v4961_v47 = vpop.f32.mrf.mxu2 }
 0xcd4   :  { %v8548_v36 = vadd.f32 %v4973_v25, %v7803_v41  ;;  %4999 = vst [vmem:[#allocation1] ss:$2 sm:$0xff] %v8545_v20  ;;  %v4924_v17 = vadd.f32 %v4923_v22, %v4905_v7 }
 0xcd5   :  { %v4928_v42 = vpop.f32.mrf.mxu0 }
 0xcd6   :  { %5001 = vst [vmem:[#allocation1 + $0x1] ss:$2 sm:$0xff] %v8548_v36  ;;  %v4943_v40 = vadd.f32 %v4942_v4, %v4924_v17  ;;  %v4947_v15 = vpop.f32.mrf.mxu1 }
 0xcd8   :  { %v4962_v61 = vadd.f32 %v4961_v47, %v4943_v40 }
 0xcd9   :  { %v4907_v12 = vpop.f32.mrf.mxu3 }
 0xcda   :  { %v4974_v28 = vrot.slane %v4962_v61, 4  ;;  %v8553_v27 = vadd.f32 %v4962_v61, %v7840_v44  ;;  %v4908_v35 = vadd.f32 %v4907_v12, %v4889_v37  ;;  %v4964_v13 = vpop.f32.mrf.mxu2 }
 0xcdc   :  { %v8556_v41 = vadd.f32 %v4974_v28, %v7843_v18  ;;  %5003 = vst [vmem:[#allocation1 + $0x10] ss:$2 sm:$0xff] %v8553_v27  ;;  %v4927_v43 = vadd.f32 %v4926_v59, %v4908_v35 }
 0xcdd   :  { %v5014_v32 = vld.sshfl [vmem:[#allocation1] sm:$0xff pattern:$0x75316420] }
 0xcde   :  { %5005 = vst [vmem:[#allocation1 + $0x11] ss:$2 sm:$0xff] %v8556_v41  ;;  %v4946_v6 = vadd.f32 %v4945_v38, %v4927_v43  ;;  %v5022_v1 = vsel %vm109_vm0, %v5014_v32, 0.0 }
 0xcdf   :  { %5023 = vadd.xlane.f32.xlu2 %v5022_v1  ;;  %v5268_v1 = vperm.slane %v8582_v2, 0 }
 0xce0   :  { %v4965_v44 = vadd.f32 %v4964_v13, %v4946_v6  ;;  %v5296_v6 = vperm.slane %v8582_v2, 4 }
 0xce1   :  { %v4909_v60 = vpop.f32.mrf.mxu3 }
 0xce2   :  { %v4975_v26 = vrot.slane %v4965_v44, 4  ;;  %v8562_v62 = vadd.f32 %v4965_v44, %v7880_v39  ;;  %v4910_v18 = vadd.f32 %v4909_v60, %v4891_v63  ;;  %v4966_v9 = vpop.f32.mrf.mxu2  ;;  %v5317_v63 = vperm.slane %v8582_v2, 7 }
 0xce4   :  { %v8565_v3 = vadd.f32 %v4975_v26, %v7883_v55  ;;  %5007 = vst [vmem:[#allocation1 + $0x20] ss:$2 sm:$0xff] %v8562_v62  ;;  %v4929_v31 = vadd.f32 %v4928_v42, %v4910_v18 }
 0xce5   :  { %v5015_v21 = vld.sshfl [vmem:[#allocation1 + $0x10] sm:$0xff pattern:$0x75316420] }
 0xce6   :  { %5009 = vst [vmem:[#allocation1 + $0x21] ss:$2 sm:$0xff] %v8565_v3  ;;  %v4948_v51 = vadd.f32 %v4947_v15, %v4929_v31  ;;  %v5025_v33 = vsel %vm109_vm0, %v5015_v21, 0.0 }
 0xce7   :  { %5026 = vadd.xlane.f32.xlu1 %v5025_v33  ;;  %v5310_v33 = vperm.slane %v8582_v2, 6 }
 0xce8   :  { %v4967_v52 = vadd.f32 %v4966_v9, %v4948_v51 }
 0xcea   :  { %v4976_v39 = vrot.slane %v4967_v52, 4  ;;  %v8571_v11 = vadd.f32 %v4967_v52, %v7910_v29  ;;  %v5275_v29 = vperm.slane %v8582_v2, 1 }
 0xcec   :  { %v8574_v55 = vadd.f32 %v4976_v39, %v7913_v16  ;;  %5011 = vst [vmem:[#allocation1 + $0x30] ss:$2 sm:$0xff] %v8571_v11  ;;  %v5282_v16 = vperm.slane %v8582_v2, 2 }
 0xced   :  { %v5016_v45 = vld.sshfl [vmem:[#allocation1 + $0x20] sm:$0xff pattern:$0x75316420] }
 0xcee   :  { %5013 = vst [vmem:[#allocation1 + $0x31] ss:$2 sm:$0xff] %v8574_v55  ;;  %v5028_v48 = vsel %vm109_vm0, %v5016_v45, 0.0 }
 0xcef   :  { %5029 = vadd.xlane.f32.xlu0 %v5028_v48 }
 0xcf5   :  { %v5017_v57 = vld.sshfl [vmem:[#allocation1 + $0x30] sm:$0xff pattern:$0x75316420] }
 0xcf6   :  { %v5031_v23 = vsel %vm109_vm0, %v5017_v57, 0.0 }
 0xcf7   :  { %5280 = vperm.xlu2 %6501, %v5275_v29   ;;  %5390 = vadd.xlane.f32.xlu0 %v5389_v49 }
 0xd00   :  { %5287 = vperm.xlu1 %6502, %v5282_v16  }
 0xd20   :  { %5032 = vadd.xlane.f32.xlu2 %v5031_v23 }
 0xd38   :  { %5294 = vperm.xlu2 %6501, %v5289_v14  }
 0xd40   :  { %5308 = vperm.xlu2 %6501, %v5303_v10  }
 0xd52   :  { %v5024_v22 = vpop.xlane.xlu2 %5023 }
 0xd53   :  { %v5034_v30 = vmul.f32 %v5024_v22, %v7665_v24 }
 0xd55   :  { %v5045_v53 = vperm.slane %v5034_v30, %v7667_v19  ;;  %v5049_v58 = vperm.slane %v5034_v30, %v7669_v56 }
 0xd57   :  { %v8595_v4 = vsub.f32 %v8545_v20, %v5045_v53  ;;  %v8598_v50 = vsub.f32 %v8548_v36, %v5049_v58 }
 0xd59   :  { %v5090_v46 = vmul.f32 %v8595_v4, %v8595_v4  ;;  %v5091_v25 = vmul.f32 %v8598_v50, %v8598_v50 }
 0xd5a   :  { %v5027_v7 = vpop.xlane.xlu1 %5026  ;;  %v8636_v44 = vpop.permute.xlu2 %5280 }
 0xd5b   :  { %5106 = vst [vmem:[#allocation1] ss:$2 sm:$0xff] %v5090_v46  ;;  %v5035_v47 = vmul.f32 %v5027_v7, %v7665_v24 }
 0xd5c   :  { %5108 = vst [vmem:[#allocation1 + $0x1] ss:$2 sm:$0xff] %v5091_v25 }
 0xd5d   :  { %v5053_v34 = vperm.slane %v5035_v47, %v7667_v19  ;;  %v5057_v0 = vperm.slane %v5035_v47, %v7669_v56 }
 0xd5f   :  { %v8608_v20 = vsub.f32 %v8553_v27, %v5053_v34  ;;  %v8611_v36 = vsub.f32 %v8556_v41, %v5057_v0 }
 0xd61   :  { %v5092_v17 = vmul.f32 %v8608_v20, %v8608_v20  ;;  %v5093_v40 = vmul.f32 %v8611_v36, %v8611_v36 }
 0xd62   :  { %v5030_v37 = vpop.xlane.xlu0 %5029 }
 0xd63   :  { %5110 = vst [vmem:[#allocation1 + $0x10] ss:$2 sm:$0xff] %v5092_v17  ;;  %v5036_v8 = vmul.f32 %v5030_v37, %v7665_v24  ;;  %v5121_v61 = vld.sshfl [vmem:[#allocation1] sm:$0xff pattern:$0x75316420] }
 0xd64   :  { %5112 = vst [vmem:[#allocation1 + $0x11] ss:$2 sm:$0xff] %v5093_v40  ;;  %v5129_v59 = vsel %vm109_vm0, %v5121_v61, 0.0 }
 0xd65   :  { %v5061_v12 = vperm.slane %v5036_v8, %v7667_v19  ;;  %v5065_v28 = vperm.slane %v5036_v8, %v7669_v56  ;;  %5130 = vadd.xlane.f32.xlu1 %v5129_v59 }
 0xd67   :  { %v8622_v27 = vsub.f32 %v8562_v62, %v5061_v12  ;;  %v8625_v35 = vsub.f32 %v8565_v3, %v5065_v28  ;;  %v8674_v12 = vld [vmem:[%s8969_s12] ss:$0 sm:$0xff] }
 0xd69   :  { %v5094_v38 = vmul.f32 %v8622_v27, %v8622_v27  ;;  %v5095_v54 = vmul.f32 %v8625_v35, %v8625_v35 }
 0xd6a   :  { %v5391_v39 = vpop.xlane.xlu0 %5390 }
 0xd6b   :  { %5114 = vst [vmem:[#allocation1 + $0x20] ss:$2 sm:$0xff] %v5094_v38  ;;  %v5122_v41 = vld.sshfl [vmem:[#allocation1 + $0x10] sm:$0xff pattern:$0x75316420]  ;;  %v8662_v47 = vmax.f32 %v5391_v39, 1.0 }
 0xd6c   :  { %5116 = vst [vmem:[#allocation1 + $0x21] ss:$2 sm:$0xff] %v5095_v54  ;;  %v5132_v43 = vsel %vm109_vm0, %v5122_v41, 0.0 }
 0xd6d   :  { %5133 = vadd.xlane.f32.xlu0 %v5132_v43  ;;  %v8666_v40 = vrot.slane %v8662_v47, 1  ;;  %vm5414_vm15 = vweird.f32 %v8662_v47 }
 0xd6f   :  { %vm5429_vm7 = vweird.f32 %v8666_v40 }
 0xd72   :  { %v8653_v9 = vpop.permute.xlu1 %5287 }
 0xd73   :  { %v5123_v13 = vld.sshfl [vmem:[#allocation1 + $0x20] sm:$0xff pattern:$0x75316420] }
 0xd74   :  { %v5135_v32 = vsel %vm109_vm0, %v5123_v13, 0.0 }
 0xd75   :  { %5136 = vadd.xlane.f32.xlu2 %v5135_v32  ;;  %v8683_v32 = vrot.slane %v8674_v12, 4 }
 0xd7e   :  { %5301 = vperm.xlu1 %6502, %v5296_v6  }
 0xd81   :  { %5273 = vperm.xlu0 %6503, %v5268_v1   ;;  %v8688_v1 = vld [vmem:[%s8970_s13] ss:$0 sm:$0xff] }
 0xd8d   :  { %5322 = vperm.xlu2 %6501, %v5317_v63   ;;  %v8691_v63 = vrot.slane %v8662_v47, 2 }
 0xd93   :  { %v5033_v60 = vpop.xlane.xlu2 %5032 }
 0xd94   :  { %v5037_v26 = vmul.f32 %v5033_v60, %v7665_v24 }
 0xd96   :  { %v5069_v62 = vperm.slane %v5037_v26, %v7667_v19  ;;  %v5073_v18 = vperm.slane %v5037_v26, %v7669_v56 }
 0xd98   :  { %v8642_v42 = vsub.f32 %v8571_v11, %v5069_v62  ;;  %v8645_v3 = vsub.f32 %v8574_v55, %v5073_v18 }
 0xd9a   :  { %v5096_v31 = vmul.f32 %v8642_v42, %v8642_v42  ;;  %v5097_v15 = vmul.f32 %v8645_v3, %v8645_v3 }
 0xd9b   :  { %v8655_v52 = vpop.permute.xlu2 %5294 }
 0xd9c   :  { %5118 = vst [vmem:[#allocation1 + $0x30] ss:$2 sm:$0xff] %v5096_v31 }
 0xd9d   :  { %5120 = vst [vmem:[#allocation1 + $0x31] ss:$2 sm:$0xff] %v5097_v15 }
 0xda3   :  { %v8658_v45 = vpop.permute.xlu2 %5308 }
 0xda4   :  { %v5124_v21 = vld.sshfl [vmem:[#allocation1 + $0x30] sm:$0xff pattern:$0x75316420] }
 0xda5   :  { %v5138_v51 = vsel %vm109_vm0, %v5124_v21, 0.0  ;;  %v8699_v21 = vrot.slane %v8688_v1, 4 }
 0xda8   :  { %5139 = vadd.xlane.f32.xlu1 %v5138_v51  ;;  %v8702_v51 = vrot.slane %v8662_v47, 4 }
 0xdc1   :  { %5315 = vperm.xlu1 %6502, %v5310_v33  }
 0xdd8   :  { %v5131_v11 = vpop.xlane.xlu1 %5130 }
 0xdd9   :  { %v5141_v55 = vmul.f32 %v5131_v11, %v7665_v24 }
 0xddb   :  { %v5145_v5 = vadd.f32 1e-05, %v5141_v55  ;;  %v8710_v55 = vrot.slane %v8662_v47, 3 }
 0xddd   :  { %6649 = vrsqrt.f32 %v5145_v5  ;;  %vm5155_vm9 = vweird.f32 %v5145_v5 }
 0xde0   :  { %v5134_v48 = vpop.xlane.xlu0 %5133 }
 0xde1   :  { %v5142_v29 = vmul.f32 %v5134_v48, %v7665_v24 }
 0xde3   :  { %v5146_v16 = vadd.f32 1e-05, %v5142_v29  ;;  %v6650_v23 = vpop.eup %6649 }
 0xde4   :  { %v5150_v10 = vmul.f32 %v6650_v23, %v5145_v5  ;;  %vm5156_vm8 = vweird.f32 %v6650_v23 }
 0xde5   :  { %6651 = vrsqrt.f32 %v5146_v16  ;;  %vm5157_vm1 = vmor %vm5155_vm9, %vm5156_vm8  ;;  %vm5165_vm11 = vweird.f32 %v5146_v16 }
 0xde6   :  { %v5151_v22 = vmul.f32 %v6650_v23, %v5150_v10 }
 0xde8   :  { %v5137_v57 = vpop.xlane.xlu2 %5136  ;;  %v5152_v58 = vmul.f32 0.5, %v5151_v22 }
 0xde9   :  { %v5143_v2 = vmul.f32 %v5137_v57, %v7665_v24 }
 0xdea   :  { %v5153_v7 = vsub.f32 1.5, %v5152_v58 }
 0xdeb   :  { %v5147_v14 = vadd.f32 1e-05, %v5143_v2  ;;  %v6652_v49 = vpop.eup %6651 }
 0xdec   :  { %v5160_v30 = vmul.f32 %v6652_v49, %v5146_v16  ;;  %v5154_v17 = vmul.f32 %v6650_v23, %v5153_v7  ;;  %vm5166_vm10 = vweird.f32 %v6652_v49  ;;  %v5420_v16 = vand.u32 2147483648, %v8662_v47 }
 0xded   :  { %6653 = vrsqrt.f32 %v5147_v14  ;;  %vm5167_vm12 = vmor %vm5165_vm11, %vm5166_vm10  ;;  %vm5175_vm13 = vweird.f32 %v5147_v14  ;;  %v5435_v7 = vand.u32 2147483648, %v8666_v40  ;;  %vm5444_vm10 = vweird.f32 %v8691_v63 }
 0xdee   :  { %v5161_v46 = vmul.f32 %v6652_v49, %v5160_v30  ;;  %6655 = vrcp.f32 %v8662_v47  ;;  %v5158_v59 = vsel %vm5157_vm1, %v6650_v23, %v5154_v17 }
 0xdef   :  { %6657 = vrcp.f32 %v8666_v40  ;;  %v5200_v38 = vperm.slane %v5158_v59, %v7669_v56  ;;  %v5196_v43 = vperm.slane %v5158_v59, %v7667_v19 }
 0xdf0   :  { %v5162_v34 = vmul.f32 0.5, %v5161_v46  ;;  %6659 = vrcp.f32 %v8691_v63 }
 0xdf1   :  { %v5234_v60 = vmul.f32 %v5200_v38, %v8598_v50  ;;  %v5233_v18 = vmul.f32 %v5196_v43, %v8595_v4  ;;  %6661 = vrcp.f32 %v8702_v51 }
 0xdf2   :  { %v5163_v37 = vsub.f32 1.5, %v5162_v34  ;;  %6663 = vrcp.f32 %v8710_v55 }
 0xdf3   :  { %v6654_v53 = vpop.eup %6653  ;;  %v5247_v50 = vmul.f32 %v8683_v32, %v5234_v60  ;;  %v5246_v11 = vmul.f32 %v8674_v12, %v5233_v18  ;;  %v5274_v58 = vpop.permute.xlu0 %5273 }
 0xdf4   :  { %v5170_v25 = vmul.f32 %v6654_v53, %v5147_v14  ;;  %v8668_v61 = vpop.eup %6655  ;;  %v5164_v28 = vmul.f32 %v6652_v49, %v5163_v37  ;;  %vm5176_vm3 = vweird.f32 %v6654_v53  ;;  %v5302_v14 = vpop.permute.xlu1 %5301 }
 0xdf5   :  { %v5410_v41 = vmul.f32 %v8668_v61, %v8662_v47  ;;  %v8680_v13 = vpop.eup %6657  ;;  %vm5177_vm14 = vmor %vm5175_vm13, %vm5176_vm3  ;;  %vm5415_vm4 = vweird.f32 %v8668_v61  ;;  %v5260_v57 = vadd.f32 %v8699_v21, %v5247_v50 }
 0xdf6   :  { %v5171_v0 = vmul.f32 %v6654_v53, %v5170_v25  ;;  %v5168_v6 = vsel %vm5167_vm12, %v6652_v49, %v5164_v28  ;;  %v5425_v15 = vmul.f32 %v8680_v13, %v8666_v40  ;;  %vm8722_vm5 = vmor %vm5414_vm15, %vm5415_vm4  ;;  %v5418_v49 = vand.u32 2147483647, %v8662_v47  ;;  %v8727_v22 = vpop.eup %6659 }
 0xdf7   :  { %v5411_v62 = vsub.f32 1.0, %v5410_v41  ;;  %v5204_v31 = vperm.slane %v5168_v6, %v7667_v19  ;;  %v5208_v4 = vperm.slane %v5168_v6, %v7669_v56  ;;  %v5421_v25 = vor.u32 1.1754944e-38, %v5420_v16  ;;  %v8741_v17 = vpop.eup %6661 }
 0xdf8   :  { %v5172_v8 = vmul.f32 0.5, %v5171_v0  ;;  %v5426_v5 = vsub.f32 1.0, %v5425_v15  ;;  %v5325_v34 = vmul.f32 %v8636_v44, %v5260_v57  ;;  %vm5430_vm2 = vweird.f32 %v8680_v13  ;;  %v8755_v41 = vpop.eup %6663 }
 0xdf9   :  { %v5412_v39 = vmul.f32 %v8668_v61, %v5411_v62  ;;  %v5235_v48 = vmul.f32 %v5204_v31, %v8608_v20  ;;  %v5236_v23 = vmul.f32 %v5208_v4, %v8611_v36  ;;  %v5259_v20 = vadd.f32 %v8688_v1, %v5246_v11  ;;  %vm8751_vm9 = vmor %vm5429_vm7, %vm5430_vm2 }
 0xdfa   :  { %v5173_v54 = vsub.f32 1.5, %v5172_v8  ;;  %vm5419_vm8 = vcmp.eq.f32.partialorder %v5418_v49, 8.507059e+37  ;;  %v5433_v28 = vand.u32 2147483647, %v8666_v40  ;;  %v5470_v43 = vmul.f32 %v8741_v17, %v8702_v51 }
 0xdfb   :  { %v5413_v2 = vadd.f32 %v8668_v61, %v5412_v39  ;;  %v5248_v30 = vmul.f32 %v8674_v12, %v5235_v48  ;;  %v5249_v37 = vmul.f32 %v8683_v32, %v5236_v23  ;;  %v5324_v8 = vmul.f32 %v5274_v58, %v5259_v20 }
 0xdfc   :  { %v5174_v26 = vmul.f32 %v6654_v53, %v5173_v54  ;;  %v5340_v6 = vsel %vm5332_vm6, %v5325_v34, 0.0  ;;  %v8765_v31 = vrot.slane %v8662_v47, 5  ;;  %vm5434_vm1 = vcmp.eq.f32.partialorder %v5433_v28, 8.507059e+37 }
 0xdfd   :  { %v5417_v0 = vsel %vm8722_vm5, %v8668_v61, %v5413_v2  ;;  %v5261_v59 = vadd.f32 %v8688_v1, %v5248_v30  ;;  %v5262_v40 = vadd.f32 %v8699_v21, %v5249_v37  ;;  %v5341_v11 = vrot.slane %v5340_v6, 4 }
 0xdfe   :  { %v5178_v33 = vsel %vm5177_vm14, %v6654_v53, %v5174_v26  ;;  %v5427_v53 = vmul.f32 %v8680_v13, %v5426_v5  ;;  %v8760_v60 = vsel %vm5419_vm8, %v5421_v25, %v5417_v0  ;;  %v5436_v26 = vor.u32 1.1754944e-38, %v5435_v7 }
 0xdff   :  { %v5212_v29 = vperm.slane %v5178_v33, %v7667_v19  ;;  %v5216_v36 = vperm.slane %v5178_v33, %v7669_v56  ;;  %v5326_v15 = vmul.f32 %v8653_v9, %v5261_v59  ;;  %v8775_v48 = vrot.slane %v8662_v47, 6 }
 0xe00   :  { %v5428_v44 = vadd.f32 %v8680_v13, %v5427_v53  ;;  %v5471_v5 = vsub.f32 1.0, %v5470_v43  ;;  %v8780_v9 = vrot.slane %v8662_v47, 7  ;;  %v5327_v2 = vmul.f32 %v8655_v52, %v5262_v40 }
 0xe01   :  { %v5237_v46 = vmul.f32 %v5212_v29, %v8622_v27  ;;  %v5440_v27 = vmul.f32 %v8727_v22, %v8691_v63  ;;  %v5238_v61 = vmul.f32 %v5216_v36, %v8625_v35  ;;  %v5333_v35 = vsel %vm5332_vm6, %v5324_v8, 0.0 }
 0xe02   :  { %v5432_v50 = vsel %vm8751_vm9, %v8680_v13, %v5428_v44  ;;  %v5334_v29 = vrot.slane %v5333_v35, 4  ;;  %v5347_v23 = vsel %vm5332_vm6, %v5326_v15, 0.0  ;;  %v5455_v20 = vmul.f32 %v8755_v41, %v8710_v55 }
 0xe03   :  { %v5250_v38 = vmul.f32 %v8674_v12, %v5237_v46  ;;  %v5441_v62 = vsub.f32 1.0, %v5440_v27  ;;  %v5251_v39 = vmul.f32 %v8683_v32, %v5238_v61  ;;  %v8782_v57 = vsel %vm5434_vm1, %v5436_v26, %v5432_v50 }
 0xe04   :  { %v5342_v47 = vadd.f32 %v5341_v11, %v5340_v6  ;;  %vm5445_vm11 = vweird.f32 %v8727_v22  ;;  %v5472_v30 = vmul.f32 %v8741_v17, %v5471_v5  ;;  %v5448_v53 = vand.u32 2147483647, %v8691_v63 }
 0xe05   :  { %v5263_v4 = vadd.f32 %v8688_v1, %v5250_v38  ;;  %v5442_v13 = vmul.f32 %v8727_v22, %v5441_v62  ;;  %v5264_v49 = vadd.f32 %v8699_v21, %v5251_v39  ;;  %v5335_v52 = vadd.f32 %v5334_v29, %v5333_v35  ;;  %vm8804_vm13 = vmor %vm5444_vm10, %vm5445_vm11 }
 0xe06   :  { %v5348_v58 = vrot.slane %v5347_v23, 4  ;;  %v5354_v25 = vsel %vm5332_vm6, %v5327_v2, 0.0  ;;  %vm5474_vm12 = vweird.f32 %v8702_v51  ;;  %vm5475_vm3 = vweird.f32 %v8741_v17 }
 0xe07   :  { %v5328_v10 = vmul.f32 %v5302_v14, %v5263_v4  ;;  %v5443_v36 = vadd.f32 %v8727_v22, %v5442_v13  ;;  %v5480_v14 = vand.u32 2147483648, %v8702_v51  ;;  %v5456_v34 = vsub.f32 1.0, %v5455_v20  ;;  %vm8816_vm15 = vmor %vm5474_vm12, %vm5475_vm3 }
 0xe08   :  { %v5478_v37 = vand.u32 2147483647, %v8702_v51  ;;  %v5343_v27 = vrot.slane %v5342_v47, 2  ;;  %v5329_v8 = vmul.f32 %v8658_v45, %v5264_v49  ;;  %v5473_v44 = vadd.f32 %v8741_v17, %v5472_v30 }
 0xe09   :  { %v5361_v0 = vsel %vm5332_vm6, %v5328_v10, 0.0  ;;  %vm8812_vm14 = vcmp.eq.f32.partialorder %v5448_v53, 8.507059e+37  ;;  %v5355_v61 = vrot.slane %v5354_v25, 4  ;;  %v5349_v54 = vadd.f32 %v5348_v58, %v5347_v23 }
 0xe0a   :  { %v5447_v51 = vsel %vm8804_vm13, %v8727_v22, %v5443_v36  ;;  %vm5459_vm4 = vweird.f32 %v8710_v55  ;;  %v5362_v6 = vrot.slane %v5361_v0, 4  ;;  %v5481_v26 = vor.u32 1.1754944e-38, %v5480_v14 }
 0xe0b   :  { %v5457_v40 = vmul.f32 %v8755_v41, %v5456_v34  ;;  %vm5460_vm5 = vweird.f32 %v8755_v41  ;;  %vm8829_vm7 = vcmp.eq.f32.partialorder %v5478_v37, 8.507059e+37  ;;  %v5344_v35 = vadd.f32 %v5343_v27, %v5342_v47 }
 0xe0c   :  { %v5368_v22 = vsel %vm5332_vm6, %v5329_v8, 0.0  ;;  %v5477_v15 = vsel %vm8816_vm15, %v8741_v17, %v5473_v44  ;;  %v5463_v39 = vand.u32 2147483647, %v8710_v55  ;;  %v5350_v4 = vrot.slane %v5349_v54, 2  ;;  %vm8847_vm8 = vmor %vm5459_vm4, %vm5460_vm5 }
 0xe0d   :  { %v5363_v29 = vadd.f32 %v5362_v6, %v5361_v0  ;;  %v5369_v13 = vrot.slane %v5368_v22, 4  ;;  %v5345_v2 = vrot.slane %v5344_v35, 1  ;;  %v5465_v20 = vand.u32 2147483648, %v8710_v55 }
 0xe0e   :  { %v8854_v10 = vsel %vm8829_vm7, %v5481_v26, %v5477_v15  ;;  %v5351_v53 = vadd.f32 %v5350_v4, %v5349_v54  ;;  %vm8862_vm10 = vcmp.eq.f32.partialorder %v5463_v39, 8.507059e+37  ;;  %vm5489_vm11 = vweird.f32 %v8765_v31 }
 0xe0f   :  { %v5364_v36 = vrot.slane %v5363_v29, 2  ;;  %v5466_v0 = vor.u32 1.1754944e-38, %v5465_v20  ;;  %vm5538_vm3 = vcmask 1041409   ;;  %vm5541_vm15 = vcmask 1042434  }
 0xe10   :  { %v5352_v44 = vrot.slane %v5351_v53, 1  ;;  %vm5504_vm4 = vweird.f32 %v8775_v48  ;;  %vm5519_vm7 = vweird.f32 %v8780_v9 }
 0xe11   :  { %v5365_v38 = vadd.f32 %v5364_v36, %v5363_v29 }
 0xe1b   :  { %v5140_v18 = vpop.xlane.xlu1 %5139 }
 0xe1c   :  { %v5144_v33 = vmul.f32 %v5140_v18, %v7665_v24  ;;  %v5450_v24 = vand.u32 2147483648, %v8691_v63  ;;  %v5336_v63 = vrot.slane %v5335_v52, 2 }
 0xe1e   :  { %v8777_v16 = vadd.f32 1e-05, %v5144_v33  ;;  %v5451_v46 = vor.u32 1.1754944e-38, %v5450_v24  ;;  %v5337_v50 = vadd.f32 %v5336_v63, %v5335_v52  ;;  %v5356_v33 = vadd.f32 %v5355_v61, %v5354_v25 }
 0xe1f   :  { %v5458_v24 = vadd.f32 %v8755_v41, %v5457_v40  ;;  %v5370_v25 = vadd.f32 %v5369_v13, %v5368_v22  ;;  %v5495_v61 = vand.u32 2147483648, %v8765_v31  ;;  %v5508_v13 = vand.u32 2147483647, %v8775_v48 }
 0xe20   :  { %6665 = vrsqrt.f32 %v8777_v16  ;;  %v5452_v47 = vsel %vm8812_vm14, %v5451_v46, %v5447_v51  ;;  %v5338_v49 = vrot.slane %v5337_v50, 1  ;;  %v5357_v30 = vrot.slane %v5356_v33, 2 }
 0xe21   :  { %6667 = vrcp.f32 %v8765_v31  ;;  %vm5185_vm9 = vweird.f32 %v8777_v16  ;;  %v5462_v55 = vsel %vm8847_vm8, %v8755_v41, %v5458_v24  ;;  %v5346_v46 = vadd.f32 %v5345_v2, %v5344_v35 }
 0xe22   :  { %6669 = vrcp.f32 %v8775_v48  ;;  %v5358_v8 = vadd.f32 %v5357_v30, %v5356_v33  ;;  %v5493_v41 = vand.u32 2147483647, %v8765_v31  ;;  %v5339_v28 = vadd.f32 %v5338_v49, %v5337_v50 }
 0xe23   :  { %6671 = vrcp.f32 %v8780_v9  ;;  %v5371_v51 = vrot.slane %v5370_v25, 2  ;;  %v5496_v39 = vor.u32 1.1754944e-38, %v5495_v61  ;;  %v5510_v24 = vand.u32 2147483648, %v8775_v48 }
 0xe24   :  { %v5359_v40 = vrot.slane %v5358_v8, 1  ;;  %vm8890_vm13 = vcmp.eq.f32.partialorder %v5493_v41, 8.507059e+37  ;;  %vm5544_vm8 = vcmask 1043459  }
 0xe26   :  { %v6666_v59 = vpop.eup %6665  ;;  %v5360_v29 = vadd.f32 %v5359_v40, %v5358_v8 }
 0xe27   :  { %v5180_v45 = vmul.f32 %v6666_v59, %v8777_v16  ;;  %v8825_v43 = vpop.eup %6667  ;;  %vm5186_vm2 = vweird.f32 %v6666_v59 }
 0xe28   :  { %v5485_v5 = vmul.f32 %v8825_v43, %v8765_v31  ;;  %vm5187_vm1 = vmor %vm5185_vm9, %vm5186_vm2  ;;  %v8866_v7 = vpop.eup %6669  ;;  %vm5490_vm12 = vweird.f32 %v8825_v43  ;;  %vm8931_vm9 = vcmp.eq.f32.partialorder %v5508_v13, 8.507059e+37 }
 0xe29   :  { %v5181_v18 = vmul.f32 %v6666_v59, %v5180_v45  ;;  %v8869_v16 = vpop.eup %6671  ;;  %v5438_v45 = vmul.f32 %v8782_v57, %v5346_v46  ;;  %v5423_v57 = vmul.f32 %v8760_v60, %v5339_v28  ;;  %vm8900_vm14 = vmor %vm5489_vm11, %vm5490_vm12  ;;  %v5323_v60 = vpop.permute.xlu2 %5322  ;;  %vm5505_vm5 = vweird.f32 %v8866_v7 }
 0xe2a   :  { %v5486_v58 = vsub.f32 1.0, %v5485_v5  ;;  %vm5520_vm2 = vweird.f32 %v8869_v16  ;;  %v5511_v28 = vor.u32 1.1754944e-38, %v5510_v24  ;;  %vm5547_vm11 = vcmask 1044484  }
 0xe2b   :  { %v5182_v11 = vmul.f32 0.5, %v5181_v18  ;;  %v5366_v18 = vrot.slane %v5365_v38, 1  ;;  %v5537_v50 = vrot.slane %v5438_v45, 7  ;;  %vm5550_vm12 = vcmask 1045509  }
 0xe2c   :  { %v5487_v63 = vmul.f32 %v8825_v43, %v5486_v58 }
 0xe2d   :  { %v5183_v23 = vsub.f32 1.5, %v5182_v11  ;;  %v5367_v2 = vadd.f32 %v5366_v18, %v5365_v38 }
 0xe2e   :  { %v5488_v62 = vadd.f32 %v8825_v43, %v5487_v63 }
 0xe2f   :  { %v5184_v52 = vmul.f32 %v6666_v59, %v5183_v23 }
 0xe30   :  { %v5492_v31 = vsel %vm8900_vm14, %v8825_v43, %v5488_v62 }
 0xe31   :  { %v5188_v34 = vsel %vm5187_vm1, %v6666_v59, %v5184_v52  ;;  %v5497_v43 = vsel %vm8890_vm13, %v5496_v39, %v5492_v31  ;;  %vm8939_vm1 = vmor %vm5519_vm7, %vm5520_vm2  ;;  %vm5556_vm13 = vcmask 1047559  }
 0xe32   :  { %v5224_v37 = vperm.slane %v5188_v34, %v7669_v56  ;;  %v5220_v27 = vperm.slane %v5188_v34, %v7667_v19  ;;  %v5500_v19 = vmul.f32 %v8866_v7, %v8775_v48  ;;  %v5515_v56 = vmul.f32 %v8869_v16, %v8780_v9 }
 0xe33   :  { %v5316_v33 = vpop.permute.xlu1 %5315  ;;  %v5525_v34 = vand.u32 2147483648, %v8780_v9 }
 0xe34   :  { %v5240_v59 = vmul.f32 %v5224_v37, %v8645_v3  ;;  %v5239_v54 = vmul.f32 %v5220_v27, %v8642_v42  ;;  %v5467_v3 = vsel %vm8862_vm10, %v5466_v0, %v5462_v55  ;;  %v5353_v42 = vadd.f32 %v5352_v44, %v5351_v53 }
 0xe35   :  { %v5501_v4 = vsub.f32 1.0, %v5500_v19  ;;  %v5516_v11 = vsub.f32 1.0, %v5515_v56  ;;  %v5468_v52 = vmul.f32 %v5467_v3, %v5360_v29  ;;  %v5483_v55 = vmul.f32 %v8854_v10, %v5367_v2 }
 0xe36   :  { %v5253_v6 = vmul.f32 %v8683_v32, %v5240_v59  ;;  %v5252_v26 = vmul.f32 %v8674_v12, %v5239_v54  ;;  %v5372_v12 = vadd.f32 %v5371_v51, %v5370_v25  ;;  %v5523_v25 = vand.u32 2147483647, %v8780_v9 }
 0xe37   :  { %v5502_v53 = vmul.f32 %v8866_v7, %v5501_v4  ;;  %v5539_v44 = vsel %vm5538_vm3, %v5537_v50, %v5423_v57  ;;  %v5543_v38 = vrot.slane %v5468_v52, 5  ;;  %v5546_v59 = vrot.slane %v5483_v55, 4 }
 0xe38   :  { %v5266_v22 = vadd.f32 %v8699_v21, %v5253_v6  ;;  %v5265_v32 = vadd.f32 %v8688_v1, %v5252_v26  ;;  %v5453_v1 = vmul.f32 %v5452_v47, %v5353_v42  ;;  %v5373_v17 = vrot.slane %v5372_v12, 1 }
 0xe39   :  { %v5517_v47 = vmul.f32 %v8869_v16, %v5516_v11  ;;  %v5503_v27 = vadd.f32 %v8866_v7, %v5502_v53  ;;  %vm5524_vm10 = vcmp.eq.f32.partialorder %v5523_v25, 8.507059e+37  ;;  %v5526_v45 = vor.u32 1.1754944e-38, %v5525_v34 }
 0xe3a   :  { %v5331_v5 = vmul.f32 %v5323_v60, %v5266_v22  ;;  %v5330_v21 = vmul.f32 %v5316_v33, %v5265_v32  ;;  %v5540_v14 = vrot.slane %v5453_v1, 6  ;;  %v5374_v46 = vadd.f32 %v5373_v17, %v5372_v12 }
 0xe3b   :  { %v5518_v41 = vadd.f32 %v8869_v16, %v5517_v47  ;;  %vm5553_vm3 = vcmask 1046534  }
 0xe3c   :  { %v5382_v23 = vsel %vm5332_vm6, %v5331_v5, 0.0  ;;  %v5375_v20 = vsel %vm5332_vm6, %v5330_v21, 0.0  ;;  %vm8925_vm6 = vmor %vm5504_vm4, %vm5505_vm5  ;;  %v5542_v54 = vsel %vm5541_vm15, %v5540_v14, %v5539_v44  ;;  %v5498_v51 = vmul.f32 %v5497_v43, %v5374_v46 }
 0xe3d   :  { %v5383_v49 = vrot.slane %v5382_v23, 4  ;;  %v5376_v30 = vrot.slane %v5375_v20, 4  ;;  %v5507_v6 = vsel %vm8925_vm6, %v8866_v7, %v5503_v27  ;;  %v5522_v9 = vsel %vm8939_vm1, %v8869_v16, %v5518_v41 }
 0xe3e   :  { %v5512_v3 = vsel %vm8931_vm9, %v5511_v28, %v5507_v6  ;;  %v5527_v42 = vsel %vm5524_vm10, %v5526_v45, %v5522_v9  ;;  %v5545_v57 = vsel %vm5544_vm8, %v5543_v38, %v5542_v54  ;;  %v5549_v62 = vrot.slane %v5498_v51, 3 }
 0xe3f   :  { %v5384_v58 = vadd.f32 %v5383_v49, %v5382_v23  ;;  %v5377_v36 = vadd.f32 %v5376_v30, %v5375_v20  ;;  %v5548_v22 = vsel %vm5547_vm11, %v5546_v59, %v5545_v57 }
 0xe40   :  { %v5551_v12 = vsel %vm5550_vm12, %v5549_v62, %v5548_v22 }
 0xe41   :  { %v5385_v0 = vrot.slane %v5384_v58, 2  ;;  %v5378_v37 = vrot.slane %v5377_v36, 2 }
 0xe43   :  { %v5386_v63 = vadd.f32 %v5385_v0, %v5384_v58  ;;  %v5379_v61 = vadd.f32 %v5378_v37, %v5377_v36 }
 0xe45   :  { %v5387_v19 = vrot.slane %v5386_v63, 1  ;;  %v5380_v56 = vrot.slane %v5379_v61, 1 }
 0xe47   :  { %v5381_v26 = vadd.f32 %v5380_v56, %v5379_v61  ;;  %v5388_v40 = vadd.f32 %v5387_v19, %v5386_v63 }
 0xe49   :  { %v5513_v35 = vmul.f32 %v5512_v3, %v5381_v26  ;;  %v5528_v18 = vmul.f32 %v5527_v42, %v5388_v40 }
 0xe4b   :  { %v5552_v7 = vrot.slane %v5513_v35, 2  ;;  %v5555_v32 = vrot.slane %v5528_v18, 1 }
 0xe4d   :  { %v5554_v16 = vsel %vm5553_vm3, %v5552_v7, %v5551_v12 }
 0xe4e   :  { %v5557_v15 = vsel %vm5556_vm13, %v5555_v32, %v5554_v16 }
 0xe4f   :  { %5559 = vst.msk [vmem:[%s8971_s14] sm:$0xff] %vm109_vm0, %v5557_v15 }

</bundles_post_ra>
